<compile_context>
chip_gen: v7x
topology: tpu7x:2x2x1
jax: 0.10.0
libtpu: 0.0.40
codegen_flags: <defaults>
</compile_context>

<pallas_src>
import functools

import jax
import jax.numpy as jnp
from jax.experimental import pallas as pl
from jax.experimental.pallas import tpu as pltpu


# ----------------------------------------------------------------------------
# Fused Pallas kernel: whole SESR body for one (batch, row-tile) grid point
# ----------------------------------------------------------------------------
def _sesr_fused_kernel(xw_ref, wf_ref, bf_ref, wr_ref, br_ref, wl_ref, bl_ref,
                       o_ref, *, tile_h, img_h, img_w, halo, Wp, rows, cin, sf,
                       num_lblocks):
    t = pl.program_id(1)
    HW = rows * Wp                           # multiple of 128 (Wp is)

    x3 = xw_ref[0, 0]                        # (cin, rows, Wp) f32 halo'd window

    # ---- in-image border mask, built ONCE per tile (hoisted out of loops) ----
    ry = jax.lax.broadcasted_iota(jnp.int32, (1, rows, Wp), 1) + (t * tile_h - halo)
    cx = jax.lax.broadcasted_iota(jnp.int32, (1, rows, Wp), 2)
    ok = (ry >= 0) & (ry < img_h) & (cx >= halo) & (cx < halo + img_w)
    mask = ok.astype(jnp.float32).reshape(1, HW)

    # ---- flatten spatial ONCE: every activation below is a (C, HW) slab ----
    x = x3.reshape(cin, HW)

    def conv(src, w_slabs, bias, k):
        """Collapsed kxk conv as k MXU matmuls (one per kernel row):
             out = sum_kh  W[kh](Cout, k*Cin) @ patches_kh(k*Cin, HW)
        patches are shifted lane-slices of the zero-extended bf16 source."""
        r = k // 2
        cin_l = src.shape[0]
        m = r * Wp + r
        z = jnp.zeros((cin_l, m), jnp.bfloat16)
        srcp = jnp.concatenate([z, src.astype(jnp.bfloat16), z], axis=1)
        acc = None
        for kh in range(k):
            taps = [srcp[:, m + (kh - r) * Wp + (kw - r):
                            m + (kh - r) * Wp + (kw - r) + HW]
                    for kw in range(k)]
            pat = jnp.concatenate(taps, axis=0)                 # (k*Cin, HW)
            y = jnp.dot(w_slabs[kh], pat, preferred_element_type=jnp.float32)
            acc = y if acc is None else acc + y
        return acc + bias                                       # (Cout, HW) f32

    # conv_first: collapsed 5x5 + bias -> ReLU6 -> border mask
    f = conv(x, wf_ref[...], bf_ref[...], 5)
    f = jnp.clip(f, 0.0, 6.0) * mask
    initial = f

    # residual blocks: collapsed 3x3 + bias, + x, ReLU6, mask
    for i in range(num_lblocks):
        y = conv(f, wr_ref[i], br_ref[i], 3)
        f = jnp.clip(y + f, 0.0, 6.0) * mask

    # long skip: add conv_first features
    f = f + initial

    # conv_last: collapsed 5x5 + bias, identity activation
    out = conv(f, wl_ref[...], bl_ref[...], 5)                  # (cps, HW) f32
    cps = out.shape[0]

    # crop the tile centre back to (cps, tile_h, W) and add the AnchorOp skip
    out3 = out.reshape(cps, rows, Wp)[:, halo:halo + tile_h, halo:halo + img_w]
    xc = x3[:, halo:halo + tile_h, halo:halo + img_w]           # (cin, th, W)
    up = jnp.concatenate(
        [jnp.broadcast_to(xc[c:c + 1], (sf * sf, tile_h, img_w))
         for c in range(cin)], axis=0)                          # repeat_interleave
    o_ref[0] = (out3 + up).astype(o_ref.dtype)


# ----------------------------------------------------------------------------
# Weight collapsing / layout helpers
# ----------------------------------------------------------------------------
def _round_up(v, m):
    return (v + m - 1) // m * m


def _collapse_slabs(we, ws):
    """Collapse expand(kxk, no bias) + squeeze(1x1) offline and lay the result
    out as per-kernel-row slabs (k, Cout, k*Cin), element [kh, o, kw*Cin + c]."""
    wc = jnp.einsum('ot,tchw->ochw', ws[:, :, 0, 0], we,
                    precision=jax.lax.Precision.HIGHEST)        # (O, C, k, k)
    O, C, k, _ = wc.shape
    return jnp.transpose(wc, (2, 0, 3, 1)).reshape(k, O, k * C)


def _pick_tile_h(H, W, *, cin=3, nc=16, cps=12, halo=7, budget_bytes=40 << 20):
    """Largest multiple-of-8 divisor of H whose per-tile VMEM footprint
    (double-buffered input window + output block + live f32 activations +
    largest bf16 patch slab) fits the budget.  Re-derive the budget per TPU
    generation (v7x: 64 MiB VMEM, v5e/v6e: 128 MiB)."""
    Wp = _round_up(W + 2 * halo, 128)
    best = None
    for th in range(8, H + 1, 8):
        if H % th:
            continue
        rows = th + 2 * halo
        HW = rows * Wp
        est = (2 * cin * _round_up(rows, 8) * Wp * 4      # input window, 2 bufs
               + 2 * cps * th * _round_up(W, 128) * 4     # output block, 2 bufs
               + 4 * nc * HW * 4                          # live f32 activations
               + 7 * nc * HW * 2)                         # bf16 patches + taps
        if est <= budget_bytes:
            best = th
    return best if best is not None else (H if H % 8 else 8)


# ----------------------------------------------------------------------------
# Full SESRRelease forward (default config: add-residual, no final clamp)
# ----------------------------------------------------------------------------
def sesr_forward(x_nchw, params, *, num_lblocks=3, scaling_factor=2, tile_h=None):
    N, cin, H, W = x_nchw.shape
    sf = scaling_factor
    halo = 2 + num_lblocks + 2      # 5x5 + L*3x3 + 5x5 receptive-field growth

    if tile_h is None:
        tile_h = _pick_tile_h(H, W, cin=cin, halo=halo)
    assert H % tile_h == 0 and (tile_h % 8 == 0 or tile_h == H), "bad tile_h"
    T = H // tile_h
    rows = tile_h + 2 * halo
    # pad width so the flattened (rows*Wp) lane axis is a multiple of 128:
    # lane-dense vregs and aligned slices; the extra columns are masked.
    Wp = _round_up(W + 2 * halo, 128)

    x = x_nchw.astype(jnp.float32)
    xp = jnp.pad(x, ((0, 0), (0, 0), (halo, halo), (halo, Wp - W - halo)))
    # overlapping halo'd row windows -> expressible with plain Blocked specs,
    # so Pallas double-buffers / overlaps the input DMA automatically.
    xw = jnp.stack([xp[:, :, i * tile_h:i * tile_h + rows, :] for i in range(T)],
                   axis=1)                                  # (N, T, cin, rows, Wp)

    # offline weight collapse; matmul operands go in as bf16 (f32 accumulation)
    we0, ws0, b0 = params['first']
    wf = _collapse_slabs(we0, ws0).astype(jnp.bfloat16)     # (5, nc, 5*cin)
    bf = b0.reshape(-1, 1).astype(jnp.float32)              # (nc, 1)
    wr = jnp.stack([_collapse_slabs(w, s) for (w, s, _) in params['res']]
                   ).astype(jnp.bfloat16)                   # (L, 3, nc, 3*nc)
    br = jnp.stack([b.reshape(-1, 1) for (_, _, b) in params['res']]
                   ).astype(jnp.float32)                    # (L, nc, 1)
    weL, wsL, bL = params['last']
    wl = _collapse_slabs(weL, wsL).astype(jnp.bfloat16)     # (5, cps, 5*nc)
    bl = bL.reshape(-1, 1).astype(jnp.float32)              # (cps, 1)
    cps = wl.shape[1]

    kernel = functools.partial(
        _sesr_fused_kernel, tile_h=tile_h, img_h=H, img_w=W, halo=halo, Wp=Wp,
        rows=rows, cin=cin, sf=sf, num_lblocks=num_lblocks)

    out = pl.pallas_call(
        kernel,
        out_shape=jax.ShapeDtypeStruct((N, cps, H, W), jnp.float32),
        grid=(N, T),
        in_specs=[
            pl.BlockSpec((1, 1, cin, rows, Wp), lambda b, t: (b, t, 0, 0, 0)),
            pl.BlockSpec(wf.shape, lambda b, t: (0, 0, 0)),
            pl.BlockSpec(bf.shape, lambda b, t: (0, 0)),
            pl.BlockSpec(wr.shape, lambda b, t: (0, 0, 0, 0)),
            pl.BlockSpec(br.shape, lambda b, t: (0, 0, 0)),
            pl.BlockSpec(wl.shape, lambda b, t: (0, 0, 0)),
            pl.BlockSpec(bl.shape, lambda b, t: (0, 0)),
        ],
        # channel-major, full-width (lane-dense at production W) output block
        out_specs=pl.BlockSpec((1, cps, tile_h, W), lambda b, t: (b, 0, t, 0)),
        compiler_params=pltpu.CompilerParams(
            # batch x row-tiles, both parallel -> v7x megacore splits the grid;
            # keep N*T >= 2 (ideally even) so both TensorCores stay busy.
            dimension_semantics=("parallel", "parallel"),
            vmem_limit_bytes=48 * 1024 * 1024,  # safe under v7x's 64 MiB; raise on v5e/v6e
        ),
    )(xw, wf, bf, wr, br, wl, bl)

    # PixelShuffle(sf): (N, c*sf^2, H, W) -> (N, c, H*sf, W*sf)
    c = cps // (sf * sf)
    y = out.reshape(N, c, sf, sf, H, W)
    y = jnp.transpose(y, (0, 1, 4, 2, 5, 3))
    return y.reshape(N, c, H * sf, W * sf)


# ----------------------------------------------------------------------------
# Pure-JAX reference (mirrors the PyTorch NCHW module) for verification
# ----------------------------------------------------------------------------
def sesr_reference(x, params, *, num_lblocks=3, scaling_factor=2):
    sf = scaling_factor
    relu6 = lambda v: jnp.clip(v, 0.0, 6.0)

    def conv(xx, w, b=None, pad=0):
        out = jax.lax.conv_general_dilated(
            xx, w, (1, 1), [(pad, pad), (pad, pad)],
            dimension_numbers=('NCHW', 'OIHW', 'NCHW'),
            precision=jax.lax.Precision.HIGHEST)
        if b is not None:
            out = out + b[None, :, None, None]
        return out

    up = jnp.repeat(x, sf * sf, axis=1)                 # AnchorOp
    we, ws, b = params['first']
    f = relu6(conv(conv(x, we, pad=2), ws, b))
    init = f
    for i in range(num_lblocks):
        we, ws, b = params['res'][i]
        f = relu6(f + conv(conv(f, we, pad=1), ws, b))
    f = f + init
    we, ws, b = params['last']
    out = conv(conv(f, we, pad=2), ws, b) + up
    N, C, H, W = out.shape
    c = C // (sf * sf)
    out = out.reshape(N, c, sf, sf, H, W).transpose(0, 1, 4, 2, 5, 3)
    return out.reshape(N, c, H * sf, W * sf)


# ----------------------------------------------------------------------------
# Deterministic parameter init (shapes from the module's __init__).
# ----------------------------------------------------------------------------
def init_params(key, *, in_channels=3, out_channels=3, num_channels=16,
                num_lblocks=3, tmp_channels=256, scaling_factor=2, scale=0.05):
    keys = iter(jax.random.split(key, 3 * (2 + num_lblocks)))

    def conv_w(cout, cin, k):
        return scale * jax.random.normal(next(keys), (cout, cin, k, k), jnp.float32)

    def bias(c):
        return scale * jax.random.normal(next(keys), (c,), jnp.float32)

    params = {
        'first': (conv_w(tmp_channels, in_channels, 5),        # expand, no bias
                  conv_w(num_channels, tmp_channels, 1),       # squeeze 1x1
                  bias(num_channels)),
        'res': [(conv_w(tmp_channels, num_channels, 3),
                 conv_w(num_channels, tmp_channels, 1),
                 bias(num_channels)) for _ in range(num_lblocks)],
        'last': (conv_w(tmp_channels, num_channels, 5),
                 conv_w(out_channels * scaling_factor ** 2, tmp_channels, 1),
                 bias(out_channels * scaling_factor ** 2)),
    }
    return params


if __name__ == "__main__":
    key = jax.random.PRNGKey(0)
    k_x, k_p = jax.random.split(key)

    N, Cin, H, W = 2, 3, 16, 16                       # small NCHW input
    x = jax.random.normal(k_x, (N, Cin, H, W), jnp.float32)
    params = init_params(k_p)

    # tile_h=8 -> 2 row tiles per image, exercising the spatial-tiling path.
    fwd = jax.jit(lambda xx, pp: sesr_forward(xx, pp, tile_h=8))
    out = jax.block_until_ready(fwd(x, params))
    assert out.shape == (N, 3, 2 * H, 2 * W)
    assert out.dtype == jnp.float32

    ref = jax.block_until_ready(sesr_reference(x, params))
    assert bool(jnp.allclose(out, ref, rtol=5e-2, atol=5e-2)), \
        float(jnp.max(jnp.abs(out - ref)))

    print("KERNEL_OK")
</pallas_src>

<mosaic_0001>
module attributes {stable_mosaic.version = 11 : i64} {
  func.func @_sesr_fused_kernel(%arg0: i32, %arg1: i32, %arg2: memref<1x1x3x22x128xf32, #tpu.memory_space<vmem>>, %arg3: memref<5x16x15xbf16, #tpu.memory_space<vmem>>, %arg4: memref<16x1xf32, #tpu.memory_space<vmem>>, %arg5: memref<3x3x16x48xbf16, #tpu.memory_space<vmem>>, %arg6: memref<3x16x1xf32, #tpu.memory_space<vmem>>, %arg7: memref<5x12x80xbf16, #tpu.memory_space<vmem>>, %arg8: memref<12x1xf32, #tpu.memory_space<vmem>>, %arg9: memref<1x12x8x16xf32, #tpu.memory_space<vmem>>) attributes {dimension_semantics = [#tpu.dimension_semantics<parallel>, #tpu.dimension_semantics<parallel>], iteration_bounds = array<i64: 2, 2>, scalar_prefetch = 0 : i64, scratch_operands = 0 : i64, tpu.core_type = #tpu.core_type<tc>, window_params = [{transform_indices = @transform_0, window_bounds = array<i64: 1, 1, 3, 22, 128>}, {pipeline_mode = #tpu.pipeline_mode<synchronous>, transform_indices = @transform_1, window_bounds = array<i64: 5, 16, 15>}, {pipeline_mode = #tpu.pipeline_mode<synchronous>, transform_indices = @transform_2, window_bounds = array<i64: 16, 1>}, {pipeline_mode = #tpu.pipeline_mode<synchronous>, transform_indices = @transform_3, window_bounds = array<i64: 3, 3, 16, 48>}, {pipeline_mode = #tpu.pipeline_mode<synchronous>, transform_indices = @transform_4, window_bounds = array<i64: 3, 16, 1>}, {pipeline_mode = #tpu.pipeline_mode<synchronous>, transform_indices = @transform_5, window_bounds = array<i64: 5, 12, 80>}, {pipeline_mode = #tpu.pipeline_mode<synchronous>, transform_indices = @transform_6, window_bounds = array<i64: 12, 1>}, {transform_indices = @transform_7, window_bounds = array<i64: 1, 12, 8, 16>}]} {
    %c0 = arith.constant 0 : index
    %c0_0 = arith.constant 0 : index
    %c0_1 = arith.constant 0 : index
    %c0_2 = arith.constant 0 : index
    %c0_3 = arith.constant 0 : index
    %0 = vector.load %arg2[%c0, %c0_0, %c0_1, %c0_2, %c0_3] : memref<1x1x3x22x128xf32, #tpu.memory_space<vmem>>, vector<1x1x3x22x128xf32>
    %1 = vector.shape_cast %0 : vector<1x1x3x22x128xf32> to vector<3x22x128xf32>
    %2 = tpu.iota {dimensions = array<i32: 1>} : vector<1x22x128xi32>
    %c8_i32 = arith.constant 8 : i32
    %3 = arith.muli %arg1, %c8_i32 : i32
    %c7_i32 = arith.constant 7 : i32
    %4 = arith.subi %3, %c7_i32 : i32
    %5 = vector.broadcast %4 : i32 to vector<1x22x128xi32>
    %6 = arith.addi %2, %5 : vector<1x22x128xi32>
    %7 = tpu.iota {dimensions = array<i32: 2>} : vector<1x22x128xi32>
    %c0_i32 = arith.constant 0 : i32
    %8 = vector.broadcast %c0_i32 : i32 to vector<1x22x128xi32>
    %9 = arith.cmpi sge, %6, %8 : vector<1x22x128xi32>
    %c16_i32 = arith.constant 16 : i32
    %10 = vector.broadcast %c16_i32 : i32 to vector<1x22x128xi32>
    %11 = arith.cmpi slt, %6, %10 : vector<1x22x128xi32>
    %12 = arith.andi %9, %11 : vector<1x22x128xi1>
    %c7_i32_4 = arith.constant 7 : i32
    %13 = vector.broadcast %c7_i32_4 : i32 to vector<1x22x128xi32>
    %14 = arith.cmpi sge, %7, %13 : vector<1x22x128xi32>
    %15 = arith.andi %12, %14 : vector<1x22x128xi1>
    %c23_i32 = arith.constant 23 : i32
    %16 = vector.broadcast %c23_i32 : i32 to vector<1x22x128xi32>
    %17 = arith.cmpi slt, %7, %16 : vector<1x22x128xi32>
    %18 = arith.andi %15, %17 : vector<1x22x128xi1>
    %19 = arith.extui %18 : vector<1x22x128xi1> to vector<1x22x128xi32>
    %20 = arith.sitofp %19 : vector<1x22x128xi32> to vector<1x22x128xf32>
    %21 = vector.shape_cast %20 : vector<1x22x128xf32> to vector<1x2816xf32>
    %22 = vector.shape_cast %1 : vector<3x22x128xf32> to vector<3x2816xf32>
    %c0_5 = arith.constant 0 : index
    %c0_6 = arith.constant 0 : index
    %c0_7 = arith.constant 0 : index
    %23 = vector.load %arg3[%c0_5, %c0_6, %c0_7] : memref<5x16x15xbf16, #tpu.memory_space<vmem>>, vector<5x16x15xbf16>
    %c0_8 = arith.constant 0 : index
    %c0_9 = arith.constant 0 : index
    %24 = vector.load %arg4[%c0_8, %c0_9] : memref<16x1xf32, #tpu.memory_space<vmem>>, vector<16x1xf32>
    %cst = arith.constant 0.000000e+00 : bf16
    %25 = vector.broadcast %cst : bf16 to vector<3x258xbf16>
    %26 = arith.truncf %22 : vector<3x2816xf32> to vector<3x2816xbf16>
    %27 = tpu.concatenate %25, %26, %25 in 1 : vector<3x258xbf16>, vector<3x2816xbf16>, vector<3x258xbf16> -> vector<3x3332xbf16>
    %28 = vector.extract_strided_slice %27 {offsets = [0, 0], sizes = [3, 2816], strides = [1, 1]} : vector<3x3332xbf16> to vector<3x2816xbf16>
    %29 = vector.extract_strided_slice %27 {offsets = [0, 1], sizes = [3, 2816], strides = [1, 1]} : vector<3x3332xbf16> to vector<3x2816xbf16>
    %30 = vector.extract_strided_slice %27 {offsets = [0, 2], sizes = [3, 2816], strides = [1, 1]} : vector<3x3332xbf16> to vector<3x2816xbf16>
    %31 = vector.extract_strided_slice %27 {offsets = [0, 3], sizes = [3, 2816], strides = [1, 1]} : vector<3x3332xbf16> to vector<3x2816xbf16>
    %32 = vector.extract_strided_slice %27 {offsets = [0, 4], sizes = [3, 2816], strides = [1, 1]} : vector<3x3332xbf16> to vector<3x2816xbf16>
    %33 = tpu.concatenate %28, %29, %30, %31, %32 in 0 : vector<3x2816xbf16>, vector<3x2816xbf16>, vector<3x2816xbf16>, vector<3x2816xbf16>, vector<3x2816xbf16> -> vector<15x2816xbf16>
    %34 = vector.extract_strided_slice %23 {offsets = [0, 0, 0], sizes = [1, 16, 15], strides = [1, 1, 1]} : vector<5x16x15xbf16> to vector<1x16x15xbf16>
    %35 = vector.shape_cast %34 : vector<1x16x15xbf16> to vector<16x15xbf16>
    %cst_10 = arith.constant dense<0.000000e+00> : vector<16x2816xf32>
    %36 = tpu.matmul %35, %33, %cst_10 {dimension_numbers = #tpu.dot_dimension_numbers<[1], [0], [0], [1], [0, 0, 1, 1], [], []>} : vector<16x15xbf16>, vector<15x2816xbf16>, vector<16x2816xf32> -> vector<16x2816xf32>
    %37 = vector.extract_strided_slice %27 {offsets = [0, 128], sizes = [3, 2816], strides = [1, 1]} : vector<3x3332xbf16> to vector<3x2816xbf16>
    %38 = vector.extract_strided_slice %27 {offsets = [0, 129], sizes = [3, 2816], strides = [1, 1]} : vector<3x3332xbf16> to vector<3x2816xbf16>
    %39 = vector.extract_strided_slice %27 {offsets = [0, 130], sizes = [3, 2816], strides = [1, 1]} : vector<3x3332xbf16> to vector<3x2816xbf16>
    %40 = vector.extract_strided_slice %27 {offsets = [0, 131], sizes = [3, 2816], strides = [1, 1]} : vector<3x3332xbf16> to vector<3x2816xbf16>
    %41 = vector.extract_strided_slice %27 {offsets = [0, 132], sizes = [3, 2816], strides = [1, 1]} : vector<3x3332xbf16> to vector<3x2816xbf16>
    %42 = tpu.concatenate %37, %38, %39, %40, %41 in 0 : vector<3x2816xbf16>, vector<3x2816xbf16>, vector<3x2816xbf16>, vector<3x2816xbf16>, vector<3x2816xbf16> -> vector<15x2816xbf16>
    %43 = vector.extract_strided_slice %23 {offsets = [1, 0, 0], sizes = [1, 16, 15], strides = [1, 1, 1]} : vector<5x16x15xbf16> to vector<1x16x15xbf16>
    %44 = vector.shape_cast %43 : vector<1x16x15xbf16> to vector<16x15xbf16>
    %cst_11 = arith.constant dense<0.000000e+00> : vector<16x2816xf32>
    %45 = tpu.matmul %44, %42, %cst_11 {dimension_numbers = #tpu.dot_dimension_numbers<[1], [0], [0], [1], [0, 0, 1, 1], [], []>} : vector<16x15xbf16>, vector<15x2816xbf16>, vector<16x2816xf32> -> vector<16x2816xf32>
    %46 = arith.addf %36, %45 : vector<16x2816xf32>
    %47 = vector.extract_strided_slice %27 {offsets = [0, 256], sizes = [3, 2816], strides = [1, 1]} : vector<3x3332xbf16> to vector<3x2816xbf16>
    %48 = vector.extract_strided_slice %27 {offsets = [0, 257], sizes = [3, 2816], strides = [1, 1]} : vector<3x3332xbf16> to vector<3x2816xbf16>
    %49 = vector.extract_strided_slice %27 {offsets = [0, 258], sizes = [3, 2816], strides = [1, 1]} : vector<3x3332xbf16> to vector<3x2816xbf16>
    %50 = vector.extract_strided_slice %27 {offsets = [0, 259], sizes = [3, 2816], strides = [1, 1]} : vector<3x3332xbf16> to vector<3x2816xbf16>
    %51 = vector.extract_strided_slice %27 {offsets = [0, 260], sizes = [3, 2816], strides = [1, 1]} : vector<3x3332xbf16> to vector<3x2816xbf16>
    %52 = tpu.concatenate %47, %48, %49, %50, %51 in 0 : vector<3x2816xbf16>, vector<3x2816xbf16>, vector<3x2816xbf16>, vector<3x2816xbf16>, vector<3x2816xbf16> -> vector<15x2816xbf16>
    %53 = vector.extract_strided_slice %23 {offsets = [2, 0, 0], sizes = [1, 16, 15], strides = [1, 1, 1]} : vector<5x16x15xbf16> to vector<1x16x15xbf16>
    %54 = vector.shape_cast %53 : vector<1x16x15xbf16> to vector<16x15xbf16>
    %cst_12 = arith.constant dense<0.000000e+00> : vector<16x2816xf32>
    %55 = tpu.matmul %54, %52, %cst_12 {dimension_numbers = #tpu.dot_dimension_numbers<[1], [0], [0], [1], [0, 0, 1, 1], [], []>} : vector<16x15xbf16>, vector<15x2816xbf16>, vector<16x2816xf32> -> vector<16x2816xf32>
    %56 = arith.addf %46, %55 : vector<16x2816xf32>
    %57 = vector.extract_strided_slice %27 {offsets = [0, 384], sizes = [3, 2816], strides = [1, 1]} : vector<3x3332xbf16> to vector<3x2816xbf16>
    %58 = vector.extract_strided_slice %27 {offsets = [0, 385], sizes = [3, 2816], strides = [1, 1]} : vector<3x3332xbf16> to vector<3x2816xbf16>
    %59 = vector.extract_strided_slice %27 {offsets = [0, 386], sizes = [3, 2816], strides = [1, 1]} : vector<3x3332xbf16> to vector<3x2816xbf16>
    %60 = vector.extract_strided_slice %27 {offsets = [0, 387], sizes = [3, 2816], strides = [1, 1]} : vector<3x3332xbf16> to vector<3x2816xbf16>
    %61 = vector.extract_strided_slice %27 {offsets = [0, 388], sizes = [3, 2816], strides = [1, 1]} : vector<3x3332xbf16> to vector<3x2816xbf16>
    %62 = tpu.concatenate %57, %58, %59, %60, %61 in 0 : vector<3x2816xbf16>, vector<3x2816xbf16>, vector<3x2816xbf16>, vector<3x2816xbf16>, vector<3x2816xbf16> -> vector<15x2816xbf16>
    %63 = vector.extract_strided_slice %23 {offsets = [3, 0, 0], sizes = [1, 16, 15], strides = [1, 1, 1]} : vector<5x16x15xbf16> to vector<1x16x15xbf16>
    %64 = vector.shape_cast %63 : vector<1x16x15xbf16> to vector<16x15xbf16>
    %cst_13 = arith.constant dense<0.000000e+00> : vector<16x2816xf32>
    %65 = tpu.matmul %64, %62, %cst_13 {dimension_numbers = #tpu.dot_dimension_numbers<[1], [0], [0], [1], [0, 0, 1, 1], [], []>} : vector<16x15xbf16>, vector<15x2816xbf16>, vector<16x2816xf32> -> vector<16x2816xf32>
    %66 = arith.addf %56, %65 : vector<16x2816xf32>
    %67 = vector.extract_strided_slice %27 {offsets = [0, 512], sizes = [3, 2816], strides = [1, 1]} : vector<3x3332xbf16> to vector<3x2816xbf16>
    %68 = vector.extract_strided_slice %27 {offsets = [0, 513], sizes = [3, 2816], strides = [1, 1]} : vector<3x3332xbf16> to vector<3x2816xbf16>
    %69 = vector.extract_strided_slice %27 {offsets = [0, 514], sizes = [3, 2816], strides = [1, 1]} : vector<3x3332xbf16> to vector<3x2816xbf16>
    %70 = vector.extract_strided_slice %27 {offsets = [0, 515], sizes = [3, 2816], strides = [1, 1]} : vector<3x3332xbf16> to vector<3x2816xbf16>
    %71 = vector.extract_strided_slice %27 {offsets = [0, 516], sizes = [3, 2816], strides = [1, 1]} : vector<3x3332xbf16> to vector<3x2816xbf16>
    %72 = tpu.concatenate %67, %68, %69, %70, %71 in 0 : vector<3x2816xbf16>, vector<3x2816xbf16>, vector<3x2816xbf16>, vector<3x2816xbf16>, vector<3x2816xbf16> -> vector<15x2816xbf16>
    %73 = vector.extract_strided_slice %23 {offsets = [4, 0, 0], sizes = [1, 16, 15], strides = [1, 1, 1]} : vector<5x16x15xbf16> to vector<1x16x15xbf16>
    %74 = vector.shape_cast %73 : vector<1x16x15xbf16> to vector<16x15xbf16>
    %cst_14 = arith.constant dense<0.000000e+00> : vector<16x2816xf32>
    %75 = tpu.matmul %74, %72, %cst_14 {dimension_numbers = #tpu.dot_dimension_numbers<[1], [0], [0], [1], [0, 0, 1, 1], [], []>} : vector<16x15xbf16>, vector<15x2816xbf16>, vector<16x2816xf32> -> vector<16x2816xf32>
    %76 = arith.addf %66, %75 : vector<16x2816xf32>
    %77 = vector.broadcast %24 : vector<16x1xf32> to vector<16x2816xf32>
    %78 = arith.addf %76, %77 : vector<16x2816xf32>
    %cst_15 = arith.constant 0.000000e+00 : f32
    %cst_16 = arith.constant 6.000000e+00 : f32
    %79 = vector.broadcast %cst_15 : f32 to vector<16x2816xf32>
    %80 = arith.maximumf %79, %78 : vector<16x2816xf32>
    %81 = vector.broadcast %cst_16 : f32 to vector<16x2816xf32>
    %82 = arith.minimumf %81, %80 : vector<16x2816xf32>
    %83 = vector.broadcast %21 : vector<1x2816xf32> to vector<16x2816xf32>
    %84 = arith.mulf %82, %83 : vector<16x2816xf32>
    %c0_17 = arith.constant 0 : index
    %c0_18 = arith.constant 0 : index
    %c0_19 = arith.constant 0 : index
    %c0_20 = arith.constant 0 : index
    %85 = vector.load %arg5[%c0_17, %c0_18, %c0_19, %c0_20] : memref<3x3x16x48xbf16, #tpu.memory_space<vmem>>, vector<1x3x16x48xbf16>
    %86 = vector.shape_cast %85 : vector<1x3x16x48xbf16> to vector<3x16x48xbf16>
    %c0_21 = arith.constant 0 : index
    %c0_22 = arith.constant 0 : index
    %c0_23 = arith.constant 0 : index
    %87 = vector.load %arg6[%c0_21, %c0_22, %c0_23] : memref<3x16x1xf32, #tpu.memory_space<vmem>>, vector<1x16x1xf32>
    %88 = vector.shape_cast %87 : vector<1x16x1xf32> to vector<16x1xf32>
    %cst_24 = arith.constant 0.000000e+00 : bf16
    %89 = vector.broadcast %cst_24 : bf16 to vector<16x129xbf16>
    %90 = arith.truncf %84 : vector<16x2816xf32> to vector<16x2816xbf16>
    %91 = tpu.concatenate %89, %90, %89 in 1 : vector<16x129xbf16>, vector<16x2816xbf16>, vector<16x129xbf16> -> vector<16x3074xbf16>
    %92 = vector.extract_strided_slice %91 {offsets = [0, 0], sizes = [16, 2816], strides = [1, 1]} : vector<16x3074xbf16> to vector<16x2816xbf16>
    %93 = vector.extract_strided_slice %91 {offsets = [0, 1], sizes = [16, 2816], strides = [1, 1]} : vector<16x3074xbf16> to vector<16x2816xbf16>
    %94 = vector.extract_strided_slice %91 {offsets = [0, 2], sizes = [16, 2816], strides = [1, 1]} : vector<16x3074xbf16> to vector<16x2816xbf16>
    %95 = tpu.concatenate %92, %93, %94 in 0 : vector<16x2816xbf16>, vector<16x2816xbf16>, vector<16x2816xbf16> -> vector<48x2816xbf16>
    %96 = vector.extract_strided_slice %86 {offsets = [0, 0, 0], sizes = [1, 16, 48], strides = [1, 1, 1]} : vector<3x16x48xbf16> to vector<1x16x48xbf16>
    %97 = vector.shape_cast %96 : vector<1x16x48xbf16> to vector<16x48xbf16>
    %cst_25 = arith.constant dense<0.000000e+00> : vector<16x2816xf32>
    %98 = tpu.matmul %97, %95, %cst_25 {dimension_numbers = #tpu.dot_dimension_numbers<[1], [0], [0], [1], [0, 0, 1, 1], [], []>} : vector<16x48xbf16>, vector<48x2816xbf16>, vector<16x2816xf32> -> vector<16x2816xf32>
    %99 = vector.extract_strided_slice %91 {offsets = [0, 128], sizes = [16, 2816], strides = [1, 1]} : vector<16x3074xbf16> to vector<16x2816xbf16>
    %100 = vector.extract_strided_slice %91 {offsets = [0, 129], sizes = [16, 2816], strides = [1, 1]} : vector<16x3074xbf16> to vector<16x2816xbf16>
    %101 = vector.extract_strided_slice %91 {offsets = [0, 130], sizes = [16, 2816], strides = [1, 1]} : vector<16x3074xbf16> to vector<16x2816xbf16>
    %102 = tpu.concatenate %99, %100, %101 in 0 : vector<16x2816xbf16>, vector<16x2816xbf16>, vector<16x2816xbf16> -> vector<48x2816xbf16>
    %103 = vector.extract_strided_slice %86 {offsets = [1, 0, 0], sizes = [1, 16, 48], strides = [1, 1, 1]} : vector<3x16x48xbf16> to vector<1x16x48xbf16>
    %104 = vector.shape_cast %103 : vector<1x16x48xbf16> to vector<16x48xbf16>
    %cst_26 = arith.constant dense<0.000000e+00> : vector<16x2816xf32>
    %105 = tpu.matmul %104, %102, %cst_26 {dimension_numbers = #tpu.dot_dimension_numbers<[1], [0], [0], [1], [0, 0, 1, 1], [], []>} : vector<16x48xbf16>, vector<48x2816xbf16>, vector<16x2816xf32> -> vector<16x2816xf32>
    %106 = arith.addf %98, %105 : vector<16x2816xf32>
    %107 = vector.extract_strided_slice %91 {offsets = [0, 256], sizes = [16, 2816], strides = [1, 1]} : vector<16x3074xbf16> to vector<16x2816xbf16>
    %108 = vector.extract_strided_slice %91 {offsets = [0, 257], sizes = [16, 2816], strides = [1, 1]} : vector<16x3074xbf16> to vector<16x2816xbf16>
    %109 = vector.extract_strided_slice %91 {offsets = [0, 258], sizes = [16, 2816], strides = [1, 1]} : vector<16x3074xbf16> to vector<16x2816xbf16>
    %110 = tpu.concatenate %107, %108, %109 in 0 : vector<16x2816xbf16>, vector<16x2816xbf16>, vector<16x2816xbf16> -> vector<48x2816xbf16>
    %111 = vector.extract_strided_slice %86 {offsets = [2, 0, 0], sizes = [1, 16, 48], strides = [1, 1, 1]} : vector<3x16x48xbf16> to vector<1x16x48xbf16>
    %112 = vector.shape_cast %111 : vector<1x16x48xbf16> to vector<16x48xbf16>
    %cst_27 = arith.constant dense<0.000000e+00> : vector<16x2816xf32>
    %113 = tpu.matmul %112, %110, %cst_27 {dimension_numbers = #tpu.dot_dimension_numbers<[1], [0], [0], [1], [0, 0, 1, 1], [], []>} : vector<16x48xbf16>, vector<48x2816xbf16>, vector<16x2816xf32> -> vector<16x2816xf32>
    %114 = arith.addf %106, %113 : vector<16x2816xf32>
    %115 = vector.broadcast %88 : vector<16x1xf32> to vector<16x2816xf32>
    %116 = arith.addf %114, %115 : vector<16x2816xf32>
    %117 = arith.addf %116, %84 : vector<16x2816xf32>
    %cst_28 = arith.constant 0.000000e+00 : f32
    %cst_29 = arith.constant 6.000000e+00 : f32
    %118 = vector.broadcast %cst_28 : f32 to vector<16x2816xf32>
    %119 = arith.maximumf %118, %117 : vector<16x2816xf32>
    %120 = vector.broadcast %cst_29 : f32 to vector<16x2816xf32>
    %121 = arith.minimumf %120, %119 : vector<16x2816xf32>
    %122 = vector.broadcast %21 : vector<1x2816xf32> to vector<16x2816xf32>
    %123 = arith.mulf %121, %122 : vector<16x2816xf32>
    %c1 = arith.constant 1 : index
    %c0_30 = arith.constant 0 : index
    %c0_31 = arith.constant 0 : index
    %c0_32 = arith.constant 0 : index
    %124 = vector.load %arg5[%c1, %c0_30, %c0_31, %c0_32] : memref<3x3x16x48xbf16, #tpu.memory_space<vmem>>, vector<1x3x16x48xbf16>
    %125 = vector.shape_cast %124 : vector<1x3x16x48xbf16> to vector<3x16x48xbf16>
    %c1_33 = arith.constant 1 : index
    %c0_34 = arith.constant 0 : index
    %c0_35 = arith.constant 0 : index
    %126 = vector.load %arg6[%c1_33, %c0_34, %c0_35] : memref<3x16x1xf32, #tpu.memory_space<vmem>>, vector<1x16x1xf32>
    %127 = vector.shape_cast %126 : vector<1x16x1xf32> to vector<16x1xf32>
    %cst_36 = arith.constant 0.000000e+00 : bf16
    %128 = vector.broadcast %cst_36 : bf16 to vector<16x129xbf16>
    %129 = arith.truncf %123 : vector<16x2816xf32> to vector<16x2816xbf16>
    %130 = tpu.concatenate %128, %129, %128 in 1 : vector<16x129xbf16>, vector<16x2816xbf16>, vector<16x129xbf16> -> vector<16x3074xbf16>
    %131 = vector.extract_strided_slice %130 {offsets = [0, 0], sizes = [16, 2816], strides = [1, 1]} : vector<16x3074xbf16> to vector<16x2816xbf16>
    %132 = vector.extract_strided_slice %130 {offsets = [0, 1], sizes = [16, 2816], strides = [1, 1]} : vector<16x3074xbf16> to vector<16x2816xbf16>
    %133 = vector.extract_strided_slice %130 {offsets = [0, 2], sizes = [16, 2816], strides = [1, 1]} : vector<16x3074xbf16> to vector<16x2816xbf16>
    %134 = tpu.concatenate %131, %132, %133 in 0 : vector<16x2816xbf16>, vector<16x2816xbf16>, vector<16x2816xbf16> -> vector<48x2816xbf16>
    %135 = vector.extract_strided_slice %125 {offsets = [0, 0, 0], sizes = [1, 16, 48], strides = [1, 1, 1]} : vector<3x16x48xbf16> to vector<1x16x48xbf16>
    %136 = vector.shape_cast %135 : vector<1x16x48xbf16> to vector<16x48xbf16>
    %cst_37 = arith.constant dense<0.000000e+00> : vector<16x2816xf32>
    %137 = tpu.matmul %136, %134, %cst_37 {dimension_numbers = #tpu.dot_dimension_numbers<[1], [0], [0], [1], [0, 0, 1, 1], [], []>} : vector<16x48xbf16>, vector<48x2816xbf16>, vector<16x2816xf32> -> vector<16x2816xf32>
    %138 = vector.extract_strided_slice %130 {offsets = [0, 128], sizes = [16, 2816], strides = [1, 1]} : vector<16x3074xbf16> to vector<16x2816xbf16>
    %139 = vector.extract_strided_slice %130 {offsets = [0, 129], sizes = [16, 2816], strides = [1, 1]} : vector<16x3074xbf16> to vector<16x2816xbf16>
    %140 = vector.extract_strided_slice %130 {offsets = [0, 130], sizes = [16, 2816], strides = [1, 1]} : vector<16x3074xbf16> to vector<16x2816xbf16>
    %141 = tpu.concatenate %138, %139, %140 in 0 : vector<16x2816xbf16>, vector<16x2816xbf16>, vector<16x2816xbf16> -> vector<48x2816xbf16>
    %142 = vector.extract_strided_slice %125 {offsets = [1, 0, 0], sizes = [1, 16, 48], strides = [1, 1, 1]} : vector<3x16x48xbf16> to vector<1x16x48xbf16>
    %143 = vector.shape_cast %142 : vector<1x16x48xbf16> to vector<16x48xbf16>
    %cst_38 = arith.constant dense<0.000000e+00> : vector<16x2816xf32>
    %144 = tpu.matmul %143, %141, %cst_38 {dimension_numbers = #tpu.dot_dimension_numbers<[1], [0], [0], [1], [0, 0, 1, 1], [], []>} : vector<16x48xbf16>, vector<48x2816xbf16>, vector<16x2816xf32> -> vector<16x2816xf32>
    %145 = arith.addf %137, %144 : vector<16x2816xf32>
    %146 = vector.extract_strided_slice %130 {offsets = [0, 256], sizes = [16, 2816], strides = [1, 1]} : vector<16x3074xbf16> to vector<16x2816xbf16>
    %147 = vector.extract_strided_slice %130 {offsets = [0, 257], sizes = [16, 2816], strides = [1, 1]} : vector<16x3074xbf16> to vector<16x2816xbf16>
    %148 = vector.extract_strided_slice %130 {offsets = [0, 258], sizes = [16, 2816], strides = [1, 1]} : vector<16x3074xbf16> to vector<16x2816xbf16>
    %149 = tpu.concatenate %146, %147, %148 in 0 : vector<16x2816xbf16>, vector<16x2816xbf16>, vector<16x2816xbf16> -> vector<48x2816xbf16>
    %150 = vector.extract_strided_slice %125 {offsets = [2, 0, 0], sizes = [1, 16, 48], strides = [1, 1, 1]} : vector<3x16x48xbf16> to vector<1x16x48xbf16>
    %151 = vector.shape_cast %150 : vector<1x16x48xbf16> to vector<16x48xbf16>
    %cst_39 = arith.constant dense<0.000000e+00> : vector<16x2816xf32>
    %152 = tpu.matmul %151, %149, %cst_39 {dimension_numbers = #tpu.dot_dimension_numbers<[1], [0], [0], [1], [0, 0, 1, 1], [], []>} : vector<16x48xbf16>, vector<48x2816xbf16>, vector<16x2816xf32> -> vector<16x2816xf32>
    %153 = arith.addf %145, %152 : vector<16x2816xf32>
    %154 = vector.broadcast %127 : vector<16x1xf32> to vector<16x2816xf32>
    %155 = arith.addf %153, %154 : vector<16x2816xf32>
    %156 = arith.addf %155, %123 : vector<16x2816xf32>
    %cst_40 = arith.constant 0.000000e+00 : f32
    %cst_41 = arith.constant 6.000000e+00 : f32
    %157 = vector.broadcast %cst_40 : f32 to vector<16x2816xf32>
    %158 = arith.maximumf %157, %156 : vector<16x2816xf32>
    %159 = vector.broadcast %cst_41 : f32 to vector<16x2816xf32>
    %160 = arith.minimumf %159, %158 : vector<16x2816xf32>
    %161 = vector.broadcast %21 : vector<1x2816xf32> to vector<16x2816xf32>
    %162 = arith.mulf %160, %161 : vector<16x2816xf32>
    %c2 = arith.constant 2 : index
    %c0_42 = arith.constant 0 : index
    %c0_43 = arith.constant 0 : index
    %c0_44 = arith.constant 0 : index
    %163 = vector.load %arg5[%c2, %c0_42, %c0_43, %c0_44] : memref<3x3x16x48xbf16, #tpu.memory_space<vmem>>, vector<1x3x16x48xbf16>
    %164 = vector.shape_cast %163 : vector<1x3x16x48xbf16> to vector<3x16x48xbf16>
    %c2_45 = arith.constant 2 : index
    %c0_46 = arith.constant 0 : index
    %c0_47 = arith.constant 0 : index
    %165 = vector.load %arg6[%c2_45, %c0_46, %c0_47] : memref<3x16x1xf32, #tpu.memory_space<vmem>>, vector<1x16x1xf32>
    %166 = vector.shape_cast %165 : vector<1x16x1xf32> to vector<16x1xf32>
    %cst_48 = arith.constant 0.000000e+00 : bf16
    %167 = vector.broadcast %cst_48 : bf16 to vector<16x129xbf16>
    %168 = arith.truncf %162 : vector<16x2816xf32> to vector<16x2816xbf16>
    %169 = tpu.concatenate %167, %168, %167 in 1 : vector<16x129xbf16>, vector<16x2816xbf16>, vector<16x129xbf16> -> vector<16x3074xbf16>
    %170 = vector.extract_strided_slice %169 {offsets = [0, 0], sizes = [16, 2816], strides = [1, 1]} : vector<16x3074xbf16> to vector<16x2816xbf16>
    %171 = vector.extract_strided_slice %169 {offsets = [0, 1], sizes = [16, 2816], strides = [1, 1]} : vector<16x3074xbf16> to vector<16x2816xbf16>
    %172 = vector.extract_strided_slice %169 {offsets = [0, 2], sizes = [16, 2816], strides = [1, 1]} : vector<16x3074xbf16> to vector<16x2816xbf16>
    %173 = tpu.concatenate %170, %171, %172 in 0 : vector<16x2816xbf16>, vector<16x2816xbf16>, vector<16x2816xbf16> -> vector<48x2816xbf16>
    %174 = vector.extract_strided_slice %164 {offsets = [0, 0, 0], sizes = [1, 16, 48], strides = [1, 1, 1]} : vector<3x16x48xbf16> to vector<1x16x48xbf16>
    %175 = vector.shape_cast %174 : vector<1x16x48xbf16> to vector<16x48xbf16>
    %cst_49 = arith.constant dense<0.000000e+00> : vector<16x2816xf32>
    %176 = tpu.matmul %175, %173, %cst_49 {dimension_numbers = #tpu.dot_dimension_numbers<[1], [0], [0], [1], [0, 0, 1, 1], [], []>} : vector<16x48xbf16>, vector<48x2816xbf16>, vector<16x2816xf32> -> vector<16x2816xf32>
    %177 = vector.extract_strided_slice %169 {offsets = [0, 128], sizes = [16, 2816], strides = [1, 1]} : vector<16x3074xbf16> to vector<16x2816xbf16>
    %178 = vector.extract_strided_slice %169 {offsets = [0, 129], sizes = [16, 2816], strides = [1, 1]} : vector<16x3074xbf16> to vector<16x2816xbf16>
    %179 = vector.extract_strided_slice %169 {offsets = [0, 130], sizes = [16, 2816], strides = [1, 1]} : vector<16x3074xbf16> to vector<16x2816xbf16>
    %180 = tpu.concatenate %177, %178, %179 in 0 : vector<16x2816xbf16>, vector<16x2816xbf16>, vector<16x2816xbf16> -> vector<48x2816xbf16>
    %181 = vector.extract_strided_slice %164 {offsets = [1, 0, 0], sizes = [1, 16, 48], strides = [1, 1, 1]} : vector<3x16x48xbf16> to vector<1x16x48xbf16>
    %182 = vector.shape_cast %181 : vector<1x16x48xbf16> to vector<16x48xbf16>
    %cst_50 = arith.constant dense<0.000000e+00> : vector<16x2816xf32>
    %183 = tpu.matmul %182, %180, %cst_50 {dimension_numbers = #tpu.dot_dimension_numbers<[1], [0], [0], [1], [0, 0, 1, 1], [], []>} : vector<16x48xbf16>, vector<48x2816xbf16>, vector<16x2816xf32> -> vector<16x2816xf32>
    %184 = arith.addf %176, %183 : vector<16x2816xf32>
    %185 = vector.extract_strided_slice %169 {offsets = [0, 256], sizes = [16, 2816], strides = [1, 1]} : vector<16x3074xbf16> to vector<16x2816xbf16>
    %186 = vector.extract_strided_slice %169 {offsets = [0, 257], sizes = [16, 2816], strides = [1, 1]} : vector<16x3074xbf16> to vector<16x2816xbf16>
    %187 = vector.extract_strided_slice %169 {offsets = [0, 258], sizes = [16, 2816], strides = [1, 1]} : vector<16x3074xbf16> to vector<16x2816xbf16>
    %188 = tpu.concatenate %185, %186, %187 in 0 : vector<16x2816xbf16>, vector<16x2816xbf16>, vector<16x2816xbf16> -> vector<48x2816xbf16>
    %189 = vector.extract_strided_slice %164 {offsets = [2, 0, 0], sizes = [1, 16, 48], strides = [1, 1, 1]} : vector<3x16x48xbf16> to vector<1x16x48xbf16>
    %190 = vector.shape_cast %189 : vector<1x16x48xbf16> to vector<16x48xbf16>
    %cst_51 = arith.constant dense<0.000000e+00> : vector<16x2816xf32>
    %191 = tpu.matmul %190, %188, %cst_51 {dimension_numbers = #tpu.dot_dimension_numbers<[1], [0], [0], [1], [0, 0, 1, 1], [], []>} : vector<16x48xbf16>, vector<48x2816xbf16>, vector<16x2816xf32> -> vector<16x2816xf32>
    %192 = arith.addf %184, %191 : vector<16x2816xf32>
    %193 = vector.broadcast %166 : vector<16x1xf32> to vector<16x2816xf32>
    %194 = arith.addf %192, %193 : vector<16x2816xf32>
    %195 = arith.addf %194, %162 : vector<16x2816xf32>
    %cst_52 = arith.constant 0.000000e+00 : f32
    %cst_53 = arith.constant 6.000000e+00 : f32
    %196 = vector.broadcast %cst_52 : f32 to vector<16x2816xf32>
    %197 = arith.maximumf %196, %195 : vector<16x2816xf32>
    %198 = vector.broadcast %cst_53 : f32 to vector<16x2816xf32>
    %199 = arith.minimumf %198, %197 : vector<16x2816xf32>
    %200 = vector.broadcast %21 : vector<1x2816xf32> to vector<16x2816xf32>
    %201 = arith.mulf %199, %200 : vector<16x2816xf32>
    %202 = arith.addf %201, %84 : vector<16x2816xf32>
    %c0_54 = arith.constant 0 : index
    %c0_55 = arith.constant 0 : index
    %c0_56 = arith.constant 0 : index
    %203 = vector.load %arg7[%c0_54, %c0_55, %c0_56] : memref<5x12x80xbf16, #tpu.memory_space<vmem>>, vector<5x12x80xbf16>
    %c0_57 = arith.constant 0 : index
    %c0_58 = arith.constant 0 : index
    %204 = vector.load %arg8[%c0_57, %c0_58] : memref<12x1xf32, #tpu.memory_space<vmem>>, vector<12x1xf32>
    %cst_59 = arith.constant 0.000000e+00 : bf16
    %205 = vector.broadcast %cst_59 : bf16 to vector<16x258xbf16>
    %206 = arith.truncf %202 : vector<16x2816xf32> to vector<16x2816xbf16>
    %207 = tpu.concatenate %205, %206, %205 in 1 : vector<16x258xbf16>, vector<16x2816xbf16>, vector<16x258xbf16> -> vector<16x3332xbf16>
    %208 = vector.extract_strided_slice %207 {offsets = [0, 0], sizes = [16, 2816], strides = [1, 1]} : vector<16x3332xbf16> to vector<16x2816xbf16>
    %209 = vector.extract_strided_slice %207 {offsets = [0, 1], sizes = [16, 2816], strides = [1, 1]} : vector<16x3332xbf16> to vector<16x2816xbf16>
    %210 = vector.extract_strided_slice %207 {offsets = [0, 2], sizes = [16, 2816], strides = [1, 1]} : vector<16x3332xbf16> to vector<16x2816xbf16>
    %211 = vector.extract_strided_slice %207 {offsets = [0, 3], sizes = [16, 2816], strides = [1, 1]} : vector<16x3332xbf16> to vector<16x2816xbf16>
    %212 = vector.extract_strided_slice %207 {offsets = [0, 4], sizes = [16, 2816], strides = [1, 1]} : vector<16x3332xbf16> to vector<16x2816xbf16>
    %213 = tpu.concatenate %208, %209, %210, %211, %212 in 0 : vector<16x2816xbf16>, vector<16x2816xbf16>, vector<16x2816xbf16>, vector<16x2816xbf16>, vector<16x2816xbf16> -> vector<80x2816xbf16>
    %214 = vector.extract_strided_slice %203 {offsets = [0, 0, 0], sizes = [1, 12, 80], strides = [1, 1, 1]} : vector<5x12x80xbf16> to vector<1x12x80xbf16>
    %215 = vector.shape_cast %214 : vector<1x12x80xbf16> to vector<12x80xbf16>
    %cst_60 = arith.constant dense<0.000000e+00> : vector<12x2816xf32>
    %216 = tpu.matmul %215, %213, %cst_60 {dimension_numbers = #tpu.dot_dimension_numbers<[1], [0], [0], [1], [0, 0, 1, 1], [], []>} : vector<12x80xbf16>, vector<80x2816xbf16>, vector<12x2816xf32> -> vector<12x2816xf32>
    %217 = vector.extract_strided_slice %207 {offsets = [0, 128], sizes = [16, 2816], strides = [1, 1]} : vector<16x3332xbf16> to vector<16x2816xbf16>
    %218 = vector.extract_strided_slice %207 {offsets = [0, 129], sizes = [16, 2816], strides = [1, 1]} : vector<16x3332xbf16> to vector<16x2816xbf16>
    %219 = vector.extract_strided_slice %207 {offsets = [0, 130], sizes = [16, 2816], strides = [1, 1]} : vector<16x3332xbf16> to vector<16x2816xbf16>
    %220 = vector.extract_strided_slice %207 {offsets = [0, 131], sizes = [16, 2816], strides = [1, 1]} : vector<16x3332xbf16> to vector<16x2816xbf16>
    %221 = vector.extract_strided_slice %207 {offsets = [0, 132], sizes = [16, 2816], strides = [1, 1]} : vector<16x3332xbf16> to vector<16x2816xbf16>
    %222 = tpu.concatenate %217, %218, %219, %220, %221 in 0 : vector<16x2816xbf16>, vector<16x2816xbf16>, vector<16x2816xbf16>, vector<16x2816xbf16>, vector<16x2816xbf16> -> vector<80x2816xbf16>
    %223 = vector.extract_strided_slice %203 {offsets = [1, 0, 0], sizes = [1, 12, 80], strides = [1, 1, 1]} : vector<5x12x80xbf16> to vector<1x12x80xbf16>
    %224 = vector.shape_cast %223 : vector<1x12x80xbf16> to vector<12x80xbf16>
    %cst_61 = arith.constant dense<0.000000e+00> : vector<12x2816xf32>
    %225 = tpu.matmul %224, %222, %cst_61 {dimension_numbers = #tpu.dot_dimension_numbers<[1], [0], [0], [1], [0, 0, 1, 1], [], []>} : vector<12x80xbf16>, vector<80x2816xbf16>, vector<12x2816xf32> -> vector<12x2816xf32>
    %226 = arith.addf %216, %225 : vector<12x2816xf32>
    %227 = vector.extract_strided_slice %207 {offsets = [0, 256], sizes = [16, 2816], strides = [1, 1]} : vector<16x3332xbf16> to vector<16x2816xbf16>
    %228 = vector.extract_strided_slice %207 {offsets = [0, 257], sizes = [16, 2816], strides = [1, 1]} : vector<16x3332xbf16> to vector<16x2816xbf16>
    %229 = vector.extract_strided_slice %207 {offsets = [0, 258], sizes = [16, 2816], strides = [1, 1]} : vector<16x3332xbf16> to vector<16x2816xbf16>
    %230 = vector.extract_strided_slice %207 {offsets = [0, 259], sizes = [16, 2816], strides = [1, 1]} : vector<16x3332xbf16> to vector<16x2816xbf16>
    %231 = vector.extract_strided_slice %207 {offsets = [0, 260], sizes = [16, 2816], strides = [1, 1]} : vector<16x3332xbf16> to vector<16x2816xbf16>
    %232 = tpu.concatenate %227, %228, %229, %230, %231 in 0 : vector<16x2816xbf16>, vector<16x2816xbf16>, vector<16x2816xbf16>, vector<16x2816xbf16>, vector<16x2816xbf16> -> vector<80x2816xbf16>
    %233 = vector.extract_strided_slice %203 {offsets = [2, 0, 0], sizes = [1, 12, 80], strides = [1, 1, 1]} : vector<5x12x80xbf16> to vector<1x12x80xbf16>
    %234 = vector.shape_cast %233 : vector<1x12x80xbf16> to vector<12x80xbf16>
    %cst_62 = arith.constant dense<0.000000e+00> : vector<12x2816xf32>
    %235 = tpu.matmul %234, %232, %cst_62 {dimension_numbers = #tpu.dot_dimension_numbers<[1], [0], [0], [1], [0, 0, 1, 1], [], []>} : vector<12x80xbf16>, vector<80x2816xbf16>, vector<12x2816xf32> -> vector<12x2816xf32>
    %236 = arith.addf %226, %235 : vector<12x2816xf32>
    %237 = vector.extract_strided_slice %207 {offsets = [0, 384], sizes = [16, 2816], strides = [1, 1]} : vector<16x3332xbf16> to vector<16x2816xbf16>
    %238 = vector.extract_strided_slice %207 {offsets = [0, 385], sizes = [16, 2816], strides = [1, 1]} : vector<16x3332xbf16> to vector<16x2816xbf16>
    %239 = vector.extract_strided_slice %207 {offsets = [0, 386], sizes = [16, 2816], strides = [1, 1]} : vector<16x3332xbf16> to vector<16x2816xbf16>
    %240 = vector.extract_strided_slice %207 {offsets = [0, 387], sizes = [16, 2816], strides = [1, 1]} : vector<16x3332xbf16> to vector<16x2816xbf16>
    %241 = vector.extract_strided_slice %207 {offsets = [0, 388], sizes = [16, 2816], strides = [1, 1]} : vector<16x3332xbf16> to vector<16x2816xbf16>
    %242 = tpu.concatenate %237, %238, %239, %240, %241 in 0 : vector<16x2816xbf16>, vector<16x2816xbf16>, vector<16x2816xbf16>, vector<16x2816xbf16>, vector<16x2816xbf16> -> vector<80x2816xbf16>
    %243 = vector.extract_strided_slice %203 {offsets = [3, 0, 0], sizes = [1, 12, 80], strides = [1, 1, 1]} : vector<5x12x80xbf16> to vector<1x12x80xbf16>
    %244 = vector.shape_cast %243 : vector<1x12x80xbf16> to vector<12x80xbf16>
    %cst_63 = arith.constant dense<0.000000e+00> : vector<12x2816xf32>
    %245 = tpu.matmul %244, %242, %cst_63 {dimension_numbers = #tpu.dot_dimension_numbers<[1], [0], [0], [1], [0, 0, 1, 1], [], []>} : vector<12x80xbf16>, vector<80x2816xbf16>, vector<12x2816xf32> -> vector<12x2816xf32>
    %246 = arith.addf %236, %245 : vector<12x2816xf32>
    %247 = vector.extract_strided_slice %207 {offsets = [0, 512], sizes = [16, 2816], strides = [1, 1]} : vector<16x3332xbf16> to vector<16x2816xbf16>
    %248 = vector.extract_strided_slice %207 {offsets = [0, 513], sizes = [16, 2816], strides = [1, 1]} : vector<16x3332xbf16> to vector<16x2816xbf16>
    %249 = vector.extract_strided_slice %207 {offsets = [0, 514], sizes = [16, 2816], strides = [1, 1]} : vector<16x3332xbf16> to vector<16x2816xbf16>
    %250 = vector.extract_strided_slice %207 {offsets = [0, 515], sizes = [16, 2816], strides = [1, 1]} : vector<16x3332xbf16> to vector<16x2816xbf16>
    %251 = vector.extract_strided_slice %207 {offsets = [0, 516], sizes = [16, 2816], strides = [1, 1]} : vector<16x3332xbf16> to vector<16x2816xbf16>
    %252 = tpu.concatenate %247, %248, %249, %250, %251 in 0 : vector<16x2816xbf16>, vector<16x2816xbf16>, vector<16x2816xbf16>, vector<16x2816xbf16>, vector<16x2816xbf16> -> vector<80x2816xbf16>
    %253 = vector.extract_strided_slice %203 {offsets = [4, 0, 0], sizes = [1, 12, 80], strides = [1, 1, 1]} : vector<5x12x80xbf16> to vector<1x12x80xbf16>
    %254 = vector.shape_cast %253 : vector<1x12x80xbf16> to vector<12x80xbf16>
    %cst_64 = arith.constant dense<0.000000e+00> : vector<12x2816xf32>
    %255 = tpu.matmul %254, %252, %cst_64 {dimension_numbers = #tpu.dot_dimension_numbers<[1], [0], [0], [1], [0, 0, 1, 1], [], []>} : vector<12x80xbf16>, vector<80x2816xbf16>, vector<12x2816xf32> -> vector<12x2816xf32>
    %256 = arith.addf %246, %255 : vector<12x2816xf32>
    %257 = vector.broadcast %204 : vector<12x1xf32> to vector<12x2816xf32>
    %258 = arith.addf %256, %257 : vector<12x2816xf32>
    %259 = vector.shape_cast %258 : vector<12x2816xf32> to vector<12x22x128xf32>
    %260 = vector.extract_strided_slice %259 {offsets = [0, 7, 7], sizes = [12, 8, 16], strides = [1, 1, 1]} : vector<12x22x128xf32> to vector<12x8x16xf32>
    %261 = vector.extract_strided_slice %1 {offsets = [0, 7, 7], sizes = [3, 8, 16], strides = [1, 1, 1]} : vector<3x22x128xf32> to vector<3x8x16xf32>
    %262 = vector.extract_strided_slice %261 {offsets = [0, 0, 0], sizes = [1, 8, 16], strides = [1, 1, 1]} : vector<3x8x16xf32> to vector<1x8x16xf32>
    %263 = vector.shape_cast %262 : vector<1x8x16xf32> to vector<1x8x16xf32>
    %264 = vector.broadcast %263 : vector<1x8x16xf32> to vector<4x8x16xf32>
    %265 = vector.extract_strided_slice %261 {offsets = [1, 0, 0], sizes = [1, 8, 16], strides = [1, 1, 1]} : vector<3x8x16xf32> to vector<1x8x16xf32>
    %266 = vector.shape_cast %265 : vector<1x8x16xf32> to vector<1x8x16xf32>
    %267 = vector.broadcast %266 : vector<1x8x16xf32> to vector<4x8x16xf32>
    %268 = vector.extract_strided_slice %261 {offsets = [2, 0, 0], sizes = [1, 8, 16], strides = [1, 1, 1]} : vector<3x8x16xf32> to vector<1x8x16xf32>
    %269 = vector.shape_cast %268 : vector<1x8x16xf32> to vector<1x8x16xf32>
    %270 = vector.broadcast %269 : vector<1x8x16xf32> to vector<4x8x16xf32>
    %271 = tpu.concatenate %264, %267, %270 in 0 : vector<4x8x16xf32>, vector<4x8x16xf32>, vector<4x8x16xf32> -> vector<12x8x16xf32>
    %272 = arith.addf %260, %271 : vector<12x8x16xf32>
    %c0_65 = arith.constant 0 : index
    %c0_66 = arith.constant 0 : index
    %c0_67 = arith.constant 0 : index
    %c0_68 = arith.constant 0 : index
    %273 = vector.load %arg9[%c0_65, %c0_66, %c0_67, %c0_68] : memref<1x12x8x16xf32, #tpu.memory_space<vmem>>, vector<1x12x8x16xf32>
    %274 = vector.shape_cast %273 : vector<1x12x8x16xf32> to vector<12x8x16xf32>
    %275 = vector.shape_cast %272 : vector<12x8x16xf32> to vector<1x12x8x16xf32>
    tpu.vector_store %arg9[%c0_65, %c0_66, %c0_67, %c0_68], %275 {strides = array<i32>} : memref<1x12x8x16xf32, #tpu.memory_space<vmem>>, vector<1x12x8x16xf32>,
    return
  }
  func.func @transform_0(%arg0: i32, %arg1: i32) -> (i32, i32, i32, i32, i32) {
    %c0_i32 = arith.constant 0 : i32
    %c0_i32_0 = arith.constant 0 : i32
    %c0_i32_1 = arith.constant 0 : i32
    %c0_i32_2 = arith.constant 0 : i32
    return %arg0, %arg1, %c0_i32, %c0_i32_0, %c0_i32_1 : i32, i32, i32, i32, i32
  }
  func.func @transform_1(%arg0: i32, %arg1: i32) -> (i32, i32, i32) {
    %c0_i32 = arith.constant 0 : i32
    %c0_i32_0 = arith.constant 0 : i32
    %c0_i32_1 = arith.constant 0 : i32
    %c0_i32_2 = arith.constant 0 : i32
    return %c0_i32, %c0_i32_0, %c0_i32_1 : i32, i32, i32
  }
  func.func @transform_2(%arg0: i32, %arg1: i32) -> (i32, i32) {
    %c0_i32 = arith.constant 0 : i32
    %c0_i32_0 = arith.constant 0 : i32
    %c0_i32_1 = arith.constant 0 : i32
    return %c0_i32, %c0_i32_0 : i32, i32
  }
  func.func @transform_3(%arg0: i32, %arg1: i32) -> (i32, i32, i32, i32) {
    %c0_i32 = arith.constant 0 : i32
    %c0_i32_0 = arith.constant 0 : i32
    %c0_i32_1 = arith.constant 0 : i32
    %c0_i32_2 = arith.constant 0 : i32
    %c0_i32_3 = arith.constant 0 : i32
    return %c0_i32, %c0_i32_0, %c0_i32_1, %c0_i32_2 : i32, i32, i32, i32
  }
  func.func @transform_4(%arg0: i32, %arg1: i32) -> (i32, i32, i32) {
    %c0_i32 = arith.constant 0 : i32
    %c0_i32_0 = arith.constant 0 : i32
    %c0_i32_1 = arith.constant 0 : i32
    %c0_i32_2 = arith.constant 0 : i32
    return %c0_i32, %c0_i32_0, %c0_i32_1 : i32, i32, i32
  }
  func.func @transform_5(%arg0: i32, %arg1: i32) -> (i32, i32, i32) {
    %c0_i32 = arith.constant 0 : i32
    %c0_i32_0 = arith.constant 0 : i32
    %c0_i32_1 = arith.constant 0 : i32
    %c0_i32_2 = arith.constant 0 : i32
    return %c0_i32, %c0_i32_0, %c0_i32_1 : i32, i32, i32
  }
  func.func @transform_6(%arg0: i32, %arg1: i32) -> (i32, i32) {
    %c0_i32 = arith.constant 0 : i32
    %c0_i32_0 = arith.constant 0 : i32
    %c0_i32_1 = arith.constant 0 : i32
    return %c0_i32, %c0_i32_0 : i32, i32
  }
  func.func @transform_7(%arg0: i32, %arg1: i32) -> (i32, i32, i32, i32) {
    %c0_i32 = arith.constant 0 : i32
    %c0_i32_0 = arith.constant 0 : i32
    %c0_i32_1 = arith.constant 0 : i32
    return %arg0, %c0_i32, %arg1, %c0_i32_0 : i32, i32, i32, i32
  }
}

</mosaic_0001>

<bundles_post_ra>
// kernel: _lambda_.1
= control target key start
LH: loop header
LB: loop body
LE: loop exit
PB: predicated region body
PF: predicated region fallthrough
CT: control target
= control target key end

     0   :  { %s15576_s24 = smov 0   ;;  %s15578_s25 = smov 0   ;;  %s22164_s0 = inlined_call_operand.vmem [shape: f32[2,2,3,22,128], index: 0, kind: input, shape index: {}]   ;;  %s22165_s1 = inlined_call_operand.vmem [shape: bf16[5,16,15], index: 1, kind: input, shape index: {}]   ;;  %s22166_s2 = inlined_call_operand.vmem [shape: f32[16,1], index: 2, kind: input, shape index: {}]   ;;  %s22167_s3 = inlined_call_operand.vmem [shape: bf16[3,3,16,48], index: 3, kind: input, shape index: {}]   ;;  %s22168_s4 = inlined_call_operand.vmem [shape: f32[3,16,1], index: 4, kind: input, shape index: {}]   ;;  %s22169_s5 = inlined_call_operand.vmem [shape: bf16[5,12,80], index: 5, kind: input, shape index: {}]   ;;  %s22170_s6 = inlined_call_operand.vmem [shape: f32[12,1], index: 6, kind: input, shape index: {}]   ;;  %s22171_s7 = inlined_call_operand.vmem [shape: f32[2,12,16,16], index: 7, kind: output, shape index: {}]  }
   0x1   :  { %s15580_s26 = smov 0   ;;  %s15582_s27 = smov 0  }
   0x2   :  { %s15584_s28 = smov 0   ;;  %s15586_s29 = smov 0  }
   0x3   :  { %s15588_s30 = smov 0  }
   0x4 LB: > { %s26_s8 = sadd.s32 1, %s15514_s28  ;;  %s29_s9 = sadd.s32 1, %s15518_s29  ;;  %s15522_s30 = sphi %s15588_s30, %s17_s30   ;;  %s15518_s29 = sphi %s15586_s29, %s23436_s29   ;;  %s15514_s28 = sphi %s15584_s28, %s23435_s28   ;;  %s15510_s27 = sphi %s15582_s27, %s23434_s27   ;;  %s15506_s26 = sphi %s15580_s26, %s23433_s26   ;;  %s15502_s25 = sphi %s15578_s25, %s23432_s25   ;;  %s15498_s24 = sphi %s15576_s24, %s23431_s24  }
   0x5   : > { %p27_p0 = scmp.ge.s32.totalorder %s26_s8, 2  ;;  %s14509_s10 = sadd.s32 4294967295, %s15522_s30  }
   0x6   : > { %p202_p1 = scmp.ne.s32.totalorder %s15502_s25, %s15498_s24  ;;  %p203_p2 = scmp.eq.s32.totalorder %s14509_s10, 3 }
   0x7   : > { %s23438_s8 = smov (%p27_p0, %s26_s8), 0  ;;  %s23440_s9 = smov (!%p27_p0, %s29_s9), %s15518_s29 }
   0x8   : > { %s188_s11 = ssub.s32 %s15514_s28, %s23438_s8  ;;  %p31_p3 = scmp.ge.s32.totalorder %s23440_s9, 2 }
   0x9   : > { %p14513_p4 = scmp.ge.s32.totalorder %s15522_s30, 1  ;;  %p15622_p5 = por %p203_p2, %p202_p1 }
   0xa   : > { %p257_p6 = scmp.lt.s32.totalorder %s15522_s30, 5  ;;  %s23442_s9 = smov (%p31_p3, %s23440_s9), 0 }
   0xb   : > { %s187_s13 = ssub.s32 %s15518_s29, %s23442_s9  ;;  %s192_s15 = sadd.s32 1, %s15502_s25 }
   0xc   : > { %p258_p7 = pnand %p14513_p4, %p257_p6  ;;  %s189_s14 = sor.u32 %s188_s11, %s187_s13 }
   0xd   : > { %p190_p8 = scmp.eq.s32.totalorder %s189_s14, 0 }
   0xe   : > { %261 = sbr.rel (%p258_p7) target bundleno = 4548 (0x11c4), region = 48 }
   0xf   : > { %s15633_s16 = scalar_select %p190_p8, %s15502_s25, %s192_s15  }
  0x15   : > { %p292_p9 = scmp.lt.s32.totalorder %s15510_s27, 1  ;;  %p294_p10 = scmp.lt.s32.totalorder %s15506_s26, 1  ;;  %v22174_v0 = vlaneseq  ;;  %v15524_v1 = vmov 1983009808   ;;  %v22175_v3 = vmov 0   ;;  %v22172_v14 = vmov 0.0  }
  0x16   : > { %v348_v2 = vunpack.c.l.s4 %v15524_v1  ;;  %1741 = vmatprep.mubr.bf16.mxu0 %v22175_v3  ;;  %1784 = vmatprep.mubr.bf16.mxu1 %v22175_v3  ;;  %v15526_v6 = vmov 1934713408   ;;  %s15528_s13 = smov 2   ;;  %s15529_s14 = smov 126   ;;  %vm765_vm0 = vcmask 15360   ;;  %vm1034_vm1 = vcmask 1039360  }
  0x17   : > { %s293_s17 = scalar_select %p292_p9, %s15510_s27, 1  ;;  %15432 = vset.pattern.permute.xlu0 %v22175_v3  ;;  %15433 = vset.pattern.permute.xlu1 %v22175_v3  ;;  %v15644_v4 = vshrl.u32 %v22174_v0, 7  ;;  %v363_v7 = vunpack.c.l.s4 %v15526_v6  ;;  %vm1410_vm2 = vcmask 1041408   ;;  %vm1411_vm3 = vsmask.f32 1280 }
  0x18   : > { %s295_s18 = scalar_select %p294_p10, %s15506_s26, 1  ;;  %v349_v5 = vunpack.c.0.s8 %v348_v2  ;;  %vm1278_vm4 = vcmask 1022976   ;;  %vm16097_vm5 = vmand %vm1410_vm2, %vm1411_vm3  ;;  %vm1146_vm6 = vcmask 1031168   ;;  %vm1524_vm7 = vcmask 1044480  }
  0x19   : > { %s15362_s19 = smul.u32 18, %s293_s17  ;;  %22681 = vst [vmem:[#allocation3_spill] sm:$0xff] %v15644_v4  ;;  %v364_v9 = vunpack.c.0.s8 %v363_v7  ;;  %s15530_s15 = smov 127   ;;  %vm1525_vm8 = vsmask.f32 4352  ;;  %vm1435_vm9 = vcmask 1042432  }
  0x1a   : > { %s15361_s20 = smul.u32 9, %s295_s18  ;;  %v15652_v8 = vsub.s32 %v349_v5, %v15644_v4  ;;  %s15531_s17 = smov 124   ;;  %vm1661_vm10 = vcmask 1046528   ;;  %vm16119_vm11 = vmand %vm1524_vm7, %vm1525_vm8  ;;  %vm1388_vm12 = vcmask 1014784   ;;  %vm1662_vm13 = vcmask 1047552  }
  0x1b   : > { %v15662_v21 = vsub.s32 %v364_v9, %v15644_v4  ;;  %s15532_s18 = smov 125   ;;  %vm1549_vm14 = vcmask 1045504   ;;  %vm1657_vm15 = vcmask 121856   ;;  %s15534_s23 = smov 1  }
  0x1c   : > { %s298_s21 = sadd.s32 %s15362_s19, %s15361_s20  ;;  %22682 = vst [vmem:[#allocation4_spill] sm:$0xff] %v15652_v8 }
  0x1d   : > { %s14514_s22 = sshll.u32 %s298_s21, 3  ;;  %22683 = vst [vmem:[#allocation5_spill] sm:$0xff] %v15662_v21  ;;  %s14515_s21 = sshll.u32 %s15506_s26, 3 }
  0x1e   : > { %s15649_s11 = scalar_lea.vmem %s22164_s0, %s14514_s22  ;;  %s14516_s22 = sadd.s32 4294967289, %s14515_s21 }
  0x1f   : > { %v302_v10 = vld [vmem:[%s15649_s11] sm:$0xff]  ;;  %v305_v11 = vld [vmem:[%s15649_s11 + $0x18] sm:$0xff]  ;;  %v308_v12 = vld [vmem:[%s15649_s11 + $0x30] sm:$0xff] }
  0x20   : > { %v478_v13 = vcombine.high %v302_v10, %v308_v12  ;;  %v494_v15 = vcombine.high %v305_v11, %v22172_v14  ;;  %v477_v16 = vcombine.low %v302_v10, %v308_v12  ;;  %v303_v17 = vld [vmem:[%s15649_s11 + $0x8] sm:$0xff]  ;;  %v309_v18 = vld [vmem:[%s15649_s11 + $0x38] sm:$0xff]  ;;  %v14521_v25 = vld.sshfl [vmem:[%s15649_s11 + $0x20] sm:$0xff pattern:$0x76325410] }
  0x21   : > { %v14520_v19 = vld.sshfl [vmem:[%s15649_s11 + $0x18] sm:$0xff pattern:$0x76325410]  ;;  %v545_v20 = vcombine.low %v303_v17, %v309_v18  ;;  %v306_v26 = vld [vmem:[%s15649_s11 + $0x20] sm:$0xff]  ;;  %v546_v33 = vcombine.high %v303_v17, %v309_v18  ;;  %v307_v10 = vld [vmem:[%s15649_s11 + $0x28] sm:$0x3f] }
  0x22   : > { %v492_v22 = vrot.slane %v478_v13, %v15652_v8  ;;  %v508_v23 = vrot.slane %v494_v15, %v15652_v8  ;;  %v485_v24 = vrot.slane %v477_v16, %v15652_v8  ;;  %v562_v34 = vcombine.high %v306_v26, %v22172_v14  ;;  %v15438_v55 = vld [vmem:[%s15649_s11 + $0x10] ss:$48 sps:$4 sm:$0xff]   ;;  %v14522_v1 = vld.sshfl [vmem:[%s15649_s11 + $0x28] sm:$0x3f pattern:$0x76325410] }
  0x23   : > { %v553_v27 = vrot.slane %v545_v20, %v15652_v8  ;;  %v560_v43 = vrot.slane %v546_v33, %v15652_v8  ;;  %v621_v60 = vrot.slane %v15438_v55, %v15652_v8  ;;  %v15440_v11 = vld [vmem:[%s15649_s11 + $0x14] ss:$48 sps:$4 sm:$0x33]   ;;  %v637_v16 = vcombine.high %v307_v10, %v22172_v14 }
  0x24   : > { %v525_v28 = vcombine.low %v492_v22, %v508_v23  ;;  %v509_v29 = vcombine.low %v485_v24, %v14520_v19  ;;  %v510_v30 = vcombine.high %v485_v24, %v14520_v19  ;;  %v526_v32 = vcombine.high %v492_v22, %v508_v23 }
  0x25   : > { %v577_v31 = vcombine.low %v553_v27, %v14521_v25  ;;  %v576_v44 = vrot.slane %v562_v34, %v15652_v8  ;;  %v578_v49 = vcombine.high %v553_v27, %v14521_v25  ;;  %v638_v5 = vcombine.low %v621_v60, %v14522_v1 }
  0x26   : > { %v533_v35 = vrot.slane %v525_v28, %v15662_v21  ;;  %v517_v36 = vrot.slane %v509_v29, %v15662_v21  ;;  %v524_v37 = vrot.slane %v510_v30, %v15662_v21  ;;  %v540_v42 = vrot.slane %v526_v32, %v15662_v21 }
  0x27   : > { %v585_v41 = vrot.slane %v577_v31, %v15662_v21  ;;  %v593_v48 = vcombine.low %v560_v43, %v576_v44  ;;  %v592_v54 = vrot.slane %v578_v49, %v15662_v21  ;;  %v594_v2 = vcombine.high %v560_v43, %v576_v44 }
  0x28   : > { %v681_v38 = vpack.c.bf16 %v533_v35, %v533_v35  ;;  %v677_v39 = vpack.c.bf16 %v517_v36, %v517_v36  ;;  %v541_v40 = vcombine.high %v517_v36, %v22172_v14  ;;  %v679_v45 = vpack.c.bf16 %v524_v37, %v524_v37 }
  0x29   : > { %v543_v47 = vcombine.high %v533_v35, %v22172_v14  ;;  %v685_v50 = vpack.c.bf16 %v585_v41, %v585_v41  ;;  %v544_v52 = vcombine.high %v540_v42, %v22172_v14  ;;  %v683_v53 = vpack.c.bf16 %v540_v42, %v540_v42 }
  0x2a   : > { %729 = vrot.lane.b32.xlu1 %v681_v38, %s15528_s13  ;;  %721 = vrot.lane.b32.xlu0 %v677_v39, %s15528_s13  ;;  %v678_v46 = vpack.c.bf16 %v541_v40, %v541_v40  ;;  %v601_v57 = vrot.slane %v593_v48, %v15662_v21  ;;  %v609_v58 = vcombine.high %v585_v41, %v22172_v14  ;;  %v818_v36 = vrot.slane %v22175_v3, 6 }
  0x2b   : > { %v682_v51 = vpack.c.bf16 %v543_v47, %v543_v47  ;;  %v684_v56 = vpack.c.bf16 %v544_v52, %v544_v52  ;;  %v542_v59 = vcombine.high %v524_v37, %v22172_v14  ;;  %v610_v63 = vcombine.high %v592_v54, %v22172_v14 }
  0x2c   : > { %v689_v61 = vpack.c.bf16 %v601_v57, %v601_v57  ;;  %v686_v62 = vpack.c.bf16 %v609_v58, %v609_v58  ;;  %v611_v9 = vcombine.high %v601_v57, %v22172_v14  ;;  %v608_v12 = vrot.slane %v594_v2, %v15662_v21 }
  0x2d   : > { %v680_v6 = vpack.c.bf16 %v542_v59, %v542_v59  ;;  %v688_v7 = vpack.c.bf16 %v610_v63, %v610_v63  ;;  %v687_v13 = vpack.c.bf16 %v592_v54, %v592_v54  ;;  %v646_v15 = vrot.slane %v638_v5, %v15662_v21 }
  0x2e   : > { %725 = vrot.lane.b32.xlu1 %v679_v45, %s15528_s13  ;;  %723 = vrot.lane.b32.xlu0 %v678_v46, %s15528_s13  ;;  %v690_v17 = vpack.c.bf16 %v611_v9, %v611_v9  ;;  %v612_v18 = vcombine.high %v608_v12, %v22172_v14  ;;  %v628_v19 = vrot.slane %v15440_v11, %v15652_v8  ;;  %v821_v37 = vrot.slane %v22175_v3, 7 }
  0x2f   : > { %v639_v20 = vcombine.high %v621_v60, %v14522_v1  ;;  %v693_v22 = vpack.c.bf16 %v646_v15, %v646_v15  ;;  %v662_v25 = vcombine.high %v646_v15, %v22172_v14  ;;  %v691_v27 = vpack.c.bf16 %v608_v12, %v608_v12 }
  0x30   : > { %v692_v23 = vpack.c.bf16 %v612_v18, %v612_v18  ;;  %v654_v24 = vcombine.low %v628_v19, %v637_v16  ;;  %v1080_v38 = vrot.slane %v22175_v3, 5  ;;  %v822_v39 = vor.u32 %v821_v37, %v818_v36 }
  0x31   : > { %v653_v26 = vrot.slane %v639_v20, %v15662_v21  ;;  %v694_v29 = vpack.c.bf16 %v662_v25, %v662_v25  ;;  %v1168_v40 = vrot.slane %v22175_v3, 3  ;;  %v1169_v41 = vrot.slane %v22175_v3, 4 }
  0x32   : > { %737 = vrot.lane.b32.xlu1 %v685_v50, %s15528_s13  ;;  %731 = vrot.lane.b32.xlu0 %v682_v51, %s15528_s13  ;;  %v661_v28 = vrot.slane %v654_v24, %v15662_v21  ;;  %v1322_v42 = vrot.slane %v22175_v3, 2 }
  0x33   : > { %v663_v30 = vcombine.high %v653_v26, %v22172_v14  ;;  %v695_v34 = vpack.c.bf16 %v653_v26, %v653_v26  ;;  %v1170_v43 = vor.u32 %v1169_v41, %v1168_v40 }
  0x34   : > { %v697_v31 = vpack.c.bf16 %v661_v28, %v661_v28  ;;  %v664_v33 = vcombine.high %v661_v28, %v22172_v14 }
  0x35   : > { %v696_v32 = vpack.c.bf16 %v663_v30, %v663_v30 }
  0x36   : > { %733 = vrot.lane.b32.xlu1 %v683_v53, %s15528_s13  ;;  %735 = vrot.lane.b32.xlu0 %v684_v56, %s15528_s13  ;;  %v698_v35 = vpack.c.bf16 %v664_v33, %v664_v33 }
  0x3a   : > { %745 = vrot.lane.b32.xlu1 %v689_v61, %s15528_s13  ;;  %739 = vrot.lane.b32.xlu0 %v686_v62, %s15528_s13 }
  0x3e   : > { %727 = vrot.lane.b32.xlu1 %v680_v6, %s15528_s13  ;;  %743 = vrot.lane.b32.xlu0 %v688_v7, %s15528_s13 }
  0x42   : > { %747 = vrot.lane.b32.xlu0 %v690_v17, %s15528_s13  ;;  %741 = vrot.lane.b32.xlu1 %v687_v13, %s15528_s13 }
  0x46   : > { %753 = vrot.lane.b32.xlu1 %v693_v22, %s15528_s13  ;;  %751 = vrot.lane.b32.xlu0 %v692_v23, %s15528_s13 }
  0x4a   : > { %749 = vrot.lane.b32.xlu1 %v691_v27, %s15528_s13  ;;  %755 = vrot.lane.b32.xlu0 %v694_v29, %s15528_s13 }
  0x4e   : > { %761 = vrot.lane.b32.xlu1 %v697_v31, %s15528_s13  ;;  %759 = vrot.lane.b32.xlu0 %v696_v32, %s15528_s13 }
  0x52   : > { %757 = vrot.lane.b32.xlu1 %v695_v34, %s15528_s13  ;;  %763 = vrot.lane.b32.xlu0 %v698_v35, %s15528_s13 }
  0x56   : > { %1102 = vrot.lane.b32.xlu1 %v1080_v38, %s15529_s14  ;;  %990 = vrot.lane.b32.xlu0 %v822_v39, %s15530_s15 }
  0x5a   : > { %1344 = vrot.lane.b32.xlu1 %v1322_v42, %s15531_s17  ;;  %1234 = vrot.lane.b32.xlu0 %v1170_v43, %s15532_s18 }
  0x9c   : > { %v730_v44 = vpop.permute.xlu1 %729  ;;  %v722_v45 = vpop.permute.xlu0 %721 }
  0x9d   : > { %v15735_v46 = vsel %vm765_vm0, 0, %v722_v45 }
  0x9e   : > { %v1081_v47 = vrot.slane %v15735_v46, 5  ;;  %v1323_v50 = vrot.slane %v15735_v46, 2  ;;  %v823_v15 = vshrl.u32 %v15735_v46, 16  ;;  %v826_v16 = vshll.u32 %v15735_v46, 16 }
  0xa0   : > { %v15738_v48 = vpop.permute.xlu1 %725  ;;  %v15740_v49 = vpop.permute.xlu0 %723  ;;  %1104 = vrot.lane.b32.xlu1 %v1081_v47, %s15529_s14  ;;  %v825_v19 = vrot.slane %v823_v15, 6  ;;  %v828_v20 = vrot.slane %v826_v16, 7  ;;  %v1171_v26 = vrot.slane %v823_v15, 3  ;;  %v1172_v27 = vrot.slane %v826_v16, 4 }
  0xa1   : > { %v15746_v51 = vsel %vm765_vm0, %v722_v45, %v15740_v49 }
  0xa2   : > { %v1082_v52 = vrot.slane %v15746_v51, 5  ;;  %v1324_v55 = vrot.slane %v15746_v51, 2  ;;  %v829_v25 = vor.u32 %v828_v20, %v825_v19  ;;  %v1173_v33 = vor.u32 %v1172_v27, %v1171_v26 }
  0xa3   : > { %v834_v16 = vshll.u32 %v15746_v51, 16 }
  0xa4   : > { %v738_v53 = vpop.permute.xlu1 %737  ;;  %1106 = vrot.lane.b32.xlu0 %v1082_v52, %s15529_s14  ;;  %v15750_v54 = vpop.permute.xlu0 %731  ;;  %1346 = vrot.lane.b32.xlu1 %v1323_v50, %s15531_s17 }
  0xa5   : > { %v15756_v56 = vsel %vm765_vm0, %v730_v44, %v15750_v54 }
  0xa6   : > { %v1086_v59 = vrot.slane %v15756_v56, 5  ;;  %v1328_v62 = vrot.slane %v15756_v56, 2 }
  0xa8   : > { %v15758_v57 = vpop.permute.xlu1 %733  ;;  %1348 = vrot.lane.b32.xlu0 %v1324_v55, %s15531_s17  ;;  %v736_v58 = vpop.permute.xlu0 %735 }
  0xa9   : > { %v15803_v24 = vsel %vm765_vm0, %v736_v58, %v738_v53  ;;  %v15809_v28 = vsel %vm765_vm0, %v15758_v57, %v736_v58 }
  0xaa   : > { %v1089_v29 = vrot.slane %v15803_v24, 5  ;;  %v1088_v32 = vrot.slane %v15809_v28, 5  ;;  %v1331_v38 = vrot.slane %v15803_v24, 2  ;;  %v1330_v42 = vrot.slane %v15809_v28, 2 }
  0xab   : > { %v887_v50 = vshrl.u32 %v15803_v24, 16  ;;  %v890_v52 = vshll.u32 %v15803_v24, 16 }
  0xac   : > { %v746_v60 = vpop.permute.xlu1 %745  ;;  %1114 = vrot.lane.b32.xlu0 %v1086_v59, %s15529_s14  ;;  %v15763_v61 = vpop.permute.xlu0 %739 }
  0xad   : > { %v15768_v63 = vsel %vm765_vm0, %v738_v53, %v15763_v61  ;;  %v892_v15 = vrot.slane %v890_v52, 7  ;;  %v1195_v27 = vrot.slane %v887_v50, 3 }
  0xae   : > { %22684 = vst [vmem:[#allocation6_spill] sm:$0xff] %v15768_v63  ;;  %v1090_v7 = vrot.slane %v15768_v63, 5  ;;  %v1332_v12 = vrot.slane %v15768_v63, 2 }
  0xb0   : > { %v728_v1 = vpop.permute.xlu1 %727  ;;  %1356 = vrot.lane.b32.xlu0 %v1328_v62, %s15531_s17  ;;  %v15771_v2 = vpop.permute.xlu0 %743 }
  0xb1   : > { %v15774_v5 = vsel %vm765_vm0, %v728_v1, %v730_v44  ;;  %v15780_v9 = vsel %vm765_vm0, %v15738_v48, %v728_v1  ;;  %v15827_v47 = vsel %vm765_vm0, %v15771_v2, %v746_v60  ;;  %v879_v1 = vshrl.u32 %v15809_v28, 16 }
  0xb2   : > { %v1085_v6 = vrot.slane %v15774_v5, 5  ;;  %v1084_v11 = vrot.slane %v15780_v9, 5  ;;  %v1327_v17 = vrot.slane %v15774_v5, 2  ;;  %v1326_v22 = vrot.slane %v15780_v9, 2 }
  0xb3   : > { %v855_v30 = vshrl.u32 %v15774_v5, 16  ;;  %v858_v31 = vshll.u32 %v15774_v5, 16  ;;  %v847_v36 = vshrl.u32 %v15780_v9, 16  ;;  %v850_v37 = vshll.u32 %v15780_v9, 16 }
  0xb4   : > { %1112 = vrot.lane.b32.xlu1 %v1085_v6, %s15529_s14  ;;  %1122 = vrot.lane.b32.xlu0 %v1090_v7, %s15529_s14  ;;  %v15784_v10 = vpop.permute.xlu0 %747  ;;  %v15833_v53 = vpop.permute.xlu1 %741  ;;  %v1093_v55 = vrot.slane %v15827_v47, 5  ;;  %v882_v6 = vshll.u32 %v15809_v28, 16  ;;  %v881_v19 = vrot.slane %v879_v1, 6 }
  0xb5   : > { %v15790_v13 = vsel %vm765_vm0, %v746_v60, %v15784_v10  ;;  %v857_v34 = vrot.slane %v855_v30, 6  ;;  %v860_v35 = vrot.slane %v858_v31, 7  ;;  %v849_v40 = vrot.slane %v847_v36, 6 }
  0xb6   : > { %22685 = vst [vmem:[#allocation7_spill] sm:$0xff] %v15790_v13  ;;  %v1094_v18 = vrot.slane %v15790_v13, 5  ;;  %v1336_v23 = vrot.slane %v15790_v13, 2  ;;  %v852_v41 = vrot.slane %v850_v37, 7  ;;  %v1183_v44 = vrot.slane %v855_v30, 3 }
  0xb7   : > { %v861_v39 = vor.u32 %v860_v35, %v857_v34  ;;  %v1184_v45 = vrot.slane %v858_v31, 4  ;;  %v1180_v59 = vrot.slane %v847_v36, 3  ;;  %v1181_v62 = vrot.slane %v850_v37, 4 }
  0xb8   : > { %1110 = vrot.lane.b32.xlu1 %v1084_v11, %s15529_s14  ;;  %1364 = vrot.lane.b32.xlu0 %v1332_v12, %s15531_s17  ;;  %v853_v43 = vor.u32 %v852_v41, %v849_v40  ;;  %v15839_v60 = vsel %vm765_vm0, %v15833_v53, %v15771_v2  ;;  %v889_v12 = vrot.slane %v887_v50, 6  ;;  %v831_v2 = vshrl.u32 %v15746_v51, 16 }
  0xb9   : > { %v1185_v58 = vor.u32 %v1184_v45, %v1183_v44  ;;  %v1092_v7 = vrot.slane %v15839_v60, 5  ;;  %v1182_v11 = vor.u32 %v1181_v62, %v1180_v59  ;;  %v884_v20 = vrot.slane %v882_v6, 7 }
  0xba   : > { %v1174_v30 = vrot.slane %v831_v2, 3  ;;  %v1175_v31 = vrot.slane %v834_v16, 4  ;;  %v863_v34 = vshrl.u32 %v15756_v56, 16  ;;  %v866_v35 = vshll.u32 %v15756_v56, 16 }
  0xbb   : > { %v885_v26 = vor.u32 %v884_v20, %v881_v19  ;;  %v911_v50 = vshrl.u32 %v15839_v60, 16  ;;  %v898_v62 = vshll.u32 %v15768_v63, 16 }
  0xbc   : > { %1354 = vrot.lane.b32.xlu1 %v1327_v17, %s15531_s17  ;;  %1130 = vrot.lane.b32.xlu0 %v1094_v18, %s15529_s14  ;;  %v1335_v17 = vrot.slane %v15827_v47, 2  ;;  %v893_v18 = vor.u32 %v892_v15, %v889_v12  ;;  %v1176_v40 = vor.u32 %v1175_v31, %v1174_v30  ;;  %v1186_v59 = vrot.slane %v863_v34, 3  ;;  %v752_v12 = vpop.permute.xlu0 %751  ;;  %v754_v15 = vpop.permute.xlu1 %753 }
  0xbd   : > { %v15871_v19 = vsel %vm765_vm0, %v752_v12, %v754_v15  ;;  %v1199_v31 = vrot.slane %v898_v62, 4 }
  0xc0   : > { %1352 = vrot.lane.b32.xlu1 %v1326_v22, %s15531_s17  ;;  %1372 = vrot.lane.b32.xlu0 %v1336_v23, %s15531_s17  ;;  %v833_v22 = vrot.slane %v831_v2, 6  ;;  %v836_v23 = vrot.slane %v834_v16, 7  ;;  %v900_v16 = vrot.slane %v898_v62, 7 }
  0xc2   : > { %v837_v36 = vor.u32 %v836_v23, %v833_v22  ;;  %v15876_v23 = vsel %vm765_vm0, %v15740_v49, %v15738_v48  ;;  %v15884_v48 = vpop.permute.xlu0 %755 }
  0xc4   : > { %1120 = vrot.lane.b32.xlu1 %v1089_v29, %s15529_s14  ;;  %992 = vrot.lane.b32.xlu0 %v829_v25, %s15530_s15  ;;  %v1334_v25 = vrot.slane %v15839_v60, 2  ;;  %v1196_v29 = vrot.slane %v890_v52, 4  ;;  %v914_v52 = vshll.u32 %v15839_v60, 16 }
  0xc6   : > { %v1197_v37 = vor.u32 %v1196_v29, %v1195_v27 }
  0xc8   : > { %1118 = vrot.lane.b32.xlu1 %v1088_v32, %s15529_s14  ;;  %1236 = vrot.lane.b32.xlu0 %v1173_v33, %s15532_s18  ;;  %v1192_v32 = vrot.slane %v879_v1, 3  ;;  %v1193_v33 = vrot.slane %v882_v6, 4  ;;  %v1187_v6 = vrot.slane %v866_v35, 4 }
  0xca   : > { %v1194_v41 = vor.u32 %v1193_v33, %v1192_v32  ;;  %v1188_v20 = vor.u32 %v1187_v6, %v1186_v59  ;;  %v1204_v32 = vrot.slane %v911_v50, 3  ;;  %v1205_v33 = vrot.slane %v914_v52, 4 }
  0xcc   : > { %1362 = vrot.lane.b32.xlu1 %v1331_v38, %s15531_s17  ;;  %1000 = vrot.lane.b32.xlu0 %v861_v39, %s15530_s15  ;;  %v919_v38 = vshrl.u32 %v15827_v47, 16  ;;  %v922_v39 = vshll.u32 %v15827_v47, 16 }
  0xce   : > { %v921_v44 = vrot.slane %v919_v38, 6  ;;  %v924_v45 = vrot.slane %v922_v39, 7 }
  0xd0   : > { %1360 = vrot.lane.b32.xlu1 %v1330_v42, %s15531_s17  ;;  %998 = vrot.lane.b32.xlu0 %v853_v43, %s15530_s15  ;;  %v865_v42 = vrot.slane %v863_v34, 6  ;;  %v868_v43 = vrot.slane %v866_v35, 7  ;;  %v925_v1 = vor.u32 %v924_v45, %v921_v44  ;;  %v927_v34 = vshrl.u32 %v15790_v13, 16 }
  0xd1   : > { %v930_v35 = vshll.u32 %v15790_v13, 16 }
  0xd2   : > { %v1210_v59 = vrot.slane %v927_v34, 3 }
  0xd3   : > { %v1211_v62 = vrot.slane %v930_v35, 4 }
  0xd4   : > { %1128 = vrot.lane.b32.xlu1 %v1093_v55, %s15529_s14  ;;  %1244 = vrot.lane.b32.xlu0 %v1185_v58, %s15532_s18  ;;  %v895_v55 = vshrl.u32 %v15768_v63, 16  ;;  %v869_v58 = vor.u32 %v868_v43, %v865_v42  ;;  %v929_v42 = vrot.slane %v927_v34, 6  ;;  %v932_v43 = vrot.slane %v930_v35, 7 }
  0xd6   : > { %v897_v2 = vrot.slane %v895_v55, 6  ;;  %v1198_v30 = vrot.slane %v895_v55, 3  ;;  %v15898_v55 = vpop.permute.xlu1 %749 }
  0xd7   : > { %v15902_v6 = vsel %vm765_vm0, %v15898_v55, %v752_v12  ;;  %v1097_v12 = vrot.slane %v15871_v19, 5 }
  0xd8   : > { %1126 = vrot.lane.b32.xlu1 %v1092_v7, %s15529_s14  ;;  %1242 = vrot.lane.b32.xlu0 %v1182_v11, %s15532_s18  ;;  %v913_v7 = vrot.slane %v911_v50, 6  ;;  %v916_v11 = vrot.slane %v914_v52, 7  ;;  %v901_v27 = vor.u32 %v900_v16, %v897_v2  ;;  %v760_v16 = vpop.permute.xlu0 %759 }
  0xda   : > { %v917_v22 = vor.u32 %v916_v11, %v913_v7 }
  0xdc   : > { %1370 = vrot.lane.b32.xlu1 %v1335_v17, %s15531_s17  ;;  %1008 = vrot.lane.b32.xlu0 %v893_v18, %s15530_s15  ;;  %v1207_v17 = vrot.slane %v919_v38, 3  ;;  %v1208_v18 = vrot.slane %v922_v39, 4  ;;  %v839_v38 = vshrl.u32 %v15876_v23, 16  ;;  %v842_v39 = vshll.u32 %v15876_v23, 16 }
  0xde   : > { %v1209_v29 = vor.u32 %v1208_v18, %v1207_v17  ;;  %v841_v52 = vrot.slane %v839_v38, 6  ;;  %v943_v17 = vshrl.u32 %v15902_v6, 16  ;;  %v946_v18 = vshll.u32 %v15902_v6, 16 }
  0xe0   : > { %1368 = vrot.lane.b32.xlu1 %v1334_v25, %s15531_s17  ;;  %1006 = vrot.lane.b32.xlu0 %v885_v26, %s15530_s15  ;;  %v951_v25 = vshrl.u32 %v15871_v19, 16  ;;  %v954_v26 = vshll.u32 %v15871_v19, 16 }
  0xe2   : > { %v953_v49 = vrot.slane %v951_v25, 6  ;;  %v1220_v34 = vrot.slane %v954_v26, 4 }
  0xe4   : > { %994 = vrot.lane.b32.xlu1 %v837_v36, %s15530_s15  ;;  %1252 = vrot.lane.b32.xlu0 %v1197_v37, %s15532_s18  ;;  %v956_v36 = vrot.slane %v954_v26, 7  ;;  %v15890_v37 = vsel %vm765_vm0, %v754_v15, %v15884_v48  ;;  %v1212_v15 = vor.u32 %v1211_v62, %v1210_v59  ;;  %v1217_v59 = vrot.slane %v946_v18, 4 }
  0xe5   : > { %22686 = vst [vmem:[#allocation8_spill] sm:$0xff] %v15890_v37  ;;  %v959_v45 = vshrl.u32 %v15890_v37, 16  ;;  %v962_v50 = vshll.u32 %v15890_v37, 16  ;;  %v1339_v62 = vrot.slane %v15871_v19, 2 }
  0xe6   : > { %v957_v44 = vor.u32 %v956_v36, %v953_v49  ;;  %v1098_v49 = vrot.slane %v15890_v37, 5 }
  0xe7   : > { %v961_v7 = vrot.slane %v959_v45, 6  ;;  %v964_v11 = vrot.slane %v962_v50, 7  ;;  %v1222_v26 = vrot.slane %v959_v45, 3 }
  0xe8   : > { %1238 = vrot.lane.b32.xlu1 %v1176_v40, %s15532_s18  ;;  %1250 = vrot.lane.b32.xlu0 %v1194_v41, %s15532_s18  ;;  %v1200_v40 = vor.u32 %v1199_v31, %v1198_v30  ;;  %v1206_v41 = vor.u32 %v1205_v33, %v1204_v32  ;;  %v762_v30 = vpop.permute.xlu1 %761  ;;  %v1083_v31 = vrot.slane %v15876_v23, 5  ;;  %v1219_v33 = vrot.slane %v951_v25, 3 }
  0xe9   : > { %v1096_v25 = vrot.slane %v15902_v6, 5 }
  0xea   : > { %v1221_v35 = vor.u32 %v1220_v34, %v1219_v33 }
  0xec   : > { %1002 = vrot.lane.b32.xlu1 %v869_v58, %s15530_s15  ;;  %1016 = vrot.lane.b32.xlu0 %v925_v1, %s15530_s15  ;;  %v933_v58 = vor.u32 %v932_v43, %v929_v42  ;;  %v844_v1 = vrot.slane %v842_v39, 7  ;;  %v15921_v42 = vpop.permute.xlu1 %757 }
  0xee   : > { %v845_v2 = vor.u32 %v844_v1, %v841_v52  ;;  %v15927_v52 = vsel %vm765_vm0, %v760_v16, %v762_v30 }
  0xef   : > { %v986_v45 = vshll.u32 %v15927_v52, 16 }
  0xf0   : > { %1246 = vrot.lane.b32.xlu1 %v1188_v20, %s15532_s18  ;;  %1014 = vrot.lane.b32.xlu0 %v917_v22, %s15530_s15  ;;  %v965_v20 = vor.u32 %v964_v11, %v961_v7  ;;  %v945_v22 = vrot.slane %v943_v17, 6  ;;  %v983_v7 = vshrl.u32 %v15927_v52, 16 }
  0xf4   : > { %1010 = vrot.lane.b32.xlu1 %v901_v27, %s15530_s15  ;;  %1260 = vrot.lane.b32.xlu0 %v1209_v29, %s15532_s18  ;;  %v948_v27 = vrot.slane %v946_v18, 7  ;;  %v15913_v29 = vpop.permute.xlu0 %763 }
  0xf5   : > { %v15947_v11 = vsel %vm765_vm0, %v762_v30, %v15913_v29 }
  0xf6   : > { %v949_v32 = vor.u32 %v948_v27, %v945_v22  ;;  %22688 = vst [vmem:[#allocation10_spill] sm:$0xff] %v15947_v11  ;;  %v15960_v22 = vsel %vm765_vm0, %v15921_v42, %v760_v16  ;;  %v1340_v27 = vrot.slane %v15890_v37, 2  ;;  %v1617_v30 = vshrl.u32 %v15947_v11, 16 }
  0xf7   : > { %22690 = vst [vmem:[#allocation12_spill] sm:$0xff] %v15960_v22  ;;  %v1338_v16 = vrot.slane %v15902_v6, 2 }
  0xf8   : > { %1254 = vrot.lane.b32.xlu1 %v1200_v40, %s15532_s18  ;;  %1258 = vrot.lane.b32.xlu0 %v1206_v41, %s15532_s18  ;;  %v15919_v36 = vpop.permute.xlu0 %990  ;;  %v1177_v40 = vrot.slane %v839_v38, 3  ;;  %v1178_v41 = vrot.slane %v842_v39, 4  ;;  %v1216_v39 = vrot.slane %v943_v17, 3 }
  0xfa   : > { %v1179_v43 = vor.u32 %v1178_v41, %v1177_v40  ;;  %v975_v40 = vshrl.u32 %v15960_v22, 16 }
  0xfc   : > { %1018 = vrot.lane.b32.xlu1 %v933_v58, %s15530_s15  ;;  %1024 = vrot.lane.b32.xlu0 %v957_v44, %s15530_s15  ;;  %v1223_v44 = vrot.slane %v962_v50, 4  ;;  %v15929_v58 = vpop.permute.xlu1 %1102  ;;  %v15933_v38 = vpop.permute.xlu0 %1234  ;;  %v15941_v50 = vsel %vm765_vm0, %v15750_v54, %v15758_v57 }
  0xfd   : > { %22687 = vst [vmem:[#allocation9_spill] sm:$0xff] %v15933_v38  ;;  %v871_v54 = vshrl.u32 %v15941_v50, 16  ;;  %v874_v57 = vshll.u32 %v15941_v50, 16 }
  0xfe   : > { %v1224_v1 = vor.u32 %v1223_v44, %v1222_v26  ;;  %v978_v44 = vshll.u32 %v15960_v22, 16 }
  0xff   : > { %v873_v33 = vrot.slane %v871_v54, 6  ;;  %v876_v34 = vrot.slane %v874_v57, 7 }
 0x100   : > { %1262 = vrot.lane.b32.xlu1 %v1212_v15, %s15532_s18  ;;  %996 = vrot.lane.b32.xlu0 %v845_v2, %s15530_s15  ;;  %v1325_v15 = vrot.slane %v15876_v23, 2  ;;  %v1218_v2 = vor.u32 %v1217_v59, %v1216_v39  ;;  %v15950_v17 = vpop.permute.xlu1 %1344 }
 0x101   : > { %22689 = vst [vmem:[#allocation11_spill] sm:$0xff] %v15950_v17 }
 0x104   : > { %1136 = vrot.lane.b32.xlu0 %v1097_v12, %s15529_s14  ;;  %1026 = vrot.lane.b32.xlu1 %v965_v20, %s15530_s15  ;;  %v985_v20 = vrot.slane %v983_v7, 6  ;;  %v988_v12 = vrot.slane %v986_v45, 7 }
 0x108   : > { %1108 = vrot.lane.b32.xlu0 %v1083_v31, %s15529_s14  ;;  %1022 = vrot.lane.b32.xlu1 %v949_v32, %s15530_s15  ;;  %v989_v32 = vor.u32 %v988_v12, %v985_v20 }
 0x10c   : > { %1268 = vrot.lane.b32.xlu0 %v1221_v35, %s15532_s18  ;;  %1138 = vrot.lane.b32.xlu1 %v1098_v49, %s15529_s14  ;;  %v1620_v35 = vshll.u32 %v15947_v11, 16 }
 0x10e   : > { %v1622_v26 = vrot.slane %v1620_v35, 7 }
 0x110   : > { %1240 = vrot.lane.b32.xlu0 %v1179_v43, %s15532_s18  ;;  %1134 = vrot.lane.b32.xlu1 %v1096_v25, %s15529_s14  ;;  %v877_v43 = vor.u32 %v876_v34, %v873_v33  ;;  %v1619_v25 = vrot.slane %v1617_v30, 6  ;;  %v1231_v33 = vrot.slane %v983_v7, 3  ;;  %v1232_v34 = vrot.slane %v986_v45, 4 }
 0x111   : > { %v16002_v7 = vsel %vm765_vm0, %v15763_v61, %v15833_v53  ;;  %v1343_v53 = vrot.slane %v15927_v52, 2 }
 0x112   : > { %v15967_v49 = vpop.permute.xlu1 %1104  ;;  %22691 = vst [vmem:[#allocation13_spill] sm:$0xff] %v16002_v7  ;;  %v1333_v4 = vrot.slane %v16002_v7, 2 }
 0x114   : > { %1378 = vrot.lane.b32.xlu0 %v1339_v62, %s15531_s17  ;;  %1270 = vrot.lane.b32.xlu1 %v1224_v1, %s15532_s18  ;;  %v1101_v62 = vrot.slane %v15927_v52, 5  ;;  %v1623_v1 = vor.u32 %v1622_v26, %v1619_v25  ;;  %v1233_v25 = vor.u32 %v1232_v34, %v1231_v33  ;;  %v1628_v26 = vrot.slane %v15947_v11, 5 }
 0x115   : > { %v1633_v33 = vrot.slane %v1620_v35, 4 }
 0x116   : > { %v15952_v18 = vpop.permute.xlu0 %1106  ;;  %v15978_v39 = vpop.permute.xlu1 %1346 }
 0x118   : > { %1350 = vrot.lane.b32.xlu0 %v1325_v15, %s15531_s17  ;;  %1266 = vrot.lane.b32.xlu1 %v1218_v2, %s15532_s18  ;;  %v977_v15 = vrot.slane %v975_v40, 6  ;;  %v980_v2 = vrot.slane %v978_v44, 7 }
 0x11a   : > { %v15964_v31 = vpop.permute.xlu0 %1348 }
 0x11c   : > { %1380 = vrot.lane.b32.xlu1 %v1340_v27, %s15531_s17  ;;  %1032 = vrot.lane.b32.xlu0 %v989_v32, %s15530_s15  ;;  %v1087_v27 = vrot.slane %v15941_v50, 5  ;;  %v981_v32 = vor.u32 %v980_v2, %v977_v15 }
 0x11e   : > { %v15973_v41 = vpop.permute.xlu0 %1114 }
 0x120   : > { %1376 = vrot.lane.b32.xlu1 %v1338_v16, %s15531_s17  ;;  %1004 = vrot.lane.b32.xlu0 %v877_v43, %s15530_s15 }
 0x122   : > { %v15980_v59 = vpop.permute.xlu0 %1356 }
 0x124   : > { %1144 = vrot.lane.b32.xlu0 %v1101_v62, %s15529_s14  ;;  %1624 = vrot.lane.b32.xlu1 %v1623_v1, %s15530_s15  ;;  %v1189_v62 = vrot.slane %v871_v54, 3  ;;  %v1190_v1 = vrot.slane %v874_v57, 4  ;;  %v903_v54 = vshrl.u32 %v16002_v7, 16  ;;  %v906_v57 = vshll.u32 %v16002_v7, 16 }
 0x126   : > { %v15985_v20 = vpop.permute.xlu1 %1112  ;;  %v15987_v12 = vpop.permute.xlu0 %1122  ;;  %v1191_v2 = vor.u32 %v1190_v1, %v1189_v62  ;;  %v1229_v62 = vrot.slane %v978_v44, 4  ;;  %v905_v14 = vrot.slane %v903_v54, 6  ;;  %v1202_v0 = vrot.slane %v906_v57, 4 }
 0x128   : > { %1116 = vrot.lane.b32.xlu0 %v1087_v27, %s15529_s14  ;;  %1030 = vrot.lane.b32.xlu1 %v981_v32, %s15530_s15  ;;  %v1100_v27 = vrot.slane %v15960_v22, 5  ;;  %v1632_v32 = vrot.slane %v1617_v30, 3  ;;  %v16023_v30 = vsel %vm765_vm0, %v15784_v10, %v15898_v55 }
 0x129   : > { %22692 = vst [vmem:[#allocation14_spill] sm:$0xff] %v16023_v30  ;;  %v938_v44 = vshll.u32 %v16023_v30, 16  ;;  %v1337_v13 = vrot.slane %v16023_v30, 2 }
 0x12a   : > { %v15992_v16 = vpop.permute.xlu1 %1110  ;;  %v15994_v43 = vpop.permute.xlu0 %1364 }
 0x12b   : > { %v940_v3 = vrot.slane %v938_v44, 7 }
 0x12c   : > { %1276 = vrot.lane.b32.xlu0 %v1233_v25, %s15532_s18  ;;  %1629 = vrot.lane.b32.xlu1 %v1628_v26, %s15529_s14  ;;  %v1634_v25 = vor.u32 %v1633_v33, %v1632_v32  ;;  %v1228_v26 = vrot.slane %v975_v40, 3  ;;  %v908_v32 = vrot.slane %v906_v57, 7  ;;  %v935_v40 = vshrl.u32 %v16023_v30, 16 }
 0x12e   : > { %v16004_v45 = vpop.permute.xlu1 %1354  ;;  %v16006_v15 = vpop.permute.xlu0 %1130  ;;  %v909_v55 = vor.u32 %v908_v32, %v905_v14  ;;  %v1342_v14 = vrot.slane %v15960_v22, 2  ;;  %v937_v32 = vrot.slane %v935_v40, 6 }
 0x130   : > { %1248 = vrot.lane.b32.xlu0 %v1191_v2, %s15532_s18  ;;  %1142 = vrot.lane.b32.xlu1 %v1100_v27, %s15529_s14  ;;  %v1329_v2 = vrot.slane %v15941_v50, 2  ;;  %v1230_v27 = vor.u32 %v1229_v62, %v1228_v26  ;;  %v16044_v26 = vsel %vm765_vm0, %v15884_v48, %v15921_v42  ;;  %v941_v42 = vor.u32 %v940_v3, %v937_v32 }
 0x131   : > { %22693 = vst [vmem:[#allocation15_spill] sm:$0xff] %v16044_v26  ;;  %v970_v57 = vshll.u32 %v16044_v26, 16 }
 0x132   : > { %v16013_v34 = vpop.permute.xlu1 %1352  ;;  %v16015_v61 = vpop.permute.xlu0 %1372 }
 0x133   : > { %v972_v32 = vrot.slane %v970_v57, 7 }
 0x134   : > { %1386 = vrot.lane.b32.xlu0 %v1343_v53, %s15531_s17  ;;  %1635 = vrot.lane.b32.xlu1 %v1634_v25, %s15532_s18  ;;  %v1639_v53 = vrot.slane %v15947_v11, 2  ;;  %v1201_v25 = vrot.slane %v903_v54, 3  ;;  %v967_v54 = vshrl.u32 %v16044_v26, 16  ;;  %v1095_v11 = vrot.slane %v16023_v30, 5 }
 0x136   : > { %v16025_v35 = vpop.permute.xlu1 %1120  ;;  %v16027_v1 = vpop.permute.xlu0 %992  ;;  %v969_v3 = vrot.slane %v967_v54, 6 }
 0x138   : > { %1358 = vrot.lane.b32.xlu0 %v1329_v2, %s15531_s17  ;;  %1274 = vrot.lane.b32.xlu1 %v1230_v27, %s15532_s18  ;;  %v1203_v27 = vor.u32 %v1202_v0, %v1201_v25  ;;  %v1213_v0 = vrot.slane %v935_v40, 3  ;;  %v1214_v25 = vrot.slane %v938_v44, 4 }
 0x13a   : > { %v16034_v33 = vpop.permute.xlu1 %1118  ;;  %v16036_v10 = vpop.permute.xlu0 %1236  ;;  %v1215_v8 = vor.u32 %v1214_v25, %v1213_v0  ;;  %v1225_v0 = vrot.slane %v967_v54, 3  ;;  %v1226_v25 = vrot.slane %v970_v57, 4  ;;  %v1099_v54 = vrot.slane %v16044_v26, 5 }
 0x13c   : > { %1012 = vrot.lane.b32.xlu0 %v909_v55, %s15530_s15  ;;  %1640 = vrot.lane.b32.xlu1 %v1639_v53, %s15531_s17  ;;  %v1091_v53 = vrot.slane %v16002_v7, 5  ;;  %v1227_v37 = vor.u32 %v1226_v25, %v1225_v0  ;;  %v1341_v25 = vrot.slane %v16044_v26, 2 }
 0x13e   : > { %v16046_v62 = vpop.permute.xlu1 %1362  ;;  %v16048_v2 = vpop.permute.xlu0 %1000 }
 0x140   : > { %1256 = vrot.lane.b32.xlu0 %v1203_v27, %s15532_s18  ;;  %1384 = vrot.lane.b32.xlu1 %v1342_v14, %s15531_s17  ;;  %v16064_v27 = vsel %vm765_vm0, %v15913_v29, 0 }
 0x141   : > { %22694 = vst [vmem:[#allocation16_spill] sm:$0xff] %v16064_v27  ;;  %v2665_v40 = vshrl.u32 %v16064_v27, 16  ;;  %v2668_v44 = vshll.u32 %v16064_v27, 16 }
 0x142   : > { %v16055_v55 = vpop.permute.xlu1 %1360  ;;  %v16057_v48 = vpop.permute.xlu0 %998 }
 0x143   : > { %v2667_v7 = vrot.slane %v2665_v40, 6  ;;  %v2670_v63 = vrot.slane %v2668_v44, 7  ;;  %v2682_v0 = vrot.slane %v2668_v44, 4 }
 0x144   : > { %1020 = vrot.lane.b32.xlu0 %v941_v42, %s15530_s15  ;;  %1124 = vrot.lane.b32.xlu1 %v1091_v53, %s15529_s14  ;;  %v973_v53 = vor.u32 %v972_v32, %v969_v3 }
 0x145   : > { %v2671_v32 = vor.u32 %v2670_v63, %v2667_v7  ;;  %v1279_v63 = vsel %vm1278_vm4, %v15933_v38, %v16036_v10 }
 0x146   : > { %v16066_v14 = vpop.permute.xlu1 %1128  ;;  %v16068_v21 = vpop.permute.xlu0 %1244 }
 0x148   : > { %1264 = vrot.lane.b32.xlu0 %v1215_v8, %s15532_s18  ;;  %1366 = vrot.lane.b32.xlu1 %v1333_v4, %s15531_s17 }
 0x14a   : > { %v16075_v42 = vpop.permute.xlu1 %1126  ;;  %v16077_v29 = vpop.permute.xlu0 %1242 }
 0x14c   : > { %1028 = vrot.lane.b32.xlu0 %v973_v53, %s15530_s15  ;;  %1132 = vrot.lane.b32.xlu1 %v1095_v11, %s15529_s14  ;;  %v1035_v11 = vsel %vm1034_vm1, %v15919_v36, %v16027_v1  ;;  %v2681_v53 = vrot.slane %v2665_v40, 3 }
 0x14e   : > { %v16082_v8 = vpop.permute.xlu1 %1370  ;;  %v16084_v4 = vpop.permute.xlu0 %1008  ;;  %v2683_v44 = vor.u32 %v2682_v0, %v2681_v53 }
 0x150   : > { %1272 = vrot.lane.b32.xlu0 %v1227_v37, %s15532_s18  ;;  %1374 = vrot.lane.b32.xlu1 %v1337_v13, %s15531_s17  ;;  %v1414_v13 = vsel %vm16097_vm5, 0, %v1035_v11 }
 0x152   : > { %v16093_v57 = vpop.permute.xlu1 %1368  ;;  %v16095_v3 = vpop.permute.xlu0 %1006 }
 0x154   : > { %2672 = vrot.lane.b32.xlu0 %v2671_v32, %s15530_s15  ;;  %1140 = vrot.lane.b32.xlu1 %v1099_v54, %s15529_s14  ;;  %v1147_v54 = vsel %vm1146_vm6, %v15929_v58, %v15967_v49  ;;  %v22719_v32 = vld [vmem:[#allocation3_spill] sm:$0xff] }
 0x155   : > { %v1442_v30 = vsel %vm1435_vm9, %v1414_v13, %v1147_v54  ;;  %v1039_v13 = vsel %vm1034_vm1, %v16057_v48, %v16048_v2  ;;  %v15533_v54 = vmov 65535  }
 0x156   : > { %v16108_v7 = vpop.permute.xlu1 %994  ;;  %v16110_v40 = vpop.permute.xlu0 %1252  ;;  %v1528_v0 = vsel %vm16119_vm11, %v1442_v30, %v1279_v63  ;;  %v1663_v26 = vsel %vm1661_vm10, 4294967295, %v15533_v54  ;;  %v1389_v30 = vsel %vm1388_vm12, %v15950_v17, %v15978_v39  ;;  %v1418_v17 = vsel %vm16097_vm5, %v15780_v9, %v1039_v13 }
 0x157   : > { %v1036_v11 = vsel %vm1034_vm1, %v16027_v1, %v16108_v7  ;;  %v1148_v1 = vsel %vm1146_vm6, %v15967_v49, %v15952_v18  ;;  %v1555_v54 = vsel %vm1549_vm14, %v1528_v0, %v1389_v30  ;;  %v16160_v22 = vsel %vm1662_vm13, %v1663_v26, 0 }
 0x158   : > { %v1415_v53 = vsel %vm16097_vm5, %v15735_v46, %v1036_v11  ;;  %2684 = vrot.lane.b32.xlu0 %v2683_v44, %s15532_s18  ;;  %1382 = vrot.lane.b32.xlu1 %v1341_v25, %s15531_s17  ;;  %v2677_v44 = vrot.slane %v16064_v27, 5  ;;  %v1390_v25 = vsel %vm1388_vm12, %v15978_v39, %v15964_v31  ;;  %v1283_v39 = vsel %vm1278_vm4, %v16077_v29, %v16068_v21 }
 0x159   : > { %v1446_v63 = vsel %vm1435_vm9, %v1415_v53, %v1148_v1  ;;  %v1151_v9 = vsel %vm1146_vm6, %v15992_v16, %v15985_v20  ;;  %v16179_v13 = vand.u32 %v16160_v22, %v1555_v54  ;;  %v1393_v54 = vsel %vm1388_vm12, %v16013_v34, %v16004_v45 }
 0x15a   : > { %v16137_v38 = vpop.permute.xlu1 %1238  ;;  %v16139_v46 = vpop.permute.xlu0 %1250  ;;  %v1458_v30 = vsel %vm1435_vm9, %v1418_v17, %v1151_v9  ;;  %v1152_v17 = vsel %vm1146_vm6, %v15985_v20, %v15973_v41  ;;  %v1394_v20 = vsel %vm1388_vm12, %v16004_v45, %v15980_v59 }
 0x15b   : > { %v1280_v49 = vsel %vm1278_vm4, %v16036_v10, %v16137_v38  ;;  %v1287_v45 = vsel %vm1278_vm4, %v16139_v46, %v16110_v40 }
 0x15c   : > { %v1529_v11 = vsel %vm16119_vm11, %v1446_v63, %v1280_v49  ;;  %2678 = vrot.lane.b32.xlu1 %v2677_v44, %s15529_s14  ;;  %v2688_v44 = vrot.slane %v16064_v27, 2  ;;  %v16190_v63 = vld [vmem:[%s22165_s1 + $0x8] sm:$0xff]  }
 0x15d   : > { %v1558_v10 = vsel %vm1549_vm14, %v1529_v11, %v1390_v25 }
 0x15e   : > { %v16166_v53 = vpop.permute.xlu1 %1002  ;;  %v1017_v1 = vpop.permute.xlu0 %1016  ;;  %v16170_v0 = vand.u32 %v16160_v22, %v1558_v10 }
 0x15f   : > { %v1040_v26 = vsel %vm1034_vm1, %v16048_v2, %v16166_v53  ;;  %v1532_v2 = vsel %vm16119_vm11, %v1458_v30, %v1283_v39  ;;  %v22700_v30 = vmov 0  }
 0x160   : > { %22699 = vst [vmem:[#allocation17_spill] sm:$0xff] %v16170_v0  ;;  %v1419_v49 = vsel %vm16097_vm5, %v15774_v5, %v1040_v26  ;;  %2689 = vrot.lane.b32.xlu1 %v2688_v44, %s15531_s17  ;;  %1709 = vmatprep.subr.bf16.mxu0 %v16170_v0  ;;  %v1043_v5 = vsel %vm1034_vm1, %v16095_v3, %v16084_v4 }
 0x161   : > { %1710 = vmatpush1.bf16.msra.mxu0 %v16179_v13  ;;  %v1462_v39 = vsel %vm1435_vm9, %v1419_v49, %v1152_v17  ;;  %v1567_v44 = vsel %vm1549_vm14, %v1532_v2, %v1393_v54  ;;  %v1422_v26 = vsel %vm16097_vm5, %v15809_v28, %v1043_v5  ;;  %v1155_v54 = vsel %vm1146_vm6, %v16034_v33, %v16025_v35 }
 0x162   : > { %v16201_v25 = vpop.permute.xlu1 %1246  ;;  %v16203_v11 = vpop.permute.xlu0 %1014  ;;  %v16237_v28 = vand.u32 %v16160_v22, %v1567_v44  ;;  %v1156_v44 = vsel %vm1146_vm6, %v16025_v35, %v15987_v12  ;;  %v1398_v35 = vsel %vm1388_vm12, %v16046_v62, %v15994_v43 }
 0x163   : > { %v1284_v10 = vsel %vm1278_vm4, %v16068_v21, %v16201_v25 }
 0x164   : > { %v1533_v9 = vsel %vm16119_vm11, %v1462_v39, %v1284_v10  ;;  %14524 = vmatmul.mubr.msk.bf16.vlgmr.msra.gmra.mrb[0].mxu0 %vm1657_vm15, %v16190_v63  ;;  %v1474_v10 = vsel %vm1435_vm9, %v1422_v26, %v1155_v54 }
 0x165   : > { %v1570_v21 = vsel %vm1549_vm14, %v1533_v9, %v1394_v20  ;;  %1827 = vmatprep.mubr.bf16.mxu0 %v22700_v30  ;;  %v1536_v20 = vsel %vm16119_vm11, %v1474_v10, %v1287_v45 }
 0x166   : > { %v16229_v49 = vand.u32 %v16160_v22, %v1570_v21  ;;  %v16231_v2 = vpop.permute.xlu1 %1010  ;;  %v1261_v17 = vpop.permute.xlu0 %1260 }
 0x167   : > { %v1044_v5 = vsel %vm1034_vm1, %v16084_v4, %v16231_v2  ;;  %v1047_v4 = vsel %vm1034_vm1, %v16203_v11, %v1017_v1 }
 0x168   : > { %22701 = vst [vmem:[#allocation18_spill] sm:$0xff] %v16229_v49  ;;  %v1423_v39 = vsel %vm16097_vm5, %v15803_v24, %v1044_v5  ;;  %1795 = vmatprep.subr.bf16.mxu0 %v16229_v49  ;;  %v1397_v24 = vsel %vm1388_vm12, %v16055_v55, %v16046_v62  ;;  %v1426_v10 = vsel %vm16097_vm5, %v15839_v60, %v1047_v4 }
 0x169   : > { %1796 = vmatpush1.bf16.msra.mxu0 %v16237_v28  ;;  %v1478_v45 = vsel %vm1435_vm9, %v1423_v39, %v1156_v44  ;;  %v1579_v54 = vsel %vm1549_vm14, %v1536_v20, %v1397_v24  ;;  %v1159_v24 = vsel %vm1146_vm6, %v16075_v42, %v16066_v14 }
 0x16a   : > { %v16255_v9 = vpop.permute.xlu1 %1254  ;;  %v16257_v26 = vpop.permute.xlu0 %1258  ;;  %v1490_v4 = vsel %vm1435_vm9, %v1426_v10, %v1159_v24  ;;  %v1401_v10 = vsel %vm1388_vm12, %v16093_v57, %v16082_v8 }
 0x16b   : > { %v1288_v21 = vsel %vm1278_vm4, %v16110_v40, %v16255_v9  ;;  %v1291_v62 = vsel %vm1278_vm4, %v16257_v26, %v1261_v17 }
 0x16c   : > { %v1537_v5 = vsel %vm16119_vm11, %v1478_v45, %v1288_v21  ;;  %14526 = vmatmul.mubr.msk.bf16.vlgmr.msra.gmra.mrb[4].mxu0 %vm1657_vm15, %v16190_v63  ;;  %v16290_v21 = vand.u32 %v16160_v22, %v1579_v54  ;;  %v1160_v54 = vsel %vm1146_vm6, %v16066_v14, %v16006_v15 }
 0x16d   : > { %v1582_v40 = vsel %vm1549_vm14, %v1537_v5, %v1398_v35  ;;  %1913 = vmatprep.mubr.bf16.mxu0 %v22700_v30  ;;  %v1540_v35 = vsel %vm16119_vm11, %v1490_v4, %v1291_v62  ;;  %v1402_v62 = vsel %vm1388_vm12, %v16082_v8, %v16015_v61 }
 0x16e   : > { %v16280_v39 = vand.u32 %v16160_v22, %v1582_v40  ;;  %v16284_v20 = vpop.permute.xlu1 %1018  ;;  %v1025_v44 = vpop.permute.xlu0 %1024  ;;  %v1591_v24 = vsel %vm1549_vm14, %v1540_v35, %v1401_v10 }
 0x16f   : > { %v1048_v60 = vsel %vm1034_vm1, %v1017_v1, %v16284_v20  ;;  %v16329_v8 = vand.u32 %v16160_v22, %v1591_v24 }
 0x170   : > { %22702 = vst [vmem:[#allocation19_spill] sm:$0xff] %v16280_v39  ;;  %v1427_v45 = vsel %vm16097_vm5, %v15827_v47, %v1048_v60  ;;  %1881 = vmatprep.subr.bf16.mxu0 %v16280_v39 }
 0x171   : > { %1882 = vmatpush1.bf16.msra.mxu0 %v16290_v21  ;;  %v1494_v40 = vsel %vm1435_vm9, %v1427_v45, %v1160_v54 }
 0x172   : > { %v16305_v5 = vpop.permute.xlu1 %1262  ;;  %v997_v1 = vpop.permute.xlu0 %996 }
 0x173   : > { %v1292_v47 = vsel %vm1278_vm4, %v1261_v17, %v16305_v5  ;;  %v1037_v24 = vsel %vm1034_vm1, %v16108_v7, %v997_v1 }
 0x174   : > { %v1541_v14 = vsel %vm16119_vm11, %v1494_v40, %v1292_v47  ;;  %14528 = vmatmul.mubr.msk.bf16.vlgmr.msra.gmra.mrb[8].mxu0 %vm1657_vm15, %v16190_v63  ;;  %v1416_v7 = vsel %vm16097_vm5, %v15746_v51, %v1037_v24 }
 0x175   : > { %v1594_v60 = vsel %vm1549_vm14, %v1541_v14, %v1402_v62  ;;  %1999 = vmatprep.mubr.bf16.mxu0 %v22700_v30  ;;  %v1038_v14 = vsel %vm1034_vm1, %v997_v1, %v16057_v48 }
 0x176   : > { %v16324_v17 = vand.u32 %v16160_v22, %v1594_v60  ;;  %v16326_v4 = vpop.permute.xlu1 %1026  ;;  %v1137_v45 = vpop.permute.xlu0 %1136  ;;  %v1417_v48 = vsel %vm16097_vm5, %v15876_v23, %v1038_v14 }
 0x178   : > { %22703 = vst [vmem:[#allocation20_spill] sm:$0xff] %v16324_v17  ;;  %1967 = vmatprep.subr.bf16.mxu0 %v16324_v17 }
 0x179   : > { %1968 = vmatpush1.bf16.msra.mxu0 %v16329_v8 }
 0x17a   : > { %v16333_v35 = vpop.permute.xlu1 %1022  ;;  %v1109_v54 = vpop.permute.xlu0 %1108 }
 0x17b   : > { %v1149_v17 = vsel %vm1146_vm6, %v15952_v18, %v1109_v54  ;;  %v1150_v39 = vsel %vm1146_vm6, %v1109_v54, %v15992_v16  ;;  %v1052_v18 = vsel %vm1034_vm1, %v1025_v44, %v16326_v4 }
 0x17c   : > { %14530 = vmatmul.mubr.msk.bf16.vlgmr.msra.gmra.mrb[12].mxu0 %vm1657_vm15, %v16190_v63  ;;  %v1450_v1 = vsel %vm1435_vm9, %v1416_v7, %v1149_v17  ;;  %v1454_v16 = vsel %vm1435_vm9, %v1417_v48, %v1150_v39 }
 0x17d   : > { %2085 = vmatprep.mubr.bf16.mxu0 %v22700_v30 }
 0x17e   : > { %v16338_v10 = vpop.permute.xlu1 %1138  ;;  %v1269_v47 = vpop.permute.xlu0 %1268 }
 0x182   : > { %v16340_v40 = vpop.permute.xlu1 %1134  ;;  %v1241_v62 = vpop.permute.xlu0 %1240 }
 0x183   : > { %v1281_v49 = vsel %vm1278_vm4, %v16137_v38, %v1241_v62  ;;  %v1282_v0 = vsel %vm1278_vm4, %v1241_v62, %v16077_v29  ;;  %v1164_v38 = vsel %vm1146_vm6, %v1137_v45, %v16338_v10 }
 0x184   : > { %v1530_v51 = vsel %vm16119_vm11, %v1450_v1, %v1281_v49  ;;  %v1531_v62 = vsel %vm16119_vm11, %v1454_v16, %v1282_v0  ;;  %v1431_v49 = vsel %vm16097_vm5, %v15871_v19, %v1052_v18  ;;  %v1163_v16 = vsel %vm1146_vm6, %v16340_v40, %v1137_v45 }
 0x186   : > { %v16346_v60 = vpop.permute.xlu1 %1270  ;;  %v1379_v27 = vpop.permute.xlu0 %1378 }
 0x187   : > { %v1296_v39 = vsel %vm1278_vm4, %v1269_v47, %v16346_v60 }
 0x18a   : > { %v16368_v54 = vpop.permute.xlu1 %1266  ;;  %v1351_v29 = vpop.permute.xlu0 %1350 }
 0x18b   : > { %v1391_v23 = vsel %vm1388_vm12, %v15964_v31, %v1351_v29  ;;  %v1392_v17 = vsel %vm1388_vm12, %v1351_v29, %v16013_v34  ;;  %v1051_v31 = vsel %vm1034_vm1, %v16333_v35, %v1025_v44  ;;  %v1510_v34 = vsel %vm1435_vm9, %v1431_v49, %v1164_v38 }
 0x18c   : > { %v1561_v24 = vsel %vm1549_vm14, %v1530_v51, %v1391_v23  ;;  %v1564_v14 = vsel %vm1549_vm14, %v1531_v62, %v1392_v17  ;;  %v1545_v19 = vsel %vm16119_vm11, %v1510_v34, %v1296_v39  ;;  %v1295_v29 = vsel %vm1278_vm4, %v16368_v54, %v1269_v47 }
 0x18d   : > { %v16386_v7 = vand.u32 %v16160_v22, %v1561_v24  ;;  %v16389_v0 = vand.u32 %v16160_v22, %v1564_v14  ;;  %v1430_v38 = vsel %vm16097_vm5, %v15902_v6, %v1051_v31 }
 0x18e   : > { %v16394_v48 = vpop.permute.xlu1 %1380  ;;  %v1033_v1 = vpop.permute.xlu0 %1032  ;;  %v1506_v51 = vsel %vm1435_vm9, %v1430_v38, %v1163_v16 }
 0x18f   : > { %v1406_v18 = vsel %vm1388_vm12, %v1379_v27, %v16394_v48  ;;  %1752 = vmatprep.subr.bf16.mxu1 %v16389_v0  ;;  %v1544_v17 = vsel %vm16119_vm11, %v1506_v51, %v1295_v29 }
 0x190   : > { %v1606_v44 = vsel %vm1549_vm14, %v1545_v19, %v1406_v18  ;;  %1753 = vmatpush1.bf16.msra.mxu1 %v16386_v7 }
 0x191   : > { %v16411_v45 = vand.u32 %v16160_v22, %v1606_v44 }
 0x192   : > { %v16414_v62 = vpop.permute.xlu1 %1376  ;;  %v1005_v23 = vpop.permute.xlu0 %1004 }
 0x193   : > { %v1405_v47 = vsel %vm1388_vm12, %v16414_v62, %v1379_v27  ;;  %2053 = vmatprep.subr.bf16.mxu0 %v16411_v45  ;;  %14525 = vmatmul.mubr.msk.bf16.vlgmr.msra.gmra.mrb[0].mxu1 %vm1657_vm15, %v16190_v63  ;;  %v1041_v18 = vsel %vm1034_vm1, %v16166_v53, %v1005_v23  ;;  %v1042_v29 = vsel %vm1034_vm1, %v1005_v23, %v16095_v3 }
 0x194   : > { %v1603_v6 = vsel %vm1549_vm14, %v1544_v17, %v1405_v47  ;;  %1870 = vmatprep.mubr.bf16.mxu1 %v22700_v30  ;;  %v1420_v53 = vsel %vm16097_vm5, %v15756_v56, %v1041_v18  ;;  %v1421_v3 = vsel %vm16097_vm5, %v15941_v50, %v1042_v29 }
 0x195   : > { %v16426_v39 = vand.u32 %v16160_v22, %v1603_v6 }
 0x196   : > { %v16428_v24 = vpop.permute.xlu1 %1624  ;;  %v1145_v14 = vpop.permute.xlu0 %1144 }
 0x197   : > { %2054 = vmatpush1.bf16.msra.mxu0 %v16426_v39 }
 0x19a   : > { %v16431_v49 = vpop.permute.xlu1 %1030  ;;  %v1117_v27 = vpop.permute.xlu0 %1116  ;;  %14532 = vmatmul.mubr.msk.bf16.vlgmr.msra.gmra.mrb[16].mxu0 %vm1657_vm15, %v16190_v63 }
 0x19b   : > { %2171 = vmatprep.mubr.bf16.mxu0 %v22700_v30  ;;  %v1153_v51 = vsel %vm1146_vm6, %v15973_v41, %v1117_v27  ;;  %v1154_v17 = vsel %vm1146_vm6, %v1117_v27, %v16034_v33  ;;  %v1626_v41 = vsel %vm1034_vm1, %v1033_v1, %v16428_v24 }
 0x19c   : > { %v1466_v23 = vsel %vm1435_vm9, %v1420_v53, %v1153_v51  ;;  %v1470_v33 = vsel %vm1435_vm9, %v1421_v3, %v1154_v17  ;;  %v1055_v53 = vsel %vm1034_vm1, %v16431_v49, %v1033_v1 }
 0x19e   : > { %v16436_v31 = vpop.permute.xlu1 %1629  ;;  %v1277_v34 = vpop.permute.xlu0 %1276 }
 0x1a2   : > { %v16438_v16 = vpop.permute.xlu1 %1142  ;;  %v1249_v19 = vpop.permute.xlu0 %1248 }
 0x1a3   : > { %v1285_v47 = vsel %vm1278_vm4, %v16201_v25, %v1249_v19  ;;  %v1286_v6 = vsel %vm1278_vm4, %v1249_v19, %v16139_v46  ;;  %v1631_v25 = vsel %vm1146_vm6, %v1145_v14, %v16436_v31 }
 0x1a4   : > { %v1534_v56 = vsel %vm16119_vm11, %v1466_v23, %v1285_v47  ;;  %v1535_v19 = vsel %vm16119_vm11, %v1470_v33, %v1286_v6  ;;  %v1413_v47 = vsel %vm16097_vm5, 0, %v15919_v36  ;;  %v1643_v6 = vsel %vm16097_vm5, %v15927_v52, %v1626_v41 }
 0x1a5   : > { %v1646_v3 = vsel %vm1435_vm9, %v1643_v6, %v1631_v25 }
 0x1a6   : > { %v16444_v44 = vpop.permute.xlu1 %1635  ;;  %v1387_v38 = vpop.permute.xlu0 %1386 }
 0x1a7   : > { %v1637_v29 = vsel %vm1278_vm4, %v1277_v34, %v16444_v44 }
 0x1a8   : > { %v1648_v52 = vsel %vm16119_vm11, %v1646_v3, %v1637_v29 }
 0x1aa   : > { %v16466_v27 = vpop.permute.xlu1 %1274  ;;  %v1359_v46 = vpop.permute.xlu0 %1358 }
 0x1ab   : > { %v1395_v50 = vsel %vm1388_vm12, %v15980_v59, %v1359_v46  ;;  %v1396_v18 = vsel %vm1388_vm12, %v1359_v46, %v16055_v55  ;;  %v1167_v46 = vsel %vm1146_vm6, %v16438_v16, %v1145_v14  ;;  %v1299_v1 = vsel %vm1278_vm4, %v16466_v27, %v1277_v34 }
 0x1ac   : > { %v1573_v51 = vsel %vm1549_vm14, %v1534_v56, %v1395_v50  ;;  %v1576_v17 = vsel %vm1549_vm14, %v1535_v19, %v1396_v18  ;;  %v1438_v56 = vsel %vm1435_vm9, %v1413_v47, %v15929_v58  ;;  %v22704_v19 = vld [vmem:[#allocation12_spill] sm:$0xff] }
 0x1ad   : > { %v16487_v59 = vand.u32 %v16160_v22, %v1573_v51  ;;  %v16490_v55 = vand.u32 %v16160_v22, %v1576_v17  ;;  %v1434_v14 = vsel %vm16097_vm5, %v22704_v19, %v1055_v53  ;;  %v22705_v17 = vld [vmem:[#allocation9_spill] sm:$0xff] }
 0x1ae   : > { %v16495_v23 = vpop.permute.xlu1 %1640  ;;  %v1013_v33 = vpop.permute.xlu0 %1012  ;;  %v1522_v18 = vsel %vm1435_vm9, %v1434_v14, %v1167_v46  ;;  %v1527_v34 = vsel %vm16119_vm11, %v1438_v56, %v22705_v17 }
 0x1af   : > { %v1642_v41 = vsel %vm1388_vm12, %v1387_v38, %v16495_v23  ;;  %1838 = vmatprep.subr.bf16.mxu1 %v16490_v55  ;;  %v1548_v47 = vsel %vm16119_vm11, %v1522_v18, %v1299_v1  ;;  %v1045_v53 = vsel %vm1034_vm1, %v16231_v2, %v1013_v33  ;;  %v1046_v3 = vsel %vm1034_vm1, %v1013_v33, %v16203_v11  ;;  %v22708_v2 = vld [vmem:[#allocation13_spill] sm:$0xff] }
 0x1b0   : > { %v1651_v25 = vsel %vm1549_vm14, %v1648_v52, %v1642_v41  ;;  %1839 = vmatpush1.bf16.msra.mxu1 %v16487_v59  ;;  %v22706_v41 = vld [vmem:[#allocation11_spill] sm:$0xff]  ;;  %v1425_v11 = vsel %vm16097_vm5, %v22708_v2, %v1046_v3 }
 0x1b1   : > { %v16514_v50 = vand.u32 %v16160_v22, %v1651_v25  ;;  %v22707_v25 = vld [vmem:[#allocation6_spill] sm:$0xff] }
 0x1b2   : > { %v16517_v29 = vpop.permute.xlu1 %1384  ;;  %v1257_v51 = vpop.permute.xlu0 %1256  ;;  %v1424_v19 = vsel %vm16097_vm5, %v22707_v25, %v1045_v53  ;;  %v16589_v25 = vld [vmem:[%s22165_s1] sm:$0xff]  }
 0x1b3   : > { %v1409_v6 = vsel %vm1388_vm12, %v16517_v29, %v1387_v38  ;;  %2139 = vmatprep.subr.bf16.mxu0 %v16514_v50  ;;  %14527 = vmatmul.mubr.msk.bf16.vlgmr.msra.gmra.mrb[4].mxu1 %vm1657_vm15, %v16190_v63  ;;  %v1552_v38 = vsel %vm1549_vm14, %v1527_v34, %v22706_v41 }
 0x1b4   : > { %v1615_v46 = vsel %vm1549_vm14, %v1548_v47, %v1409_v6  ;;  %1956 = vmatprep.mubr.bf16.mxu1 %v22700_v30  ;;  %v16555_v47 = vand.u32 %v16160_v22, %v1552_v38  ;;  %v1289_v6 = vsel %vm1278_vm4, %v16255_v9, %v1257_v51 }
 0x1b5   : > { %v16536_v52 = vand.u32 %v16160_v22, %v1615_v46 }
 0x1b6   : > { %v1125_v56 = vpop.permute.xlu1 %1124  ;;  %v1021_v1 = vpop.permute.xlu0 %1020 }
 0x1b7   : > { %v1157_v33 = vsel %vm1146_vm6, %v15987_v12, %v1125_v56  ;;  %v1158_v14 = vsel %vm1146_vm6, %v1125_v56, %v16075_v42  ;;  %2140 = vmatpush1.bf16.msra.mxu0 %v16536_v52  ;;  %v1290_v12 = vsel %vm1278_vm4, %v1257_v51, %v16257_v26  ;;  %v1049_v42 = vsel %vm1034_vm1, %v16284_v20, %v1021_v1 }
 0x1b8   : > { %v1482_v18 = vsel %vm1435_vm9, %v1424_v19, %v1157_v33  ;;  %v1486_v34 = vsel %vm1435_vm9, %v1425_v11, %v1158_v14  ;;  %2192 = vmatprep.subr.bf16.mxu0 %v16179_v13  ;;  %v1050_v20 = vsel %vm1034_vm1, %v1021_v1, %v16333_v35  ;;  %v22709_v35 = vld [vmem:[#allocation7_spill] sm:$0xff]  ;;  %v22710_v19 = vld [vmem:[#allocation14_spill] sm:$0xff] }
 0x1b9   : > { %v1538_v9 = vsel %vm16119_vm11, %v1482_v18, %v1289_v6  ;;  %v1539_v26 = vsel %vm16119_vm11, %v1486_v34, %v1290_v12  ;;  %v1428_v1 = vsel %vm16097_vm5, %v22709_v35, %v1049_v42  ;;  %v1429_v2 = vsel %vm16097_vm5, %v22710_v19, %v1050_v20 }
 0x1ba   : > { %v1367_v53 = vpop.permute.xlu1 %1366  ;;  %14534 = vmatmul.mubr.msk.bf16.vlgmr.msra.gmra.mrb[20].mxu0 %vm1657_vm15, %v16190_v63  ;;  %v1265_v3 = vpop.permute.xlu0 %1264 }
 0x1bb   : > { %v1399_v13 = vsel %vm1388_vm12, %v15994_v43, %v1367_v53  ;;  %v1400_v46 = vsel %vm1388_vm12, %v1367_v53, %v16093_v57  ;;  %2193 = vmatpush1.bf16.msra.mxu0 %v16555_v47  ;;  %2224 = vmatprep.mubr.bf16.mxu0 %v22700_v30  ;;  %v1293_v6 = vsel %vm1278_vm4, %v16305_v5, %v1265_v3 }
 0x1bc   : > { %v1585_v51 = vsel %vm1549_vm14, %v1538_v9, %v1399_v13  ;;  %v1588_v38 = vsel %vm1549_vm14, %v1539_v26, %v1400_v46  ;;  %2278 = vmatprep.subr.bf16.mxu0 %v16237_v28  ;;  %v1294_v12 = vsel %vm1278_vm4, %v1265_v3, %v16368_v54  ;;  %v22711_v46 = vld [vmem:[#allocation8_spill] sm:$0xff]  ;;  %v22712_v26 = vld [vmem:[#allocation15_spill] sm:$0xff] }
 0x1bd   : > { %v16581_v43 = vand.u32 %v16160_v22, %v1585_v51  ;;  %v16584_v57 = vand.u32 %v16160_v22, %v1588_v38 }
 0x1be   : > { %v1133_v56 = vpop.permute.xlu1 %1132  ;;  %v1029_v14 = vpop.permute.xlu0 %1028 }
 0x1bf   : > { %v1161_v11 = vsel %vm1146_vm6, %v16006_v15, %v1133_v56  ;;  %v1162_v33 = vsel %vm1146_vm6, %v1133_v56, %v16340_v40  ;;  %1924 = vmatprep.subr.bf16.mxu1 %v16584_v57  ;;  %v1053_v15 = vsel %vm1034_vm1, %v16326_v4, %v1029_v14  ;;  %v1054_v4 = vsel %vm1034_vm1, %v1029_v14, %v16431_v49 }
 0x1c0   : > { %v1498_v18 = vsel %vm1435_vm9, %v1428_v1, %v1161_v11  ;;  %v1502_v34 = vsel %vm1435_vm9, %v1429_v2, %v1162_v33  ;;  %1925 = vmatpush1.bf16.msra.mxu1 %v16581_v43  ;;  %v1432_v9 = vsel %vm16097_vm5, %v22711_v46, %v1053_v15  ;;  %v1433_v20 = vsel %vm16097_vm5, %v22712_v26, %v1054_v4  ;;  %v22717_v4 = vld [vmem:[#allocation10_spill] sm:$0xff] }
 0x1c1   : > { %v1542_v13 = vsel %vm16119_vm11, %v1498_v18, %v1293_v6  ;;  %v1543_v5 = vsel %vm16119_vm11, %v1502_v34, %v1294_v12  ;;  %v22713_v18 = vld [vmem:[#allocation17_spill] sm:$0xff]  ;;  %v22715_v34 = vld [vmem:[#allocation19_spill] sm:$0xff]  ;;  %v22716_v6 = vld [vmem:[#allocation20_spill] sm:$0xff] }
 0x1c2   : > { %v1375_v42 = vpop.permute.xlu1 %1374  ;;  %14536 = vmatmul.mubr.msk.bf16.vlgmr.msra.gmra.mrb[0].mxu0 %vm1657_vm15, %v16589_v25  ;;  %v1273_v51 = vpop.permute.xlu0 %1272  ;;  %v16725_v12 = vld [vmem:[%s22165_s1 + $0x10] sm:$0xff]  }
 0x1c3   : > { %v1403_v40 = vsel %vm1388_vm12, %v16015_v61, %v1375_v42  ;;  %v1404_v53 = vsel %vm1388_vm12, %v1375_v42, %v16414_v62  ;;  %2279 = vmatpush1.bf16.msra.mxu0 %v16389_v0  ;;  %14529 = vmatmul.mubr.msk.bf16.vlgmr.msra.gmra.mrb[8].mxu1 %vm1657_vm15, %v16190_v63  ;;  %v1297_v19 = vsel %vm1278_vm4, %v16346_v60, %v1273_v51  ;;  %v675_v42 = vld [vmem:[%s22166_s2] sm:$0xff] }
 0x1c4   : > { %v1597_v54 = vsel %vm1549_vm14, %v1542_v13, %v1403_v40  ;;  %v1600_v3 = vsel %vm1549_vm14, %v1543_v5, %v1404_v53  ;;  %2364 = vmatprep.subr.bf16.mxu0 %v16290_v21  ;;  %2310 = vmatprep.mubr.bf16.mxu0 %v22700_v30  ;;  %v1298_v2 = vsel %vm1278_vm4, %v1273_v51, %v16466_v27  ;;  %v676_v53 = vld [vmem:[%s22166_s2 + $0x8] sm:$0xff] }
 0x1c5   : > { %v16630_v61 = vand.u32 %v16160_v22, %v1597_v54  ;;  %v16633_v62 = vand.u32 %v16160_v22, %v1600_v3  ;;  %2042 = vmatprep.mubr.bf16.mxu1 %v22700_v30  ;;  %4297 = vperm.xlu0 %15432, %v675_v42  }
 0x1c6   : > { %v1141_v49 = vpop.permute.xlu1 %1140  ;;  %v16746_v40 = vpop.permute.xlu0 %2672  ;;  %4302 = vperm.xlu1 %15433, %v676_v53  }
 0x1c7   : > { %v1165_v38 = vsel %vm1146_vm6, %v16338_v10, %v1141_v49  ;;  %v1166_v56 = vsel %vm1146_vm6, %v1141_v49, %v16438_v16  ;;  %2010 = vmatprep.subr.bf16.mxu1 %v16633_v62  ;;  %v2674_v13 = vsel %vm1034_vm1, %v16428_v24, %v16746_v40 }
 0x1c8   : > { %v1514_v35 = vsel %vm1435_vm9, %v1432_v9, %v1165_v38  ;;  %v1518_v1 = vsel %vm1435_vm9, %v1433_v20, %v1166_v56  ;;  %2011 = vmatpush1.bf16.msra.mxu1 %v16630_v61  ;;  %v2692_v54 = vsel %vm16097_vm5, %v22717_v4, %v2674_v13  ;;  %v22718_v20 = vld [vmem:[#allocation16_spill] sm:$0xff] }
 0x1c9   : > { %v1546_v33 = vsel %vm16119_vm11, %v1514_v35, %v1297_v19  ;;  %v1547_v14 = vsel %vm16119_vm11, %v1518_v1, %v1298_v2 }
 0x1ca   : > { %v1383_v11 = vpop.permute.xlu1 %1382  ;;  %14538 = vmatmul.mubr.msk.bf16.vlgmr.msra.gmra.mrb[4].mxu0 %vm1657_vm15, %v16589_v25  ;;  %v16768_v3 = vpop.permute.xlu0 %2684 }
 0x1cb   : > { %v1407_v10 = vsel %vm1388_vm12, %v16394_v48, %v1383_v11  ;;  %v1408_v16 = vsel %vm1388_vm12, %v1383_v11, %v16517_v29  ;;  %2365 = vmatpush1.bf16.msra.mxu0 %v16490_v55  ;;  %14531 = vmatmul.mubr.msk.bf16.vlgmr.msra.gmra.mrb[12].mxu1 %vm1657_vm15, %v16190_v63 }
 0x1cc   : > { %v1609_v60 = vsel %vm1549_vm14, %v1546_v33, %v1407_v10  ;;  %v1612_v27 = vsel %vm1549_vm14, %v1547_v14, %v1408_v16  ;;  %2450 = vmatprep.subr.bf16.mxu0 %v16329_v8  ;;  %2396 = vmatprep.mubr.bf16.mxu0 %v22700_v30 }
 0x1cd   : > { %v16672_v48 = vand.u32 %v16160_v22, %v1609_v60  ;;  %v16675_v29 = vand.u32 %v16160_v22, %v1612_v27  ;;  %2128 = vmatprep.mubr.bf16.mxu1 %v22700_v30  ;;  %v313_v60 = vadd.s32 8, %v22719_v32 }
 0x1ce   : > { %v16739_v15 = vpop.permute.xlu1 %2678 }
 0x1cf   : > { %2096 = vmatprep.subr.bf16.mxu1 %v16675_v29  ;;  %v3230_v26 = vsel %vm1146_vm6, %v16739_v15, %v15929_v58  ;;  %v3231_v58 = vsel %vm1278_vm4, %v16768_v3, %v22705_v17 }
 0x1d0   : > { %2097 = vmatpush1.bf16.msra.mxu1 %v16672_v48 }
 0x1d1   : > { %2235 = vmatprep.subr.bf16.mxu1 %v16386_v7 }
 0x1d2   : > { %14540 = vmatmul.mubr.msk.bf16.vlgmr.msra.gmra.mrb[8].mxu0 %vm1657_vm15, %v16589_v25  ;;  %v16763_v5 = vpop.permute.xlu1 %2689 }
 0x1d3   : > { %2451 = vmatpush1.bf16.msra.mxu0 %v16584_v57  ;;  %2482 = vmatprep.mubr.bf16.mxu0 %v22700_v30  ;;  %v2691_v24 = vsel %vm1388_vm12, %v16495_v23, %v16763_v5 }
 0x1d4   : > { %14533 = vmatmul.mubr.msk.bf16.vlgmr.msra.gmra.mrb[16].mxu1 %vm1657_vm15, %v16190_v63  ;;  %2536 = vmatprep.subr.bf16.mxu0 %v16426_v39  ;;  %v22714_v63 = vld [vmem:[#allocation18_spill] sm:$0xff] }
 0x1d5   : > { %2236 = vmatpush1.bf16.msra.mxu1 %v22713_v18  ;;  %2267 = vmatprep.mubr.bf16.mxu1 %v22700_v30 }
 0x1d6   : > { %2321 = vmatprep.subr.bf16.mxu1 %v16487_v59 }
 0x1da   : > { %14542 = vmatmul.mubr.msk.bf16.vlgmr.msra.gmra.mrb[12].mxu0 %vm1657_vm15, %v16589_v25 }
 0x1db   : > { %2537 = vmatpush1.bf16.msra.mxu0 %v16633_v62  ;;  %2568 = vmatprep.mubr.bf16.mxu0 %v22700_v30 }
 0x1dc   : > { %14537 = vmatmul.mubr.msk.bf16.vlgmr.msra.gmra.mrb[0].mxu1 %vm1657_vm15, %v16589_v25  ;;  %2622 = vmatprep.subr.bf16.mxu0 %v16536_v52 }
 0x1dd   : > { %2322 = vmatpush1.bf16.msra.mxu1 %v22714_v63  ;;  %2353 = vmatprep.mubr.bf16.mxu1 %v22700_v30 }
 0x1de   : > { %2407 = vmatprep.subr.bf16.mxu1 %v16581_v43 }
 0x1e2   : > { %14544 = vmatmul.mubr.msk.bf16.vlgmr.msra.gmra.mrb[16].mxu0 %vm1657_vm15, %v16589_v25 }
 0x1e3   : > { %2623 = vmatpush1.bf16.msra.mxu0 %v16675_v29  ;;  %2654 = vmatprep.mubr.bf16.mxu0 %v22700_v30 }
 0x1e4   : > { %14539 = vmatmul.mubr.msk.bf16.vlgmr.msra.gmra.mrb[4].mxu1 %vm1657_vm15, %v16589_v25  ;;  %2711 = vmatprep.subr.bf16.mxu0 %v16386_v7 }
 0x1e5   : > { %2408 = vmatpush1.bf16.msra.mxu1 %v22715_v34  ;;  %2439 = vmatprep.mubr.bf16.mxu1 %v22700_v30 }
 0x1e6   : > { %2493 = vmatprep.subr.bf16.mxu1 %v16630_v61 }
 0x1ea   : > { %14546 = vmatmul.mubr.msk.bf16.vlgmr.msra.gmra.mrb[20].mxu0 %vm1657_vm15, %v16589_v25 }
 0x1eb   : > { %2712 = vmatpush1.bf16.msra.mxu0 %v22713_v18  ;;  %2743 = vmatprep.mubr.bf16.mxu0 %v22700_v30 }
 0x1ec   : > { %14541 = vmatmul.mubr.msk.bf16.vlgmr.msra.gmra.mrb[8].mxu1 %vm1657_vm15, %v16589_v25  ;;  %2797 = vmatprep.subr.bf16.mxu0 %v16487_v59 }
 0x1ed   : > { %2494 = vmatpush1.bf16.msra.mxu1 %v22716_v6  ;;  %2525 = vmatprep.mubr.bf16.mxu1 %v22700_v30 }
 0x1ee   : > { %2579 = vmatprep.subr.bf16.mxu1 %v16672_v48 }
 0x1f2   : > { %14548 = vmatmul.mubr.msk.bf16.vlgmr.msra.gmra.mrb[0].mxu0 %vm1657_vm15, %v16725_v12 }
 0x1f3   : > { %2798 = vmatpush1.bf16.msra.mxu0 %v22714_v63  ;;  %2829 = vmatprep.mubr.bf16.mxu0 %v22700_v30 }
 0x1f4   : > { %14543 = vmatmul.mubr.msk.bf16.vlgmr.msra.gmra.mrb[12].mxu1 %vm1657_vm15, %v16589_v25  ;;  %2883 = vmatprep.subr.bf16.mxu0 %v16581_v43 }
 0x1f5   : > { %2580 = vmatpush1.bf16.msra.mxu1 %v16411_v45  ;;  %2611 = vmatprep.mubr.bf16.mxu1 %v22700_v30 }
 0x1f6   : > { %2754 = vmatprep.subr.bf16.mxu1 %v16237_v28 }
 0x1fa   : > { %14550 = vmatmul.mubr.msk.bf16.vlgmr.msra.gmra.mrb[4].mxu0 %vm1657_vm15, %v16725_v12 }
 0x1fb   : > { %2884 = vmatpush1.bf16.msra.mxu0 %v22715_v34  ;;  %2915 = vmatprep.mubr.bf16.mxu0 %v22700_v30 }
 0x1fc   : > { %14545 = vmatmul.mubr.msk.bf16.vlgmr.msra.gmra.mrb[16].mxu1 %vm1657_vm15, %v16589_v25  ;;  %2969 = vmatprep.subr.bf16.mxu0 %v16630_v61  ;;  %v2680_v25 = vsel %vm1146_vm6, %v16436_v31, %v16739_v15  ;;  %v2686_v31 = vsel %vm1278_vm4, %v16444_v44, %v16768_v3  ;;  %v15444_v44 = vld [vmem:[%s22165_s1 + $0x18] sm:$0xff]  }
 0x1fd   : > { %2755 = vmatpush1.bf16.msra.mxu1 %v16389_v0  ;;  %2786 = vmatprep.mubr.bf16.mxu1 %v22700_v30  ;;  %v2695_v49 = vsel %vm1435_vm9, %v2692_v54, %v2680_v25 }
 0x1fe   : > { %2840 = vmatprep.subr.bf16.mxu1 %v16290_v21  ;;  %v2697_v46 = vsel %vm16119_vm11, %v2695_v49, %v2686_v31 }
 0x1ff   : > { %v2700_v23 = vsel %vm1549_vm14, %v2697_v46, %v2691_v24 }
 0x200   : > { %v16793_v9 = vand.u32 %v2700_v23, %v16160_v22 }
 0x202   : > { %14552 = vmatmul.mubr.msk.bf16.vlgmr.msra.gmra.mrb[8].mxu0 %vm1657_vm15, %v16725_v12 }
 0x203   : > { %2970 = vmatpush1.bf16.msra.mxu0 %v22716_v6  ;;  %3001 = vmatprep.mubr.bf16.mxu0 %v22700_v30 }
 0x204   : > { %14549 = vmatmul.mubr.msk.bf16.vlgmr.msra.gmra.mrb[0].mxu1 %vm1657_vm15, %v16725_v12  ;;  %3055 = vmatprep.subr.bf16.mxu0 %v16672_v48 }
 0x205   : > { %2841 = vmatpush1.bf16.msra.mxu1 %v16490_v55  ;;  %2872 = vmatprep.mubr.bf16.mxu1 %v22700_v30 }
 0x206   : > { %2926 = vmatprep.subr.bf16.mxu1 %v16329_v8 }
 0x20a   : > { %14554 = vmatmul.mubr.msk.bf16.vlgmr.msra.gmra.mrb[12].mxu0 %vm1657_vm15, %v16725_v12 }
 0x20b   : > { %3056 = vmatpush1.bf16.msra.mxu0 %v16411_v45  ;;  %3087 = vmatprep.mubr.bf16.mxu0 %v22700_v30 }
 0x20c   : > { %14551 = vmatmul.mubr.msk.bf16.vlgmr.msra.gmra.mrb[4].mxu1 %vm1657_vm15, %v16725_v12  ;;  %3141 = vmatprep.subr.bf16.mxu0 %v16793_v9 }
 0x20d   : > { %2927 = vmatpush1.bf16.msra.mxu1 %v16584_v57  ;;  %2958 = vmatprep.mubr.bf16.mxu1 %v22700_v30 }
 0x20e   : > { %3012 = vmatprep.subr.bf16.mxu1 %v16426_v39 }
 0x212   : > { %14556 = vmatmul.mubr.msk.bf16.vlgmr.msra.gmra.mrb[16].mxu0 %vm1657_vm15, %v16725_v12 }
 0x213   : > { %3142 = vmatpush1.bf16.msra.mxu0 %v16514_v50  ;;  %3173 = vmatprep.mubr.bf16.mxu0 %v22700_v30 }
 0x214   : > { %14553 = vmatmul.mubr.msk.bf16.vlgmr.msra.gmra.mrb[8].mxu1 %vm1657_vm15, %v16725_v12  ;;  %3253 = vmatprep.subr.bf16.mxu0 %v16389_v0 }
 0x215   : > { %3013 = vmatpush1.bf16.msra.mxu1 %v16633_v62  ;;  %3044 = vmatprep.mubr.bf16.mxu1 %v22700_v30 }
 0x216   : > { %3098 = vmatprep.subr.bf16.mxu1 %v16536_v52 }
 0x21a   : > { %14558 = vmatmul.mubr.msk.bf16.vlgmr.msra.gmra.mrb[20].mxu0 %vm1657_vm15, %v16725_v12 }
 0x21b   : > { %3254 = vmatpush1.bf16.msra.mxu0 %v16386_v7  ;;  %3285 = vmatprep.mubr.bf16.mxu0 %v22700_v30  ;;  %v3228_v7 = vsel %vm1034_vm1, %v16746_v40, %v15919_v36  ;;  %v3233_v36 = vsel %vm1388_vm12, %v16763_v5, %v22706_v41 }
 0x21c   : > { %14555 = vmatmul.mubr.msk.bf16.vlgmr.msra.gmra.mrb[12].mxu1 %vm1657_vm15, %v16725_v12  ;;  %3339 = vmatprep.subr.bf16.mxu0 %v16490_v55  ;;  %v3234_v51 = vsel %vm16097_vm5, %v22718_v20, %v3228_v7 }
 0x21d   : > { %3099 = vmatpush1.bf16.msra.mxu1 %v16675_v29  ;;  %3130 = vmatprep.mubr.bf16.mxu1 %v22700_v30  ;;  %v3237_v38 = vsel %vm1435_vm9, %v3234_v51, %v3230_v26 }
 0x21e   : > { %3296 = vmatprep.subr.bf16.mxu1 %v22714_v63  ;;  %v3239_v37 = vsel %vm16119_vm11, %v3237_v38, %v3231_v58 }
 0x21f   : > { %v3242_v56 = vsel %vm1549_vm14, %v3239_v37, %v3233_v36 }
 0x220   : > { %v3251_v41 = vand.u32 %v3242_v56, %v16160_v22  ;;  %v15445_v22 = vld [vmem:[%s22165_s1 + $0x20] sm:$0xff]  }
 0x222   : > { %14560 = vmatmul.mubr.msk.bf16.vlgmr.msra.gmra.mrb[0].mxu0 %vm1657_vm15, %v15444_v44 }
 0x223   : > { %3340 = vmatpush1.bf16.msra.mxu0 %v16487_v59  ;;  %3371 = vmatprep.mubr.bf16.mxu0 %v22700_v30 }
 0x224   : > { %14557 = vmatmul.mubr.msk.bf16.vlgmr.msra.gmra.mrb[16].mxu1 %vm1657_vm15, %v16725_v12  ;;  %3425 = vmatprep.subr.bf16.mxu0 %v16584_v57 }
 0x225   : > { %3297 = vmatpush1.bf16.msra.mxu1 %v16237_v28  ;;  %3328 = vmatprep.mubr.bf16.mxu1 %v22700_v30 }
 0x226   : > { %3382 = vmatprep.subr.bf16.mxu1 %v22715_v34 }
 0x22a   : > { %14562 = vmatmul.mubr.msk.bf16.vlgmr.msra.gmra.mrb[4].mxu0 %vm1657_vm15, %v15444_v44 }
 0x22b   : > { %3426 = vmatpush1.bf16.msra.mxu0 %v16581_v43  ;;  %3457 = vmatprep.mubr.bf16.mxu0 %v22700_v30 }
 0x22c   : > { %14561 = vmatmul.mubr.msk.bf16.vlgmr.msra.gmra.mrb[0].mxu1 %vm1657_vm15, %v15444_v44  ;;  %3511 = vmatprep.subr.bf16.mxu0 %v16633_v62 }
 0x22d   : > { %3383 = vmatpush1.bf16.msra.mxu1 %v16290_v21  ;;  %3414 = vmatprep.mubr.bf16.mxu1 %v22700_v30 }
 0x22e   : > { %3468 = vmatprep.subr.bf16.mxu1 %v22716_v6 }
 0x232   : > { %14564 = vmatmul.mubr.msk.bf16.vlgmr.msra.gmra.mrb[8].mxu0 %vm1657_vm15, %v15444_v44 }
 0x233   : > { %3512 = vmatpush1.bf16.msra.mxu0 %v16630_v61  ;;  %3543 = vmatprep.mubr.bf16.mxu0 %v22700_v30 }
 0x234   : > { %14563 = vmatmul.mubr.msk.bf16.vlgmr.msra.gmra.mrb[4].mxu1 %vm1657_vm15, %v15444_v44  ;;  %3597 = vmatprep.subr.bf16.mxu0 %v16675_v29 }
 0x235   : > { %3469 = vmatpush1.bf16.msra.mxu1 %v16329_v8  ;;  %3500 = vmatprep.mubr.bf16.mxu1 %v22700_v30 }
 0x236   : > { %3554 = vmatprep.subr.bf16.mxu1 %v16411_v45 }
 0x23a   : > { %14566 = vmatmul.mubr.msk.bf16.vlgmr.msra.gmra.mrb[12].mxu0 %vm1657_vm15, %v15444_v44 }
 0x23b   : > { %3598 = vmatpush1.bf16.msra.mxu0 %v16672_v48  ;;  %3629 = vmatprep.mubr.bf16.mxu0 %v22700_v30 }
 0x23c   : > { %14565 = vmatmul.mubr.msk.bf16.vlgmr.msra.gmra.mrb[8].mxu1 %vm1657_vm15, %v15444_v44  ;;  %3683 = vmatprep.subr.bf16.mxu0 %v3251_v41 }
 0x23d   : > { %3555 = vmatpush1.bf16.msra.mxu1 %v16426_v39  ;;  %3586 = vmatprep.mubr.bf16.mxu1 %v22700_v30 }
 0x23e   : > { %3640 = vmatprep.subr.bf16.mxu1 %v16514_v50 }
 0x242   : > { %14568 = vmatmul.mubr.msk.bf16.vlgmr.msra.gmra.mrb[16].mxu0 %vm1657_vm15, %v15444_v44 }
 0x243   : > { %3684 = vmatpush1.bf16.msra.mxu0 %v16793_v9  ;;  %3715 = vmatprep.mubr.bf16.mxu0 %v22700_v30 }
 0x244   : > { %14567 = vmatmul.mubr.msk.bf16.vlgmr.msra.gmra.mrb[12].mxu1 %vm1657_vm15, %v15444_v44  ;;  %3778 = vmatprep.subr.bf16.mxu0 %v16237_v28  ;;  %v314_v28 = vadd.s32 16, %v22719_v32  ;;  %v16984_v42 = vpop.permute.xlu0 %4297 }
 0x245   : > { %3641 = vmatpush1.bf16.msra.mxu1 %v16536_v52  ;;  %3672 = vmatprep.mubr.bf16.mxu1 %v22700_v30  ;;  %v16987_v13 = vpop.permute.xlu1 %4302 }
 0x246   : > { %3821 = vmatprep.subr.bf16.mxu1 %v16487_v59 }
 0x24a   : > { %14570 = vmatmul.mubr.msk.bf16.vlgmr.msra.gmra.mrb[20].mxu0 %vm1657_vm15, %v15444_v44 }
 0x24b   : > { %3779 = vmatpush1.bf16.msra.mxu0 %v16389_v0  ;;  %3810 = vmatprep.mubr.bf16.mxu0 %v22700_v30 }
 0x24c   : > { %14569 = vmatmul.mubr.msk.bf16.vlgmr.msra.gmra.mrb[16].mxu1 %vm1657_vm15, %v15444_v44  ;;  %3864 = vmatprep.subr.bf16.mxu0 %v16290_v21  ;;  %v317_v21 = vstv %s14516_s22 }
 0x24d   : > { %3822 = vmatpush1.bf16.msra.mxu1 %v22714_v63  ;;  %3853 = vmatprep.mubr.bf16.mxu1 %v22700_v30  ;;  %v318_v14 = vadd.s32 %v317_v21, %v22719_v32  ;;  %v319_v27 = vadd.s32 %v317_v21, %v313_v60 }
 0x24e   : > { %3907 = vmatprep.subr.bf16.mxu1 %v16581_v43 }
 0x24f   : > { %vm323_vm11 = vcmp.ge.s32.totalorder %v318_v14, 0  ;;  %vm326_vm13 = vcmp.lt.s32.totalorder %v318_v14, 16 }
 0x250   : > { %vm329_vm14 = vmand %vm323_vm11, %vm326_vm13  ;;  %vm4910_vm13 = vcmask 392192  }
 0x252   : > { %14572 = vmatmul.mubr.msk.bf16.vlgmr.msra.gmra.mrb[0].mxu0 %vm1657_vm15, %v15445_v22 }
 0x253   : > { %3865 = vmatpush1.bf16.msra.mxu0 %v16490_v55  ;;  %3896 = vmatprep.mubr.bf16.mxu0 %v22700_v30  ;;  %v22722_v55 = vld [vmem:[#allocation4_spill] sm:$0xff] }
 0x254   : > { %14573 = vmatmul.mubr.msk.bf16.vlgmr.msra.gmra.mrb[0].mxu1 %vm1657_vm15, %v15445_v22  ;;  %3950 = vmatprep.subr.bf16.mxu0 %v16329_v8  ;;  %v22720_v8 = vlaneseq }
 0x255   : > { %3908 = vmatpush1.bf16.msra.mxu1 %v22715_v34  ;;  %3939 = vmatprep.mubr.bf16.mxu1 %v22700_v30 }
 0x256   : > { %3993 = vmatprep.subr.bf16.mxu1 %v16630_v61  ;;  %v322_v0 = vand.u32 127, %v22720_v8 }
 0x258   : > { %vm332_vm5 = vcmp.ge.s32.totalorder %v322_v0, 7  ;;  %vm336_vm8 = vcmp.lt.s32.totalorder %v322_v0, 23 }
 0x25a   : > { %14574 = vmatmul.mubr.msk.bf16.vlgmr.msra.gmra.mrb[4].mxu0 %vm1657_vm15, %v15445_v22 }
 0x25b   : > { %3951 = vmatpush1.bf16.msra.mxu0 %v16584_v57  ;;  %3982 = vmatprep.mubr.bf16.mxu0 %v22700_v30  ;;  %v16947_v57 = vsub.s32 0, %v22719_v32 }
 0x25c   : > { %14575 = vmatmul.mubr.msk.bf16.vlgmr.msra.gmra.mrb[4].mxu1 %vm1657_vm15, %v15445_v22  ;;  %4036 = vmatprep.subr.bf16.mxu0 %v16426_v39  ;;  %v22721_v39 = vmov 0.0  }
 0x25d   : > { %3994 = vmatpush1.bf16.msra.mxu1 %v22716_v6  ;;  %4025 = vmatprep.mubr.bf16.mxu1 %v22700_v30 }
 0x25e   : > { %4079 = vmatprep.subr.bf16.mxu1 %v16672_v48 }
 0x262   : > { %14576 = vmatmul.mubr.msk.bf16.vlgmr.msra.gmra.mrb[8].mxu0 %vm1657_vm15, %v15445_v22 }
 0x263   : > { %4037 = vmatpush1.bf16.msra.mxu0 %v16633_v62  ;;  %4068 = vmatprep.mubr.bf16.mxu0 %v22700_v30 }
 0x264   : > { %14577 = vmatmul.mubr.msk.bf16.vlgmr.msra.gmra.mrb[8].mxu1 %vm1657_vm15, %v15445_v22  ;;  %4122 = vmatprep.subr.bf16.mxu0 %v16536_v52  ;;  %v22723_v52 = vld [vmem:[#allocation5_spill] sm:$0xff] }
 0x265   : > { %4080 = vmatpush1.bf16.msra.mxu1 %v16411_v45  ;;  %4111 = vmatprep.mubr.bf16.mxu1 %v22700_v30  ;;  %v320_v45 = vadd.s32 %v317_v21, %v314_v28 }
 0x266   : > { %4165 = vmatprep.subr.bf16.mxu1 %v16793_v9 }
 0x267   : > { %vm325_vm2 = vcmp.ge.s32.totalorder %v320_v45, 0  ;;  %vm328_vm3 = vcmp.lt.s32.totalorder %v320_v45, 16 }
 0x268   : > { %vm331_vm7 = vmand %vm325_vm2, %vm328_vm3  ;;  %vm324_vm3 = vcmp.ge.s32.totalorder %v319_v27, 0 }
 0x269   : > { %vm335_vm9 = vmand %vm331_vm7, %vm332_vm5  ;;  %vm327_vm7 = vcmp.lt.s32.totalorder %v319_v27, 16 }
 0x26a   : > { %14578 = vmatmul.mubr.msk.bf16.vlgmr.msra.gmra.mrb[12].mxu0 %vm1657_vm15, %v15445_v22  ;;  %vm339_vm10 = vmand %vm335_vm9, %vm336_vm8 }
 0x26b   : > { %4123 = vmatpush1.bf16.msra.mxu0 %v16675_v29  ;;  %4154 = vmatprep.mubr.bf16.mxu0 %v22700_v30  ;;  %v14519_v59 = vsel %vm339_vm10, 1.0, %v22721_v39  ;;  %vm330_vm9 = vmand %vm324_vm3, %vm327_vm7 }
 0x26c   : > { %14579 = vmatmul.mubr.msk.bf16.vlgmr.msra.gmra.mrb[12].mxu1 %vm1657_vm15, %v15445_v22  ;;  %4208 = vmatprep.subr.bf16.mxu0 %v16555_v47  ;;  %v466_v17 = vcombine.high %v14519_v59, %v22721_v39  ;;  %vm334_vm10 = vmand %vm330_vm9, %vm332_vm5 }
 0x26d   : > { %4166 = vmatpush1.bf16.msra.mxu1 %v16514_v50  ;;  %4197 = vmatprep.mubr.bf16.mxu1 %v22700_v30  ;;  %v450_v50 = vrot.slane %v14519_v59, %v22722_v55  ;;  %vm338_vm11 = vmand %vm334_vm10, %vm336_vm8 }
 0x26e   : > { %v473_v61 = vrot.slane %v466_v17, %v22723_v52  ;;  %v14518_v5 = vsel %vm338_vm11, 1.0, %v22721_v39 }
 0x26f   : > { %v16943_v47 = vrot.slane %v450_v50, %v22723_v52  ;;  %v451_v43 = vcombine.high %v450_v50, %v22721_v39  ;;  %v402_v7 = vrot.slane %v14518_v5, %v22722_v55  ;;  %v395_v50 = vcombine.high %v14518_v5, %v22721_v39 }
 0x270   : > { %v16954_v1 = vrot.slane %v473_v61, %v16947_v57  ;;  %v476_v19 = vcombine.high %v473_v61, %v22721_v39 }
 0x271   : > { %v474_v62 = vcombine.high %v16943_v47, %v22721_v39  ;;  %v465_v35 = vrot.slane %v451_v43, %v22723_v52  ;;  %v17019_v59 = vrot.slane %v402_v7, %v22723_v52  ;;  %v410_v27 = vcombine.high %v402_v7, %v22721_v39 }
 0x272   : > { %14580 = vmatmul.mubr.msk.bf16.vlgmr.msra.gmra.mrb[16].mxu0 %vm1657_vm15, %v15445_v22  ;;  %22724 = vst [vmem:[#allocation12_spill] sm:$0xff] %v16954_v1  ;;  %v16965_v16 = vrot.slane %v476_v19, %v16947_v57  ;;  %v17040_v5 = vrot.slane %v395_v50, %v22722_v55 }
 0x273   : > { %4209 = vmatpush1.bf16.msra.mxu0 %v3251_v41  ;;  %4240 = vmatprep.mubr.bf16.mxu0 %v22700_v30  ;;  %v16958_v2 = vrot.slane %v474_v62, %v16947_v57  ;;  %v16961_v11 = vrot.slane %v465_v35, %v16947_v57  ;;  %v475_v10 = vcombine.high %v465_v35, %v22721_v39 }
 0x274   : > { %14581 = vmatmul.mubr.msk.bf16.vlgmr.msra.gmra.mrb[16].mxu1 %vm1657_vm15, %v15445_v22  ;;  %22727 = vst [vmem:[#allocation6_spill] sm:$0xff] %v16965_v16  ;;  %v17048_v7 = vrot.slane %v410_v27, %v22723_v52 }
 0x275   : > { %4946 = vmatprep.mubr.bf16.mxu1 %v22700_v30  ;;  %22725 = vst [vmem:[#allocation9_spill] sm:$0xff] %v16958_v2  ;;  %22726 = vst [vmem:[#allocation11_spill] sm:$0xff] %v16961_v11  ;;  %v16968_v33 = vrot.slane %v475_v10, %v16947_v57 }
 0x277   : > { %22728 = vst [vmem:[#allocation13_spill] sm:$0xff] %v16968_v33 }
 0x27a   : > { %14582 = vmatmul.mubr.msk.bf16.vlgmr.msra.gmra.mrb[20].mxu0 %vm1657_vm15, %v15445_v22  ;;  %vm333_vm15 = vmand %vm329_vm14, %vm332_vm5  ;;  %vm4665_vm5 = vcmask 7168  }
 0x27b   : > { %5118 = vmatprep.mubr.bf16.mxu0 %v22700_v30  ;;  %vm337_vm2 = vmand %vm333_vm15, %vm336_vm8  ;;  %vm11291_vm15 = vcmask 654336  }
 0x27c   : > { %v14517_v48 = vsel %vm337_vm2, 1.0, %v22721_v39  ;;  %vm17295_vm8 = vmneg %vm4665_vm5 }
 0x27d   : > { %v353_v29 = vrot.slane %v14517_v48, %v22722_v55  ;;  %v346_v18 = vcombine.high %v14517_v48, %v22721_v39  ;;  %vm20349_vm14 = vmneg %vm765_vm0 }
 0x27f   : > { %v361_v63 = vcombine.high %v353_v29, %v22721_v39  ;;  %v360_v34 = vrot.slane %v346_v18, %v22722_v55  ;;  %v368_v6 = vrot.slane %v353_v29, %v22723_v52 }
 0x281   : > { %v375_v12 = vrot.slane %v361_v63, %v22723_v52  ;;  %v376_v15 = vcombine.high %v360_v34, %v22721_v39  ;;  %v391_v53 = vcombine.high %v368_v6, %v22721_v39  ;;  %v383_v25 = vrot.slane %v360_v34, %v22723_v52 }
 0x282   : > { %v16995_v46 = vrot.slane %v368_v6, %v16947_v57 }
 0x283   : > { %v392_v54 = vcombine.high %v375_v12, %v22721_v39  ;;  %v390_v24 = vrot.slane %v376_v15, %v22723_v52  ;;  %v17001_v20 = vrot.slane %v391_v53, %v16947_v57  ;;  %v393_v36 = vcombine.high %v383_v25, %v22721_v39 }
 0x284   : > { %22729 = vst [vmem:[#allocation7_spill] sm:$0xff] %v16995_v46  ;;  %v17006_v58 = vrot.slane %v375_v12, %v16947_v57  ;;  %v17016_v0 = vrot.slane %v383_v25, %v16947_v57  ;;  %v17037_v25 = vrot.slane %v17019_v59, %v16947_v57 }
 0x285   : > { %22730 = vst [vmem:[#allocation14_spill] sm:$0xff] %v17001_v20  ;;  %v17009_v56 = vrot.slane %v392_v54, %v16947_v57  ;;  %v394_v8 = vcombine.high %v390_v24, %v22721_v39  ;;  %v17024_v62 = vrot.slane %v393_v36, %v16947_v57  ;;  %v17027_v35 = vrot.slane %v390_v24, %v16947_v57 }
 0x286   : > { %22731 = vst [vmem:[#allocation8_spill] sm:$0xff] %v17006_v58  ;;  %22733 = vst [vmem:[#allocation17_spill] sm:$0xff] %v17016_v0 }
 0x287   : > { %22732 = vst [vmem:[#allocation15_spill] sm:$0xff] %v17009_v56  ;;  %22734 = vst [vmem:[#allocation18_spill] sm:$0xff] %v17024_v62  ;;  %v17032_v6 = vrot.slane %v394_v8, %v16947_v57 }
 0x288   : > { %22735 = vst [vmem:[#allocation19_spill] sm:$0xff] %v17027_v35  ;;  %22737 = vst [vmem:[#allocation10_spill] sm:$0xff] %v17037_v25 }
 0x289   : > { %22736 = vst [vmem:[#allocation20_spill] sm:$0xff] %v17032_v6 }
 0x325   : > { %v3812_v40 = vpop.f32.mrb[0].mxu0 }
 0x326   : > { %v3814_v4 = vpop.f32.mrb[1].mxu0  ;;  %v4305_v44 = vadd.f32 %v16984_v42, %v3812_v40 }
 0x327   : > { %v3855_v3 = vpop.f32.mrb[0].mxu1  ;;  %v3816_v49 = vpop.f32.mrb[2].mxu0  ;;  %v4306_v26 = vadd.f32 %v16984_v42, %v3814_v4 }
 0x328   : > { %v4327_v31 = vadd.f32 %v16987_v13, %v3816_v49  ;;  %v3857_v23 = vpop.f32.mrb[1].mxu1  ;;  %v3818_v9 = vpop.f32.mrb[3].mxu0  ;;  %v4307_v32 = vadd.f32 %v16984_v42, %v3855_v3  ;;  %v4349_v45 = vmax.f32 %v4305_v44, 0.0 }
 0x329   : > { %v4328_v51 = vadd.f32 %v16987_v13, %v3818_v9  ;;  %v3859_v38 = vpop.f32.mrb[2].mxu1  ;;  %v4350_v17 = vmax.f32 %v4306_v26, 0.0  ;;  %v4308_v43 = vadd.f32 %v16984_v42, %v3857_v23 }
 0x32a   : > { %v4371_v37 = vmax.f32 %v4327_v31, 0.0  ;;  %v4329_v41 = vadd.f32 %v16987_v13, %v3859_v38  ;;  %v3861_v22 = vpop.f32.mrb[3].mxu1  ;;  %v4351_v48 = vmax.f32 %v4307_v32, 0.0  ;;  %v4393_v53 = vmin.f32 %v4349_v45, 6.0 }
 0x32b   : > { %v4372_v28 = vmax.f32 %v4328_v51, 0.0  ;;  %v4330_v21 = vadd.f32 %v16987_v13, %v3861_v22  ;;  %v4394_v4 = vmin.f32 %v4350_v17, 6.0  ;;  %v4352_v54 = vmax.f32 %v4308_v43, 0.0 }
 0x32c   : > { %v4415_v19 = vmin.f32 %v4371_v37, 6.0  ;;  %v4373_v10 = vmax.f32 %v4329_v41, 0.0  ;;  %v4395_v26 = vmin.f32 %v4351_v48, 6.0  ;;  %v17056_v32 = vmul.f32 %v16995_v46, %v4393_v53 }
 0x32d   : > { %v3898_v61 = vpop.f32.mrb[4].mxu0  ;;  %v4416_v29 = vmin.f32 %v4372_v28, 6.0  ;;  %v4374_v18 = vmax.f32 %v4330_v21, 0.0  ;;  %v17059_v28 = vmul.f32 %v17001_v20, %v4394_v4  ;;  %v4396_v21 = vmin.f32 %v4352_v54, 6.0 }
 0x32e   : > { %v4309_v14 = vadd.f32 %v16984_v42, %v3898_v61  ;;  %v3900_v60 = vpop.f32.mrb[5].mxu0  ;;  %v17045_v31 = vmul.f32 %v16995_v46, %v4415_v19  ;;  %v4417_v23 = vmin.f32 %v4373_v10, 6.0  ;;  %22740 = vst [vmem:[#allocation21_spill] sm:$0xff] %v17056_v32 }
 0x32f   : > { %v3941_v63 = vpop.f32.mrb[4].mxu1  ;;  %v3902_v34 = vpop.f32.mrb[6].mxu0  ;;  %v4310_v3 = vadd.f32 %v16984_v42, %v3900_v60  ;;  %v17051_v51 = vmul.f32 %v17001_v20, %v4416_v29  ;;  %v4418_v38 = vmin.f32 %v4374_v18, 6.0  ;;  %22741 = vst [vmem:[#allocation22_spill] sm:$0xff] %v17059_v28  ;;  %v425_v18 = vcombine.high %v17040_v5, %v22721_v39 }
 0x330   : > { %v4331_v12 = vadd.f32 %v16987_v13, %v3902_v34  ;;  %v3943_v15 = vpop.f32.mrb[5].mxu1  ;;  %v3904_v40 = vpop.f32.mrb[7].mxu0  ;;  %22738 = vst [vmem:[#allocation16_spill] sm:$0xff] %v17045_v31  ;;  %v4353_v9 = vmax.f32 %v4309_v14, 0.0  ;;  %v4311_v45 = vadd.f32 %v16984_v42, %v3941_v63  ;;  %v17063_v17 = vmul.f32 %v17006_v58, %v4417_v23 }
 0x331   : > { %v4332_v49 = vadd.f32 %v16987_v13, %v3904_v40  ;;  %v3945_v24 = vpop.f32.mrb[6].mxu1  ;;  %22739 = vst [vmem:[#allocation3_spill] sm:$0xff] %v17051_v51  ;;  %v4354_v8 = vmax.f32 %v4310_v3, 0.0  ;;  %v4312_v61 = vadd.f32 %v16984_v42, %v3943_v15  ;;  %v4577_v19 = vpack.c.bf16 %v17045_v31, %v17056_v32 }
 0x332   : > { %v3947_v44 = vpop.f32.mrb[7].mxu1  ;;  %v4333_v36 = vadd.f32 %v16987_v13, %v3945_v24  ;;  %v4375_v37 = vmax.f32 %v4331_v12, 0.0  ;;  %22742 = vst [vmem:[#allocation23_spill] sm:$0xff] %v17063_v17  ;;  %v4397_v43 = vmin.f32 %v4353_v9, 6.0  ;;  %v17071_v14 = vmul.f32 %v17009_v56, %v4418_v38 }
 0x333   : > { %v4376_v41 = vmax.f32 %v4332_v49, 0.0  ;;  %v4334_v22 = vadd.f32 %v16987_v13, %v3947_v44  ;;  %v4578_v27 = vpack.c.bf16 %v17051_v51, %v17059_v28  ;;  %v17078_v63 = vmul.f32 %v17006_v58, %v4395_v26  ;;  %4621 = vrot.lane.b32.xlu1 %v4577_v19, %s15534_s23 }
 0x334   : > { %22743 = vst [vmem:[#allocation24_spill] sm:$0xff] %v17071_v14  ;;  %v4377_v60 = vmax.f32 %v4333_v36, 0.0  ;;  %v4419_v34 = vmin.f32 %v4375_v37, 6.0  ;;  %v17084_v4 = vmul.f32 %v17009_v56, %v4396_v21  ;;  %v4398_v54 = vmin.f32 %v4354_v8, 6.0 }
 0x335   : > { %v3984_v50 = vpop.f32.mrb[8].mxu0  ;;  %22744 = vst [vmem:[#allocation25_spill] sm:$0xff] %v17078_v63  ;;  %v4420_v12 = vmin.f32 %v4376_v41, 6.0  ;;  %v4378_v15 = vmax.f32 %v4334_v22, 0.0  ;;  %v4355_v3 = vmax.f32 %v4311_v45, 0.0  ;;  %4623 = vrot.lane.b32.xlu0 %v4578_v27, %s15534_s23  ;;  %v441_v49 = vcombine.high %v17048_v7, %v22721_v39 }
 0x336   : > { %v17068_v10 = vpop.f32.mrb[9].mxu0  ;;  %22745 = vst [vmem:[#allocation26_spill] sm:$0xff] %v17084_v4  ;;  %v17090_v23 = vmul.f32 %v17016_v0, %v4397_v43  ;;  %v4356_v9 = vmax.f32 %v4312_v61, 0.0  ;;  %v4579_v26 = vpack.c.bf16 %v17063_v17, %v17078_v63  ;;  %v4421_v36 = vmin.f32 %v4377_v60, 6.0 }
 0x337   : > { %v4027_v48 = vpop.f32.mrb[8].mxu1  ;;  %v3988_v29 = vpop.f32.mrb[10].mxu0  ;;  %v4580_v41 = vpack.c.bf16 %v17071_v14, %v17084_v4  ;;  %v17100_v21 = vmul.f32 %v17016_v0, %v4419_v34  ;;  %v17103_v8 = vmul.f32 %v17024_v62, %v4420_v12  ;;  %v4422_v45 = vmin.f32 %v4378_v15, 6.0 }
 0x338   : > { %v4029_v40 = vpop.f32.mrb[9].mxu1  ;;  %v17081_v53 = vpop.f32.mrb[11].mxu0  ;;  %22746 = vst [vmem:[#allocation27_spill] sm:$0xff] %v17090_v23  ;;  %v4315_v44 = vadd.f32 %v16984_v42, %v4027_v48  ;;  %4625 = vrot.lane.b32.xlu1 %v4579_v26, %s15534_s23  ;;  %v17108_v61 = vmul.f32 %v17024_v62, %v4398_v54  ;;  %v4399_v19 = vmin.f32 %v4355_v3, 6.0  ;;  %v4335_v60 = vadd.f32 %v16987_v13, %v3988_v29 }
 0x339   : > { %v4031_v24 = vpop.f32.mrb[10].mxu1  ;;  %v4316_v37 = vadd.f32 %v16984_v42, %v4029_v40  ;;  %22747 = vst [vmem:[#allocation28_spill] sm:$0xff] %v17100_v21  ;;  %22748 = vst [vmem:[#allocation29_spill] sm:$0xff] %v17103_v8  ;;  %4627 = vrot.lane.b32.xlu0 %v4580_v41, %s15534_s23  ;;  %v4400_v34 = vmin.f32 %v4356_v9, 6.0  ;;  %v4313_v40 = vadd.f32 %v16984_v42, %v3984_v50 }
 0x33a   : > { %v4033_v38 = vpop.f32.mrb[11].mxu1  ;;  %v4337_v22 = vadd.f32 %v16987_v13, %v4031_v24  ;;  %22749 = vst [vmem:[#allocation30_spill] sm:$0xff] %v17108_v61  ;;  %v4359_v12 = vmax.f32 %v4315_v44, 0.0  ;;  %v17116_v26 = vmul.f32 %v17027_v35, %v4421_v36  ;;  %v17120_v54 = vcombine.high %v17019_v59, %v22721_v39 }
 0x33b   : > { %v4338_v43 = vadd.f32 %v16987_v13, %v4033_v38  ;;  %v4360_v3 = vmax.f32 %v4316_v37, 0.0  ;;  %v17127_v50 = vrot.slane %v17048_v7, %v16947_v57  ;;  %v4581_v9 = vpack.c.bf16 %v17100_v21, %v17090_v23 }
 0x33c   : > { %v4381_v27 = vmax.f32 %v4337_v22, 0.0  ;;  %22750 = vst [vmem:[#allocation31_spill] sm:$0xff] %v17116_v26  ;;  %v17123_v22 = vmul.f32 %v17032_v6, %v4422_v45  ;;  %v4582_v44 = vpack.c.bf16 %v17103_v8, %v17108_v61  ;;  %v17134_v37 = vmul.f32 %v17027_v35, %v4399_v19 }
 0x33d   : > { %v4070_v48 = vpop.f32.mrb[12].mxu0  ;;  %v4382_v24 = vmax.f32 %v4338_v43, 0.0  ;;  %22752 = vst [vmem:[#allocation33_spill] sm:$0xff] %v17127_v50  ;;  %v4379_v43 = vmax.f32 %v4335_v60, 0.0  ;;  %v439_v45 = vrot.slane %v425_v18, %v22723_v52  ;;  %v17138_v62 = vmul.f32 %v17032_v6, %v4400_v34  ;;  %4629 = vrot.lane.b32.xlu1 %v4581_v9, %s15534_s23 }
 0x33e   : > { %v17113_v15 = vpop.f32.mrb[13].mxu0  ;;  %v4425_v29 = vmin.f32 %v4381_v27, 6.0  ;;  %22751 = vst [vmem:[#allocation32_spill] sm:$0xff] %v17123_v22  ;;  %22753 = vst [vmem:[#allocation34_spill] sm:$0xff] %v17134_v37  ;;  %v4357_v7 = vmax.f32 %v4313_v40, 0.0  ;;  %v4403_v0 = vmin.f32 %v4359_v12, 6.0  ;;  %v17141_v21 = vrot.slane %v441_v49, %v16947_v57  ;;  %4631 = vrot.lane.b32.xlu0 %v4582_v44, %s15534_s23 }
 0x33f   : > { %v4113_v38 = vpop.f32.mrb[12].mxu1  ;;  %v4074_v41 = vpop.f32.mrb[14].mxu0  ;;  %v4426_v27 = vmin.f32 %v4382_v24, 6.0  ;;  %22754 = vst [vmem:[#allocation35_spill] sm:$0xff] %v17138_v62  ;;  %v4404_v19 = vmin.f32 %v4360_v3, 6.0  ;;  %v4583_v34 = vpack.c.bf16 %v17116_v26, %v17134_v37  ;;  %v4584_v49 = vpack.c.bf16 %v17123_v22, %v17138_v62 }
 0x340   : > { %v4115_v36 = vpop.f32.mrb[13].mxu1  ;;  %v4076_v59 = vpop.f32.mrb[15].mxu0  ;;  %22755 = vst [vmem:[#allocation36_spill] sm:$0xff] %v17141_v21  ;;  %v17146_v60 = vmul.f32 %v17127_v50, %v4425_v29  ;;  %v4319_v18 = vadd.f32 %v16984_v42, %v4113_v38  ;;  %v4339_v40 = vadd.f32 %v16987_v13, %v4074_v41  ;;  %v4423_v9 = vmin.f32 %v4379_v43, 6.0 }
 0x341   : > { %v4117_v55 = vpop.f32.mrb[14].mxu1  ;;  %v4320_v12 = vadd.f32 %v16984_v42, %v4115_v36  ;;  %v17157_v3 = vmul.f32 %v17141_v21, %v4426_v27  ;;  %v443_v29 = vcombine.high %v439_v45, %v22721_v39  ;;  %v4401_v6 = vmin.f32 %v4357_v7, 6.0  ;;  %4633 = vrot.lane.b32.xlu1 %v4583_v34, %s15534_s23 }
 0x342   : > { %v4119_v8 = vpop.f32.mrb[15].mxu1  ;;  %22756 = vst [vmem:[#allocation37_spill] sm:$0xff] %v17146_v60  ;;  %v4341_v24 = vadd.f32 %v16987_v13, %v4117_v55  ;;  %v17162_v35 = vmul.f32 %v17127_v50, %v4403_v0  ;;  %v4336_v41 = vadd.f32 %v16987_v13, %v17081_v53  ;;  %4635 = vrot.lane.b32.xlu0 %v4584_v49, %s15534_s23  ;;  %v4363_v27 = vmax.f32 %v4319_v18, 0.0 }
 0x343   : > { %22757 = vst [vmem:[#allocation38_spill] sm:$0xff] %v17157_v3  ;;  %v4342_v38 = vadd.f32 %v16987_v13, %v4119_v8  ;;  %v17171_v43 = vmul.f32 %v17141_v21, %v4404_v19  ;;  %v4317_v8 = vadd.f32 %v16984_v42, %v4070_v48  ;;  %v4314_v53 = vadd.f32 %v16984_v42, %v17068_v10 }
 0x344   : > { %22758 = vst [vmem:[#allocation39_spill] sm:$0xff] %v17162_v35  ;;  %v4385_v55 = vmax.f32 %v4341_v24, 0.0  ;;  %v4383_v50 = vmax.f32 %v4339_v40, 0.0  ;;  %v4364_v34 = vmax.f32 %v4320_v12, 0.0  ;;  %v4587_v49 = vpack.c.bf16 %v17146_v60, %v17162_v35 }
 0x345   : > { %v4156_v44 = vpop.f32.mrb[16].mxu0  ;;  %22759 = vst [vmem:[#allocation40_spill] sm:$0xff] %v17171_v43  ;;  %v4386_v7 = vmax.f32 %v4342_v38, 0.0  ;;  %v17185_v19 = vmul.f32 %v17037_v25, %v4423_v9  ;;  %v4340_v48 = vadd.f32 %v16987_v13, %v4076_v59  ;;  %v4588_v38 = vpack.c.bf16 %v17157_v3, %v17171_v43 }
 0x346   : > { %v17168_v36 = vpop.f32.mrb[17].mxu0  ;;  %v4429_v18 = vmin.f32 %v4385_v55, 6.0  ;;  %v4380_v10 = vmax.f32 %v4336_v41, 0.0  ;;  %v432_v40 = vrot.slane %v17040_v5, %v22723_v52  ;;  %v17195_v12 = vrot.slane %v439_v45, %v16947_v57  ;;  %4641 = vrot.lane.b32.xlu0 %v4587_v49, %s15534_s23 }
 0x347   : > { %v17174_v22 = vpop.f32.mrb[16].mxu1  ;;  %v4160_v0 = vpop.f32.mrb[18].mxu0  ;;  %22760 = vst [vmem:[#allocation41_spill] sm:$0xff] %v17185_v19  ;;  %v4430_v35 = vmin.f32 %v4386_v7, 6.0  ;;  %v17199_v60 = vmul.f32 %v17037_v25, %v4401_v6  ;;  %v4361_v59 = vmax.f32 %v4317_v8, 0.0  ;;  %v4318_v55 = vadd.f32 %v16984_v42, %v17113_v15  ;;  %4643 = vrot.lane.b32.xlu1 %v4588_v38, %s15534_s23 }
 0x348   : > { %v17180_v24 = vpop.f32.mrb[17].mxu1  ;;  %v17182_v26 = vpop.f32.mrb[19].mxu0  ;;  %22761 = vst [vmem:[#allocation42_spill] sm:$0xff] %v17195_v12  ;;  %v4407_v43 = vmin.f32 %v4363_v27, 6.0  ;;  %v4358_v41 = vmax.f32 %v4314_v53, 0.0  ;;  %v4427_v3 = vmin.f32 %v4383_v50, 6.0  ;;  %v17205_v45 = vrot.slane %v443_v29, %v16947_v57 }
 0x349   : > { %v17190_v21 = vpop.f32.mrb[18].mxu1  ;;  %22762 = vst [vmem:[#allocation43_spill] sm:$0xff] %v17199_v60  ;;  %v4408_v5 = vmin.f32 %v4364_v34, 6.0  ;;  %v4384_v7 = vmax.f32 %v4340_v48, 0.0  ;;  %v17208_v49 = vmul.f32 %v17195_v12, %v4429_v18  ;;  %v4343_v6 = vadd.f32 %v16987_v13, %v4160_v0 }
 0x34a   : > { %v4205_v9 = vpop.f32.mrb[19].mxu1  ;;  %22763 = vst [vmem:[#allocation44_spill] sm:$0xff] %v17205_v45  ;;  %v4585_v8 = vpack.c.bf16 %v17185_v19, %v17199_v60  ;;  %v4424_v15 = vmin.f32 %v4380_v10, 6.0  ;;  %v17216_v27 = vrot.slane %v432_v40, %v16947_v57  ;;  %v442_v50 = vcombine.high %v432_v40, %v22721_v39 }
 0x34b   : > { %22764 = vst [vmem:[#allocation45_spill] sm:$0xff] %v17208_v49  ;;  %v17220_v29 = vmul.f32 %v17205_v45, %v4430_v35  ;;  %v4405_v34 = vmin.f32 %v4361_v59, 6.0  ;;  %v4362_v48 = vmax.f32 %v4318_v55, 0.0  ;;  %v17225_v0 = vmul.f32 %v17195_v12, %v4407_v43 }
 0x34c   : > { %22765 = vst [vmem:[#allocation46_spill] sm:$0xff] %v17216_v27  ;;  %v4321_v18 = vadd.f32 %v16984_v42, %v4156_v44  ;;  %4637 = vrot.lane.b32.xlu1 %v4585_v8, %s15534_s23  ;;  %v4402_v10 = vmin.f32 %v4358_v41, 6.0  ;;  %v17231_v25 = vrot.slane %v17120_v54, %v16947_v57  ;;  %v17234_v39 = vmul.f32 %v17205_v45, %v4408_v5 }
 0x34d   : > { %v17213_v52 = vpop.f32.mrb[20].mxu0  ;;  %22766 = vst [vmem:[#allocation47_spill] sm:$0xff] %v17220_v29  ;;  %22767 = vst [vmem:[#allocation48_spill] sm:$0xff] %v17225_v0  ;;  %v17239_v40 = vmul.f32 %v17216_v27, %v4427_v3  ;;  %v4428_v43 = vmin.f32 %v4384_v7, 6.0  ;;  %v4387_v59 = vmax.f32 %v4343_v6, 0.0  ;;  %v4591_v44 = vpack.c.bf16 %v17208_v49, %v17225_v0 }
 0x34e   : > { %v17222_v53 = vpop.f32.mrb[21].mxu0  ;;  %22768 = vst [vmem:[#allocation49_spill] sm:$0xff] %v17231_v25  ;;  %22769 = vst [vmem:[#allocation50_spill] sm:$0xff] %v17234_v39  ;;  %v17244_v55 = vmul.f32 %v17231_v25, %v4424_v15  ;;  %v4592_v54 = vpack.c.bf16 %v17220_v29, %v17234_v39  ;;  %v17249_v41 = vmul.f32 %v17216_v27, %v4405_v34  ;;  %v4406_v5 = vmin.f32 %v4362_v48, 6.0 }
 0x34f   : > { %v4246_v38 = vpop.f32.mrb[22].mxu0  ;;  %22770 = vst [vmem:[#allocation51_spill] sm:$0xff] %v17239_v40  ;;  %v17252_v8 = vrot.slane %v442_v50, %v16947_v57  ;;  %v4365_v3 = vmax.f32 %v4321_v18, 0.0  ;;  %4649 = vrot.lane.b32.xlu0 %v4591_v44, %s15534_s23  ;;  %v17256_v7 = vmul.f32 %v17231_v25, %v4402_v10  ;;  %v4431_v15 = vmin.f32 %v4387_v59, 6.0 }
 0x350   : > { %v17236_v35 = vpop.f32.mrb[23].mxu0  ;;  %22771 = vst [vmem:[#allocation52_spill] sm:$0xff] %v17244_v55  ;;  %22772 = vst [vmem:[#allocation53_spill] sm:$0xff] %v17249_v41  ;;  %4651 = vrot.lane.b32.xlu1 %v4592_v54, %s15534_s23  ;;  %v4589_v34 = vpack.c.bf16 %v17239_v40, %v17249_v41  ;;  %v17271_v10 = vrot.slane %v16943_v47, %v16947_v57  ;;  %v4346_v47 = vadd.f32 %v16987_v13, %v4205_v9 }
 0x351   : > { %22773 = vst [vmem:[#allocation54_spill] sm:$0xff] %v17252_v8  ;;  %22774 = vst [vmem:[#allocation55_spill] sm:$0xff] %v17256_v7  ;;  %v17260_v6 = vmul.f32 %v17252_v8, %v4428_v43  ;;  %v4586_v48 = vpack.c.bf16 %v17244_v55, %v17256_v7  ;;  %v17267_v50 = vmul.f32 %v17252_v8, %v4406_v5  ;;  %v4409_v18 = vmin.f32 %v4365_v3, 6.0 }
 0x352   : > { %22777 = vst [vmem:[#allocation58_spill] sm:$0xff] %v17271_v10  ;;  %v17276_v43 = vmul.f32 %v17271_v10, %v4431_v15  ;;  %v4345_v5 = vadd.f32 %v16987_v13, %v17190_v21  ;;  %v4323_v21 = vadd.f32 %v16984_v42, %v17174_v22  ;;  %v4347_v8 = vadd.f32 %v16987_v13, %v4246_v38 }
 0x353   : > { %22775 = vst [vmem:[#allocation56_spill] sm:$0xff] %v17260_v6  ;;  %22776 = vst [vmem:[#allocation57_spill] sm:$0xff] %v17267_v50  ;;  %4645 = vrot.lane.b32.xlu0 %v4589_v34, %s15534_s23  ;;  %v4590_v59 = vpack.c.bf16 %v17260_v6, %v17267_v50  ;;  %v17281_v44 = vmul.f32 %v17271_v10, %v4409_v18  ;;  %v22780_v34 = vmov 0  ;;  %v4344_v18 = vadd.f32 %v16987_v13, %v17182_v26 }
 0x354   : > { %4639 = vrot.lane.b32.xlu1 %v4586_v48, %s15534_s23  ;;  %22778 = vst [vmem:[#allocation59_spill] sm:$0xff] %v17276_v43  ;;  %v22781_v34 = vsel %vm17295_vm8, 4294967295, %v22780_v34  ;;  %v4324_v48 = vadd.f32 %v16984_v42, %v17180_v24  ;;  %v4322_v6 = vadd.f32 %v16984_v42, %v17168_v36  ;;  %v4367_v26 = vmax.f32 %v4323_v21, 0.0 }
 0x355   : > { %22779 = vst [vmem:[#allocation60_spill] sm:$0xff] %v17281_v44  ;;  %v4593_v54 = vpack.c.bf16 %v17276_v43, %v17281_v44  ;;  %22782 = vst [vmem:[#allocation61_spill] sm:$0xff] %v22781_v34  ;;  %v4391_v0 = vmax.f32 %v4347_v8, 0.0  ;;  %v4348_v27 = vadd.f32 %v16987_v13, %v17236_v35 }
 0x356   : > { %v4368_v12 = vmax.f32 %v4324_v48, 0.0  ;;  %v4366_v36 = vmax.f32 %v4322_v6, 0.0 }
 0x357   : > { %4647 = vrot.lane.b32.xlu0 %v4590_v59, %s15534_s23  ;;  %v4390_v59 = vmax.f32 %v4346_v47, 0.0  ;;  %v4325_v47 = vadd.f32 %v16984_v42, %v17213_v52  ;;  %v4392_v13 = vmax.f32 %v4348_v27, 0.0 }
 0x358   : > { %v4412_v48 = vmin.f32 %v4368_v12, 6.0 }
 0x359   : > { %v4434_v10 = vmin.f32 %v4390_v59, 6.0  ;;  %v4369_v21 = vmax.f32 %v4325_v47, 0.0  ;;  %v4410_v59 = vmin.f32 %v4366_v36, 6.0  ;;  %v4436_v55 = vmin.f32 %v4392_v13, 6.0 }
 0x35a   : > { %v17339_v12 = vmul.f32 %v16968_v33, %v4412_v48 }
 0x35b   : > { %4653 = vrot.lane.b32.xlu0 %v4593_v54, %s15534_s23  ;;  %v4389_v54 = vmax.f32 %v4345_v5, 0.0  ;;  %v4388_v5 = vmax.f32 %v4344_v18, 0.0  ;;  %v17333_v18 = vmul.f32 %v16968_v33, %v4434_v10  ;;  %v17532_v13 = vmul.f32 %v16965_v16, %v4436_v55 }
 0x35c   : > { %22785 = vst [vmem:[#allocation64_spill] sm:$0xff] %v17339_v12 }
 0x35d   : > { %v4433_v38 = vmin.f32 %v4389_v54, 6.0  ;;  %v4432_v52 = vmin.f32 %v4388_v5, 6.0  ;;  %22783 = vst [vmem:[#allocation62_spill] sm:$0xff] %v17333_v18  ;;  %v17359_v5 = vmul.f32 %v16958_v2, %v4410_v59  ;;  %22794 = vst [vmem:[#allocation73_spill] sm:$0xff] %v17532_v13 }
 0x35f   : > { %v17336_v8 = vmul.f32 %v16961_v11, %v4433_v38  ;;  %v17349_v10 = vmul.f32 %v16958_v2, %v4432_v52  ;;  %22789 = vst [vmem:[#allocation68_spill] sm:$0xff] %v17359_v5 }
 0x361   : > { %22784 = vst [vmem:[#allocation63_spill] sm:$0xff] %v17336_v8  ;;  %22787 = vst [vmem:[#allocation66_spill] sm:$0xff] %v17349_v10  ;;  %v4594_v48 = vpack.c.bf16 %v17349_v10, %v17359_v5 }
 0x3a5   : > { %v17288_v57 = vpop.permute.xlu1 %4621 }
 0x3a6   : > { %v4710_v15 = vsel %vm4665_vm5, 0, %v17288_v57 }
 0x3a7   : > { %v4624_v3 = vpop.permute.xlu0 %4623  ;;  %4718 = vrot.lane.b32.xlu1 %v4710_v15, %s15530_s15 }
 0x3a8   : > { %v17303_v9 = vsel %vm4665_vm5, %v17288_v57, %v4624_v3 }
 0x3a9   : > { %4914 = vmatprep.subr.bf16.mxu1 %v17303_v9 }
 0x3aa   : > { %14585 = vmatpush1.bf16.msk.msra.mxu1 %vm17295_vm8, %v17288_v57  ;;  %v4626_v24 = vpop.permute.xlu1 %4625 }
 0x3ab   : > { %v4628_v50 = vpop.permute.xlu0 %4627  ;;  %4808 = vrot.lane.b32.xlu1 %v4710_v15, %s15529_s14  ;;  %v17326_v43 = vsel %vm4665_vm5, %v4624_v3, %v4626_v24  ;;  %v4411_v15 = vmin.f32 %v4367_v26, 6.0  ;;  %v4435_v3 = vmin.f32 %v4391_v0, 6.0  ;;  %v4596_v0 = vpack.c.bf16 %v17333_v18, %v17339_v12 }
 0x3ac   : > { %v17318_v22 = vsel %vm4665_vm5, %v4626_v24, %v4628_v50  ;;  %v4413_v24 = vmin.f32 %v4369_v21, 6.0 }
 0x3ad   : > { %4724 = vrot.lane.b32.xlu0 %v17318_v22, %s15530_s15  ;;  %v17344_v6 = vmul.f32 %v16961_v11, %v4411_v15  ;;  %v17354_v26 = vmul.f32 %v16954_v1, %v4435_v3 }
 0x3ae   : > { %v17363_v38 = vmul.f32 %v16954_v1, %v4413_v24 }
 0x3af   : > { %v4630_v45 = vpop.permute.xlu1 %4629  ;;  %4722 = vrot.lane.b32.xlu1 %v17326_v43, %s15530_s15  ;;  %22786 = vst [vmem:[#allocation65_spill] sm:$0xff] %v17344_v6  ;;  %22788 = vst [vmem:[#allocation67_spill] sm:$0xff] %v17354_v26  ;;  %v4595_v47 = vpack.c.bf16 %v17336_v8, %v17344_v6 }
 0x3b0   : > { %22790 = vst [vmem:[#allocation69_spill] sm:$0xff] %v17363_v38  ;;  %v4597_v15 = vpack.c.bf16 %v17354_v26, %v17363_v38  ;;  %v4632_v52 = vpop.permute.xlu0 %4631  ;;  %v17373_v3 = vsel %vm4665_vm5, %v4628_v50, %v4630_v45 }
 0x3b1   : > { %4720 = vrot.lane.b32.xlu0 %v17303_v9, %s15530_s15  ;;  %v17380_v24 = vsel %vm4665_vm5, %v4630_v45, %v4632_v52 }
 0x3b3   : > { %4810 = vrot.lane.b32.xlu1 %v17303_v9, %s15529_s14  ;;  %v4634_v54 = vpop.permute.xlu1 %4633 }
 0x3b4   : > { %v17387_v50 = vsel %vm4665_vm5, %v4632_v52, %v4634_v54 }
 0x3b5   : > { %4812 = vrot.lane.b32.xlu0 %v17326_v43, %s15529_s14 }
 0x3b7   : > { %4659 = vrot.lane.b32.xlu1 %v4596_v0, %s15534_s23  ;;  %v4636_v0 = vpop.permute.xlu0 %4635 }
 0x3b8   : > { %v17402_v52 = vsel %vm4665_vm5, %v4634_v54, %v4636_v0 }
 0x3b9   : > { %v4644_v36 = vpop.permute.xlu1 %4643  ;;  %4657 = vrot.lane.b32.xlu0 %v4595_v47, %s15534_s23 }
 0x3bb   : > { %4655 = vrot.lane.b32.xlu1 %v4594_v48, %s15534_s23  ;;  %v4642_v45 = vpop.permute.xlu0 %4641 }
 0x3bc   : > { %v17413_v1 = vsel %vm4665_vm5, %v4642_v45, %v4644_v36 }
 0x3bd   : > { %4661 = vrot.lane.b32.xlu0 %v4597_v15, %s15534_s23  ;;  %22791 = vst [vmem:[#allocation70_spill] sm:$0xff] %v17413_v1 }
 0x3be   : > { %v4638_v21 = vpop.permute.xlu1 %4637 }
 0x3bf   : > { %4726 = vrot.lane.b32.xlu1 %v17373_v3, %s15530_s15  ;;  %v17393_v15 = vsel %vm4665_vm5, %v4636_v0, %v4638_v21 }
 0x3c1   : > { %4814 = vrot.lane.b32.xlu0 %v17318_v22, %s15529_s14 }
 0x3c2   : > { %v4652_v59 = vpop.permute.xlu1 %4651 }
 0x3c3   : > { %4816 = vrot.lane.b32.xlu1 %v17373_v3, %s15529_s14 }
 0x3c5   : > { %4728 = vrot.lane.b32.xlu0 %v17380_v24, %s15530_s15 }
 0x3c6   : > { %v4640_v47 = vpop.permute.xlu1 %4639 }
 0x3c7   : > { %v17390_v48 = vsel %vm4665_vm5, %v4638_v21, %v4640_v47  ;;  %4730 = vrot.lane.b32.xlu1 %v17387_v50, %s15530_s15  ;;  %v4650_v21 = vpop.permute.xlu0 %4649  ;;  %v17426_v0 = vsel %vm4665_vm5, %v4640_v47, %v4642_v45 }
 0x3c8   : > { %5086 = vmatprep.subr.bf16.mxu0 %v17390_v48 }
 0x3c9   : > { %5087 = vmatpush1.bf16.msra.mxu0 %v17393_v15  ;;  %4818 = vrot.lane.b32.xlu0 %v17380_v24, %s15529_s14 }
 0x3cb   : > { %4820 = vrot.lane.b32.xlu1 %v17387_v50, %s15529_s14  ;;  %v17415_v2 = vpop.permute.xlu0 %4645 }
 0x3cc   : > { %v17423_v54 = vsel %vm4665_vm5, %v4644_v36, %v17415_v2  ;;  %v17439_v36 = vsel %vm4665_vm5, %v4650_v21, %v4652_v59 }
 0x3cd   : > { %4732 = vrot.lane.b32.xlu0 %v17402_v52, %s15530_s15  ;;  %22792 = vst [vmem:[#allocation71_spill] sm:$0xff] %v17439_v36 }
 0x3cf   : > { %4734 = vrot.lane.b32.xlu1 %v17393_v15, %s15530_s15  ;;  %v17432_v38 = vpop.permute.xlu0 %4647 }
 0x3d0   : > { %v17453_v45 = vsel %vm4665_vm5, %v17432_v38, %v4650_v21  ;;  %v17579_v37 = vsel %vm4665_vm5, %v17415_v2, %v17432_v38 }
 0x3d1   : > { %4822 = vrot.lane.b32.xlu0 %v17402_v52, %s15529_s14 }
 0x3d3   : > { %4824 = vrot.lane.b32.xlu1 %v17393_v15, %s15529_s14  ;;  %v17441_v5 = vpop.permute.xlu0 %4653 }
 0x3d4   : > { %v17449_v47 = vsel %vm4665_vm5, %v4652_v59, %v17441_v5 }
 0x3d5   : > { %4740 = vrot.lane.b32.xlu0 %v17413_v1, %s15530_s15 }
 0x3d7   : > { %4742 = vrot.lane.b32.xlu1 %v17423_v54, %s15530_s15 }
 0x3d9   : > { %4738 = vrot.lane.b32.xlu0 %v17426_v0, %s15530_s15 }
 0x3db   : > { %4830 = vrot.lane.b32.xlu1 %v17413_v1, %s15529_s14 }
 0x3dd   : > { %4832 = vrot.lane.b32.xlu0 %v17423_v54, %s15529_s14 }
 0x3df   : > { %4828 = vrot.lane.b32.xlu1 %v17426_v0, %s15529_s14 }
 0x3e1   : > { %4748 = vrot.lane.b32.xlu0 %v17439_v36, %s15530_s15 }
 0x3e3   : > { %4750 = vrot.lane.b32.xlu1 %v17449_v47, %s15530_s15 }
 0x3e5   : > { %4746 = vrot.lane.b32.xlu0 %v17453_v45, %s15530_s15 }
 0x3e7   : > { %4838 = vrot.lane.b32.xlu1 %v17439_v36, %s15529_s14 }
 0x3e9   : > { %4840 = vrot.lane.b32.xlu0 %v17449_v47, %s15529_s14 }
 0x3eb   : > { %4836 = vrot.lane.b32.xlu1 %v17453_v45, %s15529_s14 }
 0x419   : > { %v17465_v59 = vpop.permute.xlu1 %4718 }
 0x41d   : > { %v17467_v26 = vpop.permute.xlu1 %4808 }
 0x41f   : > { %v4725_v21 = vpop.permute.xlu0 %4724 }
 0x421   : > { %v4723_v10 = vpop.permute.xlu1 %4722 }
 0x423   : > { %v4721_v33 = vpop.permute.xlu0 %4720 }
 0x424   : > { %v17470_v11 = vsel %vm1034_vm1, %v4721_v33, %v4723_v10  ;;  %v17474_v12 = vsel %vm1034_vm1, %v17465_v59, %v4721_v33  ;;  %v17489_v33 = vld [vmem:[%s22167_s3 + $0x8] sm:$0xff]  }
 0x425   : > { %4916 = vmatprep.subr.bf16.mxu1 %v17470_v11  ;;  %v4811_v6 = vpop.permute.xlu1 %4810 }
 0x426   : > { %4917 = vmatpush1.bf16.msra.mxu1 %v17474_v12  ;;  %v17484_v49 = vsel %vm1146_vm6, %v17467_v26, %v4811_v6 }
 0x427   : > { %v4813_v18 = vpop.permute.xlu0 %4812 }
 0x428   : > { %v17479_v8 = vsel %vm1146_vm6, %v4811_v6, %v4813_v18  ;;  %v4326_v6 = vadd.f32 %v16984_v42, %v17222_v53 }
 0x429   : > { %4918 = vmatprep.subr.bf16.mxu1 %v17479_v8  ;;  %v4660_v44 = vpop.permute.xlu1 %4659 }
 0x42a   : > { %4919 = vmatpush1.bf16.msra.mxu1 %v17484_v49  ;;  %v4370_v53 = vmax.f32 %v4326_v6, 0.0 }
 0x42b   : > { %v4658_v39 = vpop.permute.xlu0 %4657  ;;  %4957 = vmatprep.subr.bf16.mxu1 %v17318_v22 }
 0x42c   : > { %v17496_v40 = vsel %vm4665_vm5, %v4658_v39, %v4660_v44 }
 0x42d   : > { %22793 = vst [vmem:[#allocation72_spill] sm:$0xff] %v17496_v40  ;;  %4756 = vrot.lane.b32.xlu0 %v17496_v40, %s15530_s15  ;;  %14586 = vmatmul.mubr.msk.bf16.vlgmr.msra.gmra.mrb[20].mxu1 %vm4910_vm13, %v17489_v33  ;;  %v4656_v29 = vpop.permute.xlu1 %4655 }
 0x42e   : > { %4958 = vmatpush1.bf16.msra.mxu1 %v17326_v43  ;;  %4989 = vmatprep.mubr.bf16.mxu1 %v22700_v30  ;;  %v17507_v35 = vsel %vm4665_vm5, %v4656_v29, %v4658_v39  ;;  %v4414_v39 = vmin.f32 %v4370_v53, 6.0  ;;  %v17594_v2 = vsel %vm4665_vm5, %v17441_v5, %v4656_v29 }
 0x42f   : > { %v17509_v41 = vpop.permute.xlu0 %4661 }
 0x430   : > { %v17513_v42 = vsel %vm4665_vm5, %v4660_v44, %v17509_v41  ;;  %v17528_v44 = vsel %vm1034_vm1, %v4723_v10, %v4725_v21  ;;  %v17539_v53 = vmul.f32 %v16965_v16, %v4414_v39 }
 0x431   : > { %4758 = vrot.lane.b32.xlu1 %v17513_v42, %s15530_s15  ;;  %4754 = vrot.lane.b32.xlu0 %v17507_v35, %s15530_s15  ;;  %v4727_v25 = vpop.permute.xlu1 %4726 }
 0x432   : > { %v17520_v27 = vsel %vm1034_vm1, %v4725_v21, %v4727_v25  ;;  %22795 = vst [vmem:[#allocation74_spill] sm:$0xff] %v17539_v53  ;;  %v4598_v62 = vpack.c.bf16 %v17532_v13, %v17539_v53 }
 0x433   : > { %v4815_v19 = vpop.permute.xlu0 %4814  ;;  %4959 = vmatprep.subr.bf16.mxu1 %v17520_v27 }
 0x434   : > { %4960 = vmatpush1.bf16.msra.mxu1 %v17528_v44  ;;  %v17546_v10 = vsel %vm1146_vm6, %v4813_v18, %v4815_v19 }
 0x435   : > { %4846 = vrot.lane.b32.xlu1 %v17496_v40, %s15529_s14  ;;  %4848 = vrot.lane.b32.xlu0 %v17513_v42, %s15529_s14  ;;  %v4817_v6 = vpop.permute.xlu1 %4816 }
 0x436   : > { %v17535_v60 = vsel %vm1146_vm6, %v4815_v19, %v4817_v6 }
 0x437   : > { %v4729_v7 = vpop.permute.xlu0 %4728  ;;  %4961 = vmatprep.subr.bf16.mxu1 %v17535_v60 }
 0x438   : > { %4962 = vmatpush1.bf16.msra.mxu1 %v17546_v10 }
 0x439   : > { %4844 = vrot.lane.b32.xlu1 %v17507_v35, %s15529_s14  ;;  %4716 = vrot.lane.b32.xlu0 %v22700_v30, %s15530_s15  ;;  %v4731_v55 = vpop.permute.xlu1 %4730 }
 0x43a   : > { %5000 = vmatprep.subr.bf16.mxu1 %v17380_v24  ;;  %v17559_v19 = vsel %vm1034_vm1, %v4729_v7, %v4731_v55 }
 0x43b   : > { %v4819_v21 = vpop.permute.xlu0 %4818  ;;  %14587 = vmatmul.mubr.msk.bf16.vlgmr.msra.gmra.mrb[24].mxu1 %vm4910_vm13, %v17489_v33 }
 0x43c   : > { %5001 = vmatpush1.bf16.msra.mxu1 %v17373_v3  ;;  %5032 = vmatprep.mubr.bf16.mxu1 %v22700_v30 }
 0x43d   : > { %4806 = vrot.lane.b32.xlu1 %v22700_v30, %s15529_s14  ;;  %4663 = vrot.lane.b32.xlu0 %v4598_v62, %s15534_s23  ;;  %v4821_v39 = vpop.permute.xlu1 %4820  ;;  %v17568_v62 = vsel %vm1034_vm1, %v4727_v25, %v4729_v7  ;;  %v17587_v25 = vsel %vm1146_vm6, %v4817_v6, %v4819_v21 }
 0x43e   : > { %5002 = vmatprep.subr.bf16.mxu1 %v17559_v19  ;;  %v17574_v53 = vsel %vm1146_vm6, %v4819_v21, %v4821_v39 }
 0x43f   : > { %v4733_v18 = vpop.permute.xlu0 %4732 }
 0x440   : > { %5003 = vmatpush1.bf16.msra.mxu1 %v17568_v62  ;;  %v17615_v5 = vsel %vm1034_vm1, %v4731_v55, %v4733_v18 }
 0x441   : > { %4736 = vrot.lane.b32.xlu1 %v17390_v48, %s15530_s15  ;;  %4826 = vrot.lane.b32.xlu0 %v17390_v48, %s15529_s14  ;;  %v17570_v16 = vpop.permute.xlu1 %4734 }
 0x442   : > { %5004 = vmatprep.subr.bf16.mxu1 %v17574_v53  ;;  %v17608_v6 = vsel %vm1034_vm1, %v4733_v18, %v17570_v16 }
 0x443   : > { %v4823_v13 = vpop.permute.xlu0 %4822  ;;  %22796 = vst [vmem:[#allocation75_spill] sm:$0xff] %v17608_v6 }
 0x444   : > { %5005 = vmatpush1.bf16.msra.mxu1 %v17587_v25  ;;  %v17626_v58 = vsel %vm1146_vm6, %v4821_v39, %v4823_v13 }
 0x445   : > { %4744 = vrot.lane.b32.xlu1 %v17579_v37, %s15530_s15  ;;  %4834 = vrot.lane.b32.xlu0 %v17579_v37, %s15529_s14  ;;  %v17589_v7 = vpop.permute.xlu1 %4824 }
 0x446   : > { %5043 = vmatprep.subr.bf16.mxu1 %v17402_v52  ;;  %v17620_v21 = vsel %vm1146_vm6, %v4823_v13, %v17589_v7 }
 0x447   : > { %v4741_v61 = vpop.permute.xlu0 %4740  ;;  %14588 = vmatmul.mubr.msk.bf16.vlgmr.msra.gmra.mrb[28].mxu1 %vm4910_vm13, %v17489_v33  ;;  %22797 = vst [vmem:[#allocation76_spill] sm:$0xff] %v17620_v21 }
 0x448   : > { %5044 = vmatpush1.bf16.msra.mxu1 %v17387_v50  ;;  %5075 = vmatprep.mubr.bf16.mxu1 %v22700_v30 }
 0x449   : > { %4842 = vrot.lane.b32.xlu0 %v17594_v2, %s15529_s14  ;;  %4752 = vrot.lane.b32.xlu1 %v17594_v2, %s15530_s15  ;;  %v17603_v38 = vpop.permute.xlu1 %4742 }
 0x44a   : > { %5045 = vmatprep.subr.bf16.mxu1 %v17608_v6  ;;  %v17637_v18 = vsel %vm1034_vm1, %v4741_v61, %v17603_v38 }
 0x44b   : > { %v17612_v29 = vpop.permute.xlu0 %4738  ;;  %22798 = vst [vmem:[#allocation77_spill] sm:$0xff] %v17637_v18 }
 0x44c   : > { %5046 = vmatpush1.bf16.msra.mxu1 %v17615_v5  ;;  %v17643_v13 = vsel %vm1034_vm1, %v17612_v29, %v4741_v61 }
 0x44d   : > { %v4831_v23 = vpop.permute.xlu1 %4830  ;;  %5047 = vmatprep.subr.bf16.mxu1 %v17620_v21 }
 0x44f   : > { %v17623_v56 = vpop.permute.xlu0 %4832 }
 0x450   : > { %5048 = vmatpush1.bf16.msra.mxu1 %v17626_v58  ;;  %v17650_v17 = vsel %vm1146_vm6, %v4831_v23, %v17623_v56 }
 0x451   : > { %5129 = vmatprep.subr.bf16.mxu1 %v17413_v1  ;;  %v17630_v55 = vpop.permute.xlu1 %4828  ;;  %22799 = vst [vmem:[#allocation78_spill] sm:$0xff] %v17650_v17 }
 0x452   : > { %v17657_v63 = vsel %vm1146_vm6, %v17630_v55, %v4831_v23 }
 0x453   : > { %14589 = vmatmul.mubr.msk.bf16.vlgmr.msra.gmra.mrb[32].mxu1 %vm4910_vm13, %v17489_v33  ;;  %v4749_v14 = vpop.permute.xlu0 %4748 }
 0x454   : > { %5130 = vmatpush1.bf16.msra.mxu1 %v17426_v0  ;;  %5161 = vmatprep.mubr.bf16.mxu1 %v22700_v30 }
 0x455   : > { %5131 = vmatprep.subr.bf16.mxu1 %v17637_v18  ;;  %v17645_v39 = vpop.permute.xlu1 %4750 }
 0x456   : > { %v17666_v20 = vsel %vm1034_vm1, %v4749_v14, %v17645_v39 }
 0x457   : > { %v17653_v4 = vpop.permute.xlu0 %4746  ;;  %22800 = vst [vmem:[#allocation79_spill] sm:$0xff] %v17666_v20 }
 0x458   : > { %5132 = vmatpush1.bf16.msra.mxu1 %v17643_v13  ;;  %v17674_v23 = vsel %vm1034_vm1, %v17653_v4, %v4749_v14 }
 0x459   : > { %5133 = vmatprep.subr.bf16.mxu1 %v17650_v17  ;;  %v4839_v61 = vpop.permute.xlu1 %4838 }
 0x45b   : > { %v17669_v46 = vpop.permute.xlu0 %4840 }
 0x45c   : > { %5134 = vmatpush1.bf16.msra.mxu1 %v17657_v63  ;;  %v17681_v31 = vsel %vm1146_vm6, %v4839_v61, %v17669_v46 }
 0x45d   : > { %5215 = vmatprep.subr.bf16.mxu1 %v17439_v36  ;;  %v17676_v51 = vpop.permute.xlu1 %4836  ;;  %22801 = vst [vmem:[#allocation80_spill] sm:$0xff] %v17681_v31 }
 0x45e   : > { %v17686_v28 = vsel %vm1146_vm6, %v17676_v51, %v4839_v61 }
 0x45f   : > { %14591 = vmatmul.mubr.msk.bf16.vlgmr.msra.gmra.mrb[36].mxu1 %vm4910_vm13, %v17489_v33 }
 0x460   : > { %5216 = vmatpush1.bf16.msra.mxu1 %v17453_v45  ;;  %5247 = vmatprep.mubr.bf16.mxu1 %v22700_v30 }
 0x461   : > { %5217 = vmatprep.subr.bf16.mxu1 %v17666_v20 }
 0x464   : > { %5218 = vmatpush1.bf16.msra.mxu1 %v17674_v23 }
 0x465   : > { %5219 = vmatprep.subr.bf16.mxu1 %v17681_v31 }
 0x468   : > { %5220 = vmatpush1.bf16.msra.mxu1 %v17686_v28 }
 0x469   : > { %5301 = vmatprep.subr.bf16.mxu1 %v17496_v40 }
 0x46b   : > { %14593 = vmatmul.mubr.msk.bf16.vlgmr.msra.gmra.mrb[40].mxu1 %vm4910_vm13, %v17489_v33 }
 0x46c   : > { %5302 = vmatpush1.bf16.msra.mxu1 %v17507_v35  ;;  %5333 = vmatprep.mubr.bf16.mxu1 %v22700_v30 }
 0x49f   : > { %v4757_v14 = vpop.permute.xlu0 %4756 }
 0x4a3   : > { %v17694_v32 = vpop.permute.xlu0 %4754  ;;  %v17696_v20 = vpop.permute.xlu1 %4758 }
 0x4a4   : > { %v17700_v61 = vsel %vm1034_vm1, %v4757_v14, %v17696_v20  ;;  %v17704_v31 = vsel %vm1034_vm1, %v17694_v32, %v4757_v14 }
 0x4a5   : > { %22802 = vst [vmem:[#allocation81_spill] sm:$0xff] %v17700_v61  ;;  %5303 = vmatprep.subr.bf16.mxu1 %v17700_v61 }
 0x4a6   : > { %5304 = vmatpush1.bf16.msra.mxu1 %v17704_v31 }
 0x4a7   : > { %v17708_v40 = vpop.permute.xlu0 %4848  ;;  %v4847_v36 = vpop.permute.xlu1 %4846 }
 0x4a8   : > { %v17712_v17 = vsel %vm1146_vm6, %v4847_v36, %v17708_v40 }
 0x4a9   : > { %22803 = vst [vmem:[#allocation82_spill] sm:$0xff] %v17712_v17  ;;  %5305 = vmatprep.subr.bf16.mxu1 %v17712_v17 }
 0x4ab   : > { %v17715_v18 = vpop.permute.xlu0 %4716  ;;  %v17717_v1 = vpop.permute.xlu1 %4844 }
 0x4ac   : > { %22804 = vst [vmem:[#allocation83_spill] sm:$0xff] %v17715_v18  ;;  %v17721_v14 = vsel %vm1146_vm6, %v17717_v1, %v4847_v36 }
 0x4ad   : > { %5306 = vmatpush1.bf16.msra.mxu1 %v17721_v14 }
 0x4ae   : > { %14599 = vmatprep.subr.msk.bf16.mxu1 %vm17295_vm8, %v17288_v57 }
 0x4af   : > { %v17727_v61 = vpop.permute.xlu0 %4663  ;;  %v17729_v21 = vpop.permute.xlu1 %4806 }
 0x4b0   : > { %22805 = vst [vmem:[#allocation84_spill] sm:$0xff] %v17727_v61  ;;  %22806 = vst [vmem:[#allocation85_spill] sm:$0xff] %v17729_v21  ;;  %v4713_v17 = vsel %vm4665_vm5, %v17727_v61, 0  ;;  %v17736_v6 = vsel %vm4665_vm5, %v17509_v41, %v17727_v61  ;;  %14595 = vmatmul.mubr.msk.bf16.vlgmr.msra.gmra.mrb[44].mxu1 %vm4910_vm13, %v17489_v33  ;;  %v4762_v61 = vsel %vm1034_vm1, %v17715_v18, %v17465_v59 }
 0x4b1   : > { %4897 = vrot.lane.b32.xlu0 %v4713_v17, %s15530_s15  ;;  %4760 = vrot.lane.b32.xlu1 %v17736_v6, %s15530_s15  ;;  %v4852_v59 = vsel %vm1146_vm6, %v17729_v21, %v17467_v26 }
 0x4b2   : > { %5396 = vmatpush1.bf16.msra.mxu1 %v22700_v30  ;;  %5427 = vmatprep.mubr.bf16.mxu1 %v22700_v30 }
 0x4b3   : > { %5397 = vmatprep.subr.bf16.mxu1 %v17474_v12  ;;  %v4737_v57 = vpop.permute.xlu1 %4736  ;;  %v4827_v36 = vpop.permute.xlu0 %4826  ;;  %v4576_v12 = vld [vmem:[%s22168_s4 + $0x8] sm:$0xff] }
 0x4b4   : > { %v17748_v41 = vsel %vm1034_vm1, %v4737_v57, %v17612_v29  ;;  %v17752_v34 = vsel %vm1034_vm1, %v17570_v16, %v4737_v57  ;;  %v4575_v16 = vld [vmem:[%s22168_s4] sm:$0xff] }
 0x4b5   : > { %4901 = vrot.lane.b32.xlu0 %v4713_v17, %s15529_s14  ;;  %4850 = vrot.lane.b32.xlu1 %v17736_v6, %s15529_s14  ;;  %v17771_v17 = vsel %vm1146_vm6, %v4827_v36, %v17630_v55  ;;  %v17780_v29 = vld [vmem:[%s22167_s3] sm:$0xff]  }
 0x4b6   : > { %5088 = vmatprep.subr.bf16.mxu0 %v17748_v41  ;;  %5398 = vmatpush1.bf16.msra.mxu1 %v4762_v61 }
 0x4b7   : > { %5089 = vmatpush1.bf16.msra.mxu0 %v17752_v34  ;;  %5399 = vmatprep.subr.bf16.mxu1 %v17484_v49  ;;  %v17784_v49 = vsel %vm1146_vm6, %v17589_v7, %v4827_v36  ;;  %v4745_v55 = vpop.permute.xlu1 %4744  ;;  %v4835_v7 = vpop.permute.xlu0 %4834 }
 0x4b8   : > { %5090 = vmatprep.subr.bf16.mxu0 %v17771_v17  ;;  %v17798_v26 = vsel %vm1034_vm1, %v4745_v55, %v17653_v4  ;;  %v17806_v61 = vsel %vm1034_vm1, %v17603_v38, %v4745_v55  ;;  %v17812_v4 = vsel %vm1146_vm6, %v4835_v7, %v17676_v51  ;;  %v17818_v57 = vsel %vm1146_vm6, %v17623_v56, %v4835_v7  ;;  %v22823_v55 = vld [vmem:[#allocation7_spill] sm:$0xff] }
 0x4b9   : > { %6404 = vperm.xlu0 %15432, %v4576_v12   ;;  %6399 = vperm.xlu1 %15433, %v4575_v16  }
 0x4ba   : > { %5400 = vmatpush1.bf16.msra.mxu1 %v4852_v59 }
 0x4bb   : > { %5091 = vmatpush1.bf16.msra.mxu0 %v17784_v49  ;;  %5438 = vmatprep.subr.bf16.mxu1 %v17326_v43  ;;  %v4753_v38 = vpop.permute.xlu1 %4752  ;;  %v4843_v51 = vpop.permute.xlu0 %4842 }
 0x4bc   : > { %5172 = vmatprep.subr.bf16.mxu0 %v17579_v37  ;;  %v17832_v56 = vsel %vm1034_vm1, %v4753_v38, %v17694_v32  ;;  %v17840_v36 = vsel %vm1034_vm1, %v17645_v39, %v4753_v38  ;;  %v17846_v32 = vsel %vm1146_vm6, %v4843_v51, %v17717_v1  ;;  %v17852_v12 = vsel %vm1146_vm6, %v17669_v46, %v4843_v51  ;;  %v17907_v1 = vld [vmem:[%s22167_s3 + $0x10] sm:$0xff]  }
 0x4bd   : > { %14600 = vmatmul.mubr.msk.bf16.vlgmr.msra.gmra.mrb[20].mxu1 %vm4910_vm13, %v17780_v29 }
 0x4be   : > { %5439 = vmatpush1.bf16.msra.mxu1 %v17303_v9  ;;  %14590 = vmatmul.mubr.msk.bf16.vlgmr.msra.gmra.mrb[24].mxu0 %vm4910_vm13, %v17489_v33 }
 0x4bf   : > { %5173 = vmatpush1.bf16.msra.mxu0 %v17423_v54  ;;  %5440 = vmatprep.subr.bf16.mxu1 %v17528_v44 }
 0x4c0   : > { %5174 = vmatprep.subr.bf16.mxu0 %v17798_v26  ;;  %5470 = vmatprep.mubr.bf16.mxu1 %v22700_v30 }
 0x4c1   : > { %5204 = vmatprep.mubr.bf16.mxu0 %v22700_v30 }
 0x4c2   : > { %5441 = vmatpush1.bf16.msra.mxu1 %v17470_v11 }
 0x4c3   : > { %5175 = vmatpush1.bf16.msra.mxu0 %v17806_v61  ;;  %5442 = vmatprep.subr.bf16.mxu1 %v17546_v10 }
 0x4c4   : > { %5176 = vmatprep.subr.bf16.mxu0 %v17812_v4 }
 0x4c6   : > { %5443 = vmatpush1.bf16.msra.mxu1 %v17479_v8 }
 0x4c7   : > { %5177 = vmatpush1.bf16.msra.mxu0 %v17818_v57  ;;  %5481 = vmatprep.subr.bf16.mxu1 %v17373_v3 }
 0x4c8   : > { %5258 = vmatprep.subr.bf16.mxu0 %v17594_v2 }
 0x4c9   : > { %14601 = vmatmul.mubr.msk.bf16.vlgmr.msra.gmra.mrb[24].mxu1 %vm4910_vm13, %v17780_v29 }
 0x4ca   : > { %5482 = vmatpush1.bf16.msra.mxu1 %v17318_v22  ;;  %14592 = vmatmul.mubr.msk.bf16.vlgmr.msra.gmra.mrb[28].mxu0 %vm4910_vm13, %v17489_v33 }
 0x4cb   : > { %5259 = vmatpush1.bf16.msra.mxu0 %v17449_v47  ;;  %5483 = vmatprep.subr.bf16.mxu1 %v17568_v62 }
 0x4cc   : > { %5260 = vmatprep.subr.bf16.mxu0 %v17832_v56  ;;  %5513 = vmatprep.mubr.bf16.mxu1 %v22700_v30 }
 0x4cd   : > { %5290 = vmatprep.mubr.bf16.mxu0 %v22700_v30 }
 0x4ce   : > { %5484 = vmatpush1.bf16.msra.mxu1 %v17520_v27 }
 0x4cf   : > { %5261 = vmatpush1.bf16.msra.mxu0 %v17840_v36  ;;  %5485 = vmatprep.subr.bf16.mxu1 %v17587_v25 }
 0x4d0   : > { %5262 = vmatprep.subr.bf16.mxu0 %v17846_v32 }
 0x4d2   : > { %5486 = vmatpush1.bf16.msra.mxu1 %v17535_v60 }
 0x4d3   : > { %5263 = vmatpush1.bf16.msra.mxu0 %v17852_v12  ;;  %5524 = vmatprep.subr.bf16.mxu1 %v17387_v50 }
 0x4d4   : > { %5344 = vmatprep.subr.bf16.mxu0 %v17736_v6 }
 0x4d5   : > { %14602 = vmatmul.mubr.msk.bf16.vlgmr.msra.gmra.mrb[28].mxu1 %vm4910_vm13, %v17780_v29 }
 0x4d6   : > { %5525 = vmatpush1.bf16.msra.mxu1 %v17380_v24  ;;  %14594 = vmatmul.mubr.msk.bf16.vlgmr.msra.gmra.mrb[32].mxu0 %vm4910_vm13, %v17489_v33 }
 0x4d7   : > { %5345 = vmatpush1.bf16.msra.mxu0 %v17513_v42  ;;  %5526 = vmatprep.subr.bf16.mxu1 %v17615_v5 }
 0x4d8   : > { %5556 = vmatprep.mubr.bf16.mxu1 %v22700_v30  ;;  %5376 = vmatprep.mubr.bf16.mxu0 %v22700_v30 }
 0x4da   : > { %5527 = vmatpush1.bf16.msra.mxu1 %v17559_v19 }
 0x4db   : > { %5528 = vmatprep.subr.bf16.mxu1 %v17626_v58 }
 0x4de   : > { %5529 = vmatpush1.bf16.msra.mxu1 %v17574_v53 }
 0x4df   : > { %5610 = vmatprep.subr.bf16.mxu1 %v17426_v0 }
 0x4e1   : > { %14603 = vmatmul.mubr.msk.bf16.vlgmr.msra.gmra.mrb[32].mxu1 %vm4910_vm13, %v17780_v29 }
 0x4e2   : > { %5611 = vmatpush1.bf16.msra.mxu1 %v17390_v48  ;;  %5642 = vmatprep.mubr.bf16.mxu1 %v22700_v30 }
 0x4e3   : > { %5612 = vmatprep.subr.bf16.mxu1 %v17643_v13 }
 0x4e6   : > { %5613 = vmatpush1.bf16.msra.mxu1 %v17748_v41 }
 0x4e7   : > { %5614 = vmatprep.subr.bf16.mxu1 %v17657_v63 }
 0x4ea   : > { %5615 = vmatpush1.bf16.msra.mxu1 %v17771_v17 }
 0x4eb   : > { %5696 = vmatprep.subr.bf16.mxu1 %v17453_v45 }
 0x4ed   : > { %14605 = vmatmul.mubr.msk.bf16.vlgmr.msra.gmra.mrb[36].mxu1 %vm4910_vm13, %v17780_v29 }
 0x4ee   : > { %5697 = vmatpush1.bf16.msra.mxu1 %v17579_v37  ;;  %5728 = vmatprep.mubr.bf16.mxu1 %v22700_v30 }
 0x4ef   : > { %5698 = vmatprep.subr.bf16.mxu1 %v17674_v23 }
 0x4f2   : > { %5699 = vmatpush1.bf16.msra.mxu1 %v17798_v26 }
 0x4f3   : > { %5700 = vmatprep.subr.bf16.mxu1 %v17686_v28 }
 0x4f6   : > { %5701 = vmatpush1.bf16.msra.mxu1 %v17812_v4 }
 0x4f7   : > { %5782 = vmatprep.subr.bf16.mxu1 %v17507_v35 }
 0x4f9   : > { %14607 = vmatmul.mubr.msk.bf16.vlgmr.msra.gmra.mrb[40].mxu1 %vm4910_vm13, %v17780_v29 }
 0x4fa   : > { %5783 = vmatpush1.bf16.msra.mxu1 %v17594_v2  ;;  %5814 = vmatprep.mubr.bf16.mxu1 %v22700_v30 }
 0x4fb   : > { %5784 = vmatprep.subr.bf16.mxu1 %v17704_v31 }
 0x4fe   : > { %5785 = vmatpush1.bf16.msra.mxu1 %v17832_v56 }
 0x4ff   : > { %5786 = vmatprep.subr.bf16.mxu1 %v17721_v14 }
 0x502   : > { %5787 = vmatpush1.bf16.msra.mxu1 %v17846_v32 }
 0x503   : > { %5880 = vmatprep.subr.bf16.mxu1 %v17326_v43 }
 0x505   : > { %14609 = vmatmul.mubr.msk.bf16.vlgmr.msra.gmra.mrb[44].mxu1 %vm4910_vm13, %v17780_v29 }
 0x506   : > { %5881 = vmatpush1.bf16.msra.mxu1 %v17303_v9  ;;  %5912 = vmatprep.mubr.bf16.mxu1 %v22700_v30 }
 0x507   : > { %5882 = vmatprep.subr.bf16.mxu1 %v17528_v44  ;;  %v22819_v44 = vld [vmem:[#allocation21_spill] sm:$0xff] }
 0x50a   : > { %5883 = vmatpush1.bf16.msra.mxu1 %v17470_v11 }
 0x50b   : > { %5884 = vmatprep.subr.bf16.mxu1 %v17546_v10 }
 0x50e   : > { %5885 = vmatpush1.bf16.msra.mxu1 %v17479_v8 }
 0x50f   : > { %5923 = vmatprep.subr.bf16.mxu1 %v17373_v3  ;;  %v22809_v3 = vld [vmem:[#allocation70_spill] sm:$0xff] }
 0x511   : > { %14612 = vmatmul.mubr.msk.bf16.vlgmr.msra.gmra.mrb[20].mxu1 %vm4910_vm13, %v17907_v1 }
 0x512   : > { %5924 = vmatpush1.bf16.msra.mxu1 %v17318_v22  ;;  %5955 = vmatprep.mubr.bf16.mxu1 %v22700_v30 }
 0x513   : > { %5925 = vmatprep.subr.bf16.mxu1 %v17568_v62  ;;  %v22820_v62 = vld [vmem:[#allocation22_spill] sm:$0xff] }
 0x516   : > { %5926 = vmatpush1.bf16.msra.mxu1 %v17520_v27 }
 0x517   : > { %5927 = vmatprep.subr.bf16.mxu1 %v17587_v25 }
 0x51a   : > { %5928 = vmatpush1.bf16.msra.mxu1 %v17535_v60 }
 0x51b   : > { %5966 = vmatprep.subr.bf16.mxu1 %v17387_v50  ;;  %v22812_v50 = vld [vmem:[#allocation71_spill] sm:$0xff] }
 0x51d   : > { %14613 = vmatmul.mubr.msk.bf16.vlgmr.msra.gmra.mrb[24].mxu1 %vm4910_vm13, %v17907_v1 }
 0x51e   : > { %5967 = vmatpush1.bf16.msra.mxu1 %v17380_v24  ;;  %5998 = vmatprep.mubr.bf16.mxu1 %v22700_v30  ;;  %v22811_v24 = vld [vmem:[#allocation78_spill] sm:$0xff] }
 0x51f   : > { %5968 = vmatprep.subr.bf16.mxu1 %v17615_v5  ;;  %v22821_v5 = vld [vmem:[#allocation16_spill] sm:$0xff] }
 0x522   : > { %5969 = vmatpush1.bf16.msra.mxu1 %v17559_v19 }
 0x523   : > { %5970 = vmatprep.subr.bf16.mxu1 %v17626_v58  ;;  %v17927_v11 = vpop.permute.xlu0 %4897  ;;  %v4761_v46 = vpop.permute.xlu1 %4760 }
 0x524   : > { %v17931_v60 = vsel %vm1034_vm1, %v4761_v46, %v17927_v11  ;;  %v17935_v43 = vsel %vm1034_vm1, %v17696_v20, %v4761_v46  ;;  %v22807_v20 = vld [vmem:[#allocation75_spill] sm:$0xff] }
 0x525   : > { %5346 = vmatprep.subr.bf16.mxu0 %v17931_v60 }
 0x526   : > { %5971 = vmatpush1.bf16.msra.mxu1 %v17574_v53  ;;  %5347 = vmatpush1.bf16.msra.mxu0 %v17935_v43 }
 0x527   : > { %6009 = vmatprep.subr.bf16.mxu1 %v17393_v15  ;;  %v17941_v58 = vpop.permute.xlu0 %4901  ;;  %v4851_v9 = vpop.permute.xlu1 %4850 }
 0x528   : > { %v17945_v22 = vsel %vm1146_vm6, %v4851_v9, %v17941_v58  ;;  %v17949_v8 = vsel %vm1146_vm6, %v17708_v40, %v4851_v9  ;;  %v22808_v40 = vld [vmem:[#allocation76_spill] sm:$0xff] }
 0x529   : > { %14614 = vmatmul.mubr.msk.bf16.vlgmr.msra.gmra.mrb[28].mxu1 %vm4910_vm13, %v17907_v1  ;;  %5348 = vmatprep.subr.bf16.mxu0 %v17945_v22 }
 0x52a   : > { %6010 = vmatpush1.bf16.msra.mxu1 %v17402_v52  ;;  %5349 = vmatpush1.bf16.msra.mxu0 %v17949_v8 }
 0x52b   : > { %6011 = vmatprep.subr.bf16.mxu1 %v17752_v34  ;;  %5567 = vmatprep.subr.bf16.mxu0 %v17393_v15  ;;  %v22813_v15 = vld [vmem:[#allocation79_spill] sm:$0xff] }
 0x52c   : > { %6041 = vmatprep.mubr.bf16.mxu1 %v22700_v30 }
 0x52d   : > { %14596 = vmatmul.mubr.msk.bf16.vlgmr.msra.gmra.mrb[36].mxu0 %vm4910_vm13, %v17489_v33  ;;  %v22817_v33 = vld [vmem:[#allocation82_spill] sm:$0xff] }
 0x52e   : > { %6012 = vmatpush1.bf16.msra.mxu1 %v22807_v20  ;;  %5568 = vmatpush1.bf16.msra.mxu0 %v17402_v52  ;;  %v22814_v52 = vld [vmem:[#allocation80_spill] sm:$0xff] }
 0x52f   : > { %6013 = vmatprep.subr.bf16.mxu1 %v17784_v49  ;;  %5569 = vmatprep.subr.bf16.mxu0 %v17752_v34  ;;  %v22810_v34 = vld [vmem:[#allocation77_spill] sm:$0xff] }
 0x530   : > { %5599 = vmatprep.mubr.bf16.mxu0 %v22700_v30 }
 0x532   : > { %6014 = vmatpush1.bf16.msra.mxu1 %v22808_v40  ;;  %5570 = vmatpush1.bf16.msra.mxu0 %v22807_v20  ;;  %v22831_v20 = vld [vmem:[#allocation23_spill] sm:$0xff] }
 0x533   : > { %6095 = vmatprep.subr.bf16.mxu1 %v17423_v54  ;;  %5571 = vmatprep.subr.bf16.mxu0 %v17784_v49 }
 0x535   : > { %14615 = vmatmul.mubr.msk.bf16.vlgmr.msra.gmra.mrb[32].mxu1 %vm4910_vm13, %v17907_v1 }
 0x536   : > { %6096 = vmatpush1.bf16.msra.mxu1 %v22809_v3  ;;  %5572 = vmatpush1.bf16.msra.mxu0 %v22808_v40 }
 0x537   : > { %6097 = vmatprep.subr.bf16.mxu1 %v17806_v61  ;;  %5653 = vmatprep.subr.bf16.mxu0 %v17423_v54  ;;  %v22815_v54 = vld [vmem:[#allocation72_spill] sm:$0xff] }
 0x538   : > { %6127 = vmatprep.mubr.bf16.mxu1 %v22700_v30 }
 0x539   : > { %14604 = vmatmul.mubr.msk.bf16.vlgmr.msra.gmra.mrb[24].mxu0 %vm4910_vm13, %v17780_v29 }
 0x53a   : > { %6098 = vmatpush1.bf16.msra.mxu1 %v22810_v34  ;;  %5654 = vmatpush1.bf16.msra.mxu0 %v22809_v3 }
 0x53b   : > { %6099 = vmatprep.subr.bf16.mxu1 %v17818_v57  ;;  %5655 = vmatprep.subr.bf16.mxu0 %v17806_v61  ;;  %v22826_v61 = vld [vmem:[#allocation14_spill] sm:$0xff] }
 0x53c   : > { %5685 = vmatprep.mubr.bf16.mxu0 %v22700_v30 }
 0x53e   : > { %6100 = vmatpush1.bf16.msra.mxu1 %v22811_v24  ;;  %5656 = vmatpush1.bf16.msra.mxu0 %v22810_v34  ;;  %v22832_v34 = vld [vmem:[#allocation24_spill] sm:$0xff] }
 0x53f   : > { %6181 = vmatprep.subr.bf16.mxu1 %v17449_v47  ;;  %5657 = vmatprep.subr.bf16.mxu0 %v17818_v57 }
 0x541   : > { %14617 = vmatmul.mubr.msk.bf16.vlgmr.msra.gmra.mrb[36].mxu1 %vm4910_vm13, %v17907_v1 }
 0x542   : > { %6182 = vmatpush1.bf16.msra.mxu1 %v22812_v50  ;;  %5658 = vmatpush1.bf16.msra.mxu0 %v22811_v24 }
 0x543   : > { %6183 = vmatprep.subr.bf16.mxu1 %v17840_v36  ;;  %5739 = vmatprep.subr.bf16.mxu0 %v17449_v47  ;;  %v22816_v47 = vld [vmem:[#allocation81_spill] sm:$0xff] }
 0x544   : > { %6213 = vmatprep.mubr.bf16.mxu1 %v22700_v30 }
 0x545   : > { %14606 = vmatmul.mubr.msk.bf16.vlgmr.msra.gmra.mrb[28].mxu0 %vm4910_vm13, %v17780_v29 }
 0x546   : > { %6184 = vmatpush1.bf16.msra.mxu1 %v22813_v15  ;;  %5740 = vmatpush1.bf16.msra.mxu0 %v22812_v50 }
 0x547   : > { %6185 = vmatprep.subr.bf16.mxu1 %v17852_v12  ;;  %5741 = vmatprep.subr.bf16.mxu0 %v17840_v36 }
 0x548   : > { %5771 = vmatprep.mubr.bf16.mxu0 %v22700_v30 }
 0x54a   : > { %6186 = vmatpush1.bf16.msra.mxu1 %v22814_v52  ;;  %5742 = vmatpush1.bf16.msra.mxu0 %v22813_v15 }
 0x54b   : > { %6267 = vmatprep.subr.bf16.mxu1 %v17513_v42  ;;  %5743 = vmatprep.subr.bf16.mxu0 %v17852_v12 }
 0x54d   : > { %14619 = vmatmul.mubr.msk.bf16.vlgmr.msra.gmra.mrb[40].mxu1 %vm4910_vm13, %v17907_v1 }
 0x54e   : > { %6268 = vmatpush1.bf16.msra.mxu1 %v22815_v54  ;;  %5744 = vmatpush1.bf16.msra.mxu0 %v22814_v52 }
 0x54f   : > { %6269 = vmatprep.subr.bf16.mxu1 %v17935_v43  ;;  %5825 = vmatprep.subr.bf16.mxu0 %v17513_v42 }
 0x550   : > { %6299 = vmatprep.mubr.bf16.mxu1 %v22700_v30 }
 0x551   : > { %14608 = vmatmul.mubr.msk.bf16.vlgmr.msra.gmra.mrb[32].mxu0 %vm4910_vm13, %v17780_v29 }
 0x552   : > { %6270 = vmatpush1.bf16.msra.mxu1 %v22816_v47  ;;  %5826 = vmatpush1.bf16.msra.mxu0 %v22815_v54 }
 0x553   : > { %6271 = vmatprep.subr.bf16.mxu1 %v17949_v8  ;;  %5827 = vmatprep.subr.bf16.mxu0 %v17935_v43 }
 0x554   : > { %5857 = vmatprep.mubr.bf16.mxu0 %v22700_v30 }
 0x556   : > { %6272 = vmatpush1.bf16.msra.mxu1 %v22817_v33  ;;  %5828 = vmatpush1.bf16.msra.mxu0 %v22816_v47 }
 0x557   : > { %5829 = vmatprep.subr.bf16.mxu0 %v17949_v8 }
 0x559   : > { %14621 = vmatmul.mubr.msk.bf16.vlgmr.msra.gmra.mrb[44].mxu1 %vm4910_vm13, %v17907_v1 }
 0x55a   : > { %5830 = vmatpush1.bf16.msra.mxu0 %v22817_v33  ;;  %7257 = vmatprep.mubr.bf16.mxu1 %v22700_v30 }
 0x55b   : > { %6052 = vmatprep.subr.bf16.mxu0 %v17426_v0 }
 0x55d   : > { %14610 = vmatmul.mubr.msk.bf16.vlgmr.msra.gmra.mrb[36].mxu0 %vm4910_vm13, %v17780_v29 }
 0x55e   : > { %6053 = vmatpush1.bf16.msra.mxu0 %v17390_v48  ;;  %6084 = vmatprep.mubr.bf16.mxu0 %v22700_v30 }
 0x55f   : > { %6054 = vmatprep.subr.bf16.mxu0 %v17643_v13 }
 0x562   : > { %6055 = vmatpush1.bf16.msra.mxu0 %v17748_v41 }
 0x563   : > { %6056 = vmatprep.subr.bf16.mxu0 %v17657_v63  ;;  %v5868_v63 = vsel %vm1034_vm1, %v17927_v11, %v17715_v18  ;;  %v22829_v11 = vld [vmem:[#allocation25_spill] sm:$0xff] }
 0x566   : > { %6057 = vmatpush1.bf16.msra.mxu0 %v17771_v17 }
 0x567   : > { %6138 = vmatprep.subr.bf16.mxu0 %v17453_v45 }
 0x569   : > { %14616 = vmatmul.mubr.msk.bf16.vlgmr.msra.gmra.mrb[24].mxu0 %vm4910_vm13, %v17907_v1 }
 0x56a   : > { %6139 = vmatpush1.bf16.msra.mxu0 %v17579_v37  ;;  %6170 = vmatprep.mubr.bf16.mxu0 %v22700_v30  ;;  %v18071_v37 = vpop.permute.xlu1 %6399 }
 0x56b   : > { %6140 = vmatprep.subr.bf16.mxu0 %v17674_v23  ;;  %v22822_v23 = vld [vmem:[#allocation3_spill] sm:$0xff] }
 0x56e   : > { %6141 = vmatpush1.bf16.msra.mxu0 %v17798_v26 }
 0x56f   : > { %6142 = vmatprep.subr.bf16.mxu0 %v17686_v28  ;;  %v22818_v28 = vld [vmem:[#allocation84_spill] sm:$0xff] }
 0x572   : > { %6143 = vmatpush1.bf16.msra.mxu0 %v17812_v4 }
 0x573   : > { %6224 = vmatprep.subr.bf16.mxu0 %v17507_v35  ;;  %v18074_v35 = vpop.permute.xlu0 %6404 }
 0x575   : > { %14618 = vmatmul.mubr.msk.bf16.vlgmr.msra.gmra.mrb[28].mxu0 %vm4910_vm13, %v17907_v1 }
 0x576   : > { %6225 = vmatpush1.bf16.msra.mxu0 %v17594_v2  ;;  %6256 = vmatprep.mubr.bf16.mxu0 %v22700_v30 }
 0x577   : > { %6226 = vmatprep.subr.bf16.mxu0 %v17704_v31  ;;  %v5870_v31 = vsel %vm1146_vm6, %v17941_v58, %v17729_v21  ;;  %v22830_v58 = vld [vmem:[#allocation26_spill] sm:$0xff] }
 0x57a   : > { %6227 = vmatpush1.bf16.msra.mxu0 %v17832_v56 }
 0x57b   : > { %6228 = vmatprep.subr.bf16.mxu0 %v17721_v14 }
 0x57e   : > { %6229 = vmatpush1.bf16.msra.mxu0 %v17846_v32 }
 0x57f   : > { %14622 = vmatprep.subr.msk.bf16.mxu0 %vm4665_vm5, %v22818_v28  ;;  %v22833_v28 = vld [vmem:[#allocation8_spill] sm:$0xff] }
 0x581   : > { %14620 = vmatmul.mubr.msk.bf16.vlgmr.msra.gmra.mrb[32].mxu0 %vm4910_vm13, %v17907_v1 }
 0x582   : > { %6311 = vmatpush1.bf16.msra.mxu0 %v17736_v6  ;;  %6342 = vmatprep.mubr.bf16.mxu0 %v22700_v30 }
 0x583   : > { %6312 = vmatprep.subr.bf16.mxu0 %v5868_v63 }
 0x586   : > { %6313 = vmatpush1.bf16.msra.mxu0 %v17931_v60 }
 0x587   : > { %6314 = vmatprep.subr.bf16.mxu0 %v5870_v31 }
 0x58a   : > { %6315 = vmatpush1.bf16.msra.mxu0 %v17945_v22 }
 0x58d   : > { %14623 = vmatmul.mubr.msk.bf16.vlgmr.msra.gmra.mrb[36].mxu0 %vm4910_vm13, %v17907_v1 }
 0x58e   : > { %6999 = vmatprep.mubr.bf16.mxu0 %v22700_v30 }
 0x5e4   : > { %v5914_v48 = vpop.f32.mrb[20].mxu1 }
 0x5e5   : > { %v6407_v0 = vadd.f32 %v18071_v37, %v5914_v48  ;;  %v5916_v45 = vpop.f32.mrb[21].mxu1  ;;  %v22836_v48 = vld [vmem:[#allocation15_spill] sm:$0xff] }
 0x5e6   : > { %v6408_v42 = vadd.f32 %v18071_v37, %v5916_v45  ;;  %v5918_v27 = vpop.f32.mrb[22].mxu1 }
 0x5e7   : > { %v6451_v53 = vadd.f32 %v6407_v0, %v22819_v44  ;;  %v6429_v10 = vadd.f32 %v18074_v35, %v5918_v27  ;;  %v5920_v19 = vpop.f32.mrb[23].mxu1 }
 0x5e8   : > { %v6452_v25 = vadd.f32 %v6408_v42, %v22820_v62  ;;  %v6430_v2 = vadd.f32 %v18074_v35, %v5920_v19  ;;  %v22863_v62 = vld [vmem:[#allocation10_spill] sm:$0xff] }
 0x5e9   : > { %v6495_v6 = vmax.f32 %v6451_v53, 0.0  ;;  %v6473_v13 = vadd.f32 %v6429_v10, %v22821_v5 }
 0x5ea   : > { %v6496_v39 = vmax.f32 %v6452_v25, 0.0  ;;  %v6474_v14 = vadd.f32 %v6430_v2, %v22822_v23 }
 0x5eb   : > { %v6539_v41 = vmin.f32 %v6495_v6, 6.0  ;;  %v6517_v16 = vmax.f32 %v6473_v13, 0.0  ;;  %v22839_v6 = vld [vmem:[#allocation27_spill] sm:$0xff] }
 0x5ec   : > { %v6540_v17 = vmin.f32 %v6496_v39, 6.0  ;;  %v6518_v59 = vmax.f32 %v6474_v14, 0.0 }
 0x5ed   : > { %v6561_v29 = vmin.f32 %v6517_v16, 6.0  ;;  %v18084_v26 = vmul.f32 %v6539_v41, %v22823_v55  ;;  %v22840_v41 = vld [vmem:[#allocation30_spill] sm:$0xff] }
 0x5ee   : > { %v6562_v49 = vmin.f32 %v6518_v59, 6.0  ;;  %v18090_v4 = vmul.f32 %v6540_v17, %v22826_v61 }
 0x5ef   : > { %22824 = vst [vmem:[#allocation75_spill] sm:$0xff] %v18084_v26  ;;  %v18087_v7 = vmul.f32 %v6561_v29, %v22823_v55  ;;  %v22841_v29 = vld [vmem:[#allocation28_spill] sm:$0xff] }
 0x5f0   : > { %22827 = vst [vmem:[#allocation70_spill] sm:$0xff] %v18090_v4  ;;  %v18093_v57 = vmul.f32 %v6562_v49, %v22826_v61  ;;  %v5957_v38 = vpop.f32.mrb[24].mxu1 }
 0x5f1   : > { %22825 = vst [vmem:[#allocation76_spill] sm:$0xff] %v18087_v7  ;;  %v6409_v56 = vadd.f32 %v18071_v37, %v5957_v38  ;;  %v5959_v51 = vpop.f32.mrb[25].mxu1  ;;  %v6637_v36 = vpack.c.bf16 %v18087_v7, %v18084_v26 }
 0x5f2   : > { %22828 = vst [vmem:[#allocation77_spill] sm:$0xff] %v18093_v57  ;;  %v6410_v32 = vadd.f32 %v18071_v37, %v5959_v51  ;;  %v5961_v12 = vpop.f32.mrb[26].mxu1  ;;  %v6638_v1 = vpack.c.bf16 %v18093_v57, %v18090_v4 }
 0x5f3   : > { %v6453_v46 = vadd.f32 %v6409_v56, %v22829_v11  ;;  %v6431_v60 = vadd.f32 %v18074_v35, %v5961_v12  ;;  %v5963_v43 = vpop.f32.mrb[27].mxu1  ;;  %6681 = vrot.lane.b32.xlu1 %v6637_v36, %s15534_s23  ;;  %v22842_v56 = vld [vmem:[#allocation29_spill] sm:$0xff] }
 0x5f4   : > { %v6454_v9 = vadd.f32 %v6410_v32, %v22830_v58  ;;  %v6432_v22 = vadd.f32 %v18074_v35, %v5963_v43  ;;  %6683 = vrot.lane.b32.xlu0 %v6638_v1, %s15534_s23  ;;  %v22843_v43 = vld [vmem:[#allocation17_spill] sm:$0xff] }
 0x5f5   : > { %v6497_v8 = vmax.f32 %v6453_v46, 0.0  ;;  %v6475_v40 = vadd.f32 %v6431_v60, %v22831_v20  ;;  %v22862_v20 = vld [vmem:[#allocation52_spill] sm:$0xff] }
 0x5f6   : > { %v6498_v3 = vmax.f32 %v6454_v9, 0.0  ;;  %v6476_v24 = vadd.f32 %v6432_v22, %v22832_v34 }
 0x5f7   : > { %v6541_v50 = vmin.f32 %v6497_v8, 6.0  ;;  %v6519_v15 = vmax.f32 %v6475_v40, 0.0  ;;  %v22846_v8 = vld [vmem:[#allocation18_spill] sm:$0xff] }
 0x5f8   : > { %v6542_v52 = vmin.f32 %v6498_v3, 6.0  ;;  %v6520_v54 = vmax.f32 %v6476_v24, 0.0 }
 0x5f9   : > { %v6563_v47 = vmin.f32 %v6519_v15, 6.0  ;;  %v18110_v63 = vmul.f32 %v6541_v50, %v22833_v28 }
 0x5fa   : > { %v6564_v33 = vmin.f32 %v6520_v54, 6.0  ;;  %v18116_v0 = vmul.f32 %v6542_v52, %v22836_v48 }
 0x5fb   : > { %22834 = vst [vmem:[#allocation78_spill] sm:$0xff] %v18110_v63  ;;  %v18113_v31 = vmul.f32 %v6563_v47, %v22833_v28 }
 0x5fc   : > { %22837 = vst [vmem:[#allocation79_spill] sm:$0xff] %v18116_v0  ;;  %v18119_v45 = vmul.f32 %v6564_v33, %v22836_v48  ;;  %v6000_v42 = vpop.f32.mrb[28].mxu1 }
 0x5fd   : > { %22835 = vst [vmem:[#allocation71_spill] sm:$0xff] %v18113_v31  ;;  %v6411_v27 = vadd.f32 %v18071_v37, %v6000_v42  ;;  %v6002_v53 = vpop.f32.mrb[29].mxu1  ;;  %v6639_v10 = vpack.c.bf16 %v18113_v31, %v18110_v63  ;;  %v22849_v42 = vld [vmem:[#allocation34_spill] sm:$0xff] }
 0x5fe   : > { %22838 = vst [vmem:[#allocation80_spill] sm:$0xff] %v18119_v45  ;;  %v6412_v19 = vadd.f32 %v18071_v37, %v6002_v53  ;;  %v6004_v25 = vpop.f32.mrb[30].mxu1  ;;  %v6640_v2 = vpack.c.bf16 %v18119_v45, %v18116_v0 }
 0x5ff   : > { %v6455_v13 = vadd.f32 %v6411_v27, %v22839_v6  ;;  %v6433_v39 = vadd.f32 %v18074_v35, %v6004_v25  ;;  %v6006_v14 = vpop.f32.mrb[31].mxu1  ;;  %6685 = vrot.lane.b32.xlu1 %v6639_v10, %s15534_s23 }
 0x600   : > { %v6456_v16 = vadd.f32 %v6412_v19, %v22840_v41  ;;  %v6434_v17 = vadd.f32 %v18074_v35, %v6006_v14  ;;  %6687 = vrot.lane.b32.xlu0 %v6640_v2, %s15534_s23  ;;  %v22850_v19 = vld [vmem:[#allocation35_spill] sm:$0xff] }
 0x601   : > { %v6499_v59 = vmax.f32 %v6455_v13, 0.0  ;;  %v6477_v49 = vadd.f32 %v6433_v39, %v22841_v29  ;;  %v22851_v39 = vld [vmem:[#allocation31_spill] sm:$0xff]  ;;  %v22861_v29 = vld [vmem:[#allocation41_spill] sm:$0xff] }
 0x602   : > { %v6500_v38 = vmax.f32 %v6456_v16, 0.0  ;;  %v6478_v51 = vadd.f32 %v6434_v17, %v22842_v56  ;;  %v22852_v17 = vld [vmem:[#allocation32_spill] sm:$0xff] }
 0x603   : > { %v6543_v36 = vmin.f32 %v6499_v59, 6.0  ;;  %v6521_v32 = vmax.f32 %v6477_v49, 0.0 }
 0x604   : > { %v6544_v12 = vmin.f32 %v6500_v38, 6.0  ;;  %v6522_v1 = vmax.f32 %v6478_v51, 0.0 }
 0x605   : > { %v6565_v46 = vmin.f32 %v6521_v32, 6.0  ;;  %v18136_v9 = vmul.f32 %v6543_v36, %v22843_v43 }
 0x606   : > { %v6566_v60 = vmin.f32 %v6522_v1, 6.0  ;;  %v18142_v40 = vmul.f32 %v6544_v12, %v22846_v8  ;;  %v22853_v1 = vld [vmem:[#allocation19_spill] sm:$0xff] }
 0x607   : > { %22844 = vst [vmem:[#allocation72_spill] sm:$0xff] %v18136_v9  ;;  %v18139_v22 = vmul.f32 %v6565_v46, %v22843_v43 }
 0x608   : > { %22847 = vst [vmem:[#allocation82_spill] sm:$0xff] %v18142_v40  ;;  %v18145_v3 = vmul.f32 %v6566_v60, %v22846_v8  ;;  %v6043_v24 = vpop.f32.mrb[32].mxu1 }
 0x609   : > { %22845 = vst [vmem:[#allocation81_spill] sm:$0xff] %v18139_v22  ;;  %v6413_v50 = vadd.f32 %v18071_v37, %v6043_v24  ;;  %v6045_v15 = vpop.f32.mrb[33].mxu1  ;;  %v6641_v52 = vpack.c.bf16 %v18139_v22, %v18136_v9  ;;  %v22856_v24 = vld [vmem:[#allocation20_spill] sm:$0xff] }
 0x60a   : > { %22848 = vst [vmem:[#allocation84_spill] sm:$0xff] %v18145_v3  ;;  %v6414_v54 = vadd.f32 %v18071_v37, %v6045_v15  ;;  %v6047_v47 = vpop.f32.mrb[34].mxu1  ;;  %v6642_v33 = vpack.c.bf16 %v18145_v3, %v18142_v40 }
 0x60b   : > { %v6457_v27 = vadd.f32 %v6413_v50, %v22849_v42  ;;  %v6435_v53 = vadd.f32 %v18074_v35, %v6047_v47  ;;  %v6049_v10 = vpop.f32.mrb[35].mxu1  ;;  %6689 = vrot.lane.b32.xlu1 %v6641_v52, %s15534_s23 }
 0x60c   : > { %v6458_v25 = vadd.f32 %v6414_v54, %v22850_v19  ;;  %v6436_v2 = vadd.f32 %v18074_v35, %v6049_v10  ;;  %6691 = vrot.lane.b32.xlu0 %v6642_v33, %s15534_s23 }
 0x60d   : > { %v6501_v13 = vmax.f32 %v6457_v27, 0.0  ;;  %v6479_v14 = vadd.f32 %v6435_v53, %v22851_v39  ;;  %v22860_v39 = vld [vmem:[#allocation55_spill] sm:$0xff] }
 0x60e   : > { %v6502_v16 = vmax.f32 %v6458_v25, 0.0  ;;  %v6480_v59 = vadd.f32 %v6436_v2, %v22852_v17 }
 0x60f   : > { %v6545_v49 = vmin.f32 %v6501_v13, 6.0  ;;  %v6523_v38 = vmax.f32 %v6479_v14, 0.0 }
 0x610   : > { %v6546_v51 = vmin.f32 %v6502_v16, 6.0  ;;  %v6524_v36 = vmax.f32 %v6480_v59, 0.0 }
 0x611   : > { %v6567_v32 = vmin.f32 %v6523_v38, 6.0  ;;  %v18162_v46 = vmul.f32 %v6545_v49, %v22853_v1 }
 0x612   : > { %v6568_v12 = vmin.f32 %v6524_v36, 6.0  ;;  %v18168_v50 = vmul.f32 %v6546_v51, %v22856_v24 }
 0x613   : > { %22854 = vst [vmem:[#allocation86_spill] sm:$0xff] %v18162_v46  ;;  %v18165_v60 = vmul.f32 %v6567_v32, %v22853_v1 }
 0x614   : > { %22857 = vst [vmem:[#allocation88_spill] sm:$0xff] %v18168_v50  ;;  %v18171_v15 = vmul.f32 %v6568_v12, %v22856_v24  ;;  %v6129_v52 = vpop.f32.mrb[36].mxu1 }
 0x615   : > { %22855 = vst [vmem:[#allocation87_spill] sm:$0xff] %v18165_v60  ;;  %v18173_v54 = vpop.f32.mrb[37].mxu1  ;;  %v6643_v47 = vpack.c.bf16 %v18165_v60, %v18162_v46 }
 0x616   : > { %22858 = vst [vmem:[#allocation89_spill] sm:$0xff] %v18171_v15  ;;  %v6133_v33 = vpop.f32.mrb[38].mxu1  ;;  %v6644_v27 = vpack.c.bf16 %v18171_v15, %v18168_v50 }
 0x617   : > { %v6135_v53 = vpop.f32.mrb[39].mxu1  ;;  %6693 = vrot.lane.b32.xlu1 %v6643_v47, %s15534_s23  ;;  %v22859_v47 = vld [vmem:[#allocation43_spill] sm:$0xff] }
 0x618   : > { %6695 = vrot.lane.b32.xlu0 %v6644_v27, %s15534_s23 }
 0x620   : > { %v18181_v10 = vpop.f32.mrb[40].mxu1 }
 0x621   : > { %v6217_v25 = vpop.f32.mrb[41].mxu1 }
 0x622   : > { %v18183_v2 = vpop.f32.mrb[42].mxu1 }
 0x623   : > { %v6221_v13 = vpop.f32.mrb[43].mxu1 }
 0x62c   : > { %v18185_v14 = vpop.f32.mrb[44].mxu1 }
 0x62d   : > { %v18187_v16 = vpop.f32.mrb[45].mxu1 }
 0x62e   : > { %v18189_v59 = vpop.f32.mrb[46].mxu1 }
 0x62f   : > { %v18191_v49 = vpop.f32.mrb[47].mxu1 }
 0x63c   : > { %v6086_v38 = vpop.f32.mrb[24].mxu0 }
 0x63d   : > { %v6415_v51 = vadd.f32 %v18071_v37, %v6086_v38  ;;  %v6088_v36 = vpop.f32.mrb[25].mxu0 }
 0x63e   : > { %v6416_v32 = vadd.f32 %v18071_v37, %v6088_v36  ;;  %v6090_v12 = vpop.f32.mrb[26].mxu0  ;;  %v6439_v36 = vadd.f32 %v18074_v35, %v6133_v33 }
 0x63f   : > { %v6459_v27 = vadd.f32 %v6415_v51, %v22859_v47  ;;  %v6437_v17 = vadd.f32 %v18074_v35, %v6090_v12  ;;  %v6092_v19 = vpop.f32.mrb[27].mxu0  ;;  %v6417_v12 = vadd.f32 %v18071_v37, %v6129_v52  ;;  %v22870_v52 = vld [vmem:[#allocation39_spill] sm:$0xff] }
 0x640   : > { %v6460_v42 = vadd.f32 %v6416_v32, %v22860_v39  ;;  %v6438_v56 = vadd.f32 %v18074_v35, %v6092_v19 }
 0x641   : > { %v6503_v41 = vmax.f32 %v6459_v27, 0.0  ;;  %v6481_v6 = vadd.f32 %v6437_v17, %v22861_v29  ;;  %v22866_v17 = vld [vmem:[#allocation37_spill] sm:$0xff]  ;;  %v6461_v33 = vadd.f32 %v6417_v12, %v22870_v52  ;;  %v22873_v12 = vld [vmem:[#allocation51_spill] sm:$0xff] }
 0x642   : > { %v6504_v34 = vmax.f32 %v6460_v42, 0.0  ;;  %v6482_v58 = vadd.f32 %v6438_v56, %v22862_v20  ;;  %v6483_v42 = vadd.f32 %v6439_v36, %v22866_v17  ;;  %v22867_v27 = vld [vmem:[#allocation49_spill] sm:$0xff]  ;;  %v6422_v36 = vadd.f32 %v18071_v37, %v6217_v25  ;;  %v22872_v20 = vld [vmem:[#allocation47_spill] sm:$0xff] }
 0x643   : > { %v6547_v38 = vmin.f32 %v6503_v41, 6.0  ;;  %v6525_v11 = vmax.f32 %v6481_v6, 0.0  ;;  %v6505_v44 = vmax.f32 %v6461_v33, 0.0  ;;  %v22878_v33 = vld [vmem:[#allocation33_spill] sm:$0xff] }
 0x644   : > { %v6548_v23 = vmin.f32 %v6504_v34, 6.0  ;;  %v6526_v5 = vmax.f32 %v6482_v58, 0.0 }
 0x645   : > { %v6569_v51 = vmin.f32 %v6525_v11, 6.0  ;;  %v18204_v32 = vmul.f32 %v6547_v38, %v22863_v62  ;;  %v6444_v11 = vadd.f32 %v18074_v35, %v6221_v13 }
 0x646   : > { %v6570_v47 = vmin.f32 %v6526_v5, 6.0  ;;  %v18211_v56 = vmul.f32 %v6548_v23, %v22867_v27 }
 0x647   : > { %22864 = vst [vmem:[#allocation90_spill] sm:$0xff] %v18204_v32  ;;  %v18207_v19 = vmul.f32 %v6569_v51, %v22863_v62  ;;  %v6488_v39 = vadd.f32 %v6444_v11, %v22872_v20  ;;  %v22883_v20 = vld [vmem:[#allocation60_spill] sm:$0xff] }
 0x648   : > { %22868 = vst [vmem:[#allocation92_spill] sm:$0xff] %v18211_v56  ;;  %v18214_v6 = vmul.f32 %v6570_v47, %v22867_v27  ;;  %v6172_v34 = vpop.f32.mrb[28].mxu0  ;;  %v22871_v47 = vld [vmem:[#allocation53_spill] sm:$0xff]  ;;  %v22874_v27 = vld [vmem:[#allocation50_spill] sm:$0xff] }
 0x649   : > { %22865 = vst [vmem:[#allocation91_spill] sm:$0xff] %v18207_v19  ;;  %v6419_v58 = vadd.f32 %v18071_v37, %v6172_v34  ;;  %v18218_v5 = vpop.f32.mrb[29].mxu0  ;;  %v6645_v41 = vpack.c.bf16 %v18207_v19, %v18204_v32  ;;  %v6527_v34 = vmax.f32 %v6483_v42, 0.0  ;;  %v6466_v62 = vadd.f32 %v6422_v36, %v22874_v27 }
 0x64a   : > { %22869 = vst [vmem:[#allocation93_spill] sm:$0xff] %v18214_v6  ;;  %v6176_v38 = vpop.f32.mrb[30].mxu0  ;;  %v6646_v23 = vpack.c.bf16 %v18214_v6, %v18211_v56  ;;  %v6549_v56 = vmin.f32 %v6505_v44, 6.0  ;;  %v6418_v42 = vadd.f32 %v18071_v37, %v18173_v54 }
 0x64b   : > { %v6463_v51 = vadd.f32 %v6419_v58, %v22871_v47  ;;  %v6441_v17 = vadd.f32 %v18074_v35, %v6176_v38  ;;  %v6178_v13 = vpop.f32.mrb[31].mxu0  ;;  %6697 = vrot.lane.b32.xlu1 %v6645_v41, %s15534_s23  ;;  %v6571_v19 = vmin.f32 %v6527_v34, 6.0  ;;  %v6440_v58 = vadd.f32 %v18074_v35, %v6135_v53  ;;  %v22882_v34 = vld [vmem:[#allocation40_spill] sm:$0xff] }
 0x64c   : > { %6699 = vrot.lane.b32.xlu0 %v6646_v23, %s15534_s23  ;;  %v6532_v38 = vmax.f32 %v6488_v39, 0.0  ;;  %v6510_v41 = vmax.f32 %v6466_v62, 0.0  ;;  %v22875_v23 = vld [vmem:[#allocation46_spill] sm:$0xff]  ;;  %v6443_v39 = vadd.f32 %v18074_v35, %v18183_v2 }
 0x64d   : > { %v6507_v29 = vmax.f32 %v6463_v51, 0.0  ;;  %v6485_v52 = vadd.f32 %v6441_v17, %v22873_v12  ;;  %v18243_v36 = vmul.f32 %v6571_v19, %v22878_v33  ;;  %v6421_v19 = vadd.f32 %v18071_v37, %v18181_v10  ;;  %v22884_v12 = vld [vmem:[#allocation45_spill] sm:$0xff] }
 0x64e   : > { %v6576_v44 = vmin.f32 %v6532_v38, 6.0 }
 0x64f   : > { %v6551_v6 = vmin.f32 %v6507_v29, 6.0  ;;  %v6529_v25 = vmax.f32 %v6485_v52, 0.0  ;;  %22879 = vst [vmem:[#allocation96_spill] sm:$0xff] %v18243_v36  ;;  %v22880_v29 = vld [vmem:[#allocation38_spill] sm:$0xff] }
 0x650   : > { %v6484_v52 = vadd.f32 %v6440_v58, %v22880_v29  ;;  %v6554_v58 = vmin.f32 %v6510_v41, 6.0  ;;  %v6487_v29 = vadd.f32 %v6443_v39, %v22884_v12  ;;  %v22890_v12 = vld [vmem:[#allocation58_spill] sm:$0xff] }
 0x651   : > { %v6573_v47 = vmin.f32 %v6529_v25, 6.0  ;;  %v18237_v11 = vmul.f32 %v6551_v6, %v22875_v23  ;;  %v18254_v6 = vmul.f32 %v6549_v56, %v22878_v33  ;;  %v6462_v25 = vadd.f32 %v6418_v42, %v22882_v34  ;;  %v22887_v42 = vld [vmem:[#allocation59_spill] sm:$0xff]  ;;  %v22888_v34 = vld [vmem:[#allocation48_spill] sm:$0xff] }
 0x652   : > { %v6528_v27 = vmax.f32 %v6484_v52, 0.0 }
 0x653   : > { %22876 = vst [vmem:[#allocation94_spill] sm:$0xff] %v18237_v11  ;;  %v18240_v17 = vmul.f32 %v6573_v47, %v22875_v23  ;;  %22881 = vst [vmem:[#allocation97_spill] sm:$0xff] %v18254_v6  ;;  %v6647_v56 = vpack.c.bf16 %v18243_v36, %v18254_v6  ;;  %v22885_v23 = vld [vmem:[#allocation44_spill] sm:$0xff] }
 0x654   : > { %v6258_v51 = vpop.f32.mrb[32].mxu0  ;;  %v18268_v10 = vmul.f32 %v6576_v44, %v22885_v23  ;;  %v6572_v52 = vmin.f32 %v6528_v27, 6.0 }
 0x655   : > { %22877 = vst [vmem:[#allocation95_spill] sm:$0xff] %v18240_v17  ;;  %v6423_v53 = vadd.f32 %v18071_v37, %v6258_v51  ;;  %v18249_v54 = vpop.f32.mrb[33].mxu0  ;;  %v6649_v62 = vpack.c.bf16 %v18240_v17, %v18237_v11  ;;  %v6531_v11 = vmax.f32 %v6487_v29, 0.0  ;;  %v6442_v29 = vadd.f32 %v18074_v35, %v6178_v13 }
 0x656   : > { %v6262_v47 = vpop.f32.mrb[34].mxu0  ;;  %22886 = vst [vmem:[#allocation98_spill] sm:$0xff] %v18268_v10  ;;  %v6447_v13 = vadd.f32 %v18074_v35, %v18189_v59 }
 0x657   : > { %v6467_v2 = vadd.f32 %v6423_v53, %v22883_v20  ;;  %v6445_v38 = vadd.f32 %v18074_v35, %v6262_v47  ;;  %v18261_v51 = vpop.f32.mrb[35].mxu0  ;;  %6705 = vrot.lane.b32.xlu1 %v6649_v62, %s15534_s23  ;;  %v6465_v53 = vadd.f32 %v6421_v19, %v22888_v34  ;;  %v6506_v20 = vmax.f32 %v6462_v25, 0.0  ;;  %v22893_v25 = vld [vmem:[#allocation36_spill] sm:$0xff] }
 0x658   : > { %v18273_v47 = vmul.f32 %v6554_v58, %v22885_v23  ;;  %v18286_v58 = vmul.f32 %v6572_v52, %v22893_v25  ;;  %v6575_v27 = vmin.f32 %v6531_v11, 6.0  ;;  %v22896_v11 = vld [vmem:[#allocation42_spill] sm:$0xff] }
 0x659   : > { %v6511_v33 = vmax.f32 %v6467_v2, 0.0  ;;  %v6489_v41 = vadd.f32 %v6445_v38, %v22887_v42  ;;  %v6509_v44 = vmax.f32 %v6465_v53, 0.0  ;;  %v6550_v2 = vmin.f32 %v6506_v20, 6.0 }
 0x65a   : > { %22889 = vst [vmem:[#allocation99_spill] sm:$0xff] %v18273_v47  ;;  %v6652_v39 = vpack.c.bf16 %v18268_v10, %v18273_v47  ;;  %22894 = vst [vmem:[#allocation102_spill] sm:$0xff] %v18286_v58  ;;  %v18304_v52 = vmul.f32 %v6575_v27, %v22896_v11  ;;  %v22905_v47 = vld [vmem:[#allocation64_spill] sm:$0xff] }
 0x65b   : > { %v6555_v17 = vmin.f32 %v6511_v33, 6.0  ;;  %v6533_v62 = vmax.f32 %v6489_v41, 0.0  ;;  %6701 = vrot.lane.b32.xlu1 %v6647_v56, %s15534_s23  ;;  %v6553_v41 = vmin.f32 %v6509_v44, 6.0  ;;  %v18294_v53 = vmul.f32 %v6550_v2, %v22893_v25  ;;  %v22898_v44 = vld [vmem:[#allocation56_spill] sm:$0xff] }
 0x65c   : > { %22897 = vst [vmem:[#allocation104_spill] sm:$0xff] %v18304_v52  ;;  %v6486_v42 = vadd.f32 %v6442_v29, %v22898_v44 }
 0x65d   : > { %v6577_v36 = vmin.f32 %v6533_v62, 6.0  ;;  %v18279_v38 = vmul.f32 %v6555_v17, %v22890_v12  ;;  %22895 = vst [vmem:[#allocation103_spill] sm:$0xff] %v18294_v53  ;;  %v18314_v34 = vmul.f32 %v6553_v41, %v22896_v11  ;;  %v22901_v41 = vld [vmem:[#allocation63_spill] sm:$0xff] }
 0x65e   : > { %v6491_v23 = vadd.f32 %v6447_v13, %v22901_v41 }
 0x65f   : > { %22891 = vst [vmem:[#allocation100_spill] sm:$0xff] %v18279_v38  ;;  %v18282_v19 = vmul.f32 %v6577_v36, %v22890_v12  ;;  %6711 = vrot.lane.b32.xlu1 %v6652_v39, %s15534_s23  ;;  %v6420_v36 = vadd.f32 %v18071_v37, %v18218_v5  ;;  %v6448_v39 = vadd.f32 %v18074_v35, %v18191_v49  ;;  %22899 = vst [vmem:[#allocation105_spill] sm:$0xff] %v18314_v34  ;;  %v22900_v12 = vld [vmem:[#allocation57_spill] sm:$0xff] }
 0x660   : > { %v6344_v33 = vpop.f32.mrb[36].mxu0  ;;  %v6648_v5 = vpack.c.bf16 %v18286_v58, %v18294_v53  ;;  %v6426_v49 = vadd.f32 %v18071_v37, %v18187_v16  ;;  %v6651_v16 = vpack.c.bf16 %v18304_v52, %v18314_v34  ;;  %v6535_v13 = vmax.f32 %v6491_v23, 0.0  ;;  %v22906_v52 = vld [vmem:[#allocation54_spill] sm:$0xff] }
 0x661   : > { %22892 = vst [vmem:[#allocation101_spill] sm:$0xff] %v18282_v19  ;;  %v18289_v56 = vpop.f32.mrb[37].mxu0  ;;  %v6653_v20 = vpack.c.bf16 %v18282_v19, %v18279_v38  ;;  %v6464_v29 = vadd.f32 %v6420_v36, %v22900_v12  ;;  %v6530_v19 = vmax.f32 %v6486_v42, 0.0  ;;  %v22904_v36 = vld [vmem:[#allocation65_spill] sm:$0xff] }
 0x662   : > { %v6348_v17 = vpop.f32.mrb[38].mxu0  ;;  %v6470_v10 = vadd.f32 %v6426_v49, %v22905_v47  ;;  %v6579_v58 = vmin.f32 %v6535_v13, 6.0  ;;  %v6446_v49 = vadd.f32 %v18074_v35, %v18261_v51  ;;  %v22909_v51 = vld [vmem:[#allocation11_spill] sm:$0xff]  ;;  %v6428_v15 = vadd.f32 %v18071_v37, %v18289_v56 }
 0x663   : > { %v18298_v62 = vpop.f32.mrb[39].mxu0  ;;  %6713 = vrot.lane.b32.xlu0 %v6653_v20, %s15534_s23  ;;  %v6425_v20 = vadd.f32 %v18071_v37, %v18185_v14  ;;  %v22902_v14 = vld [vmem:[#allocation62_spill] sm:$0xff]  ;;  %v6508_v25 = vmax.f32 %v6464_v29, 0.0  ;;  %v6574_v42 = vmin.f32 %v6530_v19, 6.0  ;;  %v6449_v29 = vadd.f32 %v18074_v35, %v6348_v17  ;;  %v22911_v17 = vld [vmem:[#allocation13_spill] sm:$0xff] }
 0x664   : > { %v6492_v38 = vadd.f32 %v6448_v39, %v22902_v14  ;;  %v6514_v14 = vmax.f32 %v6470_v10, 0.0  ;;  %v6427_v19 = vadd.f32 %v18071_v37, %v6344_v33 }
 0x665   : > { %v18309_v2 = vpop.permute.xlu1 %6681  ;;  %v6469_v12 = vadd.f32 %v6425_v20, %v22904_v36  ;;  %v6552_v41 = vmin.f32 %v6508_v25, 6.0  ;;  %v18344_v20 = vmul.f32 %v6574_v42, %v22906_v52  ;;  %v18363_v25 = vmul.f32 %v6579_v58, %v22909_v51  ;;  %v22917_v42 = vld [vmem:[#allocation68_spill] sm:$0xff]  ;;  %v22918_v58 = vld [vmem:[#allocation69_spill] sm:$0xff] }
 0x666   : > { %v6684_v59 = vpop.permute.xlu0 %6683  ;;  %v6768_v27 = vsel %vm4665_vm5, 0, %v18309_v2  ;;  %v6536_v39 = vmax.f32 %v6492_v38, 0.0  ;;  %v6424_v38 = vadd.f32 %v18071_v37, %v18249_v54  ;;  %v6471_v36 = vadd.f32 %v6427_v19, %v22918_v58 }
 0x667   : > { %v18325_v44 = vsel %vm4665_vm5, %v18309_v2, %v6684_v59  ;;  %6862 = vrot.lane.b32.xlu1 %v6768_v27, %s15529_s14  ;;  %6703 = vrot.lane.b32.xlu0 %v6648_v5, %s15534_s23  ;;  %v6513_v5 = vmax.f32 %v6469_v12, 0.0  ;;  %22907 = vst [vmem:[#allocation61_spill] sm:$0xff] %v18344_v20  ;;  %v6558_v12 = vmin.f32 %v6514_v14, 6.0  ;;  %v18353_v10 = vmul.f32 %v6552_v41, %v22906_v52  ;;  %v22914_v14 = vld [vmem:[#allocation67_spill] sm:$0xff] }
 0x668   : > { %6967 = vmatprep.subr.bf16.mxu0 %v18325_v44  ;;  %v6580_v34 = vmin.f32 %v6536_v39, 6.0  ;;  %22910 = vst [vmem:[#allocation107_spill] sm:$0xff] %v18363_v25  ;;  %v6493_v13 = vadd.f32 %v6449_v29, %v22914_v14 }
 0x669   : > { %14634 = vmatpush1.bf16.msk.msra.mxu0 %vm17295_vm8, %v18309_v2  ;;  %22908 = vst [vmem:[#allocation106_spill] sm:$0xff] %v18353_v10  ;;  %v6650_v54 = vpack.c.bf16 %v18344_v20, %v18353_v10  ;;  %v18376_v39 = vmul.f32 %v6558_v12, %v22911_v17  ;;  %v6515_v12 = vmax.f32 %v6471_v36, 0.0  ;;  %v22919_v36 = vld [vmem:[#allocation9_spill] sm:$0xff] }
 0x66b   : > { %6864 = vrot.lane.b32.xlu1 %v18325_v44, %s15529_s14  ;;  %6709 = vrot.lane.b32.xlu0 %v6651_v16, %s15534_s23  ;;  %v6557_v16 = vmin.f32 %v6513_v5, 6.0  ;;  %22916 = vst [vmem:[#allocation110_spill] sm:$0xff] %v18376_v39  ;;  %v6468_v5 = vadd.f32 %v6424_v38, %v22917_v42  ;;  %v6559_v58 = vmin.f32 %v6515_v12, 6.0 }
 0x66d   : > { %v18373_v33 = vmul.f32 %v6557_v16, %v22909_v51 }
 0x66f   : > { %6774 = vrot.lane.b32.xlu0 %v6768_v27, %s15530_s15  ;;  %v22913_v27 = vld [vmem:[#allocation66_spill] sm:$0xff]  ;;  %22915 = vst [vmem:[#allocation109_spill] sm:$0xff] %v18373_v33  ;;  %v6655_v16 = vpack.c.bf16 %v18363_v25, %v18373_v33 }
 0x670   : > { %v6490_v41 = vadd.f32 %v6446_v49, %v22913_v27  ;;  %v6537_v49 = vmax.f32 %v6493_v13, 0.0  ;;  %v6512_v27 = vmax.f32 %v6468_v5, 0.0 }
 0x671   : > { %v6686_v47 = vpop.permute.xlu1 %6685 }
 0x672   : > { %v18350_v23 = vsel %vm4665_vm5, %v6684_v59, %v6686_v47  ;;  %v18366_v59 = vmul.f32 %v6580_v34, %v22911_v17  ;;  %v6534_v34 = vmax.f32 %v6490_v41, 0.0  ;;  %v6688_v14 = vpop.permute.xlu0 %6687  ;;  %v6581_v19 = vmin.f32 %v6537_v49, 6.0 }
 0x673   : > { %6778 = vrot.lane.b32.xlu1 %v18350_v23, %s15530_s15  ;;  %6776 = vrot.lane.b32.xlu0 %v18325_v44, %s15530_s15  ;;  %v18390_v42 = vsel %vm4665_vm5, %v6686_v47, %v6688_v14  ;;  %v6556_v13 = vmin.f32 %v6512_v27, 6.0 }
 0x674   : > { %22912 = vst [vmem:[#allocation108_spill] sm:$0xff] %v18366_v59  ;;  %v6656_v29 = vpack.c.bf16 %v18366_v59, %v18376_v39  ;;  %v6578_v38 = vmin.f32 %v6534_v34, 6.0  ;;  %v22921_v34 = vld [vmem:[#allocation12_spill] sm:$0xff] }
 0x675   : > { %v18403_v49 = vmul.f32 %v6581_v19, %v22921_v34  ;;  %v18406_v47 = vmul.f32 %v6556_v13, %v22919_v36 }
 0x676   : > { %v18400_v5 = vmul.f32 %v6578_v38, %v22919_v36 }
 0x677   : > { %6707 = vrot.lane.b32.xlu1 %v6650_v54, %s15534_s23  ;;  %6866 = vrot.lane.b32.xlu0 %v18350_v23, %s15529_s14  ;;  %22922 = vst [vmem:[#allocation112_spill] sm:$0xff] %v18403_v49  ;;  %22923 = vst [vmem:[#allocation113_spill] sm:$0xff] %v18406_v47 }
 0x678   : > { %22920 = vst [vmem:[#allocation111_spill] sm:$0xff] %v18400_v5  ;;  %v6654_v27 = vpack.c.bf16 %v18400_v5, %v18406_v47 }
 0x67b   : > { %6719 = vrot.lane.b32.xlu1 %v6656_v29, %s15534_s23  ;;  %6717 = vrot.lane.b32.xlu0 %v6655_v16, %s15534_s23 }
 0x67d   : > { %v6690_v54 = vpop.permute.xlu1 %6689 }
 0x67e   : > { %v18393_v41 = vsel %vm4665_vm5, %v6688_v14, %v6690_v54  ;;  %v18409_v14 = vmul.f32 %v6559_v58, %v22921_v34  ;;  %v6692_v16 = vpop.permute.xlu0 %6691 }
 0x67f   : > { %6782 = vrot.lane.b32.xlu1 %v18393_v41, %s15530_s15  ;;  %6780 = vrot.lane.b32.xlu0 %v18390_v42, %s15530_s15  ;;  %v18422_v58 = vsel %vm4665_vm5, %v6690_v54, %v6692_v16 }
 0x680   : > { %22924 = vst [vmem:[#allocation114_spill] sm:$0xff] %v18409_v14  ;;  %v6657_v29 = vpack.c.bf16 %v18403_v49, %v18409_v14 }
 0x683   : > { %6870 = vrot.lane.b32.xlu1 %v18393_v41, %s15529_s14  ;;  %6868 = vrot.lane.b32.xlu0 %v18390_v42, %s15529_s14 }
 0x687   : > { %6715 = vrot.lane.b32.xlu1 %v6654_v27, %s15534_s23  ;;  %6721 = vrot.lane.b32.xlu0 %v6657_v29, %s15534_s23 }
 0x689   : > { %v6694_v12 = vpop.permute.xlu1 %6693 }
 0x68a   : > { %v18425_v38 = vsel %vm4665_vm5, %v6692_v16, %v6694_v12  ;;  %v6696_v19 = vpop.permute.xlu0 %6695 }
 0x68b   : > { %6786 = vrot.lane.b32.xlu1 %v18425_v38, %s15530_s15  ;;  %6784 = vrot.lane.b32.xlu0 %v18422_v58, %s15530_s15  ;;  %v18436_v13 = vsel %vm4665_vm5, %v6694_v12, %v6696_v19 }
 0x68f   : > { %6874 = vrot.lane.b32.xlu1 %v18425_v38, %s15529_s14  ;;  %6872 = vrot.lane.b32.xlu0 %v18422_v58, %s15529_s14 }
 0x693   : > { %6788 = vrot.lane.b32.xlu0 %v18436_v13, %s15530_s15 }
 0x697   : > { %6876 = vrot.lane.b32.xlu0 %v18436_v13, %s15529_s14 }
 0x6bd   : > { %v6698_v54 = vpop.permute.xlu1 %6697 }
 0x6be   : > { %v18443_v27 = vsel %vm4665_vm5, %v6696_v19, %v6698_v54  ;;  %v6700_v29 = vpop.permute.xlu0 %6699 }
 0x6bf   : > { %v18446_v16 = vsel %vm4665_vm5, %v6698_v54, %v6700_v29  ;;  %6790 = vrot.lane.b32.xlu1 %v18443_v27, %s15530_s15 }
 0x6c0   : > { %6792 = vrot.lane.b32.xlu0 %v18446_v16, %s15530_s15 }
 0x6c3   : > { %6878 = vrot.lane.b32.xlu1 %v18443_v27, %s15529_s14 }
 0x6c4   : > { %6880 = vrot.lane.b32.xlu0 %v18446_v16, %s15529_s14 }
 0x6c9   : > { %v6706_v12 = vpop.permute.xlu1 %6705 }
 0x6cd   : > { %v6702_v34 = vpop.permute.xlu1 %6701 }
 0x6ce   : > { %v18457_v19 = vsel %vm4665_vm5, %v6700_v29, %v6702_v34 }
 0x6cf   : > { %6794 = vrot.lane.b32.xlu1 %v18457_v19, %s15530_s15 }
 0x6d1   : > { %v6712_v17 = vpop.permute.xlu1 %6711 }
 0x6d3   : > { %6882 = vrot.lane.b32.xlu1 %v18457_v19, %s15529_s14 }
 0x6d5   : > { %v18463_v54 = vpop.permute.xlu0 %6713 }
 0x6d9   : > { %v6704_v14 = vpop.permute.xlu0 %6703  ;;  %v18471_v39 = vpop.permute.xlu1 %6862 }
 0x6da   : > { %v18466_v49 = vsel %vm4665_vm5, %v6702_v34, %v6704_v14  ;;  %v18469_v51 = vsel %vm4665_vm5, %v6704_v14, %v6706_v12  ;;  %v18485_v14 = vsel %vm4665_vm5, %v6712_v17, %v18463_v54 }
 0x6db   : > { %22925 = vst [vmem:[#allocation115_spill] sm:$0xff] %v18466_v49  ;;  %22926 = vst [vmem:[#allocation116_spill] sm:$0xff] %v18469_v51  ;;  %6796 = vrot.lane.b32.xlu0 %v18466_v49, %s15530_s15  ;;  %6798 = vrot.lane.b32.xlu1 %v18469_v51, %s15530_s15 }
 0x6dd   : > { %v6710_v29 = vpop.permute.xlu0 %6709  ;;  %v6865_v34 = vpop.permute.xlu1 %6864 }
 0x6de   : > { %v18490_v25 = vsel %vm4665_vm5, %v6710_v29, %v6712_v17 }
 0x6df   : > { %6884 = vrot.lane.b32.xlu0 %v18466_v49, %s15529_s14  ;;  %6886 = vrot.lane.b32.xlu1 %v18469_v51, %s15529_s14  ;;  %22927 = vst [vmem:[#allocation117_spill] sm:$0xff] %v18490_v25 }
 0x6e1   : > { %v18481_v59 = vpop.permute.xlu0 %6774 }
 0x6e3   : > { %6806 = vrot.lane.b32.xlu1 %v18485_v14, %s15530_s15 }
 0x6e5   : > { %v6779_v36 = vpop.permute.xlu1 %6778  ;;  %v6777_v33 = vpop.permute.xlu0 %6776 }
 0x6e6   : > { %v18493_v47 = vsel %vm1034_vm1, %v6777_v33, %v6779_v36  ;;  %v18497_v5 = vsel %vm1034_vm1, %v18481_v59, %v6777_v33  ;;  %v18520_v33 = vsel %vm1146_vm6, %v18471_v39, %v6865_v34 }
 0x6e7   : > { %6892 = vrot.lane.b32.xlu1 %v18490_v25, %s15529_s14  ;;  %6969 = vmatprep.subr.bf16.mxu0 %v18493_v47 }
 0x6e8   : > { %6970 = vmatpush1.bf16.msra.mxu0 %v18497_v5 }
 0x6e9   : > { %v6708_v52 = vpop.permute.xlu1 %6707  ;;  %v6867_v10 = vpop.permute.xlu0 %6866 }
 0x6ea   : > { %v18504_v20 = vsel %vm4665_vm5, %v6706_v12, %v6708_v52  ;;  %v18507_v17 = vsel %vm4665_vm5, %v6708_v52, %v6710_v29  ;;  %v18510_v53 = vsel %vm1146_vm6, %v6865_v34, %v6867_v10  ;;  %v18525_v52 = vld [vmem:[%s22167_s3 + $0x20] sm:$0xff]   ;;  %v6450_v34 = vadd.f32 %v18074_v35, %v18298_v62  ;;  %v22928_v35 = vld [vmem:[#allocation73_spill] sm:$0xff] }
 0x6eb   : > { %6802 = vrot.lane.b32.xlu0 %v18507_v17, %s15530_s15  ;;  %7225 = vmatprep.subr.bf16.mxu1 %v18504_v20 }
 0x6ec   : > { %6971 = vmatprep.subr.bf16.mxu0 %v18510_v53  ;;  %6890 = vrot.lane.b32.xlu1 %v18507_v17, %s15529_s14  ;;  %v6494_v62 = vadd.f32 %v6450_v34, %v22928_v35 }
 0x6ed   : > { %7226 = vmatpush1.bf16.msra.mxu1 %v18469_v51  ;;  %6972 = vmatpush1.bf16.msra.mxu0 %v18520_v33  ;;  %v6720_v12 = vpop.permute.xlu1 %6719  ;;  %v6718_v29 = vpop.permute.xlu0 %6717 }
 0x6ee   : > { %7010 = vmatprep.subr.bf16.mxu0 %v18390_v42  ;;  %v6538_v37 = vmax.f32 %v6494_v62, 0.0 }
 0x6ef   : > { %6804 = vrot.lane.b32.xlu0 %v18490_v25, %s15530_s15 }
 0x6f0   : > { %14635 = vmatmul.mubr.msk.bf16.vlgmr.msra.gmra.mrb[40].mxu0 %vm4910_vm13, %v18525_v52 }
 0x6f1   : > { %7011 = vmatpush1.bf16.msra.mxu0 %v18350_v23  ;;  %v6783_v6 = vpop.permute.xlu1 %6782  ;;  %v6781_v32 = vpop.permute.xlu0 %6780  ;;  %7042 = vmatprep.mubr.bf16.mxu0 %v22700_v30 }
 0x6f2   : > { %v18539_v24 = vsel %vm1034_vm1, %v6781_v32, %v6783_v6  ;;  %v18542_v1 = vsel %vm1034_vm1, %v6779_v36, %v6781_v32  ;;  %v22929_v36 = vld [vmem:[#allocation74_spill] sm:$0xff] }
 0x6f3   : > { %6894 = vrot.lane.b32.xlu0 %v18485_v14, %s15529_s14  ;;  %7012 = vmatprep.subr.bf16.mxu0 %v18539_v24  ;;  %v6472_v8 = vadd.f32 %v6428_v15, %v22929_v36  ;;  %v6582_v15 = vmin.f32 %v6538_v37, 6.0  ;;  %v18579_v36 = vsel %vm4665_vm5, %v6718_v29, %v6720_v12  ;;  %v22932_v37 = vld [vmem:[#allocation6_spill] sm:$0xff] }
 0x6f4   : > { %22931 = vst [vmem:[#allocation119_spill] sm:$0xff] %v18579_v36 }
 0x6f5   : > { %7013 = vmatpush1.bf16.msra.mxu0 %v18542_v1  ;;  %v6871_v60 = vpop.permute.xlu1 %6870  ;;  %v6869_v50 = vpop.permute.xlu0 %6868  ;;  %v18593_v40 = vmul.f32 %v6582_v15, %v22932_v37 }
 0x6f6   : > { %v18552_v46 = vsel %vm1146_vm6, %v6869_v50, %v6871_v60  ;;  %v18555_v32 = vsel %vm1146_vm6, %v6867_v10, %v6869_v50  ;;  %v6516_v50 = vmax.f32 %v6472_v8, 0.0 }
 0x6f7   : > { %7014 = vmatprep.subr.bf16.mxu0 %v18552_v46  ;;  %22933 = vst [vmem:[#allocation120_spill] sm:$0xff] %v18593_v40 }
 0x6f8   : > { %v6560_v22 = vmin.f32 %v6516_v50, 6.0 }
 0x6f9   : > { %7015 = vmatpush1.bf16.msra.mxu0 %v18555_v32  ;;  %v6716_v56 = vpop.permute.xlu1 %6715  ;;  %v18560_v43 = vpop.permute.xlu0 %6721 }
 0x6fa   : > { %v18563_v34 = vsel %vm4665_vm5, %v6716_v56, %v6718_v29  ;;  %v18567_v35 = vsel %vm4665_vm5, %v6720_v12, %v18560_v43  ;;  %7053 = vmatprep.subr.bf16.mxu0 %v18422_v58  ;;  %v18603_v50 = vmul.f32 %v6560_v22, %v22932_v37  ;;  %v18623_v22 = vsel %vm4665_vm5, %v18463_v54, %v6716_v56 }
 0x6fb   : > { %22930 = vst [vmem:[#allocation118_spill] sm:$0xff] %v18563_v34  ;;  %6810 = vrot.lane.b32.xlu0 %v18563_v34, %s15530_s15  ;;  %6814 = vrot.lane.b32.xlu1 %v18567_v35, %s15530_s15 }
 0x6fc   : > { %14636 = vmatmul.mubr.msk.bf16.vlgmr.msra.gmra.mrb[44].mxu0 %vm4910_vm13, %v18525_v52  ;;  %22934 = vst [vmem:[#allocation121_spill] sm:$0xff] %v18603_v50  ;;  %v6658_v15 = vpack.c.bf16 %v18593_v40, %v18603_v50 }
 0x6fd   : > { %7054 = vmatpush1.bf16.msra.mxu0 %v18393_v41  ;;  %v6787_v10 = vpop.permute.xlu1 %6786  ;;  %v6785_v62 = vpop.permute.xlu0 %6784  ;;  %7085 = vmatprep.mubr.bf16.mxu0 %v22700_v30 }
 0x6fe   : > { %v18582_v8 = vsel %vm1034_vm1, %v6785_v62, %v6787_v10  ;;  %v18585_v3 = vsel %vm1034_vm1, %v6783_v6, %v6785_v62 }
 0x6ff   : > { %6812 = vrot.lane.b32.xlu0 %v18579_v36, %s15530_s15  ;;  %6900 = vrot.lane.b32.xlu1 %v18579_v36, %s15529_s14 }
 0x700   : > { %7055 = vmatprep.subr.bf16.mxu0 %v18582_v8 }
 0x701   : > { %7056 = vmatpush1.bf16.msra.mxu0 %v18585_v3  ;;  %v6875_v12 = vpop.permute.xlu1 %6874  ;;  %v6873_v29 = vpop.permute.xlu0 %6872 }
 0x702   : > { %v18597_v9 = vsel %vm1146_vm6, %v6873_v29, %v6875_v12  ;;  %v18600_v6 = vsel %vm1146_vm6, %v6871_v60, %v6873_v29 }
 0x703   : > { %6902 = vrot.lane.b32.xlu0 %v18567_v35, %s15529_s14  ;;  %6898 = vrot.lane.b32.xlu1 %v18563_v34, %s15529_s14 }
 0x704   : > { %7057 = vmatprep.subr.bf16.mxu0 %v18597_v9 }
 0x705   : > { %7058 = vmatpush1.bf16.msra.mxu0 %v18600_v6  ;;  %v6789_v60 = vpop.permute.xlu0 %6788 }
 0x706   : > { %7096 = vmatprep.subr.bf16.mxu0 %v18436_v13 }
 0x707   : > { %6723 = vrot.lane.b32.xlu0 %v6658_v15, %s15534_s23  ;;  %6800 = vrot.lane.b32.xlu1 %v18504_v20, %s15530_s15  ;;  %v18636_v15 = vsel %vm1034_vm1, %v6787_v10, %v6789_v60 }
 0x708   : > { %14637 = vmatmul.mubr.msk.bf16.vlgmr.msra.gmra.mrb[48].mxu0 %vm4910_vm13, %v18525_v52 }
 0x709   : > { %7097 = vmatpush1.bf16.msra.mxu0 %v18425_v38  ;;  %7128 = vmatprep.mubr.bf16.mxu0 %v22700_v30  ;;  %v6877_v54 = vpop.permute.xlu0 %6876 }
 0x70a   : > { %v18644_v50 = vsel %vm1146_vm6, %v6875_v12, %v6877_v54 }
 0x70b   : > { %6888 = vrot.lane.b32.xlu0 %v18504_v20, %s15529_s14  ;;  %6808 = vrot.lane.b32.xlu1 %v18623_v22, %s15530_s15 }
 0x70f   : > { %6896 = vrot.lane.b32.xlu0 %v18623_v22, %s15529_s14 }
 0x731   : > { %v6791_v62 = vpop.permute.xlu1 %6790 }
 0x732   : > { %v18632_v29 = vsel %vm1034_vm1, %v6789_v60, %v6791_v62  ;;  %v6793_v10 = vpop.permute.xlu0 %6792 }
 0x733   : > { %7098 = vmatprep.subr.bf16.mxu0 %v18632_v29  ;;  %v18657_v12 = vsel %vm1034_vm1, %v6791_v62, %v6793_v10 }
 0x734   : > { %7099 = vmatpush1.bf16.msra.mxu0 %v18636_v15 }
 0x735   : > { %v6879_v56 = vpop.permute.xlu1 %6878 }
 0x736   : > { %v18640_v37 = vsel %vm1146_vm6, %v6877_v54, %v6879_v56  ;;  %v6881_v54 = vpop.permute.xlu0 %6880 }
 0x737   : > { %7100 = vmatprep.subr.bf16.mxu0 %v18640_v37  ;;  %v18665_v45 = vsel %vm1146_vm6, %v6879_v56, %v6881_v54 }
 0x738   : > { %7101 = vmatpush1.bf16.msra.mxu0 %v18644_v50 }
 0x739   : > { %7139 = vmatprep.subr.bf16.mxu0 %v18446_v16 }
 0x73b   : > { %14638 = vmatmul.mubr.msk.bf16.vlgmr.msra.gmra.mrb[52].mxu0 %vm4910_vm13, %v18525_v52 }
 0x73c   : > { %7140 = vmatpush1.bf16.msra.mxu0 %v18443_v27  ;;  %7171 = vmatprep.mubr.bf16.mxu0 %v22700_v30 }
 0x741   : > { %v6795_v60 = vpop.permute.xlu1 %6794 }
 0x742   : > { %v18653_v40 = vsel %vm1034_vm1, %v6793_v10, %v6795_v60 }
 0x743   : > { %7141 = vmatprep.subr.bf16.mxu0 %v18653_v40 }
 0x744   : > { %7142 = vmatpush1.bf16.msra.mxu0 %v18657_v12 }
 0x745   : > { %v6883_v48 = vpop.permute.xlu1 %6882 }
 0x746   : > { %v18661_v28 = vsel %vm1146_vm6, %v6881_v54, %v6883_v48 }
 0x747   : > { %7143 = vmatprep.subr.bf16.mxu0 %v18661_v28 }
 0x748   : > { %7144 = vmatpush1.bf16.msra.mxu0 %v18665_v45 }
 0x749   : > { %7182 = vmatprep.subr.bf16.mxu0 %v18466_v49 }
 0x74b   : > { %14639 = vmatmul.mubr.msk.bf16.vlgmr.msra.gmra.mrb[56].mxu0 %vm4910_vm13, %v18525_v52 }
 0x74c   : > { %7183 = vmatpush1.bf16.msra.mxu0 %v18457_v19  ;;  %7214 = vmatprep.mubr.bf16.mxu0 %v22700_v30 }
 0x74d   : > { %v6797_v62 = vpop.permute.xlu0 %6796  ;;  %v6799_v10 = vpop.permute.xlu1 %6798 }
 0x74e   : > { %v18674_v31 = vsel %vm1034_vm1, %v6797_v62, %v6799_v10  ;;  %v18677_v0 = vsel %vm1034_vm1, %v6795_v60, %v6797_v62 }
 0x74f   : > { %22935 = vst [vmem:[#allocation122_spill] sm:$0xff] %v18674_v31  ;;  %7184 = vmatprep.subr.bf16.mxu0 %v18674_v31 }
 0x750   : > { %7185 = vmatpush1.bf16.msra.mxu0 %v18677_v0 }
 0x751   : > { %v6885_v56 = vpop.permute.xlu0 %6884  ;;  %v18681_v54 = vpop.permute.xlu1 %6886 }
 0x752   : > { %v18685_v63 = vsel %vm1146_vm6, %v6885_v56, %v18681_v54  ;;  %v18688_v61 = vsel %vm1146_vm6, %v6883_v48, %v6885_v56 }
 0x753   : > { %22936 = vst [vmem:[#allocation123_spill] sm:$0xff] %v18685_v63  ;;  %7186 = vmatprep.subr.bf16.mxu0 %v18685_v63 }
 0x754   : > { %7187 = vmatpush1.bf16.msra.mxu0 %v18688_v61 }
 0x755   : > { %7268 = vmatprep.subr.bf16.mxu0 %v18490_v25  ;;  %v18695_v60 = vpop.permute.xlu1 %6806 }
 0x757   : > { %14640 = vmatmul.mubr.msk.bf16.vlgmr.msra.gmra.mrb[60].mxu0 %vm4910_vm13, %v18525_v52 }
 0x758   : > { %7269 = vmatpush1.bf16.msra.mxu0 %v18507_v17  ;;  %7300 = vmatprep.mubr.bf16.mxu0 %v22700_v30 }
 0x759   : > { %v6893_v55 = vpop.permute.xlu1 %6892 }
 0x75d   : > { %v6803_v62 = vpop.permute.xlu0 %6802 }
 0x75e   : > { %v6891_v7 = vpop.permute.xlu1 %6890 }
 0x75f   : > { %v18716_v25 = vsel %vm1146_vm6, %v6891_v7, %v6893_v55 }
 0x761   : > { %v6805_v57 = vpop.permute.xlu0 %6804 }
 0x762   : > { %v18701_v48 = vsel %vm1034_vm1, %v6805_v57, %v18695_v60  ;;  %v18704_v56 = vsel %vm1034_vm1, %v6803_v62, %v6805_v57 }
 0x763   : > { %22937 = vst [vmem:[#allocation124_spill] sm:$0xff] %v18701_v48  ;;  %7270 = vmatprep.subr.bf16.mxu0 %v18701_v48 }
 0x764   : > { %7271 = vmatpush1.bf16.msra.mxu0 %v18704_v56 }
 0x765   : > { %v18708_v4 = vpop.permute.xlu0 %6894 }
 0x766   : > { %v18712_v26 = vsel %vm1146_vm6, %v6893_v55, %v18708_v4 }
 0x767   : > { %22938 = vst [vmem:[#allocation125_spill] sm:$0xff] %v18712_v26  ;;  %7272 = vmatprep.subr.bf16.mxu0 %v18712_v26 }
 0x768   : > { %7273 = vmatpush1.bf16.msra.mxu0 %v18716_v25 }
 0x769   : > { %7354 = vmatprep.subr.bf16.mxu0 %v18579_v36 }
 0x76b   : > { %14642 = vmatmul.mubr.msk.bf16.vlgmr.msra.gmra.mrb[64].mxu0 %vm4910_vm13, %v18525_v52 }
 0x76c   : > { %7355 = vmatpush1.bf16.msra.mxu0 %v18563_v34  ;;  %7386 = vmatprep.mubr.bf16.mxu0 %v22700_v30 }
 0x76d   : > { %v6811_v57 = vpop.permute.xlu0 %6810  ;;  %v18724_v48 = vpop.permute.xlu1 %6814 }
 0x76e   : > { %22939 = vst [vmem:[#allocation126_spill] sm:$0xff] %v18724_v48 }
 0x771   : > { %v6813_v63 = vpop.permute.xlu0 %6812  ;;  %v6901_v31 = vpop.permute.xlu1 %6900 }
 0x772   : > { %v18728_v55 = vsel %vm1034_vm1, %v6813_v63, %v18724_v48  ;;  %v18731_v26 = vsel %vm1034_vm1, %v6811_v57, %v6813_v63 }
 0x773   : > { %22940 = vst [vmem:[#allocation127_spill] sm:$0xff] %v18728_v55  ;;  %7356 = vmatprep.subr.bf16.mxu0 %v18728_v55 }
 0x774   : > { %7357 = vmatpush1.bf16.msra.mxu0 %v18731_v26 }
 0x775   : > { %v18735_v36 = vpop.permute.xlu0 %6902  ;;  %v6899_v49 = vpop.permute.xlu1 %6898 }
 0x776   : > { %22941 = vst [vmem:[#allocation128_spill] sm:$0xff] %v18735_v36  ;;  %v18739_v51 = vsel %vm1146_vm6, %v6901_v31, %v18735_v36  ;;  %v18742_v34 = vsel %vm1146_vm6, %v6899_v49, %v6901_v31 }
 0x777   : > { %22942 = vst [vmem:[#allocation129_spill] sm:$0xff] %v18739_v51  ;;  %7358 = vmatprep.subr.bf16.mxu0 %v18739_v51 }
 0x778   : > { %7359 = vmatpush1.bf16.msra.mxu0 %v18742_v34 }
 0x779   : > { %v18746_v63 = vpop.permute.xlu0 %6723  ;;  %14648 = vmatprep.subr.msk.bf16.mxu0 %vm17295_vm8, %v18309_v2  ;;  %v6801_v55 = vpop.permute.xlu1 %6800 }
 0x77a   : > { %v6771_v48 = vsel %vm4665_vm5, %v18746_v63, 0  ;;  %v18756_v36 = vsel %vm4665_vm5, %v18560_v43, %v18746_v63  ;;  %v18759_v31 = vsel %vm1034_vm1, %v6801_v55, %v6803_v62  ;;  %v18762_v51 = vsel %vm1034_vm1, %v6799_v10, %v6801_v55 }
 0x77b   : > { %6951 = vrot.lane.b32.xlu0 %v6771_v48, %s15530_s15  ;;  %6816 = vrot.lane.b32.xlu1 %v18756_v36, %s15530_s15  ;;  %v6818_v10 = vsel %vm1034_vm1, %v17715_v18, %v18481_v59  ;;  %v6906_v59 = vsel %vm1146_vm6, %v17729_v21, %v18471_v39 }
 0x77c   : > { %7227 = vmatprep.subr.bf16.mxu1 %v18759_v31  ;;  %14644 = vmatmul.mubr.msk.bf16.vlgmr.msra.gmra.mrb[68].mxu0 %vm4910_vm13, %v18525_v52 }
 0x77d   : > { %7449 = vmatpush1.bf16.msra.mxu0 %v22700_v30  ;;  %v6889_v43 = vpop.permute.xlu0 %6888  ;;  %7228 = vmatpush1.bf16.msra.mxu1 %v18762_v51 }
 0x77e   : > { %7450 = vmatprep.subr.bf16.mxu0 %v18497_v5  ;;  %v18774_v2 = vsel %vm1146_vm6, %v6889_v43, %v6891_v7  ;;  %7480 = vmatprep.mubr.bf16.mxu0 %v22700_v30  ;;  %v18786_v62 = vsel %vm1146_vm6, %v18681_v54, %v6889_v43  ;;  %v14631_v7 = vld [vmem:[%s22168_s4 + $0x18] sm:$0xff]  ;;  %v14630_v5 = vld [vmem:[%s22168_s4 + $0x10] sm:$0xff] }
 0x77f   : > { %6955 = vrot.lane.b32.xlu0 %v6771_v48, %s15529_s14  ;;  %6904 = vrot.lane.b32.xlu1 %v18756_v36, %s15529_s14  ;;  %v6809_v48 = vpop.permute.xlu1 %6808  ;;  %v18805_v54 = vld [vmem:[%s22167_s3 + $0x18] sm:$0xff]  }
 0x780   : > { %7229 = vmatprep.subr.bf16.mxu1 %v18774_v2  ;;  %v18818_v39 = vsel %vm1034_vm1, %v18695_v60, %v6809_v48 }
 0x781   : > { %7451 = vmatpush1.bf16.msra.mxu0 %v6818_v10  ;;  %7230 = vmatpush1.bf16.msra.mxu1 %v18786_v62  ;;  %v6897_v55 = vpop.permute.xlu0 %6896 }
 0x782   : > { %7452 = vmatprep.subr.bf16.mxu0 %v18520_v33  ;;  %7311 = vmatprep.subr.bf16.mxu1 %v18623_v22  ;;  %v18809_v33 = vsel %vm1034_vm1, %v6809_v48, %v6811_v57  ;;  %v18823_v57 = vsel %vm1146_vm6, %v6897_v55, %v6899_v49  ;;  %v18830_v43 = vsel %vm1146_vm6, %v18708_v4, %v6897_v55  ;;  %v22943_v4 = vld [vmem:[#allocation118_spill] sm:$0xff]  ;;  %v18906_v49 = vld [vmem:[%s22167_s3 + $0x28] sm:$0xff]  }
 0x783   : > { %8457 = vperm.xlu0 %15432, %v14631_v7   ;;  %8452 = vperm.xlu1 %15433, %v14630_v5   ;;  %v22960_v7 = vld [vmem:[#allocation7_spill] sm:$0xff] }
 0x784   : > { %14641 = vmatmul.mubr.msk.bf16.vlgmr.msra.gmra.mrb[48].mxu1 %vm4910_vm13, %v18525_v52 }
 0x785   : > { %7453 = vmatpush1.bf16.msra.mxu0 %v6906_v59  ;;  %7312 = vmatpush1.bf16.msra.mxu1 %v18485_v14  ;;  %v22963_v59 = vld [vmem:[#allocation14_spill] sm:$0xff] }
 0x786   : > { %7491 = vmatprep.subr.bf16.mxu0 %v18350_v23  ;;  %7313 = vmatprep.subr.bf16.mxu1 %v18809_v33 }
 0x787   : > { %7343 = vmatprep.mubr.bf16.mxu1 %v22700_v30 }
 0x788   : > { %14649 = vmatmul.mubr.msk.bf16.vlgmr.msra.gmra.mrb[40].mxu0 %vm4910_vm13, %v18805_v54 }
 0x789   : > { %7492 = vmatpush1.bf16.msra.mxu0 %v18325_v44  ;;  %7314 = vmatpush1.bf16.msra.mxu1 %v18818_v39 }
 0x78a   : > { %7493 = vmatprep.subr.bf16.mxu0 %v18542_v1  ;;  %7315 = vmatprep.subr.bf16.mxu1 %v18823_v57 }
 0x78b   : > { %7523 = vmatprep.mubr.bf16.mxu0 %v22700_v30 }
 0x78d   : > { %7494 = vmatpush1.bf16.msra.mxu0 %v18493_v47  ;;  %7316 = vmatpush1.bf16.msra.mxu1 %v18830_v43 }
 0x78e   : > { %7495 = vmatprep.subr.bf16.mxu0 %v18555_v32  ;;  %7397 = vmatprep.subr.bf16.mxu1 %v18756_v36 }
 0x790   : > { %14643 = vmatmul.mubr.msk.bf16.vlgmr.msra.gmra.mrb[52].mxu1 %vm4910_vm13, %v18525_v52 }
 0x791   : > { %7496 = vmatpush1.bf16.msra.mxu0 %v18510_v53  ;;  %7398 = vmatpush1.bf16.msra.mxu1 %v18567_v35 }
 0x792   : > { %7534 = vmatprep.subr.bf16.mxu0 %v18393_v41  ;;  %7429 = vmatprep.mubr.bf16.mxu1 %v22700_v30 }
 0x794   : > { %14650 = vmatmul.mubr.msk.bf16.vlgmr.msra.gmra.mrb[44].mxu0 %vm4910_vm13, %v18805_v54 }
 0x795   : > { %7535 = vmatpush1.bf16.msra.mxu0 %v18390_v42  ;;  %7566 = vmatprep.mubr.bf16.mxu0 %v22700_v30 }
 0x796   : > { %7536 = vmatprep.subr.bf16.mxu0 %v18585_v3 }
 0x799   : > { %7537 = vmatpush1.bf16.msra.mxu0 %v18539_v24 }
 0x79a   : > { %7538 = vmatprep.subr.bf16.mxu0 %v18600_v6 }
 0x79d   : > { %7539 = vmatpush1.bf16.msra.mxu0 %v18552_v46 }
 0x79e   : > { %7577 = vmatprep.subr.bf16.mxu0 %v18425_v38 }
 0x7a0   : > { %14651 = vmatmul.mubr.msk.bf16.vlgmr.msra.gmra.mrb[48].mxu0 %vm4910_vm13, %v18805_v54 }
 0x7a1   : > { %7578 = vmatpush1.bf16.msra.mxu0 %v18422_v58  ;;  %7609 = vmatprep.mubr.bf16.mxu0 %v22700_v30 }
 0x7a2   : > { %7579 = vmatprep.subr.bf16.mxu0 %v18636_v15 }
 0x7a5   : > { %7580 = vmatpush1.bf16.msra.mxu0 %v18582_v8 }
 0x7a6   : > { %7581 = vmatprep.subr.bf16.mxu0 %v18644_v50 }
 0x7a9   : > { %7582 = vmatpush1.bf16.msra.mxu0 %v18597_v9 }
 0x7aa   : > { %7620 = vmatprep.subr.bf16.mxu0 %v18443_v27 }
 0x7ac   : > { %14652 = vmatmul.mubr.msk.bf16.vlgmr.msra.gmra.mrb[52].mxu0 %vm4910_vm13, %v18805_v54 }
 0x7ad   : > { %7621 = vmatpush1.bf16.msra.mxu0 %v18436_v13  ;;  %7652 = vmatprep.mubr.bf16.mxu0 %v22700_v30 }
 0x7ae   : > { %7622 = vmatprep.subr.bf16.mxu0 %v18657_v12 }
 0x7b1   : > { %7623 = vmatpush1.bf16.msra.mxu0 %v18632_v29 }
 0x7b2   : > { %7624 = vmatprep.subr.bf16.mxu0 %v18665_v45 }
 0x7b5   : > { %7625 = vmatpush1.bf16.msra.mxu0 %v18640_v37 }
 0x7b6   : > { %7663 = vmatprep.subr.bf16.mxu0 %v18457_v19 }
 0x7b8   : > { %14653 = vmatmul.mubr.msk.bf16.vlgmr.msra.gmra.mrb[56].mxu0 %vm4910_vm13, %v18805_v54 }
 0x7b9   : > { %7664 = vmatpush1.bf16.msra.mxu0 %v18446_v16  ;;  %7695 = vmatprep.mubr.bf16.mxu0 %v22700_v30 }
 0x7ba   : > { %7665 = vmatprep.subr.bf16.mxu0 %v18677_v0 }
 0x7bd   : > { %7666 = vmatpush1.bf16.msra.mxu0 %v18653_v40 }
 0x7be   : > { %7667 = vmatprep.subr.bf16.mxu0 %v18688_v61 }
 0x7c1   : > { %7668 = vmatpush1.bf16.msra.mxu0 %v18661_v28 }
 0x7c2   : > { %7749 = vmatprep.subr.bf16.mxu0 %v18507_v17 }
 0x7c4   : > { %14654 = vmatmul.mubr.msk.bf16.vlgmr.msra.gmra.mrb[60].mxu0 %vm4910_vm13, %v18805_v54 }
 0x7c5   : > { %7750 = vmatpush1.bf16.msra.mxu0 %v18504_v20  ;;  %7781 = vmatprep.mubr.bf16.mxu0 %v22700_v30 }
 0x7c6   : > { %7751 = vmatprep.subr.bf16.mxu0 %v18704_v56 }
 0x7c9   : > { %7752 = vmatpush1.bf16.msra.mxu0 %v18759_v31 }
 0x7ca   : > { %7753 = vmatprep.subr.bf16.mxu0 %v18716_v25 }
 0x7cd   : > { %7754 = vmatpush1.bf16.msra.mxu0 %v18774_v2 }
 0x7ce   : > { %7835 = vmatprep.subr.bf16.mxu0 %v22943_v4 }
 0x7d0   : > { %14656 = vmatmul.mubr.msk.bf16.vlgmr.msra.gmra.mrb[64].mxu0 %vm4910_vm13, %v18805_v54 }
 0x7d1   : > { %7836 = vmatpush1.bf16.msra.mxu0 %v18623_v22  ;;  %7867 = vmatprep.mubr.bf16.mxu0 %v22700_v30 }
 0x7d2   : > { %7837 = vmatprep.subr.bf16.mxu0 %v18731_v26 }
 0x7d5   : > { %7838 = vmatpush1.bf16.msra.mxu0 %v18809_v33 }
 0x7d6   : > { %7839 = vmatprep.subr.bf16.mxu0 %v18742_v34 }
 0x7d9   : > { %7840 = vmatpush1.bf16.msra.mxu0 %v18823_v57 }
 0x7da   : > { %7933 = vmatprep.subr.bf16.mxu0 %v18350_v23  ;;  %v22944_v23 = vld [vmem:[#allocation126_spill] sm:$0xff] }
 0x7dc   : > { %14658 = vmatmul.mubr.msk.bf16.vlgmr.msra.gmra.mrb[68].mxu0 %vm4910_vm13, %v18805_v54 }
 0x7dd   : > { %7934 = vmatpush1.bf16.msra.mxu0 %v18325_v44  ;;  %7965 = vmatprep.mubr.bf16.mxu0 %v22700_v30 }
 0x7de   : > { %7935 = vmatprep.subr.bf16.mxu0 %v18542_v1 }
 0x7e1   : > { %7936 = vmatpush1.bf16.msra.mxu0 %v18493_v47  ;;  %v22945_v47 = vld [vmem:[#allocation128_spill] sm:$0xff] }
 0x7e2   : > { %7937 = vmatprep.subr.bf16.mxu0 %v18555_v32 }
 0x7e5   : > { %7938 = vmatpush1.bf16.msra.mxu0 %v18510_v53 }
 0x7e6   : > { %7976 = vmatprep.subr.bf16.mxu0 %v18393_v41 }
 0x7e8   : > { %14661 = vmatmul.mubr.msk.bf16.vlgmr.msra.gmra.mrb[40].mxu0 %vm4910_vm13, %v18906_v49 }
 0x7e9   : > { %7977 = vmatpush1.bf16.msra.mxu0 %v18390_v42  ;;  %8008 = vmatprep.mubr.bf16.mxu0 %v22700_v30 }
 0x7ea   : > { %7978 = vmatprep.subr.bf16.mxu0 %v18585_v3 }
 0x7ed   : > { %7979 = vmatpush1.bf16.msra.mxu0 %v18539_v24  ;;  %v18916_v1 = vpop.permute.xlu0 %6951  ;;  %v6817_v44 = vpop.permute.xlu1 %6816 }
 0x7ee   : > { %7980 = vmatprep.subr.bf16.mxu0 %v18600_v6  ;;  %v18921_v53 = vsel %vm1034_vm1, %v6817_v44, %v18916_v1  ;;  %v18925_v41 = vsel %vm1034_vm1, %v22944_v23, %v6817_v44  ;;  %v22966_v44 = vld [vmem:[#allocation78_spill] sm:$0xff] }
 0x7ef   : > { %7399 = vmatprep.subr.bf16.mxu1 %v18921_v53 }
 0x7f0   : > { %7400 = vmatpush1.bf16.msra.mxu1 %v18925_v41 }
 0x7f1   : > { %7981 = vmatpush1.bf16.msra.mxu0 %v18552_v46  ;;  %v18930_v3 = vpop.permute.xlu0 %6955  ;;  %v6905_v24 = vpop.permute.xlu1 %6904  ;;  %v22946_v46 = vld [vmem:[#allocation116_spill] sm:$0xff] }
 0x7f2   : > { %8019 = vmatprep.subr.bf16.mxu0 %v18425_v38  ;;  %v18935_v42 = vsel %vm1146_vm6, %v6905_v24, %v18930_v3  ;;  %v18939_v32 = vsel %vm1146_vm6, %v22945_v47, %v6905_v24  ;;  %v22947_v38 = vld [vmem:[#allocation115_spill] sm:$0xff] }
 0x7f3   : > { %7401 = vmatprep.subr.bf16.mxu1 %v18935_v42 }
 0x7f4   : > { %14662 = vmatmul.mubr.msk.bf16.vlgmr.msra.gmra.mrb[44].mxu0 %vm4910_vm13, %v18906_v49  ;;  %7402 = vmatpush1.bf16.msra.mxu1 %v18939_v32 }
 0x7f5   : > { %8020 = vmatpush1.bf16.msra.mxu0 %v18422_v58  ;;  %7706 = vmatprep.subr.bf16.mxu1 %v22946_v46  ;;  %v22948_v58 = vld [vmem:[#allocation122_spill] sm:$0xff] }
 0x7f6   : > { %8021 = vmatprep.subr.bf16.mxu0 %v18636_v15  ;;  %8051 = vmatprep.mubr.bf16.mxu0 %v22700_v30 }
 0x7f7   : > { %14645 = vmatmul.mubr.msk.bf16.vlgmr.msra.gmra.mrb[56].mxu1 %vm4910_vm13, %v18525_v52  ;;  %v22949_v52 = vld [vmem:[#allocation123_spill] sm:$0xff] }
 0x7f8   : > { %7707 = vmatpush1.bf16.msra.mxu1 %v22947_v38  ;;  %7738 = vmatprep.mubr.bf16.mxu1 %v22700_v30 }
 0x7f9   : > { %8022 = vmatpush1.bf16.msra.mxu0 %v18582_v8  ;;  %7708 = vmatprep.subr.bf16.mxu1 %v18762_v51  ;;  %v22957_v8 = vld [vmem:[#allocation70_spill] sm:$0xff] }
 0x7fa   : > { %8023 = vmatprep.subr.bf16.mxu0 %v18644_v50 }
 0x7fc   : > { %7709 = vmatpush1.bf16.msra.mxu1 %v22948_v58 }
 0x7fd   : > { %8024 = vmatpush1.bf16.msra.mxu0 %v18597_v9  ;;  %7710 = vmatprep.subr.bf16.mxu1 %v18786_v62  ;;  %v22950_v9 = vld [vmem:[#allocation117_spill] sm:$0xff] }
 0x7fe   : > { %8062 = vmatprep.subr.bf16.mxu0 %v18443_v27  ;;  %v22952_v27 = vld [vmem:[#allocation125_spill] sm:$0xff] }
 0x800   : > { %14663 = vmatmul.mubr.msk.bf16.vlgmr.msra.gmra.mrb[48].mxu0 %vm4910_vm13, %v18906_v49  ;;  %7711 = vmatpush1.bf16.msra.mxu1 %v22949_v52 }
 0x801   : > { %8063 = vmatpush1.bf16.msra.mxu0 %v18436_v13  ;;  %7792 = vmatprep.subr.bf16.mxu1 %v18485_v14  ;;  %v22951_v13 = vld [vmem:[#allocation124_spill] sm:$0xff] }
 0x802   : > { %8064 = vmatprep.subr.bf16.mxu0 %v18657_v12  ;;  %8094 = vmatprep.mubr.bf16.mxu0 %v22700_v30  ;;  %v22959_v12 = vld [vmem:[#allocation77_spill] sm:$0xff] }
 0x803   : > { %14655 = vmatmul.mubr.msk.bf16.vlgmr.msra.gmra.mrb[48].mxu1 %vm4910_vm13, %v18805_v54 }
 0x804   : > { %7793 = vmatpush1.bf16.msra.mxu1 %v22950_v9  ;;  %7824 = vmatprep.mubr.bf16.mxu1 %v22700_v30 }
 0x805   : > { %8065 = vmatpush1.bf16.msra.mxu0 %v18632_v29  ;;  %7794 = vmatprep.subr.bf16.mxu1 %v18818_v39 }
 0x806   : > { %8066 = vmatprep.subr.bf16.mxu0 %v18665_v45  ;;  %v22953_v45 = vld [vmem:[#allocation119_spill] sm:$0xff] }
 0x808   : > { %7795 = vmatpush1.bf16.msra.mxu1 %v22951_v13 }
 0x809   : > { %8067 = vmatpush1.bf16.msra.mxu0 %v18640_v37  ;;  %7796 = vmatprep.subr.bf16.mxu1 %v18830_v43 }
 0x80a   : > { %8105 = vmatprep.subr.bf16.mxu0 %v18457_v19 }
 0x80c   : > { %14664 = vmatmul.mubr.msk.bf16.vlgmr.msra.gmra.mrb[52].mxu0 %vm4910_vm13, %v18906_v49  ;;  %7797 = vmatpush1.bf16.msra.mxu1 %v22952_v27 }
 0x80d   : > { %8106 = vmatpush1.bf16.msra.mxu0 %v18446_v16  ;;  %7878 = vmatprep.subr.bf16.mxu1 %v18567_v35  ;;  %v22954_v16 = vld [vmem:[#allocation127_spill] sm:$0xff] }
 0x80e   : > { %8107 = vmatprep.subr.bf16.mxu0 %v18677_v0  ;;  %8137 = vmatprep.mubr.bf16.mxu0 %v22700_v30  ;;  %v22955_v0 = vld [vmem:[#allocation129_spill] sm:$0xff] }
 0x80f   : > { %14657 = vmatmul.mubr.msk.bf16.vlgmr.msra.gmra.mrb[52].mxu1 %vm4910_vm13, %v18805_v54 }
 0x810   : > { %7879 = vmatpush1.bf16.msra.mxu1 %v22953_v45  ;;  %7910 = vmatprep.mubr.bf16.mxu1 %v22700_v30 }
 0x811   : > { %8108 = vmatpush1.bf16.msra.mxu0 %v18653_v40  ;;  %7880 = vmatprep.subr.bf16.mxu1 %v18925_v41 }
 0x812   : > { %8109 = vmatprep.subr.bf16.mxu0 %v18688_v61  ;;  %v7923_v61 = vsel %vm1146_vm6, %v18930_v3, %v17729_v21  ;;  %v22967_v3 = vld [vmem:[#allocation79_spill] sm:$0xff] }
 0x814   : > { %7881 = vmatpush1.bf16.msra.mxu1 %v22954_v16 }
 0x815   : > { %8110 = vmatpush1.bf16.msra.mxu0 %v18661_v28  ;;  %7882 = vmatprep.subr.bf16.mxu1 %v18939_v32  ;;  %v19061_v28 = vpop.permute.xlu1 %8452 }
 0x816   : > { %8148 = vmatprep.subr.bf16.mxu0 %v22946_v46 }
 0x818   : > { %14665 = vmatmul.mubr.msk.bf16.vlgmr.msra.gmra.mrb[56].mxu0 %vm4910_vm13, %v18906_v49  ;;  %7883 = vmatpush1.bf16.msra.mxu1 %v22955_v0 }
 0x819   : > { %8149 = vmatpush1.bf16.msra.mxu0 %v22947_v38  ;;  %8191 = vmatprep.subr.bf16.mxu1 %v18507_v17  ;;  %v22956_v17 = vld [vmem:[#allocation75_spill] sm:$0xff] }
 0x81a   : > { %8150 = vmatprep.subr.bf16.mxu0 %v18762_v51  ;;  %8180 = vmatprep.mubr.bf16.mxu0 %v22700_v30 }
 0x81b   : > { %14659 = vmatmul.mubr.msk.bf16.vlgmr.msra.gmra.mrb[56].mxu1 %vm4910_vm13, %v18805_v54 }
 0x81c   : > { %8192 = vmatpush1.bf16.msra.mxu1 %v18504_v20  ;;  %8223 = vmatprep.mubr.bf16.mxu1 %v22700_v30 }
 0x81d   : > { %8151 = vmatpush1.bf16.msra.mxu0 %v22948_v58  ;;  %8193 = vmatprep.subr.bf16.mxu1 %v18704_v56  ;;  %v22969_v58 = vld [vmem:[#allocation80_spill] sm:$0xff] }
 0x81e   : > { %8152 = vmatprep.subr.bf16.mxu0 %v18786_v62 }
 0x820   : > { %8194 = vmatpush1.bf16.msra.mxu1 %v18759_v31 }
 0x821   : > { %8153 = vmatpush1.bf16.msra.mxu0 %v22949_v52  ;;  %8195 = vmatprep.subr.bf16.mxu1 %v18716_v25  ;;  %v19064_v25 = vpop.permute.xlu0 %8457 }
 0x822   : > { %8234 = vmatprep.subr.bf16.mxu0 %v18485_v14 }
 0x824   : > { %14666 = vmatmul.mubr.msk.bf16.vlgmr.msra.gmra.mrb[60].mxu0 %vm4910_vm13, %v18906_v49  ;;  %8196 = vmatpush1.bf16.msra.mxu1 %v18774_v2 }
 0x825   : > { %8235 = vmatpush1.bf16.msra.mxu0 %v22950_v9  ;;  %8277 = vmatprep.subr.bf16.mxu1 %v22943_v4 }
 0x826   : > { %8236 = vmatprep.subr.bf16.mxu0 %v18818_v39  ;;  %8266 = vmatprep.mubr.bf16.mxu0 %v22700_v30 }
 0x827   : > { %14667 = vmatmul.mubr.msk.bf16.vlgmr.msra.gmra.mrb[48].mxu1 %vm4910_vm13, %v18906_v49 }
 0x828   : > { %8278 = vmatpush1.bf16.msra.mxu1 %v18623_v22  ;;  %8309 = vmatprep.mubr.bf16.mxu1 %v22700_v30  ;;  %v22958_v22 = vld [vmem:[#allocation76_spill] sm:$0xff] }
 0x829   : > { %8237 = vmatpush1.bf16.msra.mxu0 %v22951_v13  ;;  %8279 = vmatprep.subr.bf16.mxu1 %v18731_v26  ;;  %v7921_v26 = vsel %vm1034_vm1, %v18916_v1, %v17715_v18 }
 0x82a   : > { %8238 = vmatprep.subr.bf16.mxu0 %v18830_v43 }
 0x82c   : > { %8280 = vmatpush1.bf16.msra.mxu1 %v18809_v33 }
 0x82d   : > { %8239 = vmatpush1.bf16.msra.mxu0 %v22952_v27  ;;  %8281 = vmatprep.subr.bf16.mxu1 %v18742_v34 }
 0x82e   : > { %8320 = vmatprep.subr.bf16.mxu0 %v18567_v35 }
 0x830   : > { %14668 = vmatmul.mubr.msk.bf16.vlgmr.msra.gmra.mrb[64].mxu0 %vm4910_vm13, %v18906_v49  ;;  %8282 = vmatpush1.bf16.msra.mxu1 %v18823_v57 }
 0x831   : > { %8321 = vmatpush1.bf16.msra.mxu0 %v22953_v45  ;;  %14671 = vmatprep.subr.msk.bf16.mxu1 %vm4665_vm5, %v18746_v63 }
 0x832   : > { %8322 = vmatprep.subr.bf16.mxu0 %v18925_v41  ;;  %8352 = vmatprep.mubr.bf16.mxu0 %v22700_v30 }
 0x833   : > { %14669 = vmatmul.mubr.msk.bf16.vlgmr.msra.gmra.mrb[52].mxu1 %vm4910_vm13, %v18906_v49 }
 0x834   : > { %8364 = vmatpush1.bf16.msra.mxu1 %v18756_v36  ;;  %8395 = vmatprep.mubr.bf16.mxu1 %v22700_v30 }
 0x835   : > { %8323 = vmatpush1.bf16.msra.mxu0 %v22954_v16  ;;  %8365 = vmatprep.subr.bf16.mxu1 %v7921_v26  ;;  %v22970_v26 = vld [vmem:[#allocation8_spill] sm:$0xff] }
 0x836   : > { %8324 = vmatprep.subr.bf16.mxu0 %v18939_v32  ;;  %v22968_v32 = vld [vmem:[#allocation71_spill] sm:$0xff] }
 0x838   : > { %8366 = vmatpush1.bf16.msra.mxu1 %v18921_v53 }
 0x839   : > { %8325 = vmatpush1.bf16.msra.mxu0 %v22955_v0  ;;  %8367 = vmatprep.subr.bf16.mxu1 %v7923_v61 }
 0x83c   : > { %14670 = vmatmul.mubr.msk.bf16.vlgmr.msra.gmra.mrb[68].mxu0 %vm4910_vm13, %v18906_v49  ;;  %8368 = vmatpush1.bf16.msra.mxu1 %v18935_v42 }
 0x83d   : > { %9482 = vmatprep.mubr.bf16.mxu0 %v22700_v30 }
 0x83f   : > { %14672 = vmatmul.mubr.msk.bf16.vlgmr.msra.gmra.mrb[56].mxu1 %vm4910_vm13, %v18906_v49 }
 0x840   : > { %9052 = vmatprep.mubr.bf16.mxu1 %v22700_v30 }
 0x8bb   : > { %v7967_v40 = vpop.f32.mrb[40].mxu0 }
 0x8bc   : > { %v8460_v20 = vadd.f32 %v19061_v28, %v7967_v40  ;;  %v7969_v51 = vpop.f32.mrb[41].mxu0 }
 0x8bd   : > { %v8461_v19 = vadd.f32 %v19061_v28, %v7969_v51  ;;  %v7971_v14 = vpop.f32.mrb[42].mxu0 }
 0x8be   : > { %v8504_v35 = vadd.f32 %v8460_v20, %v22956_v17  ;;  %v8482_v36 = vadd.f32 %v19064_v25, %v7971_v14  ;;  %v7973_v34 = vpop.f32.mrb[43].mxu0  ;;  %v22973_v20 = vld [vmem:[#allocation15_spill] sm:$0xff] }
 0x8bf   : > { %v8505_v37 = vadd.f32 %v8461_v19, %v22957_v8  ;;  %v8483_v6 = vadd.f32 %v19064_v25, %v7973_v34 }
 0x8c0   : > { %v8548_v50 = vmax.f32 %v8504_v35, 0.0  ;;  %v8526_v29 = vadd.f32 %v8482_v36, %v22958_v22 }
 0x8c1   : > { %v8549_v15 = vmax.f32 %v8505_v37, 0.0  ;;  %v8527_v60 = vadd.f32 %v8483_v6, %v22959_v12  ;;  %v22976_v6 = vld [vmem:[#allocation72_spill] sm:$0xff] }
 0x8c2   : > { %v8592_v56 = vmin.f32 %v8548_v50, 6.0  ;;  %v8570_v63 = vmax.f32 %v8526_v29, 0.0 }
 0x8c3   : > { %v8593_v31 = vmin.f32 %v8549_v15, 6.0  ;;  %v8571_v2 = vmax.f32 %v8527_v60, 0.0  ;;  %v22977_v15 = vld [vmem:[#allocation82_spill] sm:$0xff] }
 0x8c4   : > { %v8614_v10 = vmin.f32 %v8570_v63, 6.0  ;;  %v19074_v5 = vmul.f32 %v8592_v56, %v22960_v7  ;;  %v22978_v63 = vld [vmem:[#allocation81_spill] sm:$0xff] }
 0x8c5   : > { %v8615_v62 = vmin.f32 %v8571_v2, 6.0  ;;  %v19080_v54 = vmul.f32 %v8593_v31, %v22963_v59 }
 0x8c6   : > { %22961 = vst [vmem:[#allocation118_spill] sm:$0xff] %v19074_v5  ;;  %v19077_v48 = vmul.f32 %v8614_v10, %v22960_v7  ;;  %v22979_v10 = vld [vmem:[#allocation84_spill] sm:$0xff] }
 0x8c7   : > { %22964 = vst [vmem:[#allocation128_spill] sm:$0xff] %v19080_v54  ;;  %v19083_v33 = vmul.f32 %v8615_v62, %v22963_v59  ;;  %v8010_v55 = vpop.f32.mrb[44].mxu0 }
 0x8c8   : > { %22962 = vst [vmem:[#allocation126_spill] sm:$0xff] %v19077_v48  ;;  %v8462_v39 = vadd.f32 %v19061_v28, %v8010_v55  ;;  %v8012_v57 = vpop.f32.mrb[45].mxu0  ;;  %v8690_v43 = vpack.c.bf16 %v19077_v48, %v19074_v5 }
 0x8c9   : > { %22965 = vst [vmem:[#allocation116_spill] sm:$0xff] %v19083_v33  ;;  %v8463_v4 = vadd.f32 %v19061_v28, %v8012_v57  ;;  %v8014_v49 = vpop.f32.mrb[46].mxu0  ;;  %v8691_v1 = vpack.c.bf16 %v19083_v33, %v19080_v54 }
 0x8ca   : > { %v8506_v53 = vadd.f32 %v8462_v39, %v22966_v44  ;;  %v8484_v23 = vadd.f32 %v19064_v25, %v8014_v49  ;;  %v8016_v41 = vpop.f32.mrb[47].mxu0  ;;  %8734 = vrot.lane.b32.xlu1 %v8690_v43, %s15534_s23 }
 0x8cb   : > { %v8507_v24 = vadd.f32 %v8463_v4, %v22967_v3  ;;  %v8485_v42 = vadd.f32 %v19064_v25, %v8016_v41  ;;  %8736 = vrot.lane.b32.xlu0 %v8691_v1, %s15534_s23  ;;  %v22980_v1 = vld [vmem:[#allocation17_spill] sm:$0xff] }
 0x8cc   : > { %v8550_v47 = vmax.f32 %v8506_v53, 0.0  ;;  %v8528_v46 = vadd.f32 %v8484_v23, %v22968_v32  ;;  %v22983_v23 = vld [vmem:[#allocation18_spill] sm:$0xff] }
 0x8cd   : > { %v8551_v38 = vmax.f32 %v8507_v24, 0.0  ;;  %v8529_v52 = vadd.f32 %v8485_v42, %v22969_v58 }
 0x8ce   : > { %v8594_v9 = vmin.f32 %v8550_v47, 6.0  ;;  %v8572_v13 = vmax.f32 %v8528_v46, 0.0 }
 0x8cf   : > { %v8595_v27 = vmin.f32 %v8551_v38, 6.0  ;;  %v8573_v45 = vmax.f32 %v8529_v52, 0.0  ;;  %v22986_v52 = vld [vmem:[#allocation86_spill] sm:$0xff] }
 0x8d0   : > { %v8616_v16 = vmin.f32 %v8572_v13, 6.0  ;;  %v19100_v61 = vmul.f32 %v8594_v9, %v22970_v26 }
 0x8d1   : > { %v8617_v0 = vmin.f32 %v8573_v45, 6.0  ;;  %v19106_v51 = vmul.f32 %v8595_v27, %v22973_v20  ;;  %v22987_v45 = vld [vmem:[#allocation88_spill] sm:$0xff] }
 0x8d2   : > { %22971 = vst [vmem:[#allocation115_spill] sm:$0xff] %v19100_v61  ;;  %v19103_v40 = vmul.f32 %v8616_v16, %v22970_v26 }
 0x8d3   : > { %22974 = vst [vmem:[#allocation123_spill] sm:$0xff] %v19106_v51  ;;  %v19109_v19 = vmul.f32 %v8617_v0, %v22973_v20  ;;  %v8053_v14 = vpop.f32.mrb[48].mxu0 }
 0x8d4   : > { %22972 = vst [vmem:[#allocation122_spill] sm:$0xff] %v19103_v40  ;;  %v8464_v17 = vadd.f32 %v19061_v28, %v8053_v14  ;;  %v8055_v35 = vpop.f32.mrb[49].mxu0  ;;  %v8692_v36 = vpack.c.bf16 %v19103_v40, %v19100_v61 }
 0x8d5   : > { %22975 = vst [vmem:[#allocation117_spill] sm:$0xff] %v19109_v19  ;;  %v8465_v34 = vadd.f32 %v19061_v28, %v8055_v35  ;;  %v8057_v8 = vpop.f32.mrb[50].mxu0  ;;  %v8693_v37 = vpack.c.bf16 %v19109_v19, %v19106_v51 }
 0x8d6   : > { %v8508_v50 = vadd.f32 %v8464_v17, %v22976_v6  ;;  %v8486_v22 = vadd.f32 %v19064_v25, %v8057_v8  ;;  %v8059_v29 = vpop.f32.mrb[51].mxu0  ;;  %8738 = vrot.lane.b32.xlu1 %v8692_v36, %s15534_s23  ;;  %v22988_v17 = vld [vmem:[#allocation87_spill] sm:$0xff] }
 0x8d7   : > { %v8509_v12 = vadd.f32 %v8465_v34, %v22977_v15  ;;  %v8487_v60 = vadd.f32 %v19064_v25, %v8059_v29  ;;  %8740 = vrot.lane.b32.xlu0 %v8693_v37, %s15534_s23  ;;  %v22989_v34 = vld [vmem:[#allocation89_spill] sm:$0xff] }
 0x8d8   : > { %v8552_v56 = vmax.f32 %v8508_v50, 0.0  ;;  %v8530_v31 = vadd.f32 %v8486_v22, %v22978_v63  ;;  %v22993_v63 = vld [vmem:[#allocation20_spill] sm:$0xff] }
 0x8d9   : > { %v8553_v2 = vmax.f32 %v8509_v12, 0.0  ;;  %v8531_v62 = vadd.f32 %v8487_v60, %v22979_v10  ;;  %v22990_v12 = vld [vmem:[#allocation19_spill] sm:$0xff] }
 0x8da   : > { %v8596_v55 = vmin.f32 %v8552_v56, 6.0  ;;  %v8574_v39 = vmax.f32 %v8530_v31, 0.0 }
 0x8db   : > { %v8597_v57 = vmin.f32 %v8553_v2, 6.0  ;;  %v8575_v43 = vmax.f32 %v8531_v62, 0.0 }
 0x8dc   : > { %v8618_v4 = vmin.f32 %v8574_v39, 6.0  ;;  %v19126_v44 = vmul.f32 %v8596_v55, %v22980_v1 }
 0x8dd   : > { %v8619_v49 = vmin.f32 %v8575_v43, 6.0  ;;  %v19132_v41 = vmul.f32 %v8597_v57, %v22983_v23 }
 0x8de   : > { %22981 = vst [vmem:[#allocation124_spill] sm:$0xff] %v19126_v44  ;;  %v19129_v53 = vmul.f32 %v8618_v4, %v22980_v1 }
 0x8df   : > { %22984 = vst [vmem:[#allocation119_spill] sm:$0xff] %v19132_v41  ;;  %v19135_v3 = vmul.f32 %v8619_v49, %v22983_v23  ;;  %v8096_v24 = vpop.f32.mrb[52].mxu0  ;;  %v22996_v49 = vld [vmem:[#allocation90_spill] sm:$0xff] }
 0x8e0   : > { %22982 = vst [vmem:[#allocation125_spill] sm:$0xff] %v19129_v53  ;;  %v8466_v42 = vadd.f32 %v19061_v28, %v8096_v24  ;;  %v8098_v47 = vpop.f32.mrb[53].mxu0  ;;  %v8694_v32 = vpack.c.bf16 %v19129_v53, %v19126_v44 }
 0x8e1   : > { %22985 = vst [vmem:[#allocation127_spill] sm:$0xff] %v19135_v3  ;;  %v8467_v46 = vadd.f32 %v19061_v28, %v8098_v47  ;;  %v8100_v38 = vpop.f32.mrb[54].mxu0  ;;  %v8695_v58 = vpack.c.bf16 %v19135_v3, %v19132_v41 }
 0x8e2   : > { %v8510_v9 = vadd.f32 %v8466_v42, %v22986_v52  ;;  %v8488_v13 = vadd.f32 %v19064_v25, %v8100_v38  ;;  %v8102_v27 = vpop.f32.mrb[55].mxu0  ;;  %8742 = vrot.lane.b32.xlu1 %v8694_v32, %s15534_s23  ;;  %v22997_v32 = vld [vmem:[#allocation92_spill] sm:$0xff]  ;;  %v22998_v52 = vld [vmem:[#allocation91_spill] sm:$0xff] }
 0x8e3   : > { %v8511_v16 = vadd.f32 %v8467_v46, %v22987_v45  ;;  %v8489_v0 = vadd.f32 %v19064_v25, %v8102_v27  ;;  %8744 = vrot.lane.b32.xlu0 %v8695_v58, %s15534_s23  ;;  %v22999_v27 = vld [vmem:[#allocation93_spill] sm:$0xff] }
 0x8e4   : > { %v8554_v14 = vmax.f32 %v8510_v9, 0.0  ;;  %v8532_v35 = vadd.f32 %v8488_v13, %v22988_v17 }
 0x8e5   : > { %v8555_v36 = vmax.f32 %v8511_v16, 0.0  ;;  %v8533_v8 = vadd.f32 %v8489_v0, %v22989_v34  ;;  %v23000_v34 = vld [vmem:[#allocation10_spill] sm:$0xff] }
 0x8e6   : > { %v8598_v37 = vmin.f32 %v8554_v14, 6.0  ;;  %v8576_v6 = vmax.f32 %v8532_v35, 0.0 }
 0x8e7   : > { %v8599_v50 = vmin.f32 %v8555_v36, 6.0  ;;  %v8577_v22 = vmax.f32 %v8533_v8, 0.0 }
 0x8e8   : > { %v8620_v29 = vmin.f32 %v8576_v6, 6.0  ;;  %v19152_v60 = vmul.f32 %v8598_v37, %v22990_v12  ;;  %v23003_v6 = vld [vmem:[#allocation49_spill] sm:$0xff] }
 0x8e9   : > { %v8621_v15 = vmin.f32 %v8577_v22, 6.0  ;;  %v19158_v31 = vmul.f32 %v8599_v50, %v22993_v63 }
 0x8ea   : > { %22991 = vst [vmem:[#allocation129_spill] sm:$0xff] %v19152_v60  ;;  %v19155_v56 = vmul.f32 %v8620_v29, %v22990_v12 }
 0x8eb   : > { %22994 = vst [vmem:[#allocation70_spill] sm:$0xff] %v19158_v31  ;;  %v19161_v2 = vmul.f32 %v8621_v15, %v22993_v63  ;;  %v8139_v10 = vpop.f32.mrb[56].mxu0  ;;  %v23027_v63 = vld [vmem:[#allocation98_spill] sm:$0xff] }
 0x8ec   : > { %22992 = vst [vmem:[#allocation75_spill] sm:$0xff] %v19155_v56  ;;  %v8468_v62 = vadd.f32 %v19061_v28, %v8139_v10  ;;  %v8141_v55 = vpop.f32.mrb[57].mxu0  ;;  %v8696_v39 = vpack.c.bf16 %v19155_v56, %v19152_v60 }
 0x8ed   : > { %22995 = vst [vmem:[#allocation76_spill] sm:$0xff] %v19161_v2  ;;  %v8469_v57 = vadd.f32 %v19061_v28, %v8141_v55  ;;  %v8143_v43 = vpop.f32.mrb[58].mxu0  ;;  %v8697_v4 = vpack.c.bf16 %v19161_v2, %v19158_v31 }
 0x8ee   : > { %v8512_v24 = vadd.f32 %v8468_v62, %v22996_v49  ;;  %v8490_v42 = vadd.f32 %v19064_v25, %v8143_v43  ;;  %v8145_v47 = vpop.f32.mrb[59].mxu0  ;;  %8746 = vrot.lane.b32.xlu1 %v8696_v39, %s15534_s23  ;;  %v23006_v43 = vld [vmem:[#allocation97_spill] sm:$0xff] }
 0x8ef   : > { %v8513_v46 = vadd.f32 %v8469_v57, %v22997_v32  ;;  %v8491_v38 = vadd.f32 %v19064_v25, %v8145_v47  ;;  %8748 = vrot.lane.b32.xlu0 %v8697_v4, %s15534_s23  ;;  %v23007_v47 = vld [vmem:[#allocation103_spill] sm:$0xff] }
 0x8f0   : > { %v8556_v58 = vmax.f32 %v8512_v24, 0.0  ;;  %v8534_v9 = vadd.f32 %v8490_v42, %v22998_v52 }
 0x8f1   : > { %v8557_v13 = vmax.f32 %v8513_v46, 0.0  ;;  %v8535_v45 = vadd.f32 %v8491_v38, %v22999_v27 }
 0x8f2   : > { %v8600_v16 = vmin.f32 %v8556_v58, 6.0  ;;  %v8578_v0 = vmax.f32 %v8534_v9, 0.0  ;;  %v23008_v9 = vld [vmem:[#allocation96_spill] sm:$0xff] }
 0x8f3   : > { %v8601_v14 = vmin.f32 %v8557_v13, 6.0  ;;  %v8579_v17 = vmax.f32 %v8535_v45, 0.0 }
 0x8f4   : > { %v8622_v35 = vmin.f32 %v8578_v0, 6.0  ;;  %v19178_v8 = vmul.f32 %v8600_v16, %v23000_v34  ;;  %v23009_v16 = vld [vmem:[#allocation102_spill] sm:$0xff] }
 0x8f5   : > { %v8623_v36 = vmin.f32 %v8579_v17, 6.0  ;;  %v19184_v50 = vmul.f32 %v8601_v14, %v23003_v6  ;;  %v23010_v14 = vld [vmem:[#allocation94_spill] sm:$0xff] }
 0x8f6   : > { %23001 = vst [vmem:[#allocation77_spill] sm:$0xff] %v19178_v8  ;;  %v19181_v37 = vmul.f32 %v8622_v35, %v23000_v34 }
 0x8f7   : > { %23004 = vst [vmem:[#allocation79_spill] sm:$0xff] %v19184_v50  ;;  %v19187_v22 = vmul.f32 %v8623_v36, %v23003_v6  ;;  %v8182_v29 = vpop.f32.mrb[60].mxu0 }
 0x8f8   : > { %23002 = vst [vmem:[#allocation78_spill] sm:$0xff] %v19181_v37  ;;  %v8470_v15 = vadd.f32 %v19061_v28, %v8182_v29  ;;  %v8184_v10 = vpop.f32.mrb[61].mxu0  ;;  %v8698_v62 = vpack.c.bf16 %v19181_v37, %v19178_v8  ;;  %v23025_v8 = vld [vmem:[#allocation54_spill] sm:$0xff] }
 0x8f9   : > { %23005 = vst [vmem:[#allocation71_spill] sm:$0xff] %v19187_v22  ;;  %v8471_v55 = vadd.f32 %v19061_v28, %v8184_v10  ;;  %v8186_v39 = vpop.f32.mrb[62].mxu0  ;;  %v8699_v57 = vpack.c.bf16 %v19187_v22, %v19184_v50 }
 0x8fa   : > { %v8514_v4 = vadd.f32 %v8470_v15, %v23006_v43  ;;  %v8492_v49 = vadd.f32 %v19064_v25, %v8186_v39  ;;  %v8188_v24 = vpop.f32.mrb[63].mxu0  ;;  %8750 = vrot.lane.b32.xlu1 %v8698_v62, %s15534_s23  ;;  %v8225_v42 = vpop.f32.mrb[48].mxu1  ;;  %v23011_v39 = vld [vmem:[#allocation95_spill] sm:$0xff] }
 0x8fb   : > { %v8515_v32 = vadd.f32 %v8471_v55, %v23007_v47  ;;  %v8493_v46 = vadd.f32 %v19064_v25, %v8188_v24  ;;  %v8472_v38 = vadd.f32 %v19061_v28, %v8225_v42  ;;  %8752 = vrot.lane.b32.xlu0 %v8699_v57, %s15534_s23  ;;  %v8227_v58 = vpop.f32.mrb[49].mxu1  ;;  %v23012_v42 = vld [vmem:[#allocation33_spill] sm:$0xff] }
 0x8fc   : > { %v8558_v52 = vmax.f32 %v8514_v4, 0.0  ;;  %v8536_v13 = vadd.f32 %v8492_v49, %v23008_v9  ;;  %v8229_v27 = vpop.f32.mrb[50].mxu1 }
 0x8fd   : > { %v8559_v45 = vmax.f32 %v8515_v32, 0.0  ;;  %v8537_v0 = vadd.f32 %v8493_v46, %v23009_v16  ;;  %v8516_v17 = vadd.f32 %v8472_v38, %v23010_v14  ;;  %v8494_v35 = vadd.f32 %v19064_v25, %v8229_v27  ;;  %v8231_v36 = vpop.f32.mrb[51].mxu1  ;;  %v23015_v46 = vld [vmem:[#allocation36_spill] sm:$0xff]  ;;  %v23018_v16 = vld [vmem:[#allocation46_spill] sm:$0xff] }
 0x8fe   : > { %v8602_v29 = vmin.f32 %v8558_v52, 6.0  ;;  %v8580_v15 = vmax.f32 %v8536_v13, 0.0 }
 0x8ff   : > { %v8603_v10 = vmin.f32 %v8559_v45, 6.0  ;;  %v8581_v62 = vmax.f32 %v8537_v0, 0.0  ;;  %v8560_v55 = vmax.f32 %v8516_v17, 0.0  ;;  %v8538_v57 = vadd.f32 %v8494_v35, %v23011_v39 }
 0x900   : > { %v8624_v43 = vmin.f32 %v8580_v15, 6.0  ;;  %v19208_v47 = vmul.f32 %v8602_v29, %v23012_v42 }
 0x901   : > { %v8625_v4 = vmin.f32 %v8581_v62, 6.0  ;;  %v8604_v24 = vmin.f32 %v8560_v55, 6.0  ;;  %v8582_v49 = vmax.f32 %v8538_v57, 0.0  ;;  %v19214_v38 = vmul.f32 %v8603_v10, %v23015_v46 }
 0x902   : > { %23013 = vst [vmem:[#allocation80_spill] sm:$0xff] %v19208_v47  ;;  %v19211_v32 = vmul.f32 %v8624_v43, %v23012_v42 }
 0x903   : > { %23016 = vst [vmem:[#allocation82_spill] sm:$0xff] %v19214_v38  ;;  %v19217_v52 = vmul.f32 %v8625_v4, %v23015_v46  ;;  %v8626_v9 = vmin.f32 %v8582_v49, 6.0  ;;  %v8268_v13 = vpop.f32.mrb[64].mxu0  ;;  %v19222_v0 = vmul.f32 %v8604_v24, %v23018_v16 }
 0x904   : > { %23014 = vst [vmem:[#allocation72_spill] sm:$0xff] %v19211_v32  ;;  %v8270_v27 = vpop.f32.mrb[65].mxu0  ;;  %v8700_v45 = vpack.c.bf16 %v19211_v32, %v19208_v47  ;;  %v8474_v6 = vadd.f32 %v19061_v28, %v8268_v13  ;;  %v23024_v13 = vld [vmem:[#allocation105_spill] sm:$0xff] }
 0x905   : > { %23017 = vst [vmem:[#allocation81_spill] sm:$0xff] %v19217_v52  ;;  %23019 = vst [vmem:[#allocation84_spill] sm:$0xff] %v19222_v0  ;;  %v19225_v14 = vmul.f32 %v8626_v9, %v23018_v16  ;;  %v8272_v17 = vpop.f32.mrb[66].mxu0  ;;  %v8701_v35 = vpack.c.bf16 %v19217_v52, %v19214_v38  ;;  %v8495_v16 = vadd.f32 %v19064_v25, %v8231_v36  ;;  %v23022_v38 = vld [vmem:[#allocation106_spill] sm:$0xff]  ;;  %v23023_v36 = vld [vmem:[#allocation104_spill] sm:$0xff] }
 0x906   : > { %v8274_v29 = vpop.f32.mrb[67].mxu0  ;;  %8754 = vrot.lane.b32.xlu1 %v8700_v45, %s15534_s23  ;;  %v8311_v15 = vpop.f32.mrb[52].mxu1  ;;  %v8496_v46 = vadd.f32 %v19064_v25, %v8272_v17 }
 0x907   : > { %23020 = vst [vmem:[#allocation86_spill] sm:$0xff] %v19225_v14  ;;  %8756 = vrot.lane.b32.xlu0 %v8701_v35, %s15534_s23  ;;  %v19231_v10 = vpop.f32.mrb[53].mxu1  ;;  %v8702_v62 = vpack.c.bf16 %v19225_v14, %v19222_v0  ;;  %v23021_v14 = vld [vmem:[#allocation61_spill] sm:$0xff]  ;;  %v8497_v22 = vadd.f32 %v19064_v25, %v8274_v29 }
 0x908   : > { %v8315_v55 = vpop.f32.mrb[54].mxu1  ;;  %v8539_v0 = vadd.f32 %v8495_v16, %v23021_v14  ;;  %v8540_v16 = vadd.f32 %v8496_v46, %v23023_v36  ;;  %v8518_v14 = vadd.f32 %v8474_v6, %v23024_v13 }
 0x909   : > { %v8317_v39 = vpop.f32.mrb[55].mxu1  ;;  %v8541_v12 = vadd.f32 %v8497_v22, %v23027_v63  ;;  %v23030_v63 = vld [vmem:[#allocation42_spill] sm:$0xff] }
 0x90a   : > { %8758 = vrot.lane.b32.xlu1 %v8702_v62, %s15534_s23  ;;  %v8473_v62 = vadd.f32 %v19061_v28, %v8227_v58  ;;  %v8583_v58 = vmax.f32 %v8539_v0, 0.0  ;;  %v8562_v50 = vmax.f32 %v8518_v14, 0.0  ;;  %v8475_v0 = vadd.f32 %v19061_v28, %v8270_v27 }
 0x90b   : > { %v8476_v27 = vadd.f32 %v19061_v28, %v8311_v15  ;;  %v23034_v15 = vld [vmem:[#allocation100_spill] sm:$0xff] }
 0x90c   : > { %v8517_v47 = vadd.f32 %v8473_v62, %v23022_v38  ;;  %v8627_v17 = vmin.f32 %v8583_v58, 6.0  ;;  %v8584_v62 = vmax.f32 %v8540_v16, 0.0  ;;  %v8606_v29 = vmin.f32 %v8562_v50, 6.0  ;;  %v23029_v16 = vld [vmem:[#allocation99_spill] sm:$0xff] }
 0x90e   : > { %v8561_v38 = vmax.f32 %v8517_v47, 0.0  ;;  %v19280_v46 = vmul.f32 %v8627_v17, %v23025_v8  ;;  %v8628_v36 = vmin.f32 %v8584_v62, 6.0  ;;  %v8498_v47 = vadd.f32 %v19064_v25, %v8315_v55 }
 0x90f   : > { %v19236_v57 = vpop.f32.mrb[68].mxu0  ;;  %v8585_v55 = vmax.f32 %v8541_v12, 0.0  ;;  %v19303_v50 = vmul.f32 %v8606_v29, %v23030_v63  ;;  %v8520_v62 = vadd.f32 %v8476_v27, %v23034_v15  ;;  %v8499_v12 = vadd.f32 %v19064_v25, %v8317_v39 }
 0x910   : > { %v19238_v43 = vpop.f32.mrb[69].mxu0  ;;  %v8605_v37 = vmin.f32 %v8561_v38, 6.0  ;;  %23026 = vst [vmem:[#allocation88_spill] sm:$0xff] %v19280_v46  ;;  %v8519_v38 = vadd.f32 %v8475_v0, %v23029_v16  ;;  %v19297_v22 = vmul.f32 %v8628_v36, %v23030_v63 }
 0x911   : > { %v19240_v4 = vpop.f32.mrb[70].mxu0  ;;  %23033 = vst [vmem:[#allocation90_spill] sm:$0xff] %v19303_v50  ;;  %v8629_v16 = vmin.f32 %v8585_v55, 6.0  ;;  %v8564_v63 = vmax.f32 %v8520_v62, 0.0  ;;  %v23037_v55 = vld [vmem:[#allocation111_spill] sm:$0xff]  ;;  %v23039_v62 = vld [vmem:[#allocation113_spill] sm:$0xff] }
 0x912   : > { %v19242_v24 = vpop.f32.mrb[71].mxu0  ;;  %v19244_v49 = vpop.f32.mrb[56].mxu1  ;;  %v19288_v58 = vmul.f32 %v8605_v37, %v23025_v8  ;;  %23031 = vst [vmem:[#allocation89_spill] sm:$0xff] %v19297_v22  ;;  %v8563_v17 = vmax.f32 %v8519_v38, 0.0  ;;  %v8477_v38 = vadd.f32 %v19061_v28, %v19231_v10 }
 0x913   : > { %v19246_v9 = vpop.f32.mrb[57].mxu1  ;;  %v8608_v15 = vmin.f32 %v8564_v63, 6.0 }
 0x914   : > { %v19248_v45 = vpop.f32.mrb[58].mxu1  ;;  %23028 = vst [vmem:[#allocation87_spill] sm:$0xff] %v19288_v58  ;;  %v8703_v37 = vpack.c.bf16 %v19280_v46, %v19288_v58  ;;  %v8607_v29 = vmin.f32 %v8563_v17, 6.0  ;;  %v8481_v20 = vadd.f32 %v19061_v28, %v19246_v9 }
 0x915   : > { %v19250_v35 = vpop.f32.mrb[59].mxu1 }
 0x916   : > { %v8503_v1 = vadd.f32 %v19064_v25, %v19250_v35 }
 0x93c   : > { %v19256_v42 = vpop.permute.xlu1 %8734 }
 0x93d   : > { %v8737_v52 = vpop.permute.xlu0 %8736  ;;  %v8821_v32 = vsel %vm4665_vm5, 0, %v19256_v42 }
 0x93e   : > { %v19264_v34 = vsel %vm4665_vm5, %v19256_v42, %v8737_v52  ;;  %8827 = vrot.lane.b32.xlu0 %v8821_v32, %s15530_s15 }
 0x93f   : > { %8917 = vrot.lane.b32.xlu1 %v19264_v34, %s15529_s14  ;;  %9020 = vmatprep.subr.bf16.mxu1 %v19264_v34 }
 0x940   : > { %14683 = vmatpush1.bf16.msk.msra.mxu1 %vm17295_vm8, %v19256_v42 }
 0x942   : > { %8829 = vrot.lane.b32.xlu0 %v19264_v34, %s15530_s15 }
 0x948   : > { %v8739_v6 = vpop.permute.xlu1 %8738 }
 0x949   : > { %v19285_v13 = vsel %vm4665_vm5, %v8737_v52, %v8739_v6  ;;  %v23032_v52 = vld [vmem:[#allocation101_spill] sm:$0xff]  ;;  %v8741_v0 = vpop.permute.xlu0 %8740 }
 0x94a   : > { %8919 = vrot.lane.b32.xlu0 %v19285_v13, %s15529_s14  ;;  %8831 = vrot.lane.b32.xlu1 %v19285_v13, %s15530_s15  ;;  %v8542_v14 = vadd.f32 %v8498_v47, %v23032_v52  ;;  %v8704_v47 = vpack.c.bf16 %v19297_v22, %v19303_v50  ;;  %v19312_v52 = vsel %vm4665_vm5, %v8739_v6, %v8741_v0 }
 0x94b   : > { %v8500_v6 = vadd.f32 %v19064_v25, %v19240_v4  ;;  %v8521_v22 = vadd.f32 %v8477_v38, %v23039_v62  ;;  %v23040_v4 = vld [vmem:[#allocation58_spill] sm:$0xff] }
 0x94c   : > { %v8586_v36 = vmax.f32 %v8542_v14, 0.0  ;;  %v8543_v14 = vadd.f32 %v8499_v12, %v23037_v55  ;;  %v23042_v12 = vld [vmem:[#allocation107_spill] sm:$0xff] }
 0x94d   : > { %v8565_v38 = vmax.f32 %v8521_v22, 0.0 }
 0x94e   : > { %8760 = vrot.lane.b32.xlu0 %v8703_v37, %s15534_s23  ;;  %8915 = vrot.lane.b32.xlu1 %v8821_v32, %s15529_s14  ;;  %v23035_v32 = vld [vmem:[#allocation44_spill] sm:$0xff]  ;;  %v8630_v39 = vmin.f32 %v8586_v36, 6.0 }
 0x94f   : > { %v19320_v27 = vmul.f32 %v8629_v16, %v23035_v32  ;;  %v19329_v10 = vmul.f32 %v8607_v29, %v23035_v32  ;;  %v8478_v16 = vadd.f32 %v19061_v28, %v19236_v57  ;;  %v19345_v29 = vmul.f32 %v8608_v15, %v23040_v4  ;;  %v23044_v57 = vld [vmem:[#allocation109_spill] sm:$0xff] }
 0x950   : > { %v19339_v36 = vmul.f32 %v8630_v39, %v23040_v4  ;;  %v8609_v22 = vmin.f32 %v8565_v38, 6.0 }
 0x951   : > { %23036 = vst [vmem:[#allocation92_spill] sm:$0xff] %v19320_v27  ;;  %23038 = vst [vmem:[#allocation91_spill] sm:$0xff] %v19329_v10  ;;  %v8705_v63 = vpack.c.bf16 %v19320_v27, %v19329_v10  ;;  %v8522_v55 = vadd.f32 %v8478_v16, %v23044_v57  ;;  %v8479_v16 = vadd.f32 %v19061_v28, %v19238_v43 }
 0x952   : > { %8833 = vrot.lane.b32.xlu0 %v19312_v52, %s15530_s15  ;;  %8762 = vrot.lane.b32.xlu1 %v8704_v47, %s15534_s23  ;;  %23041 = vst [vmem:[#allocation93_spill] sm:$0xff] %v19339_v36  ;;  %v8544_v47 = vadd.f32 %v8500_v6, %v23042_v12  ;;  %23043 = vst [vmem:[#allocation97_spill] sm:$0xff] %v19345_v29  ;;  %v8706_v6 = vpack.c.bf16 %v19339_v36, %v19345_v29  ;;  %v23049_v36 = vld [vmem:[#allocation110_spill] sm:$0xff] }
 0x953   : > { %v8566_v12 = vmax.f32 %v8522_v55, 0.0  ;;  %v8523_v29 = vadd.f32 %v8479_v16, %v23049_v36 }
 0x954   : > { %v8743_v37 = vpop.permute.xlu1 %8742  ;;  %v8588_v32 = vmax.f32 %v8544_v47, 0.0 }
 0x955   : > { %v19326_v17 = vsel %vm4665_vm5, %v8741_v0, %v8743_v37  ;;  %v8587_v0 = vmax.f32 %v8543_v14, 0.0  ;;  %v8745_v62 = vpop.permute.xlu0 %8744  ;;  %v8501_v14 = vadd.f32 %v19064_v25, %v19242_v24  ;;  %v8610_v55 = vmin.f32 %v8566_v12, 6.0 }
 0x956   : > { %8921 = vrot.lane.b32.xlu0 %v19312_v52, %s15529_s14  ;;  %8835 = vrot.lane.b32.xlu1 %v19326_v17, %s15530_s15  ;;  %v19356_v15 = vsel %vm4665_vm5, %v8743_v37, %v8745_v62  ;;  %v8632_v24 = vmin.f32 %v8588_v32, 6.0  ;;  %v8502_v37 = vadd.f32 %v19064_v25, %v19248_v45  ;;  %v23050_v45 = vld [vmem:[#allocation11_spill] sm:$0xff]  ;;  %v8567_v12 = vmax.f32 %v8523_v29, 0.0  ;;  %v23055_v29 = vld [vmem:[#allocation13_spill] sm:$0xff] }
 0x957   : > { %v8631_v39 = vmin.f32 %v8587_v0, 6.0  ;;  %v23045_v0 = vld [vmem:[#allocation9_spill] sm:$0xff]  ;;  %v19389_v36 = vmul.f32 %v8610_v55, %v23050_v45 }
 0x958   : > { %v19373_v43 = vmul.f32 %v8609_v22, %v23045_v0  ;;  %v19383_v32 = vmul.f32 %v8632_v24, %v23050_v45 }
 0x959   : > { %v19364_v47 = vmul.f32 %v8631_v39, %v23045_v0  ;;  %v8480_v39 = vadd.f32 %v19061_v28, %v19244_v49  ;;  %23053 = vst [vmem:[#allocation94_spill] sm:$0xff] %v19389_v36  ;;  %v23054_v49 = vld [vmem:[#allocation114_spill] sm:$0xff]  ;;  %v23066_v28 = vld [vmem:[#allocation121_spill] sm:$0xff] }
 0x95a   : > { %8764 = vrot.lane.b32.xlu0 %v8705_v63, %s15534_s23  ;;  %8923 = vrot.lane.b32.xlu1 %v19326_v17, %s15529_s14  ;;  %v23047_v63 = vld [vmem:[#allocation108_spill] sm:$0xff]  ;;  %23048 = vst [vmem:[#allocation96_spill] sm:$0xff] %v19373_v43  ;;  %23051 = vst [vmem:[#allocation102_spill] sm:$0xff] %v19383_v32  ;;  %v8525_v9 = vadd.f32 %v8481_v20, %v23066_v28 }
 0x95b   : > { %23046 = vst [vmem:[#allocation103_spill] sm:$0xff] %v19364_v47  ;;  %v8545_v57 = vadd.f32 %v8501_v14, %v23047_v63  ;;  %v23052_v14 = vld [vmem:[#allocation112_spill] sm:$0xff]  ;;  %v8707_v22 = vpack.c.bf16 %v19364_v47, %v19373_v43  ;;  %v8524_v16 = vadd.f32 %v8480_v39, %v23054_v49 }
 0x95c   : > { %v8569_v20 = vmax.f32 %v8525_v9, 0.0 }
 0x95d   : > { %v8568_v55 = vmax.f32 %v8524_v16, 0.0 }
 0x95e   : > { %8837 = vrot.lane.b32.xlu0 %v19356_v15, %s15530_s15  ;;  %8766 = vrot.lane.b32.xlu1 %v8706_v6, %s15534_s23  ;;  %v8546_v6 = vadd.f32 %v8502_v37, %v23052_v14  ;;  %v8611_v14 = vmin.f32 %v8567_v12, 6.0  ;;  %v23058_v12 = vld [vmem:[#allocation12_spill] sm:$0xff]  ;;  %v8613_v9 = vmin.f32 %v8569_v20, 6.0 }
 0x960   : > { %v8747_v4 = vpop.permute.xlu1 %8746  ;;  %v8590_v0 = vmax.f32 %v8546_v6, 0.0  ;;  %v19410_v6 = vmul.f32 %v8611_v14, %v23055_v29 }
 0x961   : > { %v19370_v38 = vsel %vm4665_vm5, %v8745_v62, %v8747_v4  ;;  %v8589_v62 = vmax.f32 %v8545_v57, 0.0  ;;  %v8749_v63 = vpop.permute.xlu0 %8748  ;;  %v8708_v57 = vpack.c.bf16 %v19383_v32, %v19389_v36 }
 0x962   : > { %8925 = vrot.lane.b32.xlu0 %v19356_v15, %s15529_s14  ;;  %8839 = vrot.lane.b32.xlu1 %v19370_v38, %s15530_s15  ;;  %v19398_v37 = vsel %vm4665_vm5, %v8747_v4, %v8749_v63  ;;  %23057 = vst [vmem:[#allocation61_spill] sm:$0xff] %v19410_v6  ;;  %v8612_v4 = vmin.f32 %v8568_v55, 6.0 }
 0x963   : > { %v8633_v24 = vmin.f32 %v8589_v62, 6.0 }
 0x965   : > { %v19404_v39 = vmul.f32 %v8633_v24, %v23055_v29  ;;  %v19422_v24 = vmul.f32 %v8612_v4, %v23058_v12 }
 0x966   : > { %8768 = vrot.lane.b32.xlu0 %v8707_v22, %s15534_s23  ;;  %8927 = vrot.lane.b32.xlu1 %v19370_v38, %s15529_s14  ;;  %v8634_v22 = vmin.f32 %v8590_v0, 6.0 }
 0x967   : > { %23056 = vst [vmem:[#allocation95_spill] sm:$0xff] %v19404_v39  ;;  %v8709_v0 = vpack.c.bf16 %v19404_v39, %v19410_v6  ;;  %23060 = vst [vmem:[#allocation104_spill] sm:$0xff] %v19422_v24 }
 0x968   : > { %v19417_v16 = vmul.f32 %v8634_v22, %v23058_v12 }
 0x96a   : > { %8841 = vrot.lane.b32.xlu0 %v19398_v37, %s15530_s15  ;;  %8770 = vrot.lane.b32.xlu1 %v8708_v57, %s15534_s23  ;;  %23059 = vst [vmem:[#allocation106_spill] sm:$0xff] %v19417_v16  ;;  %v8710_v57 = vpack.c.bf16 %v19417_v16, %v19422_v24 }
 0x96c   : > { %v8751_v49 = vpop.permute.xlu1 %8750 }
 0x96d   : > { %v19407_v62 = vsel %vm4665_vm5, %v8749_v63, %v8751_v49  ;;  %v8753_v63 = vpop.permute.xlu0 %8752 }
 0x96e   : > { %8929 = vrot.lane.b32.xlu0 %v19398_v37, %s15529_s14  ;;  %8843 = vrot.lane.b32.xlu1 %v19407_v62, %s15530_s15  ;;  %v19430_v14 = vsel %vm4665_vm5, %v8751_v49, %v8753_v63 }
 0x972   : > { %8772 = vrot.lane.b32.xlu0 %v8709_v0, %s15534_s23  ;;  %8931 = vrot.lane.b32.xlu1 %v19407_v62, %s15529_s14 }
 0x976   : > { %8845 = vrot.lane.b32.xlu0 %v19430_v14, %s15530_s15  ;;  %8774 = vrot.lane.b32.xlu1 %v8710_v57, %s15534_s23 }
 0x978   : > { %v8755_v55 = vpop.permute.xlu1 %8754 }
 0x979   : > { %v19436_v22 = vsel %vm4665_vm5, %v8753_v63, %v8755_v55  ;;  %v8757_v4 = vpop.permute.xlu0 %8756 }
 0x97a   : > { %8933 = vrot.lane.b32.xlu0 %v19430_v14, %s15529_s14  ;;  %8847 = vrot.lane.b32.xlu1 %v19436_v22, %s15530_s15  ;;  %v19443_v0 = vsel %vm4665_vm5, %v8755_v55, %v8757_v4 }
 0x97c   : > { %v8759_v49 = vpop.permute.xlu1 %8758 }
 0x97d   : > { %v19450_v63 = vsel %vm4665_vm5, %v8757_v4, %v8759_v49 }
 0x97e   : > { %8849 = vrot.lane.b32.xlu0 %v19443_v0, %s15530_s15  ;;  %8935 = vrot.lane.b32.xlu1 %v19436_v22, %s15529_s14 }
 0x982   : > { %8937 = vrot.lane.b32.xlu0 %v19443_v0, %s15529_s14  ;;  %8851 = vrot.lane.b32.xlu1 %v19450_v63, %s15530_s15 }
 0x986   : > { %8939 = vrot.lane.b32.xlu1 %v19450_v63, %s15529_s14 }
 0x9b0   : > { %v19458_v57 = vpop.permute.xlu0 %8827 }
 0x9b1   : > { %v8918_v55 = vpop.permute.xlu1 %8917  ;;  %v8871_v11 = vsel %vm1034_vm1, %v17715_v18, %v19458_v57 }
 0x9b4   : > { %v8830_v29 = vpop.permute.xlu0 %8829 }
 0x9b5   : > { %v19466_v4 = vsel %vm1034_vm1, %v19458_v57, %v8830_v29 }
 0x9bc   : > { %v8920_v45 = vpop.permute.xlu0 %8919  ;;  %v8832_v39 = vpop.permute.xlu1 %8831 }
 0x9bd   : > { %v19461_v32 = vsel %vm1034_vm1, %v8830_v29, %v8832_v39  ;;  %v19470_v6 = vsel %vm1146_vm6, %v8918_v55, %v8920_v45  ;;  %v19488_v29 = vld [vmem:[%s22167_s3 + $0x38] sm:$0xff]  }
 0x9be   : > { %9022 = vmatprep.subr.bf16.mxu1 %v19461_v32 }
 0x9bf   : > { %9023 = vmatpush1.bf16.msra.mxu1 %v19466_v4 }
 0x9c0   : > { %v8761_v36 = vpop.permute.xlu0 %8760  ;;  %9024 = vmatprep.subr.bf16.mxu1 %v19470_v6  ;;  %v19473_v47 = vpop.permute.xlu1 %8915 }
 0x9c1   : > { %v19476_v43 = vsel %vm4665_vm5, %v8759_v49, %v8761_v36  ;;  %v19480_v27 = vsel %vm1146_vm6, %v19473_v47, %v8918_v55 }
 0x9c2   : > { %8853 = vrot.lane.b32.xlu0 %v19476_v43, %s15530_s15 }
 0x9c3   : > { %9025 = vmatpush1.bf16.msra.mxu1 %v19480_v27 }
 0x9c4   : > { %v8834_v10 = vpop.permute.xlu0 %8833  ;;  %9063 = vmatprep.subr.bf16.mxu1 %v19312_v52  ;;  %v8763_v50 = vpop.permute.xlu1 %8762 }
 0x9c5   : > { %v19492_v49 = vsel %vm4665_vm5, %v8761_v36, %v8763_v50  ;;  %v19509_v36 = vsel %vm1034_vm1, %v8832_v39, %v8834_v10 }
 0x9c6   : > { %8941 = vrot.lane.b32.xlu0 %v19476_v43, %s15529_s14  ;;  %8855 = vrot.lane.b32.xlu1 %v19492_v49, %s15530_s15 }
 0x9c7   : > { %14684 = vmatmul.mubr.msk.bf16.vlgmr.msra.gmra.mrb[60].mxu1 %vm4910_vm13, %v19488_v29 }
 0x9c8   : > { %9064 = vmatpush1.bf16.msra.mxu1 %v19285_v13  ;;  %v8922_v55 = vpop.permute.xlu0 %8921  ;;  %v8836_v8 = vpop.permute.xlu1 %8835  ;;  %9095 = vmatprep.mubr.bf16.mxu1 %v22700_v30 }
 0x9c9   : > { %v19503_v46 = vsel %vm1034_vm1, %v8834_v10, %v8836_v8  ;;  %v19522_v60 = vsel %vm1146_vm6, %v8920_v45, %v8922_v55 }
 0x9ca   : > { %8943 = vrot.lane.b32.xlu1 %v19492_v49, %s15529_s14  ;;  %9065 = vmatprep.subr.bf16.mxu1 %v19503_v46 }
 0x9cc   : > { %9066 = vmatpush1.bf16.msra.mxu1 %v19509_v36  ;;  %v8765_v58 = vpop.permute.xlu0 %8764  ;;  %v8924_v2 = vpop.permute.xlu1 %8923 }
 0x9cd   : > { %v19513_v56 = vsel %vm4665_vm5, %v8763_v50, %v8765_v58  ;;  %v19516_v31 = vsel %vm1146_vm6, %v8922_v55, %v8924_v2 }
 0x9ce   : > { %23061 = vst [vmem:[#allocation105_spill] sm:$0xff] %v19513_v56  ;;  %8857 = vrot.lane.b32.xlu0 %v19513_v56, %s15530_s15  ;;  %9067 = vmatprep.subr.bf16.mxu1 %v19516_v31 }
 0x9d0   : > { %9068 = vmatpush1.bf16.msra.mxu1 %v19522_v60  ;;  %v8838_v10 = vpop.permute.xlu0 %8837  ;;  %v8767_v39 = vpop.permute.xlu1 %8766 }
 0x9d1   : > { %9106 = vmatprep.subr.bf16.mxu1 %v19356_v15  ;;  %v19527_v50 = vsel %vm4665_vm5, %v8765_v58, %v8767_v39  ;;  %v19544_v58 = vsel %vm1034_vm1, %v8836_v8, %v8838_v10  ;;  %v23064_v8 = vld [vmem:[#allocation120_spill] sm:$0xff] }
 0x9d2   : > { %23062 = vst [vmem:[#allocation98_spill] sm:$0xff] %v19527_v50  ;;  %8945 = vrot.lane.b32.xlu0 %v19513_v56, %s15529_s14  ;;  %8859 = vrot.lane.b32.xlu1 %v19527_v50, %s15530_s15  ;;  %v8547_v35 = vadd.f32 %v8503_v1, %v23064_v8 }
 0x9d3   : > { %14685 = vmatmul.mubr.msk.bf16.vlgmr.msra.gmra.mrb[64].mxu1 %vm4910_vm13, %v19488_v29 }
 0x9d4   : > { %9107 = vmatpush1.bf16.msra.mxu1 %v19326_v17  ;;  %v8926_v45 = vpop.permute.xlu0 %8925  ;;  %v8840_v55 = vpop.permute.xlu1 %8839  ;;  %9138 = vmatprep.mubr.bf16.mxu1 %v22700_v30  ;;  %v8591_v1 = vmax.f32 %v8547_v35, 0.0 }
 0x9d5   : > { %v19538_v23 = vsel %vm1034_vm1, %v8838_v10, %v8840_v55  ;;  %v19561_v25 = vsel %vm1146_vm6, %v8924_v2, %v8926_v45 }
 0x9d6   : > { %8947 = vrot.lane.b32.xlu1 %v19527_v50, %s15529_s14  ;;  %9108 = vmatprep.subr.bf16.mxu1 %v19538_v23  ;;  %v8635_v28 = vmin.f32 %v8591_v1, 6.0 }
 0x9d8   : > { %9109 = vmatpush1.bf16.msra.mxu1 %v19544_v58  ;;  %v8769_v3 = vpop.permute.xlu0 %8768  ;;  %v8928_v53 = vpop.permute.xlu1 %8927 }
 0x9d9   : > { %v19550_v41 = vsel %vm4665_vm5, %v8767_v39, %v8769_v3  ;;  %v19553_v44 = vsel %vm1146_vm6, %v8926_v45, %v8928_v53 }
 0x9da   : > { %23063 = vst [vmem:[#allocation99_spill] sm:$0xff] %v19550_v41  ;;  %8861 = vrot.lane.b32.xlu0 %v19550_v41, %s15530_s15  ;;  %9110 = vmatprep.subr.bf16.mxu1 %v19553_v44 }
 0x9dc   : > { %9111 = vmatpush1.bf16.msra.mxu1 %v19561_v25  ;;  %v8842_v10 = vpop.permute.xlu0 %8841  ;;  %v8771_v39 = vpop.permute.xlu1 %8770 }
 0x9dd   : > { %9149 = vmatprep.subr.bf16.mxu1 %v19398_v37  ;;  %v19567_v12 = vsel %vm4665_vm5, %v8769_v3, %v8771_v39  ;;  %v19585_v8 = vsel %vm1034_vm1, %v8840_v55, %v8842_v10 }
 0x9de   : > { %23065 = vst [vmem:[#allocation101_spill] sm:$0xff] %v19567_v12  ;;  %8949 = vrot.lane.b32.xlu0 %v19550_v41, %s15529_s14  ;;  %8863 = vrot.lane.b32.xlu1 %v19567_v12, %s15530_s15 }
 0x9df   : > { %14686 = vmatmul.mubr.msk.bf16.vlgmr.msra.gmra.mrb[68].mxu1 %vm4910_vm13, %v19488_v29 }
 0x9e0   : > { %9150 = vmatpush1.bf16.msra.mxu1 %v19370_v38  ;;  %v8930_v2 = vpop.permute.xlu0 %8929  ;;  %v8844_v45 = vpop.permute.xlu1 %8843  ;;  %9181 = vmatprep.mubr.bf16.mxu1 %v22700_v30 }
 0x9e1   : > { %v19579_v3 = vsel %vm1034_vm1, %v8842_v10, %v8844_v45  ;;  %v19598_v55 = vsel %vm1146_vm6, %v8928_v53, %v8930_v2  ;;  %v23068_v10 = vld [vmem:[#allocation6_spill] sm:$0xff] }
 0x9e2   : > { %8951 = vrot.lane.b32.xlu1 %v19567_v12, %s15529_s14  ;;  %9151 = vmatprep.subr.bf16.mxu1 %v19579_v3  ;;  %v19601_v1 = vmul.f32 %v8635_v28, %v23068_v10  ;;  %v19612_v51 = vmul.f32 %v8613_v9, %v23068_v10 }
 0x9e4   : > { %9152 = vmatpush1.bf16.msra.mxu1 %v19585_v8  ;;  %v8773_v35 = vpop.permute.xlu0 %8772  ;;  %v8932_v26 = vpop.permute.xlu1 %8931  ;;  %23069 = vst [vmem:[#allocation111_spill] sm:$0xff] %v19601_v1  ;;  %23070 = vst [vmem:[#allocation113_spill] sm:$0xff] %v19612_v51 }
 0x9e5   : > { %v19589_v19 = vsel %vm4665_vm5, %v8771_v39, %v8773_v35  ;;  %v19592_v16 = vsel %vm1146_vm6, %v8930_v2, %v8932_v26  ;;  %v8711_v2 = vpack.c.bf16 %v19601_v1, %v19612_v51 }
 0x9e6   : > { %23067 = vst [vmem:[#allocation100_spill] sm:$0xff] %v19589_v19  ;;  %8865 = vrot.lane.b32.xlu0 %v19589_v19, %s15530_s15  ;;  %9153 = vmatprep.subr.bf16.mxu1 %v19592_v16 }
 0x9e8   : > { %9154 = vmatpush1.bf16.msra.mxu1 %v19598_v55  ;;  %v19604_v40 = vpop.permute.xlu1 %8774  ;;  %v8846_v39 = vpop.permute.xlu0 %8845 }
 0x9e9   : > { %9192 = vmatprep.subr.bf16.mxu1 %v19430_v14  ;;  %v19609_v20 = vsel %vm4665_vm5, %v8773_v35, %v19604_v40  ;;  %v19632_v9 = vsel %vm1034_vm1, %v8844_v45, %v8846_v39 }
 0x9ea   : > { %8953 = vrot.lane.b32.xlu0 %v19589_v19, %s15529_s14  ;;  %8867 = vrot.lane.b32.xlu1 %v19609_v20, %s15530_s15 }
 0x9eb   : > { %14687 = vmatmul.mubr.msk.bf16.vlgmr.msra.gmra.mrb[72].mxu1 %vm4910_vm13, %v19488_v29 }
 0x9ec   : > { %9193 = vmatpush1.bf16.msra.mxu1 %v19407_v62  ;;  %v8848_v53 = vpop.permute.xlu1 %8847  ;;  %9224 = vmatprep.mubr.bf16.mxu1 %v22700_v30  ;;  %v8934_v35 = vpop.permute.xlu0 %8933 }
 0x9ed   : > { %v19625_v28 = vsel %vm1034_vm1, %v8846_v39, %v8848_v53  ;;  %v19640_v51 = vsel %vm1146_vm6, %v8932_v26, %v8934_v35 }
 0x9ee   : > { %8776 = vrot.lane.b32.xlu0 %v8711_v2, %s15534_s23  ;;  %8955 = vrot.lane.b32.xlu1 %v19609_v20, %s15529_s14 }
 0x9ef   : > { %9194 = vmatprep.subr.bf16.mxu1 %v19625_v28 }
 0x9f0   : > { %9195 = vmatpush1.bf16.msra.mxu1 %v19632_v9  ;;  %v8936_v10 = vpop.permute.xlu1 %8935  ;;  %v8850_v24 = vpop.permute.xlu0 %8849 }
 0x9f1   : > { %v19636_v1 = vsel %vm1146_vm6, %v8934_v35, %v8936_v10  ;;  %v19653_v35 = vsel %vm1034_vm1, %v8848_v53, %v8850_v24 }
 0x9f2   : > { %9196 = vmatprep.subr.bf16.mxu1 %v19636_v1 }
 0x9f4   : > { %9197 = vmatpush1.bf16.msra.mxu1 %v19640_v51  ;;  %v8852_v2 = vpop.permute.xlu1 %8851  ;;  %v8938_v39 = vpop.permute.xlu0 %8937 }
 0x9f5   : > { %9235 = vmatprep.subr.bf16.mxu1 %v19443_v0  ;;  %v19648_v45 = vsel %vm1034_vm1, %v8850_v24, %v8852_v2  ;;  %v19661_v59 = vsel %vm1146_vm6, %v8936_v10, %v8938_v39 }
 0x9f7   : > { %14688 = vmatmul.mubr.msk.bf16.vlgmr.msra.gmra.mrb[76].mxu1 %vm4910_vm13, %v19488_v29 }
 0x9f8   : > { %9236 = vmatpush1.bf16.msra.mxu1 %v19436_v22  ;;  %9267 = vmatprep.mubr.bf16.mxu1 %v22700_v30  ;;  %v8940_v26 = vpop.permute.xlu1 %8939 }
 0x9f9   : > { %9237 = vmatprep.subr.bf16.mxu1 %v19648_v45  ;;  %v19657_v61 = vsel %vm1146_vm6, %v8938_v39, %v8940_v26 }
 0x9fc   : > { %9238 = vmatpush1.bf16.msra.mxu1 %v19653_v35 }
 0x9fd   : > { %9239 = vmatprep.subr.bf16.mxu1 %v19657_v61 }
 0xa00   : > { %9240 = vmatpush1.bf16.msra.mxu1 %v19661_v59 }
 0xa01   : > { %9278 = vmatprep.subr.bf16.mxu1 %v19476_v43 }
 0xa03   : > { %14689 = vmatmul.mubr.msk.bf16.vlgmr.msra.gmra.mrb[80].mxu1 %vm4910_vm13, %v19488_v29 }
 0xa04   : > { %9279 = vmatpush1.bf16.msra.mxu1 %v19450_v63  ;;  %9310 = vmatprep.mubr.bf16.mxu1 %v22700_v30 }
 0xa34   : > { %v8854_v24 = vpop.permute.xlu0 %8853 }
 0xa35   : > { %v19674_v10 = vsel %vm1034_vm1, %v8852_v2, %v8854_v24 }
 0xa38   : > { %v8856_v53 = vpop.permute.xlu1 %8855  ;;  %v8942_v39 = vpop.permute.xlu0 %8941 }
 0xa39   : > { %v19670_v7 = vsel %vm1034_vm1, %v8854_v24, %v8856_v53  ;;  %v19682_v54 = vsel %vm1146_vm6, %v8940_v26, %v8942_v39 }
 0xa3a   : > { %23071 = vst [vmem:[#allocation107_spill] sm:$0xff] %v19670_v7  ;;  %9280 = vmatprep.subr.bf16.mxu1 %v19670_v7 }
 0xa3b   : > { %9281 = vmatpush1.bf16.msra.mxu1 %v19674_v10 }
 0xa3c   : > { %v8944_v33 = vpop.permute.xlu1 %8943 }
 0xa3d   : > { %v19678_v48 = vsel %vm1146_vm6, %v8942_v39, %v8944_v33 }
 0xa3e   : > { %23072 = vst [vmem:[#allocation109_spill] sm:$0xff] %v19678_v48  ;;  %9282 = vmatprep.subr.bf16.mxu1 %v19678_v48 }
 0xa3f   : > { %9283 = vmatpush1.bf16.msra.mxu1 %v19682_v54 }
 0xa40   : > { %9321 = vmatprep.subr.bf16.mxu1 %v19513_v56  ;;  %v8858_v5 = vpop.permute.xlu0 %8857 }
 0xa41   : > { %v19695_v26 = vsel %vm1034_vm1, %v8856_v53, %v8858_v5 }
 0xa42   : > { %14690 = vmatmul.mubr.msk.bf16.vlgmr.msra.gmra.mrb[84].mxu1 %vm4910_vm13, %v19488_v29 }
 0xa43   : > { %9322 = vmatpush1.bf16.msra.mxu1 %v19492_v49  ;;  %9353 = vmatprep.mubr.bf16.mxu1 %v22700_v30 }
 0xa44   : > { %v8860_v2 = vpop.permute.xlu1 %8859  ;;  %v8946_v39 = vpop.permute.xlu0 %8945 }
 0xa45   : > { %v19691_v24 = vsel %vm1034_vm1, %v8858_v5, %v8860_v2  ;;  %v19703_v7 = vsel %vm1146_vm6, %v8944_v33, %v8946_v39  ;;  %v23084_v57 = vld [vmem:[#allocation109_spill] sm:$0xff] }
 0xa46   : > { %23073 = vst [vmem:[#allocation108_spill] sm:$0xff] %v19691_v24  ;;  %9323 = vmatprep.subr.bf16.mxu1 %v19691_v24  ;;  %23075 = vst [vmem:[#allocation112_spill] sm:$0xff] %v19703_v7 }
 0xa47   : > { %9324 = vmatpush1.bf16.msra.mxu1 %v19695_v26 }
 0xa48   : > { %v8948_v56 = vpop.permute.xlu1 %8947 }
 0xa49   : > { %v19699_v48 = vsel %vm1146_vm6, %v8946_v39, %v8948_v56 }
 0xa4a   : > { %23074 = vst [vmem:[#allocation110_spill] sm:$0xff] %v19699_v48  ;;  %9325 = vmatprep.subr.bf16.mxu1 %v19699_v48 }
 0xa4b   : > { %9326 = vmatpush1.bf16.msra.mxu1 %v19703_v7 }
 0xa4c   : > { %9364 = vmatprep.subr.bf16.mxu1 %v19550_v41  ;;  %v8862_v24 = vpop.permute.xlu0 %8861 }
 0xa4d   : > { %v19716_v33 = vsel %vm1034_vm1, %v8860_v2, %v8862_v24 }
 0xa4e   : > { %14691 = vmatmul.mubr.msk.bf16.vlgmr.msra.gmra.mrb[88].mxu1 %vm4910_vm13, %v19488_v29  ;;  %23077 = vst [vmem:[#allocation120_spill] sm:$0xff] %v19716_v33 }
 0xa4f   : > { %9365 = vmatpush1.bf16.msra.mxu1 %v19527_v50  ;;  %9396 = vmatprep.mubr.bf16.mxu1 %v22700_v30 }
 0xa50   : > { %v8864_v5 = vpop.permute.xlu1 %8863  ;;  %v8950_v39 = vpop.permute.xlu0 %8949 }
 0xa51   : > { %v19712_v53 = vsel %vm1034_vm1, %v8862_v24, %v8864_v5  ;;  %v19724_v50 = vsel %vm1146_vm6, %v8948_v56, %v8950_v39 }
 0xa52   : > { %23076 = vst [vmem:[#allocation114_spill] sm:$0xff] %v19712_v53  ;;  %9366 = vmatprep.subr.bf16.mxu1 %v19712_v53  ;;  %23079 = vst [vmem:[#allocation130_spill] sm:$0xff] %v19724_v50 }
 0xa53   : > { %9367 = vmatpush1.bf16.msra.mxu1 %v19716_v33 }
 0xa54   : > { %v8952_v41 = vpop.permute.xlu1 %8951 }
 0xa55   : > { %v19720_v48 = vsel %vm1146_vm6, %v8950_v39, %v8952_v41 }
 0xa56   : > { %23078 = vst [vmem:[#allocation121_spill] sm:$0xff] %v19720_v48  ;;  %9368 = vmatprep.subr.bf16.mxu1 %v19720_v48 }
 0xa57   : > { %9369 = vmatpush1.bf16.msra.mxu1 %v19724_v50 }
 0xa58   : > { %v8866_v7 = vpop.permute.xlu0 %8865  ;;  %9407 = vmatprep.subr.bf16.mxu1 %v19589_v19 }
 0xa59   : > { %v19740_v56 = vsel %vm1034_vm1, %v8864_v5, %v8866_v7  ;;  %v19795_v5 = vld [vmem:[%s22167_s3 + $0x30] sm:$0xff]  }
 0xa5a   : > { %14692 = vmatmul.mubr.msk.bf16.vlgmr.msra.gmra.mrb[92].mxu1 %vm4910_vm13, %v19488_v29  ;;  %23081 = vst [vmem:[#allocation132_spill] sm:$0xff] %v19740_v56 }
 0xa5b   : > { %9408 = vmatpush1.bf16.msra.mxu1 %v19567_v12  ;;  %9439 = vmatprep.mubr.bf16.mxu1 %v22700_v30 }
 0xa5c   : > { %v8954_v2 = vpop.permute.xlu0 %8953  ;;  %v19732_v24 = vpop.permute.xlu1 %8867 }
 0xa5d   : > { %v19736_v48 = vsel %vm1034_vm1, %v8866_v7, %v19732_v24  ;;  %v19764_v7 = vsel %vm1146_vm6, %v8952_v41, %v8954_v2  ;;  %v14679_v41 = vld [vmem:[%s22168_s4 + $0x20] sm:$0xff] }
 0xa5e   : > { %23080 = vst [vmem:[#allocation131_spill] sm:$0xff] %v19736_v48  ;;  %9409 = vmatprep.subr.bf16.mxu1 %v19736_v48 }
 0xa5f   : > { %9410 = vmatpush1.bf16.msra.mxu1 %v19740_v56 }
 0xa60   : > { %v19743_v39 = vpop.permute.xlu0 %8776  ;;  %v19745_v19 = vpop.permute.xlu1 %8955 }
 0xa61   : > { %v8824_v53 = vsel %vm4665_vm5, %v19743_v39, 0  ;;  %v19752_v12 = vsel %vm4665_vm5, %v19604_v40, %v19743_v39  ;;  %v19756_v48 = vsel %vm1146_vm6, %v8954_v2, %v19745_v19  ;;  %v14680_v40 = vld [vmem:[%s22168_s4 + $0x28] sm:$0xff] }
 0xa62   : > { %9004 = vrot.lane.b32.xlu0 %v8824_v53, %s15530_s15  ;;  %9450 = vmatprep.subr.bf16.mxu0 %v19752_v12  ;;  %v23087_v2 = vld [vmem:[#allocation108_spill] sm:$0xff] }
 0xa63   : > { %8869 = vrot.lane.b32.xlu1 %v19752_v12, %s15530_s15  ;;  %9411 = vmatprep.subr.bf16.mxu1 %v19756_v48 }
 0xa64   : > { %9412 = vmatpush1.bf16.msra.mxu1 %v19764_v7  ;;  %9451 = vmatpush1.bf16.msra.mxu0 %v19609_v20 }
 0xa65   : > { %14697 = vmatprep.subr.msk.bf16.mxu1 %vm17295_vm8, %v19256_v42  ;;  %v8959_v42 = vsel %vm1146_vm6, %v17729_v21, %v19473_v47  ;;  %v23083_v47 = vld [vmem:[#allocation112_spill] sm:$0xff] }
 0xa66   : > { %9008 = vrot.lane.b32.xlu0 %v8824_v53, %s15529_s14  ;;  %v23086_v53 = vld [vmem:[#allocation105_spill] sm:$0xff] }
 0xa67   : > { %8957 = vrot.lane.b32.xlu1 %v19752_v12, %s15529_s14  ;;  %14693 = vmatmul.mubr.msk.bf16.vlgmr.msra.gmra.mrb[96].mxu1 %vm4910_vm13, %v19488_v29 }
 0xa68   : > { %9502 = vmatpush1.bf16.msra.mxu1 %v22700_v30  ;;  %9533 = vmatprep.mubr.bf16.mxu1 %v22700_v30 }
 0xa69   : > { %9503 = vmatprep.subr.bf16.mxu1 %v19466_v4  ;;  %v23085_v4 = vld [vmem:[#allocation98_spill] sm:$0xff] }
 0xa6a   : > { %10510 = vperm.xlu0 %15432, %v14680_v40   ;;  %v23088_v40 = vld [vmem:[#allocation110_spill] sm:$0xff] }
 0xa6b   : > { %10505 = vperm.xlu1 %15433, %v14679_v41   ;;  %v23089_v41 = vld [vmem:[#allocation101_spill] sm:$0xff] }
 0xa6c   : > { %9504 = vmatpush1.bf16.msra.mxu1 %v8871_v11  ;;  %v23090_v11 = vld [vmem:[#allocation99_spill] sm:$0xff] }
 0xa6d   : > { %9505 = vmatprep.subr.bf16.mxu1 %v19480_v27  ;;  %v23082_v27 = vld [vmem:[#allocation107_spill] sm:$0xff] }
 0xa70   : > { %9506 = vmatpush1.bf16.msra.mxu1 %v8959_v42 }
 0xa71   : > { %9544 = vmatprep.subr.bf16.mxu1 %v19285_v13 }
 0xa73   : > { %14698 = vmatmul.mubr.msk.bf16.vlgmr.msra.gmra.mrb[60].mxu1 %vm4910_vm13, %v19795_v5 }
 0xa74   : > { %9545 = vmatpush1.bf16.msra.mxu1 %v19264_v34  ;;  %9576 = vmatprep.mubr.bf16.mxu1 %v22700_v30 }
 0xa75   : > { %9546 = vmatprep.subr.bf16.mxu1 %v19509_v36 }
 0xa78   : > { %9547 = vmatpush1.bf16.msra.mxu1 %v19461_v32 }
 0xa79   : > { %9548 = vmatprep.subr.bf16.mxu1 %v19522_v60 }
 0xa7c   : > { %9549 = vmatpush1.bf16.msra.mxu1 %v19470_v6 }
 0xa7d   : > { %9587 = vmatprep.subr.bf16.mxu1 %v19326_v17 }
 0xa7f   : > { %14699 = vmatmul.mubr.msk.bf16.vlgmr.msra.gmra.mrb[64].mxu1 %vm4910_vm13, %v19795_v5 }
 0xa80   : > { %9588 = vmatpush1.bf16.msra.mxu1 %v19312_v52  ;;  %9619 = vmatprep.mubr.bf16.mxu1 %v22700_v30 }
 0xa81   : > { %9589 = vmatprep.subr.bf16.mxu1 %v19544_v58 }
 0xa84   : > { %9590 = vmatpush1.bf16.msra.mxu1 %v19503_v46 }
 0xa85   : > { %9591 = vmatprep.subr.bf16.mxu1 %v19561_v25 }
 0xa88   : > { %9592 = vmatpush1.bf16.msra.mxu1 %v19516_v31 }
 0xa89   : > { %9630 = vmatprep.subr.bf16.mxu1 %v19370_v38 }
 0xa8b   : > { %14700 = vmatmul.mubr.msk.bf16.vlgmr.msra.gmra.mrb[68].mxu1 %vm4910_vm13, %v19795_v5 }
 0xa8c   : > { %9631 = vmatpush1.bf16.msra.mxu1 %v19356_v15  ;;  %9662 = vmatprep.mubr.bf16.mxu1 %v22700_v30 }
 0xa8d   : > { %9632 = vmatprep.subr.bf16.mxu1 %v19585_v8 }
 0xa90   : > { %9633 = vmatpush1.bf16.msra.mxu1 %v19538_v23 }
 0xa91   : > { %9634 = vmatprep.subr.bf16.mxu1 %v19598_v55 }
 0xa94   : > { %9635 = vmatpush1.bf16.msra.mxu1 %v19553_v44 }
 0xa95   : > { %9673 = vmatprep.subr.bf16.mxu1 %v19407_v62 }
 0xa97   : > { %14701 = vmatmul.mubr.msk.bf16.vlgmr.msra.gmra.mrb[72].mxu1 %vm4910_vm13, %v19795_v5 }
 0xa98   : > { %9674 = vmatpush1.bf16.msra.mxu1 %v19398_v37  ;;  %9705 = vmatprep.mubr.bf16.mxu1 %v22700_v30 }
 0xa99   : > { %9675 = vmatprep.subr.bf16.mxu1 %v19632_v9 }
 0xa9c   : > { %9676 = vmatpush1.bf16.msra.mxu1 %v19579_v3 }
 0xa9d   : > { %9677 = vmatprep.subr.bf16.mxu1 %v19640_v51 }
 0xaa0   : > { %9678 = vmatpush1.bf16.msra.mxu1 %v19592_v16 }
 0xaa1   : > { %9716 = vmatprep.subr.bf16.mxu1 %v19436_v22 }
 0xaa3   : > { %14702 = vmatmul.mubr.msk.bf16.vlgmr.msra.gmra.mrb[76].mxu1 %vm4910_vm13, %v19795_v5 }
 0xaa4   : > { %9717 = vmatpush1.bf16.msra.mxu1 %v19430_v14  ;;  %9748 = vmatprep.mubr.bf16.mxu1 %v22700_v30 }
 0xaa5   : > { %9718 = vmatprep.subr.bf16.mxu1 %v19653_v35 }
 0xaa8   : > { %9719 = vmatpush1.bf16.msra.mxu1 %v19625_v28 }
 0xaa9   : > { %9720 = vmatprep.subr.bf16.mxu1 %v19661_v59 }
 0xaac   : > { %9721 = vmatpush1.bf16.msra.mxu1 %v19636_v1 }
 0xaad   : > { %9759 = vmatprep.subr.bf16.mxu1 %v19450_v63 }
 0xaaf   : > { %14703 = vmatmul.mubr.msk.bf16.vlgmr.msra.gmra.mrb[80].mxu1 %vm4910_vm13, %v19795_v5 }
 0xab0   : > { %9760 = vmatpush1.bf16.msra.mxu1 %v19443_v0  ;;  %9791 = vmatprep.mubr.bf16.mxu1 %v22700_v30 }
 0xab1   : > { %9761 = vmatprep.subr.bf16.mxu1 %v19674_v10 }
 0xab4   : > { %9762 = vmatpush1.bf16.msra.mxu1 %v19648_v45 }
 0xab5   : > { %9763 = vmatprep.subr.bf16.mxu1 %v19682_v54 }
 0xab8   : > { %9764 = vmatpush1.bf16.msra.mxu1 %v19657_v61 }
 0xab9   : > { %9802 = vmatprep.subr.bf16.mxu1 %v19492_v49 }
 0xabb   : > { %14704 = vmatmul.mubr.msk.bf16.vlgmr.msra.gmra.mrb[84].mxu1 %vm4910_vm13, %v19795_v5 }
 0xabc   : > { %9803 = vmatpush1.bf16.msra.mxu1 %v19476_v43  ;;  %9834 = vmatprep.mubr.bf16.mxu1 %v22700_v30 }
 0xabd   : > { %9804 = vmatprep.subr.bf16.mxu1 %v19695_v26 }
 0xac0   : > { %9805 = vmatpush1.bf16.msra.mxu1 %v23082_v27 }
 0xac1   : > { %9806 = vmatprep.subr.bf16.mxu1 %v23083_v47 }
 0xac4   : > { %9807 = vmatpush1.bf16.msra.mxu1 %v23084_v57 }
 0xac5   : > { %9845 = vmatprep.subr.bf16.mxu1 %v23085_v4 }
 0xac7   : > { %14705 = vmatmul.mubr.msk.bf16.vlgmr.msra.gmra.mrb[88].mxu1 %vm4910_vm13, %v19795_v5 }
 0xac8   : > { %9846 = vmatpush1.bf16.msra.mxu1 %v23086_v53  ;;  %9877 = vmatprep.mubr.bf16.mxu1 %v22700_v30 }
 0xac9   : > { %9847 = vmatprep.subr.bf16.mxu1 %v19716_v33 }
 0xacc   : > { %9848 = vmatpush1.bf16.msra.mxu1 %v23087_v2 }
 0xacd   : > { %9849 = vmatprep.subr.bf16.mxu1 %v19724_v50 }
 0xad0   : > { %9850 = vmatpush1.bf16.msra.mxu1 %v23088_v40 }
 0xad1   : > { %9888 = vmatprep.subr.bf16.mxu1 %v23089_v41  ;;  %v23091_v41 = vld [vmem:[#allocation114_spill] sm:$0xff] }
 0xad3   : > { %14706 = vmatmul.mubr.msk.bf16.vlgmr.msra.gmra.mrb[92].mxu1 %vm4910_vm13, %v19795_v5 }
 0xad4   : > { %9889 = vmatpush1.bf16.msra.mxu1 %v23090_v11  ;;  %v9005_v42 = vpop.permute.xlu0 %9004  ;;  %9920 = vmatprep.mubr.bf16.mxu1 %v22700_v30 }
 0xad5   : > { %9890 = vmatprep.subr.bf16.mxu1 %v19740_v56  ;;  %v8870_v53 = vpop.permute.xlu1 %8869 }
 0xad6   : > { %v9006_v33 = vsel %vm1034_vm1, %v8870_v53, %v9005_v42  ;;  %v19878_v50 = vsel %vm1034_vm1, %v19732_v24, %v8870_v53  ;;  %v23092_v24 = vld [vmem:[#allocation121_spill] sm:$0xff]  ;;  %v23093_v53 = vld [vmem:[#allocation100_spill] sm:$0xff] }
 0xad7   : > { %9452 = vmatprep.subr.bf16.mxu0 %v9006_v33 }
 0xad8   : > { %9453 = vmatpush1.bf16.msra.mxu0 %v19878_v50  ;;  %9891 = vmatpush1.bf16.msra.mxu1 %v23091_v41  ;;  %v9009_v40 = vpop.permute.xlu0 %9008 }
 0xad9   : > { %9892 = vmatprep.subr.bf16.mxu1 %v19764_v7  ;;  %v8958_v11 = vpop.permute.xlu1 %8957 }
 0xada   : > { %v9010_v2 = vsel %vm1146_vm6, %v8958_v11, %v9009_v40  ;;  %v19886_v56 = vsel %vm1146_vm6, %v19745_v19, %v8958_v11  ;;  %v23094_v19 = vld [vmem:[#allocation131_spill] sm:$0xff] }
 0xadb   : > { %9454 = vmatprep.subr.bf16.mxu0 %v9010_v2 }
 0xadc   : > { %9455 = vmatpush1.bf16.msra.mxu0 %v19886_v56  ;;  %9893 = vmatpush1.bf16.msra.mxu1 %v23092_v24 }
 0xadd   : > { %9931 = vmatprep.subr.bf16.mxu0 %v19609_v20  ;;  %9986 = vmatprep.subr.bf16.mxu1 %v19285_v13  ;;  %v9976_v13 = vsel %vm1146_vm6, %v9009_v40, %v17729_v21 }
 0xadf   : > { %14694 = vmatmul.mubr.msk.bf16.vlgmr.msra.gmra.mrb[72].mxu0 %vm4910_vm13, %v19488_v29  ;;  %14707 = vmatmul.mubr.msk.bf16.vlgmr.msra.gmra.mrb[96].mxu1 %vm4910_vm13, %v19795_v5 }
 0xae0   : > { %9932 = vmatpush1.bf16.msra.mxu0 %v23093_v53  ;;  %9987 = vmatpush1.bf16.msra.mxu1 %v19264_v34  ;;  %v19909_v34 = vld [vmem:[%s22167_s3 + $0x40] sm:$0xff]  }
 0xae1   : > { %9933 = vmatprep.subr.bf16.mxu0 %v19878_v50  ;;  %9988 = vmatprep.subr.bf16.mxu1 %v19509_v36  ;;  %v23106_v36 = vld [vmem:[#allocation116_spill] sm:$0xff] }
 0xae2   : > { %9963 = vmatprep.mubr.bf16.mxu0 %v22700_v30  ;;  %10018 = vmatprep.mubr.bf16.mxu1 %v22700_v30 }
 0xae4   : > { %9934 = vmatpush1.bf16.msra.mxu0 %v23094_v19  ;;  %9989 = vmatpush1.bf16.msra.mxu1 %v19461_v32 }
 0xae5   : > { %9935 = vmatprep.subr.bf16.mxu0 %v19886_v56  ;;  %9990 = vmatprep.subr.bf16.mxu1 %v19522_v60  ;;  %v9974_v60 = vsel %vm1034_vm1, %v9005_v42, %v17715_v18 }
 0xae8   : > { %9936 = vmatpush1.bf16.msra.mxu0 %v19756_v48  ;;  %9991 = vmatpush1.bf16.msra.mxu1 %v19470_v6 }
 0xae9   : > { %10029 = vmatprep.subr.bf16.mxu1 %v19326_v17  ;;  %14720 = vmatprep.subr.msk.bf16.mxu0 %vm4665_vm5, %v19743_v39 }
 0xaeb   : > { %14708 = vmatmul.mubr.msk.bf16.vlgmr.msra.gmra.mrb[72].mxu0 %vm4910_vm13, %v19795_v5  ;;  %14710 = vmatmul.mubr.msk.bf16.vlgmr.msra.gmra.mrb[60].mxu1 %vm4910_vm13, %v19909_v34 }
 0xaec   : > { %10030 = vmatpush1.bf16.msra.mxu1 %v19312_v52  ;;  %10417 = vmatpush1.bf16.msra.mxu0 %v19752_v12  ;;  %v20010_v52 = vpop.permute.xlu1 %10505 }
 0xaed   : > { %10031 = vmatprep.subr.bf16.mxu1 %v19544_v58  ;;  %10418 = vmatprep.subr.bf16.mxu0 %v9974_v60 }
 0xaee   : > { %10061 = vmatprep.mubr.bf16.mxu1 %v22700_v30  ;;  %10448 = vmatprep.mubr.bf16.mxu0 %v22700_v30 }
 0xaf0   : > { %10032 = vmatpush1.bf16.msra.mxu1 %v19503_v46  ;;  %10419 = vmatpush1.bf16.msra.mxu0 %v9006_v33  ;;  %v23102_v46 = vld [vmem:[#allocation132_spill] sm:$0xff] }
 0xaf1   : > { %10033 = vmatprep.subr.bf16.mxu1 %v19561_v25  ;;  %10420 = vmatprep.subr.bf16.mxu0 %v9976_v13  ;;  %v23114_v13 = vld [vmem:[#allocation104_spill] sm:$0xff] }
 0xaf4   : > { %10034 = vmatpush1.bf16.msra.mxu1 %v19516_v31  ;;  %10421 = vmatpush1.bf16.msra.mxu0 %v9010_v2  ;;  %v23101_v31 = vld [vmem:[#allocation99_spill] sm:$0xff]  ;;  %v23111_v2 = vld [vmem:[#allocation16_spill] sm:$0xff] }
 0xaf5   : > { %10072 = vmatprep.subr.bf16.mxu1 %v19370_v38 }
 0xaf7   : > { %14711 = vmatmul.mubr.msk.bf16.vlgmr.msra.gmra.mrb[64].mxu1 %vm4910_vm13, %v19909_v34  ;;  %14721 = vmatmul.mubr.msk.bf16.vlgmr.msra.gmra.mrb[72].mxu0 %vm4910_vm13, %v19909_v34 }
 0xaf8   : > { %10073 = vmatpush1.bf16.msra.mxu1 %v19356_v15  ;;  %10104 = vmatprep.mubr.bf16.mxu1 %v22700_v30 }
 0xaf9   : > { %10074 = vmatprep.subr.bf16.mxu1 %v19585_v8  ;;  %11749 = vmatprep.mubr.bf16.mxu0 %v22700_v30 }
 0xafc   : > { %10075 = vmatpush1.bf16.msra.mxu1 %v19538_v23  ;;  %v23100_v23 = vld [vmem:[#allocation101_spill] sm:$0xff] }
 0xafd   : > { %10076 = vmatprep.subr.bf16.mxu1 %v19598_v55  ;;  %v23107_v55 = vld [vmem:[#allocation7_spill] sm:$0xff] }
 0xb00   : > { %10077 = vmatpush1.bf16.msra.mxu1 %v19553_v44  ;;  %v23099_v44 = vld [vmem:[#allocation110_spill] sm:$0xff] }
 0xb01   : > { %10115 = vmatprep.subr.bf16.mxu1 %v19407_v62  ;;  %v23103_v62 = vld [vmem:[#allocation118_spill] sm:$0xff] }
 0xb03   : > { %14712 = vmatmul.mubr.msk.bf16.vlgmr.msra.gmra.mrb[68].mxu1 %vm4910_vm13, %v19909_v34 }
 0xb04   : > { %10116 = vmatpush1.bf16.msra.mxu1 %v19398_v37  ;;  %10147 = vmatprep.mubr.bf16.mxu1 %v22700_v30 }
 0xb05   : > { %10117 = vmatprep.subr.bf16.mxu1 %v19632_v9 }
 0xb08   : > { %10118 = vmatpush1.bf16.msra.mxu1 %v19579_v3 }
 0xb09   : > { %10119 = vmatprep.subr.bf16.mxu1 %v19640_v51  ;;  %v23098_v51 = vld [vmem:[#allocation130_spill] sm:$0xff] }
 0xb0c   : > { %10120 = vmatpush1.bf16.msra.mxu1 %v19592_v16  ;;  %v23104_v16 = vld [vmem:[#allocation128_spill] sm:$0xff] }
 0xb0d   : > { %10158 = vmatprep.subr.bf16.mxu1 %v19436_v22 }
 0xb0f   : > { %14713 = vmatmul.mubr.msk.bf16.vlgmr.msra.gmra.mrb[72].mxu1 %vm4910_vm13, %v19909_v34 }
 0xb10   : > { %10159 = vmatpush1.bf16.msra.mxu1 %v19430_v14  ;;  %10190 = vmatprep.mubr.bf16.mxu1 %v22700_v30 }
 0xb11   : > { %10160 = vmatprep.subr.bf16.mxu1 %v19653_v35 }
 0xb14   : > { %10161 = vmatpush1.bf16.msra.mxu1 %v19625_v28  ;;  %v23108_v28 = vld [vmem:[#allocation14_spill] sm:$0xff] }
 0xb15   : > { %10162 = vmatprep.subr.bf16.mxu1 %v19661_v59  ;;  %v23095_v59 = vld [vmem:[#allocation105_spill] sm:$0xff] }
 0xb18   : > { %10163 = vmatpush1.bf16.msra.mxu1 %v19636_v1 }
 0xb19   : > { %10201 = vmatprep.subr.bf16.mxu1 %v19450_v63  ;;  %v23105_v63 = vld [vmem:[#allocation126_spill] sm:$0xff] }
 0xb1b   : > { %14714 = vmatmul.mubr.msk.bf16.vlgmr.msra.gmra.mrb[76].mxu1 %vm4910_vm13, %v19909_v34 }
 0xb1c   : > { %10202 = vmatpush1.bf16.msra.mxu1 %v19443_v0  ;;  %10233 = vmatprep.mubr.bf16.mxu1 %v22700_v30 }
 0xb1d   : > { %10203 = vmatprep.subr.bf16.mxu1 %v19674_v10 }
 0xb20   : > { %10204 = vmatpush1.bf16.msra.mxu1 %v19648_v45 }
 0xb21   : > { %10205 = vmatprep.subr.bf16.mxu1 %v19682_v54  ;;  %v23096_v54 = vld [vmem:[#allocation120_spill] sm:$0xff] }
 0xb24   : > { %10206 = vmatpush1.bf16.msra.mxu1 %v19657_v61  ;;  %v23097_v61 = vld [vmem:[#allocation108_spill] sm:$0xff] }
 0xb25   : > { %10244 = vmatprep.subr.bf16.mxu1 %v19492_v49 }
 0xb27   : > { %14715 = vmatmul.mubr.msk.bf16.vlgmr.msra.gmra.mrb[80].mxu1 %vm4910_vm13, %v19909_v34 }
 0xb28   : > { %10245 = vmatpush1.bf16.msra.mxu1 %v19476_v43  ;;  %10276 = vmatprep.mubr.bf16.mxu1 %v22700_v30  ;;  %v20013_v43 = vpop.permute.xlu0 %10510 }
 0xb29   : > { %10246 = vmatprep.subr.bf16.mxu1 %v19695_v26 }
 0xb2c   : > { %10247 = vmatpush1.bf16.msra.mxu1 %v23082_v27 }
 0xb2d   : > { %10248 = vmatprep.subr.bf16.mxu1 %v23083_v47 }
 0xb30   : > { %10249 = vmatpush1.bf16.msra.mxu1 %v23084_v57 }
 0xb31   : > { %10287 = vmatprep.subr.bf16.mxu1 %v23085_v4 }
 0xb33   : > { %14716 = vmatmul.mubr.msk.bf16.vlgmr.msra.gmra.mrb[84].mxu1 %vm4910_vm13, %v19909_v34 }
 0xb34   : > { %10288 = vmatpush1.bf16.msra.mxu1 %v23095_v59  ;;  %10319 = vmatprep.mubr.bf16.mxu1 %v22700_v30 }
 0xb35   : > { %10289 = vmatprep.subr.bf16.mxu1 %v23096_v54 }
 0xb38   : > { %10290 = vmatpush1.bf16.msra.mxu1 %v23097_v61 }
 0xb39   : > { %10291 = vmatprep.subr.bf16.mxu1 %v23098_v51 }
 0xb3c   : > { %10292 = vmatpush1.bf16.msra.mxu1 %v23099_v44 }
 0xb3d   : > { %10330 = vmatprep.subr.bf16.mxu1 %v23100_v23  ;;  %v23115_v23 = vld [vmem:[#allocation123_spill] sm:$0xff] }
 0xb3f   : > { %14717 = vmatmul.mubr.msk.bf16.vlgmr.msra.gmra.mrb[88].mxu1 %vm4910_vm13, %v19909_v34 }
 0xb40   : > { %10331 = vmatpush1.bf16.msra.mxu1 %v23101_v31  ;;  %10362 = vmatprep.mubr.bf16.mxu1 %v22700_v30 }
 0xb41   : > { %10332 = vmatprep.subr.bf16.mxu1 %v23102_v46  ;;  %v23116_v46 = vld [vmem:[#allocation113_spill] sm:$0xff] }
 0xb44   : > { %10333 = vmatpush1.bf16.msra.mxu1 %v23091_v41  ;;  %v23112_v41 = vld [vmem:[#allocation3_spill] sm:$0xff] }
 0xb45   : > { %10334 = vmatprep.subr.bf16.mxu1 %v19764_v7  ;;  %v23110_v7 = vld [vmem:[#allocation22_spill] sm:$0xff] }
 0xb48   : > { %10335 = vmatpush1.bf16.msra.mxu1 %v23092_v24 }
 0xb49   : > { %10373 = vmatprep.subr.bf16.mxu1 %v19609_v20 }
 0xb4b   : > { %14718 = vmatmul.mubr.msk.bf16.vlgmr.msra.gmra.mrb[92].mxu1 %vm4910_vm13, %v19909_v34 }
 0xb4c   : > { %10374 = vmatpush1.bf16.msra.mxu1 %v23093_v53  ;;  %10405 = vmatprep.mubr.bf16.mxu1 %v22700_v30 }
 0xb4d   : > { %10375 = vmatprep.subr.bf16.mxu1 %v19878_v50 }
 0xb50   : > { %10376 = vmatpush1.bf16.msra.mxu1 %v23094_v19 }
 0xb51   : > { %10377 = vmatprep.subr.bf16.mxu1 %v19886_v56  ;;  %v23109_v56 = vld [vmem:[#allocation21_spill] sm:$0xff] }
 0xb54   : > { %10378 = vmatpush1.bf16.msra.mxu1 %v19756_v48 }
 0xb57   : > { %14719 = vmatmul.mubr.msk.bf16.vlgmr.msra.gmra.mrb[96].mxu1 %vm4910_vm13, %v19909_v34  ;;  %v23113_v34 = vld [vmem:[#allocation115_spill] sm:$0xff] }
 0xb58   : > { %11327 = vmatprep.mubr.bf16.mxu1 %v22700_v30 }
 0xbbe   : > { %v10020_v17 = vpop.f32.mrb[60].mxu1 }
 0xbbf   : > { %v10513_v15 = vadd.f32 %v20010_v52, %v10020_v17  ;;  %v10022_v38 = vpop.f32.mrb[61].mxu1 }
 0xbc0   : > { %v10514_v32 = vadd.f32 %v20010_v52, %v10022_v38  ;;  %v10024_v37 = vpop.f32.mrb[62].mxu1 }
 0xbc1   : > { %v10557_v6 = vadd.f32 %v10513_v15, %v23103_v62  ;;  %v10535_v48 = vadd.f32 %v20013_v43, %v10024_v37  ;;  %v10026_v12 = vpop.f32.mrb[63].mxu1  ;;  %v23117_v62 = vld [vmem:[#allocation122_spill] sm:$0xff] }
 0xbc2   : > { %v10558_v14 = vadd.f32 %v10514_v32, %v23104_v16  ;;  %v10536_v22 = vadd.f32 %v20013_v43, %v10026_v12 }
 0xbc3   : > { %v10601_v0 = vmax.f32 %v10557_v6, 0.0  ;;  %v10579_v29 = vadd.f32 %v10535_v48, %v23105_v63  ;;  %v23118_v48 = vld [vmem:[#allocation106_spill] sm:$0xff]  ;;  %v23120_v63 = vld [vmem:[#allocation111_spill] sm:$0xff] }
 0xbc4   : > { %v10602_v49 = vmax.f32 %v10558_v14, 0.0  ;;  %v10580_v50 = vadd.f32 %v10536_v22, %v23106_v36  ;;  %v23119_v22 = vld [vmem:[#allocation117_spill] sm:$0xff] }
 0xbc5   : > { %v10645_v58 = vmin.f32 %v10601_v0, 6.0  ;;  %v10623_v25 = vmax.f32 %v10579_v29, 0.0 }
 0xbc6   : > { %v10646_v3 = vmin.f32 %v10602_v49, 6.0  ;;  %v10624_v8 = vmax.f32 %v10580_v50, 0.0 }
 0xbc7   : > { %v10689_v1 = vmul.f32 %v10645_v58, %v23107_v55  ;;  %v10667_v20 = vmin.f32 %v10623_v25, 6.0 }
 0xbc8   : > { %v10690_v9 = vmul.f32 %v10646_v3, %v23108_v28  ;;  %v10668_v45 = vmin.f32 %v10624_v8, 6.0 }
 0xbc9   : > { %v10711_v35 = vmul.f32 %v10667_v20, %v23107_v55  ;;  %v20027_v39 = vadd.f32 %v10689_v1, %v23109_v56  ;;  %v23121_v1 = vld [vmem:[#allocation8_spill] sm:$0xff] }
 0xbca   : > { %v10712_v10 = vmul.f32 %v10668_v45, %v23108_v28  ;;  %v10063_v26 = vpop.f32.mrb[64].mxu1  ;;  %v10450_v33 = vpop.f32.mrb[72].mxu0  ;;  %v20030_v5 = vadd.f32 %v10690_v9, %v23110_v7  ;;  %v23122_v28 = vld [vmem:[#allocation12_spill] sm:$0xff] }
 0xbcb   : > { %v10515_v27 = vadd.f32 %v20010_v52, %v10063_v26  ;;  %v10533_v47 = vadd.f32 %v20010_v52, %v10450_v33  ;;  %v10065_v57 = vpop.f32.mrb[65].mxu1  ;;  %v10452_v4 = vpop.f32.mrb[73].mxu0  ;;  %v20035_v40 = vadd.f32 %v10711_v35, %v23111_v2  ;;  %v23124_v33 = vld [vmem:[#allocation6_spill] sm:$0xff] }
 0xbcc   : > { %v20038_v11 = vadd.f32 %v10712_v10, %v23112_v41  ;;  %v10516_v42 = vadd.f32 %v20010_v52, %v10065_v57  ;;  %v10534_v24 = vadd.f32 %v20010_v52, %v10452_v4  ;;  %v10067_v53 = vpop.f32.mrb[66].mxu1  ;;  %v10454_v19 = vpop.f32.mrb[74].mxu0  ;;  %v23123_v10 = vld [vmem:[#allocation15_spill] sm:$0xff]  ;;  %v23126_v4 = vld [vmem:[#allocation69_spill] sm:$0xff] }
 0xbcd   : > { %v10559_v60 = vadd.f32 %v10515_v27, %v23113_v34  ;;  %v10577_v59 = vadd.f32 %v10533_v47, %v23114_v13  ;;  %v10537_v54 = vadd.f32 %v20013_v43, %v10067_v53  ;;  %v10555_v61 = vadd.f32 %v20013_v43, %v10454_v19  ;;  %v10069_v51 = vpop.f32.mrb[67].mxu1  ;;  %v10456_v44 = vpop.f32.mrb[75].mxu0  ;;  %v23125_v47 = vld [vmem:[#allocation25_spill] sm:$0xff]  ;;  %v23128_v19 = vld [vmem:[#allocation74_spill] sm:$0xff] }
 0xbce   : > { %v10560_v31 = vadd.f32 %v10516_v42, %v23115_v23  ;;  %v10578_v17 = vadd.f32 %v10534_v24, %v23116_v46  ;;  %v10538_v15 = vadd.f32 %v20013_v43, %v10069_v51  ;;  %v10556_v38 = vadd.f32 %v20013_v43, %v10456_v44  ;;  %v23127_v24 = vld [vmem:[#allocation26_spill] sm:$0xff]  ;;  %v23130_v51 = vld [vmem:[#allocation67_spill] sm:$0xff]  ;;  %v23208_v46 = vld [vmem:[#allocation13_spill] sm:$0xff] }
 0xbcf   : > { %v10603_v32 = vmax.f32 %v10559_v60, 0.0  ;;  %v10621_v37 = vmax.f32 %v10577_v59, 0.0  ;;  %v10581_v6 = vadd.f32 %v10537_v54, %v23117_v62  ;;  %v10599_v12 = vadd.f32 %v10555_v61, %v23118_v48  ;;  %v23129_v54 = vld [vmem:[#allocation23_spill] sm:$0xff]  ;;  %v23133_v48 = vld [vmem:[#allocation124_spill] sm:$0xff] }
 0xbd0   : > { %v10604_v16 = vmax.f32 %v10560_v31, 0.0  ;;  %v10622_v14 = vmax.f32 %v10578_v17, 0.0  ;;  %v10582_v0 = vadd.f32 %v10538_v15, %v23119_v22  ;;  %v10600_v29 = vadd.f32 %v10556_v38, %v23120_v63  ;;  %v23131_v17 = vld [vmem:[#allocation24_spill] sm:$0xff]  ;;  %v23132_v38 = vld [vmem:[#allocation73_spill] sm:$0xff]  ;;  %v23134_v63 = vld [vmem:[#allocation119_spill] sm:$0xff] }
 0xbd1   : > { %v10647_v49 = vmin.f32 %v10603_v32, 6.0  ;;  %v10665_v36 = vmin.f32 %v10621_v37, 6.0  ;;  %v10625_v50 = vmax.f32 %v10581_v6, 0.0  ;;  %v10643_v58 = vmax.f32 %v10599_v12, 0.0  ;;  %v23198_v6 = vld [vmem:[#allocation9_spill] sm:$0xff] }
 0xbd2   : > { %v10648_v25 = vmin.f32 %v10604_v16, 6.0  ;;  %v10666_v3 = vmin.f32 %v10622_v14, 6.0  ;;  %v10626_v8 = vmax.f32 %v10582_v0, 0.0  ;;  %v10644_v55 = vmax.f32 %v10600_v29, 0.0 }
 0xbd3   : > { %v10691_v20 = vmul.f32 %v10647_v49, %v23121_v1  ;;  %v10709_v9 = vmul.f32 %v10665_v36, %v23122_v28  ;;  %v10669_v45 = vmin.f32 %v10625_v50, 6.0  ;;  %v10687_v35 = vmin.f32 %v10643_v58, 6.0  ;;  %v23199_v50 = vld [vmem:[#allocation60_spill] sm:$0xff] }
 0xbd4   : > { %v10692_v26 = vmul.f32 %v10648_v25, %v23123_v10  ;;  %v10710_v56 = vmul.f32 %v10666_v3, %v23124_v33  ;;  %v10670_v7 = vmin.f32 %v10626_v8, 6.0  ;;  %v10688_v27 = vmin.f32 %v10644_v55, 6.0  ;;  %v23135_v25 = vld [vmem:[#allocation125_spill] sm:$0xff]  ;;  %v23136_v55 = vld [vmem:[#allocation127_spill] sm:$0xff] }
 0xbd5   : > { %v20059_v57 = vadd.f32 %v10691_v20, %v23125_v47  ;;  %v10753_v2 = vadd.f32 %v10709_v9, %v23126_v4  ;;  %v10713_v41 = vmul.f32 %v10669_v45, %v23121_v1  ;;  %v10731_v42 = vmul.f32 %v10687_v35, %v23122_v28  ;;  %v23137_v35 = vld [vmem:[#allocation17_spill] sm:$0xff] }
 0xbd6   : > { %v20065_v53 = vadd.f32 %v10692_v26, %v23127_v24  ;;  %v20068_v34 = vadd.f32 %v10710_v56, %v23128_v19  ;;  %v10714_v60 = vmul.f32 %v10670_v7, %v23123_v10  ;;  %v10732_v13 = vmul.f32 %v10688_v27, %v23124_v33  ;;  %v10106_v59 = vpop.f32.mrb[68].mxu1  ;;  %v23138_v33 = vld [vmem:[#allocation18_spill] sm:$0xff] }
 0xbd7   : > { %v20073_v61 = vadd.f32 %v10713_v41, %v23129_v54  ;;  %v10775_v44 = vadd.f32 %v10731_v42, %v23130_v51  ;;  %v10517_v23 = vadd.f32 %v20010_v52, %v10106_v59  ;;  %v10108_v31 = vpop.f32.mrb[69].mxu1  ;;  %v23140_v42 = vld [vmem:[#allocation28_spill] sm:$0xff]  ;;  %v23142_v54 = vld [vmem:[#allocation29_spill] sm:$0xff] }
 0xbd8   : > { %v20080_v15 = vadd.f32 %v10714_v60, %v23131_v17  ;;  %v20083_v32 = vadd.f32 %v10732_v13, %v23132_v38  ;;  %v10518_v37 = vadd.f32 %v20010_v52, %v10108_v31  ;;  %v10110_v62 = vpop.f32.mrb[70].mxu1  ;;  %v23141_v13 = vld [vmem:[#allocation30_spill] sm:$0xff]  ;;  %v23143_v31 = vld [vmem:[#allocation129_spill] sm:$0xff] }
 0xbd9   : > { %v10561_v12 = vadd.f32 %v10517_v23, %v23133_v48  ;;  %v10539_v16 = vadd.f32 %v20013_v43, %v10110_v62  ;;  %v10112_v14 = vpop.f32.mrb[71].mxu1  ;;  %v10809_v22 = vpack.c.bf16 %v10775_v44, %v10753_v2  ;;  %v23139_v2 = vld [vmem:[#allocation27_spill] sm:$0xff]  ;;  %v23144_v48 = vld [vmem:[#allocation70_spill] sm:$0xff] }
 0xbda   : > { %v10562_v29 = vadd.f32 %v10518_v37, %v23134_v63  ;;  %v10540_v49 = vadd.f32 %v20013_v43, %v10112_v14  ;;  %v23145_v63 = vld [vmem:[#allocation75_spill] sm:$0xff]  ;;  %v23189_v14 = vld [vmem:[#allocation48_spill] sm:$0xff]  ;;  %v23197_v62 = vld [vmem:[#allocation58_spill] sm:$0xff] }
 0xbdb   : > { %v10605_v58 = vmax.f32 %v10561_v12, 0.0  ;;  %v10583_v3 = vadd.f32 %v10539_v16, %v23135_v25  ;;  %10873 = vrot.lane.b32.xlu0 %v10809_v22, %s15528_s13 }
 0xbdc   : > { %v10606_v8 = vmax.f32 %v10562_v29, 0.0  ;;  %v10584_v1 = vadd.f32 %v10540_v49, %v23136_v55 }
 0xbdd   : > { %v10649_v20 = vmin.f32 %v10605_v58, 6.0  ;;  %v10627_v28 = vmax.f32 %v10583_v3, 0.0  ;;  %v23146_v58 = vld [vmem:[#allocation76_spill] sm:$0xff] }
 0xbde   : > { %v10650_v9 = vmin.f32 %v10606_v8, 6.0  ;;  %v10628_v45 = vmax.f32 %v10584_v1, 0.0 }
 0xbdf   : > { %v10693_v10 = vmul.f32 %v10649_v20, %v23137_v35  ;;  %v10671_v26 = vmin.f32 %v10627_v28, 6.0  ;;  %v23147_v20 = vld [vmem:[#allocation19_spill] sm:$0xff] }
 0xbe0   : > { %v10694_v56 = vmul.f32 %v10650_v9, %v23138_v33  ;;  %v10672_v7 = vmin.f32 %v10628_v45, 6.0  ;;  %v23148_v45 = vld [vmem:[#allocation20_spill] sm:$0xff] }
 0xbe1   : > { %v10715_v27 = vmul.f32 %v10671_v26, %v23137_v35  ;;  %v20106_v41 = vadd.f32 %v10693_v10, %v23139_v2 }
 0xbe2   : > { %v10716_v47 = vmul.f32 %v10672_v7, %v23138_v33  ;;  %v10149_v4 = vpop.f32.mrb[72].mxu1  ;;  %v20113_v59 = vadd.f32 %v10694_v56, %v23141_v13  ;;  %v23149_v7 = vld [vmem:[#allocation34_spill] sm:$0xff]  ;;  %v23152_v13 = vld [vmem:[#allocation32_spill] sm:$0xff] }
 0xbe3   : > { %v20109_v24 = vadd.f32 %v10715_v27, %v23140_v42  ;;  %v10519_v19 = vadd.f32 %v20010_v52, %v10149_v4  ;;  %v10151_v60 = vpop.f32.mrb[73].mxu1 }
 0xbe4   : > { %v20116_v51 = vadd.f32 %v10716_v47, %v23142_v54  ;;  %v10520_v44 = vadd.f32 %v20010_v52, %v10151_v60  ;;  %v10153_v23 = vpop.f32.mrb[74].mxu1  ;;  %v23150_v47 = vld [vmem:[#allocation31_spill] sm:$0xff] }
 0xbe5   : > { %v10563_v17 = vadd.f32 %v10519_v19, %v23143_v31  ;;  %v10541_v38 = vadd.f32 %v20013_v43, %v10153_v23  ;;  %v10155_v37 = vpop.f32.mrb[75].mxu1  ;;  %v23151_v19 = vld [vmem:[#allocation35_spill] sm:$0xff]  ;;  %v23153_v31 = vld [vmem:[#allocation77_spill] sm:$0xff] }
 0xbe6   : > { %v10564_v12 = vadd.f32 %v10520_v44, %v23144_v48  ;;  %v10542_v16 = vadd.f32 %v20013_v43, %v10155_v37  ;;  %v23188_v48 = vld [vmem:[#allocation44_spill] sm:$0xff] }
 0xbe7   : > { %v10607_v22 = vmax.f32 %v10563_v17, 0.0  ;;  %v10585_v29 = vadd.f32 %v10541_v38, %v23145_v63 }
 0xbe8   : > { %v10608_v49 = vmax.f32 %v10564_v12, 0.0  ;;  %v10586_v25 = vadd.f32 %v10542_v16, %v23146_v58  ;;  %v23154_v12 = vld [vmem:[#allocation79_spill] sm:$0xff] }
 0xbe9   : > { %v10651_v3 = vmin.f32 %v10607_v22, 6.0  ;;  %v10629_v8 = vmax.f32 %v10585_v29, 0.0 }
 0xbea   : > { %v10652_v55 = vmin.f32 %v10608_v49, 6.0  ;;  %v10630_v1 = vmax.f32 %v10586_v25, 0.0  ;;  %v23155_v49 = vld [vmem:[#allocation78_spill] sm:$0xff] }
 0xbeb   : > { %v10695_v28 = vmul.f32 %v10651_v3, %v23147_v20  ;;  %v10673_v9 = vmin.f32 %v10629_v8, 6.0  ;;  %v23156_v3 = vld [vmem:[#allocation71_spill] sm:$0xff] }
 0xbec   : > { %v10696_v35 = vmul.f32 %v10652_v55, %v23148_v45  ;;  %v10674_v10 = vmin.f32 %v10630_v1, 6.0 }
 0xbed   : > { %v10717_v26 = vmul.f32 %v10673_v9, %v23147_v20  ;;  %v20134_v27 = vadd.f32 %v10695_v28, %v23149_v7  ;;  %v23157_v9 = vld [vmem:[#allocation10_spill] sm:$0xff] }
 0xbee   : > { %v10718_v33 = vmul.f32 %v10674_v10, %v23148_v45  ;;  %v10192_v56 = vpop.f32.mrb[76].mxu1  ;;  %v20141_v60 = vadd.f32 %v10696_v35, %v23151_v19  ;;  %v23158_v10 = vld [vmem:[#allocation49_spill] sm:$0xff] }
 0xbef   : > { %v20137_v4 = vadd.f32 %v10717_v26, %v23150_v47  ;;  %v10521_v2 = vadd.f32 %v20010_v52, %v10192_v56  ;;  %v10194_v42 = vpop.f32.mrb[77].mxu1  ;;  %v23160_v19 = vld [vmem:[#allocation41_spill] sm:$0xff] }
 0xbf0   : > { %v20144_v54 = vadd.f32 %v10718_v33, %v23152_v13  ;;  %v10522_v44 = vadd.f32 %v20010_v52, %v10194_v42  ;;  %v10196_v23 = vpop.f32.mrb[78].mxu1 }
 0xbf1   : > { %v10565_v17 = vadd.f32 %v10521_v2, %v23153_v31  ;;  %v10543_v38 = vadd.f32 %v20013_v43, %v10196_v23  ;;  %v10198_v37 = vpop.f32.mrb[79].mxu1  ;;  %v23159_v2 = vld [vmem:[#allocation43_spill] sm:$0xff] }
 0xbf2   : > { %v10566_v16 = vadd.f32 %v10522_v44, %v23154_v12  ;;  %v10544_v22 = vadd.f32 %v20013_v43, %v10198_v37  ;;  %v23161_v31 = vld [vmem:[#allocation55_spill] sm:$0xff] }
 0xbf3   : > { %v10609_v29 = vmax.f32 %v10565_v17, 0.0  ;;  %v10587_v58 = vadd.f32 %v10543_v38, %v23155_v49  ;;  %v23162_v38 = vld [vmem:[#allocation52_spill] sm:$0xff] }
 0xbf4   : > { %v10610_v25 = vmax.f32 %v10566_v16, 0.0  ;;  %v10588_v8 = vadd.f32 %v10544_v22, %v23156_v3  ;;  %v23163_v22 = vld [vmem:[#allocation80_spill] sm:$0xff]  ;;  %v23164_v3 = vld [vmem:[#allocation82_spill] sm:$0xff] }
 0xbf5   : > { %v10653_v55 = vmin.f32 %v10609_v29, 6.0  ;;  %v10631_v1 = vmax.f32 %v10587_v58, 0.0 }
 0xbf6   : > { %v10654_v20 = vmin.f32 %v10610_v25, 6.0  ;;  %v10632_v28 = vmax.f32 %v10588_v8, 0.0  ;;  %v23187_v25 = vld [vmem:[#allocation42_spill] sm:$0xff] }
 0xbf7   : > { %v10697_v45 = vmul.f32 %v10653_v55, %v23157_v9  ;;  %v10675_v35 = vmin.f32 %v10631_v1, 6.0  ;;  %v23179_v1 = vld [vmem:[#allocation53_spill] sm:$0xff] }
 0xbf8   : > { %v10698_v26 = vmul.f32 %v10654_v20, %v23158_v10  ;;  %v10676_v33 = vmin.f32 %v10632_v28, 6.0  ;;  %v23165_v28 = vld [vmem:[#allocation72_spill] sm:$0xff] }
 0xbf9   : > { %v10719_v56 = vmul.f32 %v10675_v35, %v23157_v9  ;;  %v20162_v42 = vadd.f32 %v10697_v45, %v23159_v2  ;;  %v23166_v35 = vld [vmem:[#allocation81_spill] sm:$0xff] }
 0xbfa   : > { %v10720_v7 = vmul.f32 %v10676_v33, %v23158_v10  ;;  %v10235_v47 = vpop.f32.mrb[80].mxu1  ;;  %v20169_v17 = vadd.f32 %v10698_v26, %v23161_v31 }
 0xbfb   : > { %v20165_v13 = vadd.f32 %v10719_v56, %v23160_v19  ;;  %v10523_v44 = vadd.f32 %v20010_v52, %v10235_v47  ;;  %v10237_v23 = vpop.f32.mrb[81].mxu1  ;;  %v23167_v47 = vld [vmem:[#allocation33_spill] sm:$0xff] }
 0xbfc   : > { %v20172_v37 = vadd.f32 %v10720_v7, %v23162_v38  ;;  %v10524_v12 = vadd.f32 %v20010_v52, %v10237_v23  ;;  %v10239_v16 = vpop.f32.mrb[82].mxu1 }
 0xbfd   : > { %v10567_v29 = vadd.f32 %v10523_v44, %v23163_v22  ;;  %v10545_v49 = vadd.f32 %v20013_v43, %v10239_v16  ;;  %v10241_v58 = vpop.f32.mrb[83].mxu1  ;;  %v23168_v44 = vld [vmem:[#allocation36_spill] sm:$0xff]  ;;  %v23169_v22 = vld [vmem:[#allocation39_spill] sm:$0xff] }
 0xbfe   : > { %v10568_v8 = vadd.f32 %v10524_v12, %v23164_v3  ;;  %v10546_v55 = vadd.f32 %v20013_v43, %v10241_v58 }
 0xbff   : > { %v10611_v20 = vmax.f32 %v10567_v29, 0.0  ;;  %v10589_v9 = vadd.f32 %v10545_v49, %v23165_v28  ;;  %v23170_v49 = vld [vmem:[#allocation37_spill] sm:$0xff]  ;;  %v23172_v28 = vld [vmem:[#allocation38_spill] sm:$0xff] }
 0xc00   : > { %v10612_v45 = vmax.f32 %v10568_v8, 0.0  ;;  %v10590_v10 = vadd.f32 %v10546_v55, %v23166_v35  ;;  %v23171_v55 = vld [vmem:[#allocation40_spill] sm:$0xff] }
 0xc01   : > { %v10655_v26 = vmin.f32 %v10611_v20, 6.0  ;;  %v10633_v33 = vmax.f32 %v10589_v9, 0.0 }
 0xc02   : > { %v10656_v56 = vmin.f32 %v10612_v45, 6.0  ;;  %v10634_v7 = vmax.f32 %v10590_v10, 0.0  ;;  %v23173_v10 = vld [vmem:[#allocation84_spill] sm:$0xff] }
 0xc03   : > { %v10699_v2 = vmul.f32 %v10655_v26, %v23167_v47  ;;  %v10677_v19 = vmin.f32 %v10633_v33, 6.0 }
 0xc04   : > { %v10700_v23 = vmul.f32 %v10656_v56, %v23168_v44  ;;  %v10678_v31 = vmin.f32 %v10634_v7, 6.0  ;;  %v23178_v7 = vld [vmem:[#allocation54_spill] sm:$0xff] }
 0xc05   : > { %v10721_v38 = vmul.f32 %v10677_v19, %v23167_v47  ;;  %v20190_v29 = vadd.f32 %v10699_v2, %v23169_v22  ;;  %v23174_v47 = vld [vmem:[#allocation87_spill] sm:$0xff] }
 0xc06   : > { %v10722_v12 = vmul.f32 %v10678_v31, %v23168_v44  ;;  %v10278_v16 = vpop.f32.mrb[84].mxu1  ;;  %v20197_v20 = vadd.f32 %v10700_v23, %v23171_v55  ;;  %v23175_v31 = vld [vmem:[#allocation86_spill] sm:$0xff] }
 0xc07   : > { %v20193_v58 = vadd.f32 %v10721_v38, %v23170_v49  ;;  %v10525_v3 = vadd.f32 %v20010_v52, %v10278_v16  ;;  %v10280_v8 = vpop.f32.mrb[85].mxu1  ;;  %v23176_v16 = vld [vmem:[#allocation88_spill] sm:$0xff] }
 0xc08   : > { %v20200_v9 = vadd.f32 %v10722_v12, %v23172_v28  ;;  %v10526_v45 = vadd.f32 %v20010_v52, %v10280_v8  ;;  %v10282_v35 = vpop.f32.mrb[86].mxu1  ;;  %v23177_v28 = vld [vmem:[#allocation46_spill] sm:$0xff] }
 0xc09   : > { %v10569_v26 = vadd.f32 %v10525_v3, %v23173_v10  ;;  %v10547_v33 = vadd.f32 %v20013_v43, %v10282_v35  ;;  %v10284_v56 = vpop.f32.mrb[87].mxu1 }
 0xc0a   : > { %v10570_v2 = vadd.f32 %v10526_v45, %v23174_v47  ;;  %v10548_v19 = vadd.f32 %v20013_v43, %v10284_v56 }
 0xc0b   : > { %v10613_v23 = vmax.f32 %v10569_v26, 0.0  ;;  %v10591_v38 = vadd.f32 %v10547_v33, %v23175_v31 }
 0xc0c   : > { %v10614_v12 = vmax.f32 %v10570_v2, 0.0  ;;  %v10592_v22 = vadd.f32 %v10548_v19, %v23176_v16  ;;  %v23180_v2 = vld [vmem:[#allocation51_spill] sm:$0xff]  ;;  %v23182_v16 = vld [vmem:[#allocation56_spill] sm:$0xff] }
 0xc0d   : > { %v10657_v49 = vmin.f32 %v10613_v23, 6.0  ;;  %v10635_v3 = vmax.f32 %v10591_v38, 0.0  ;;  %v23181_v38 = vld [vmem:[#allocation57_spill] sm:$0xff] }
 0xc0e   : > { %v10658_v8 = vmin.f32 %v10614_v12, 6.0  ;;  %v10636_v55 = vmax.f32 %v10592_v22, 0.0 }
 0xc0f   : > { %v10701_v35 = vmul.f32 %v10657_v49, %v23177_v28  ;;  %v10679_v10 = vmin.f32 %v10635_v3, 6.0 }
 0xc10   : > { %v10702_v45 = vmul.f32 %v10658_v8, %v23178_v7  ;;  %v10680_v47 = vmin.f32 %v10636_v55, 6.0 }
 0xc11   : > { %v10723_v56 = vmul.f32 %v10679_v10, %v23177_v28  ;;  %v20218_v33 = vadd.f32 %v10701_v35, %v23179_v1  ;;  %v23184_v35 = vld [vmem:[#allocation91_spill] sm:$0xff] }
 0xc12   : > { %v10724_v44 = vmul.f32 %v10680_v47, %v23178_v7  ;;  %v10321_v26 = vpop.f32.mrb[88].mxu1  ;;  %v20225_v12 = vadd.f32 %v10702_v45, %v23181_v38  ;;  %v23183_v7 = vld [vmem:[#allocation90_spill] sm:$0xff] }
 0xc13   : > { %v20221_v19 = vadd.f32 %v10723_v56, %v23180_v2  ;;  %v10527_v23 = vadd.f32 %v20010_v52, %v10321_v26  ;;  %v10323_v31 = vpop.f32.mrb[89].mxu1  ;;  %v23185_v56 = vld [vmem:[#allocation89_spill] sm:$0xff] }
 0xc14   : > { %v20228_v22 = vadd.f32 %v10724_v44, %v23182_v16  ;;  %v10528_v49 = vadd.f32 %v20010_v52, %v10323_v31  ;;  %v10325_v3 = vpop.f32.mrb[90].mxu1  ;;  %v23186_v31 = vld [vmem:[#allocation92_spill] sm:$0xff] }
 0xc15   : > { %v10571_v8 = vadd.f32 %v10527_v23, %v23183_v7  ;;  %v10549_v1 = vadd.f32 %v20013_v43, %v10325_v3  ;;  %v10327_v55 = vpop.f32.mrb[91].mxu1 }
 0xc16   : > { %v10572_v10 = vadd.f32 %v10528_v49, %v23184_v35  ;;  %v10550_v47 = vadd.f32 %v20013_v43, %v10327_v55 }
 0xc17   : > { %v10615_v44 = vmax.f32 %v10571_v8, 0.0  ;;  %v10593_v26 = vadd.f32 %v10549_v1, %v23185_v56 }
 0xc18   : > { %v10616_v2 = vmax.f32 %v10572_v10, 0.0  ;;  %v10594_v38 = vadd.f32 %v10550_v47, %v23186_v31  ;;  %v23190_v10 = vld [vmem:[#allocation45_spill] sm:$0xff]  ;;  %v23192_v31 = vld [vmem:[#allocation47_spill] sm:$0xff] }
 0xc19   : > { %v10659_v23 = vmin.f32 %v10615_v44, 6.0  ;;  %v10637_v16 = vmax.f32 %v10593_v26, 0.0  ;;  %v23191_v26 = vld [vmem:[#allocation50_spill] sm:$0xff] }
 0xc1a   : > { %v10660_v3 = vmin.f32 %v10616_v2, 6.0  ;;  %v10638_v7 = vmax.f32 %v10594_v38, 0.0 }
 0xc1b   : > { %v10703_v63 = vmul.f32 %v10659_v23, %v23187_v25  ;;  %v10681_v28 = vmin.f32 %v10637_v16, 6.0 }
 0xc1c   : > { %v10704_v49 = vmul.f32 %v10660_v3, %v23188_v48  ;;  %v10682_v35 = vmin.f32 %v10638_v7, 6.0  ;;  %v23194_v3 = vld [vmem:[#allocation96_spill] sm:$0xff] }
 0xc1d   : > { %v10725_v55 = vmul.f32 %v10681_v28, %v23187_v25  ;;  %v20246_v1 = vadd.f32 %v10703_v63, %v23189_v14 }
 0xc1e   : > { %v10726_v45 = vmul.f32 %v10682_v35, %v23188_v48  ;;  %v10364_v8 = vpop.f32.mrb[92].mxu1  ;;  %v20253_v2 = vadd.f32 %v10704_v49, %v23191_v26  ;;  %v23193_v48 = vld [vmem:[#allocation97_spill] sm:$0xff] }
 0xc1f   : > { %v20249_v47 = vadd.f32 %v10725_v55, %v23190_v10  ;;  %v10529_v44 = vadd.f32 %v20010_v52, %v10364_v8  ;;  %v10366_v56 = vpop.f32.mrb[93].mxu1  ;;  %v23195_v55 = vld [vmem:[#allocation93_spill] sm:$0xff] }
 0xc20   : > { %v20256_v38 = vadd.f32 %v10726_v45, %v23192_v31  ;;  %v10530_v25 = vadd.f32 %v20010_v52, %v10366_v56  ;;  %v10368_v28 = vpop.f32.mrb[94].mxu1  ;;  %v23196_v56 = vld [vmem:[#allocation103_spill] sm:$0xff] }
 0xc21   : > { %v10573_v23 = vadd.f32 %v10529_v44, %v23193_v48  ;;  %v10551_v14 = vadd.f32 %v20013_v43, %v10368_v28  ;;  %v10370_v63 = vpop.f32.mrb[95].mxu1 }
 0xc22   : > { %v10574_v7 = vadd.f32 %v10530_v25, %v23194_v3  ;;  %v10552_v35 = vadd.f32 %v20013_v43, %v10370_v63 }
 0xc23   : > { %v10617_v45 = vmax.f32 %v10573_v23, 0.0  ;;  %v10595_v8 = vadd.f32 %v10551_v14, %v23195_v55 }
 0xc24   : > { %v10618_v10 = vmax.f32 %v10574_v7, 0.0  ;;  %v10596_v26 = vadd.f32 %v10552_v35, %v23196_v56  ;;  %v23200_v7 = vld [vmem:[#allocation59_spill] sm:$0xff]  ;;  %v23202_v56 = vld [vmem:[#allocation66_spill] sm:$0xff] }
 0xc25   : > { %v10661_v44 = vmin.f32 %v10617_v45, 6.0  ;;  %v10639_v31 = vmax.f32 %v10595_v8, 0.0  ;;  %v23201_v8 = vld [vmem:[#allocation68_spill] sm:$0xff] }
 0xc26   : > { %v10662_v28 = vmin.f32 %v10618_v10, 6.0  ;;  %v10640_v48 = vmax.f32 %v10596_v26, 0.0 }
 0xc27   : > { %v10705_v0 = vmul.f32 %v10661_v44, %v23197_v62  ;;  %v10683_v16 = vmin.f32 %v10639_v31, 6.0 }
 0xc28   : > { %v10706_v25 = vmul.f32 %v10662_v28, %v23198_v6  ;;  %v10684_v3 = vmin.f32 %v10640_v48, 6.0  ;;  %v23204_v28 = vld [vmem:[#allocation61_spill] sm:$0xff] }
 0xc29   : > { %v10727_v63 = vmul.f32 %v10683_v16, %v23197_v62  ;;  %v20274_v14 = vadd.f32 %v10705_v0, %v23199_v50 }
 0xc2a   : > { %v10728_v49 = vmul.f32 %v10684_v3, %v23198_v6  ;;  %v10407_v23 = vpop.f32.mrb[96].mxu1  ;;  %v20281_v10 = vadd.f32 %v10706_v25, %v23201_v8  ;;  %v23203_v6 = vld [vmem:[#allocation94_spill] sm:$0xff] }
 0xc2b   : > { %v20277_v35 = vadd.f32 %v10727_v63, %v23200_v7  ;;  %v10531_v45 = vadd.f32 %v20010_v52, %v10407_v23  ;;  %v10409_v55 = vpop.f32.mrb[97].mxu1  ;;  %v23205_v63 = vld [vmem:[#allocation102_spill] sm:$0xff]  ;;  %v23206_v7 = vld [vmem:[#allocation95_spill] sm:$0xff] }
 0xc2c   : > { %v20284_v26 = vadd.f32 %v10728_v49, %v23202_v56  ;;  %v10532_v62 = vadd.f32 %v20010_v52, %v10409_v55  ;;  %v10411_v16 = vpop.f32.mrb[98].mxu1 }
 0xc2d   : > { %v10575_v44 = vadd.f32 %v10531_v45, %v23203_v6  ;;  %v10553_v0 = vadd.f32 %v20013_v43, %v10411_v16  ;;  %v10413_v50 = vpop.f32.mrb[99].mxu1  ;;  %v23207_v6 = vld [vmem:[#allocation11_spill] sm:$0xff] }
 0xc2e   : > { %v10576_v48 = vadd.f32 %v10532_v62, %v23204_v28  ;;  %v10554_v3 = vadd.f32 %v20013_v43, %v10413_v50 }
 0xc2f   : > { %v10619_v49 = vmax.f32 %v10575_v44, 0.0  ;;  %v10597_v23 = vadd.f32 %v10553_v0, %v23205_v63  ;;  %v23209_v44 = vld [vmem:[#allocation65_spill] sm:$0xff]  ;;  %v23210_v0 = vld [vmem:[#allocation63_spill] sm:$0xff]  ;;  %v23211_v63 = vld [vmem:[#allocation64_spill] sm:$0xff] }
 0xc30   : > { %v10620_v52 = vmax.f32 %v10576_v48, 0.0  ;;  %v10598_v55 = vadd.f32 %v10554_v3, %v23206_v7 }
 0xc31   : > { %v10663_v45 = vmin.f32 %v10619_v49, 6.0  ;;  %v10641_v8 = vmax.f32 %v10597_v23, 0.0  ;;  %v23212_v49 = vld [vmem:[#allocation62_spill] sm:$0xff] }
 0xc32   : > { %v10664_v56 = vmin.f32 %v10620_v52, 6.0  ;;  %v10642_v16 = vmax.f32 %v10598_v55, 0.0 }
 0xc33   : > { %v10707_v36 = vmul.f32 %v10663_v45, %v23207_v6  ;;  %v10685_v31 = vmin.f32 %v10641_v8, 6.0  ;;  %v23227_v45 = vpack.c.bf16 %v20137_v4, %v20134_v27  ;;  %v23228_v4 = vpack.c.bf16 %v20144_v54, %v20141_v60 }
 0xc34   : > { %v10708_v62 = vmul.f32 %v10664_v56, %v23208_v46  ;;  %v10686_v28 = vmin.f32 %v10642_v16, 6.0  ;;  %v23229_v56 = vpack.c.bf16 %v20165_v13, %v20162_v42  ;;  %v23230_v42 = vpack.c.bf16 %v20172_v37, %v20169_v17 }
 0xc35   : > { %v10729_v43 = vmul.f32 %v10685_v31, %v23207_v6  ;;  %v10751_v25 = vadd.f32 %v10707_v36, %v23209_v44  ;;  %v23213_v31 = vpack.c.bf16 %v20038_v11, %v20030_v5  ;;  %v23215_v36 = vpack.c.bf16 %v20080_v15, %v20065_v53 }
 0xc36   : > { %v10730_v50 = vmul.f32 %v10686_v28, %v23208_v46  ;;  %v10752_v3 = vadd.f32 %v10708_v62, %v23211_v63  ;;  %v23214_v46 = vpack.c.bf16 %v20083_v32, %v20068_v34  ;;  %v23217_v5 = vpack.c.bf16 %v20073_v61, %v20059_v57 }
 0xc37   : > { %v10773_v48 = vadd.f32 %v10729_v43, %v23210_v0  ;;  %v23225_v15 = vpack.c.bf16 %v20109_v24, %v20106_v41  ;;  %v23226_v24 = vpack.c.bf16 %v20116_v51, %v20113_v59  ;;  %v23237_v44 = vpack.c.bf16 %v20193_v58, %v20190_v29 }
 0xc38   : > { %v10774_v23 = vadd.f32 %v10730_v50, %v23212_v49  ;;  %v23293_v57 = vpack.c.bf16 %v20284_v26, %v20281_v10 }
 0xc39   : > { %v10807_v52 = vpack.c.bf16 %v10773_v48, %v10751_v25  ;;  %v23216_v25 = vpack.c.bf16 %v20035_v40, %v20027_v39 }
 0xc3a   : > { %v10808_v7 = vpack.c.bf16 %v10774_v23, %v10752_v3 }
 0xc3b   : > { %10869 = vrot.lane.b32.xlu0 %v10807_v52, %s15528_s13 }
 0xc3c   : > { %10871 = vrot.lane.b32.xlu1 %v10808_v7, %s15528_s13 }
 0xc3f   : > { %10835 = vrot.lane.b32.xlu0 %v23213_v31, %s15528_s13 }
 0xc40   : > { %10875 = vrot.lane.b32.xlu1 %v23214_v46, %s15528_s13 }
 0xc43   : > { %10839 = vrot.lane.b32.xlu0 %v23215_v36, %s15528_s13 }
 0xc44   : > { %10833 = vrot.lane.b32.xlu1 %v23216_v25, %s15528_s13 }
 0xc48   : > { %10837 = vrot.lane.b32.xlu1 %v23217_v5, %s15528_s13  ;;  %v20520_v5 = vld [vmem:[%s22169_s5 + $0x8] sm:$0x3f]  }
 0xc4d   : > { %v10874_v11 = vpop.permute.xlu0 %10873 }
 0xcad   : > { %v20327_v55 = vpop.permute.xlu0 %10869 }
 0xcae   : > { %23218 = vst [vmem:[#allocation107_spill] sm:$0xff] %v20327_v55  ;;  %v10872_v34 = vpop.permute.xlu1 %10871 }
 0xcaf   : > { %v20331_v32 = vsel %vm765_vm0, %v20327_v55, %v10872_v34  ;;  %v20334_v53 = vsel %vm765_vm0, %v10872_v34, %v10874_v11 }
 0xcb0   : > { %23219 = vst [vmem:[#allocation112_spill] sm:$0xff] %v20331_v32  ;;  %23220 = vst [vmem:[#allocation109_spill] sm:$0xff] %v20334_v53  ;;  %11717 = vmatprep.subr.bf16.mxu0 %v20334_v53 }
 0xcb1   : > { %11718 = vmatpush1.bf16.msra.mxu0 %v20331_v32  ;;  %v10836_v8 = vpop.permute.xlu0 %10835 }
 0xcb2   : > { %v20338_v39 = vpop.permute.xlu1 %10875 }
 0xcb3   : > { %23221 = vst [vmem:[#allocation98_spill] sm:$0xff] %v20338_v39  ;;  %v20342_v40 = vsel %vm765_vm0, %v10874_v11, %v20338_v39 }
 0xcb4   : > { %23222 = vst [vmem:[#allocation114_spill] sm:$0xff] %v20342_v40  ;;  %11274 = vrot.lane.b32.xlu0 %v20342_v40, %s15529_s14  ;;  %11270 = vrot.lane.b32.xlu1 %v20342_v40, %s15530_s15 }
 0xcb5   : > { %v10840_v60 = vpop.permute.xlu0 %10839 }
 0xcb6   : > { %v20353_v61 = vpop.permute.xlu1 %10833 }
 0xcb7   : > { %14724 = vmatprep.subr.msk.bf16.mxu1 %vm20349_vm14, %v20353_v61  ;;  %v10920_v41 = vsel %vm765_vm0, 0, %v20353_v61  ;;  %v20402_v59 = vsel %vm765_vm0, %v20353_v61, %v10836_v8 }
 0xcb8   : > { %10966 = vrot.lane.b32.xlu0 %v20334_v53, %s15530_s15  ;;  %10841 = vrot.lane.b32.xlu1 %v23225_v15, %s15528_s13 }
 0xcb9   : > { %11296 = vmatpush1.bf16.msra.mxu1 %v22700_v30 }
 0xcba   : > { %v10838_v51 = vpop.permute.xlu1 %10837 }
 0xcbb   : > { %v20408_v27 = vsel %vm765_vm0, %v10836_v8, %v10838_v51  ;;  %v20431_v54 = vsel %vm765_vm0, %v10838_v51, %v10840_v60 }
 0xcbc   : > { %10964 = vrot.lane.b32.xlu0 %v20331_v32, %s15530_s15  ;;  %11278 = vrot.lane.b32.xlu1 %v20342_v40, %s15532_s18 }
 0xcc0   : > { %11138 = vrot.lane.b32.xlu0 %v20334_v53, %s15532_s18  ;;  %11051 = vrot.lane.b32.xlu1 %v20334_v53, %s15529_s14 }
 0xcc4   : > { %11136 = vrot.lane.b32.xlu0 %v20331_v32, %s15532_s18  ;;  %11049 = vrot.lane.b32.xlu1 %v20331_v32, %s15529_s14 }
 0xcc8   : > { %11282 = vrot.lane.b32.xlu0 %v20342_v40, %s15531_s17  ;;  %11225 = vrot.lane.b32.xlu1 %v20334_v53, %s15531_s17 }
 0xccc   : > { %11223 = vrot.lane.b32.xlu1 %v20331_v32, %s15531_s17  ;;  %10926 = vrot.lane.b32.xlu0 %v10920_v41, %s15530_s15 }
 0xcd0   : > { %10843 = vrot.lane.b32.xlu1 %v23226_v24, %s15528_s13  ;;  %10845 = vrot.lane.b32.xlu0 %v23227_v45, %s15528_s13 }
 0xcd4   : > { %11011 = vrot.lane.b32.xlu1 %v10920_v41, %s15529_s14  ;;  %11096 = vrot.lane.b32.xlu0 %v22700_v30, %s15532_s18 }
 0xcd8   : > { %11098 = vrot.lane.b32.xlu1 %v10920_v41, %s15532_s18  ;;  %11183 = vrot.lane.b32.xlu0 %v22700_v30, %s15531_s17 }
 0xcdc   : > { %11185 = vrot.lane.b32.xlu1 %v10920_v41, %s15531_s17  ;;  %10928 = vrot.lane.b32.xlu0 %v20402_v59, %s15530_s15 }
 0xce0   : > { %10847 = vrot.lane.b32.xlu0 %v23228_v4, %s15528_s13  ;;  %10930 = vrot.lane.b32.xlu1 %v20408_v27, %s15530_s15  ;;  %v23249_v4 = vpack.c.bf16 %v20221_v19, %v20218_v33 }
 0xce4   : > { %11013 = vrot.lane.b32.xlu0 %v20402_v59, %s15529_s14  ;;  %10849 = vrot.lane.b32.xlu1 %v23229_v56, %s15528_s13  ;;  %v23250_v56 = vpack.c.bf16 %v20200_v9, %v20197_v20 }
 0xce8   : > { %11100 = vrot.lane.b32.xlu0 %v20402_v59, %s15532_s18  ;;  %11015 = vrot.lane.b32.xlu1 %v20408_v27, %s15529_s14 }
 0xcec   : > { %11187 = vrot.lane.b32.xlu0 %v20402_v59, %s15531_s17  ;;  %11102 = vrot.lane.b32.xlu1 %v20408_v27, %s15532_s18 }
 0xcf0   : > { %10932 = vrot.lane.b32.xlu0 %v20431_v54, %s15530_s15  ;;  %11189 = vrot.lane.b32.xlu1 %v20408_v27, %s15531_s17 }
 0xcf4   : > { %10851 = vrot.lane.b32.xlu0 %v23230_v42, %s15528_s13 }
 0xcf8   : > { %11017 = vrot.lane.b32.xlu0 %v20431_v54, %s15529_s14 }
 0xcfc   : > { %11104 = vrot.lane.b32.xlu0 %v20431_v54, %s15532_s18 }
 0xd00   : > { %11191 = vrot.lane.b32.xlu0 %v20431_v54, %s15531_s17 }
 0xd26   : > { %v20447_v13 = vpop.permute.xlu0 %11274  ;;  %v20449_v16 = vpop.permute.xlu1 %11270 }
 0xd27   : > { %23231 = vst [vmem:[#allocation121_spill] sm:$0xff] %v20447_v13  ;;  %23232 = vst [vmem:[#allocation100_spill] sm:$0xff] %v20449_v16 }
 0xd2a   : > { %v10967_v6 = vpop.permute.xlu0 %10966  ;;  %v10842_v62 = vpop.permute.xlu1 %10841 }
 0xd2b   : > { %v20452_v28 = vsel %vm765_vm0, %v10840_v60, %v10842_v62  ;;  %v20456_v17 = vsel %vm1034_vm1, %v10967_v6, %v20449_v16 }
 0xd2c   : > { %23233 = vst [vmem:[#allocation131_spill] sm:$0xff] %v20456_v17  ;;  %11719 = vmatprep.subr.bf16.mxu0 %v20456_v17  ;;  %10934 = vrot.lane.b32.xlu1 %v20452_v28, %s15530_s15 }
 0xd2e   : > { %v20461_v37 = vpop.permute.xlu0 %10964  ;;  %v20463_v43 = vpop.permute.xlu1 %11278 }
 0xd2f   : > { %23234 = vst [vmem:[#allocation105_spill] sm:$0xff] %v20461_v37  ;;  %23235 = vst [vmem:[#allocation120_spill] sm:$0xff] %v20463_v43  ;;  %v20467_v50 = vsel %vm1034_vm1, %v20461_v37, %v10967_v6 }
 0xd30   : > { %23236 = vst [vmem:[#allocation108_spill] sm:$0xff] %v20467_v50  ;;  %11720 = vmatpush1.bf16.msra.mxu0 %v20467_v50  ;;  %10853 = vrot.lane.b32.xlu1 %v23237_v44, %s15528_s13 }
 0xd32   : > { %v11139_v0 = vpop.permute.xlu0 %11138  ;;  %v11052_v48 = vpop.permute.xlu1 %11051 }
 0xd33   : > { %v20476_v63 = vsel %vm1146_vm6, %v11052_v48, %v20447_v13  ;;  %v20494_v29 = vsel %vm1278_vm4, %v11139_v0, %v20463_v43 }
 0xd34   : > { %23238 = vst [vmem:[#allocation130_spill] sm:$0xff] %v20476_v63  ;;  %11019 = vrot.lane.b32.xlu1 %v20452_v28, %s15529_s14  ;;  %11721 = vmatprep.subr.bf16.mxu0 %v20476_v63  ;;  %23242 = vst [vmem:[#allocation132_spill] sm:$0xff] %v20494_v29 }
 0xd36   : > { %v20481_v3 = vpop.permute.xlu0 %11136  ;;  %v20483_v49 = vpop.permute.xlu1 %11049 }
 0xd37   : > { %23239 = vst [vmem:[#allocation110_spill] sm:$0xff] %v20481_v3  ;;  %23240 = vst [vmem:[#allocation101_spill] sm:$0xff] %v20483_v49  ;;  %v20487_v23 = vsel %vm1146_vm6, %v20483_v49, %v11052_v48  ;;  %v20501_v7 = vsel %vm1278_vm4, %v20481_v3, %v11139_v0  ;;  %v20578_v0 = vld [vmem:[%s22169_s5] sm:$0x3f]  }
 0xd38   : > { %23241 = vst [vmem:[#allocation99_spill] sm:$0xff] %v20487_v23  ;;  %11106 = vrot.lane.b32.xlu1 %v20452_v28, %s15532_s18  ;;  %11722 = vmatpush1.bf16.msra.mxu0 %v20487_v23  ;;  %23244 = vst [vmem:[#allocation128_spill] sm:$0xff] %v20501_v7 }
 0xd39   : > { %11723 = vmatprep.subr.bf16.mxu0 %v20494_v29 }
 0xd3a   : > { %v20497_v58 = vpop.permute.xlu0 %11282  ;;  %v11226_v52 = vpop.permute.xlu1 %11225 }
 0xd3b   : > { %23243 = vst [vmem:[#allocation118_spill] sm:$0xff] %v20497_v58  ;;  %v20505_v31 = vsel %vm1388_vm12, %v11226_v52, %v20497_v58 }
 0xd3c   : > { %23245 = vst [vmem:[#allocation126_spill] sm:$0xff] %v20505_v31  ;;  %11193 = vrot.lane.b32.xlu1 %v20452_v28, %s15531_s17  ;;  %11724 = vmatpush1.bf16.msra.mxu0 %v20501_v7 }
 0xd3d   : > { %11725 = vmatprep.subr.bf16.mxu0 %v20505_v31 }
 0xd3e   : > { %v10927_v46 = vpop.permute.xlu0 %10926  ;;  %v20511_v36 = vpop.permute.xlu1 %11223 }
 0xd3f   : > { %23246 = vst [vmem:[#allocation116_spill] sm:$0xff] %v20511_v36  ;;  %v20515_v25 = vsel %vm1388_vm12, %v20511_v36, %v11226_v52  ;;  %v10968_v24 = vsel %vm1034_vm1, %v17715_v18, %v10927_v46 }
 0xd40   : > { %23247 = vst [vmem:[#allocation7_spill] sm:$0xff] %v20515_v25  ;;  %11726 = vmatpush1.bf16.msra.mxu0 %v20515_v25 }
 0xd41   : > { %11764 = vmatprep.subr.bf16.mxu0 %v22700_v30 }
 0xd42   : > { %v10846_v11 = vpop.permute.xlu0 %10845  ;;  %v10844_v34 = vpop.permute.xlu1 %10843 }
 0xd43   : > { %v20525_v15 = vsel %vm765_vm0, %v10842_v62, %v10844_v34  ;;  %v20528_v41 = vsel %vm765_vm0, %v10844_v34, %v10846_v11  ;;  %14735 = vmatmul.mubr.msk.bf16.vlgmr.msra.gmra.mrb[76].mxu0 %vm11291_vm15, %v20520_v5 }
 0xd44   : > { %11765 = vmatpush1.bf16.msra.mxu0 %v22700_v30  ;;  %10938 = vrot.lane.b32.xlu1 %v20528_v41, %s15530_s15 }
 0xd45   : > { %10936 = vrot.lane.b32.xlu0 %v20525_v15, %s15530_s15  ;;  %11766 = vmatprep.subr.bf16.mxu0 %v10968_v24 }
 0xd46   : > { %v20539_v45 = vpop.permute.xlu0 %11096  ;;  %v11012_v8 = vpop.permute.xlu1 %11011  ;;  %11796 = vmatprep.mubr.bf16.mxu0 %v22700_v30 }
 0xd47   : > { %23248 = vst [vmem:[#allocation14_spill] sm:$0xff] %v20539_v45  ;;  %v11053_v51 = vsel %vm1146_vm6, %v17729_v21, %v11012_v8 }
 0xd48   : > { %11767 = vmatpush1.bf16.msra.mxu0 %v17715_v18  ;;  %10857 = vrot.lane.b32.xlu1 %v23249_v4, %s15528_s13 }
 0xd49   : > { %10855 = vrot.lane.b32.xlu0 %v23250_v56, %s15528_s13  ;;  %11768 = vmatprep.subr.bf16.mxu0 %v11053_v51 }
 0xd4a   : > { %v20553_v60 = vpop.permute.xlu0 %11183  ;;  %v11099_v42 = vpop.permute.xlu1 %11098 }
 0xd4b   : > { %23251 = vst [vmem:[#allocation21_spill] sm:$0xff] %v20553_v60  ;;  %v11140_v6 = vsel %vm1278_vm4, %v20539_v45, %v11099_v42 }
 0xd4c   : > { %11023 = vrot.lane.b32.xlu1 %v20528_v41, %s15529_s14  ;;  %11769 = vmatpush1.bf16.msra.mxu0 %v17729_v21 }
 0xd4d   : > { %11021 = vrot.lane.b32.xlu0 %v20525_v15, %s15529_s14  ;;  %11770 = vmatprep.subr.bf16.mxu0 %v11140_v6 }
 0xd4e   : > { %v10929_v33 = vpop.permute.xlu0 %10928  ;;  %v11186_v19 = vpop.permute.xlu1 %11185 }
 0xd4f   : > { %v20563_v20 = vsel %vm1034_vm1, %v10927_v46, %v10929_v33  ;;  %v11227_v9 = vsel %vm1388_vm12, %v20553_v60, %v11186_v19 }
 0xd50   : > { %11297 = vmatprep.subr.bf16.mxu1 %v20563_v20  ;;  %11110 = vrot.lane.b32.xlu1 %v20528_v41, %s15532_s18 }
 0xd51   : > { %11108 = vrot.lane.b32.xlu0 %v20525_v15, %s15532_s18  ;;  %11771 = vmatpush1.bf16.msra.mxu0 %v20539_v45 }
 0xd52   : > { %11298 = vmatpush1.bf16.msra.mxu1 %v10968_v24  ;;  %11772 = vmatprep.subr.bf16.mxu0 %v11227_v9  ;;  %v10848_v62 = vpop.permute.xlu0 %10847  ;;  %v10931_v44 = vpop.permute.xlu1 %10930 }
 0xd53   : > { %v20591_v24 = vsel %vm765_vm0, %v10846_v11, %v10848_v62 }
 0xd54   : > { %11197 = vrot.lane.b32.xlu1 %v20528_v41, %s15531_s17 }
 0xd55   : > { %11195 = vrot.lane.b32.xlu0 %v20525_v15, %s15531_s17  ;;  %11773 = vmatpush1.bf16.msra.mxu0 %v20553_v60 }
 0xd56   : > { %11807 = vmatprep.subr.bf16.mxu0 %v20402_v59  ;;  %v11014_v48 = vpop.permute.xlu0 %11013  ;;  %v10850_v52 = vpop.permute.xlu1 %10849 }
 0xd57   : > { %v20585_v46 = vsel %vm765_vm0, %v10848_v62, %v10850_v52  ;;  %v20588_v34 = vsel %vm1146_vm6, %v11012_v8, %v11014_v48  ;;  %v20604_v8 = vsel %vm1034_vm1, %v10929_v33, %v10931_v44  ;;  %v23254_v33 = vpack.c.bf16 %v20249_v47, %v20246_v1 }
 0xd58   : > { %23252 = vst [vmem:[#allocation22_spill] sm:$0xff] %v20585_v46  ;;  %11299 = vmatprep.subr.bf16.mxu1 %v20588_v34  ;;  %14737 = vmatmul.mubr.msk.bf16.vlgmr.msra.gmra.mrb[80].mxu0 %vm11291_vm15, %v20578_v0 }
 0xd59   : > { %10940 = vrot.lane.b32.xlu0 %v20591_v24, %s15530_s15  ;;  %14739 = vmatpush1.bf16.msk.msra.mxu0 %vm20349_vm14, %v20353_v61 }
 0xd5a   : > { %10942 = vrot.lane.b32.xlu1 %v20585_v46, %s15530_s15  ;;  %11300 = vmatpush1.bf16.msra.mxu1 %v11053_v51  ;;  %v11101_v11 = vpop.permute.xlu0 %11100  ;;  %v11016_v4 = vpop.permute.xlu1 %11015  ;;  %v23253_v51 = vpack.c.bf16 %v20228_v22, %v20225_v12 }
 0xd5b   : > { %11809 = vmatprep.subr.bf16.mxu0 %v20604_v8  ;;  %v20608_v56 = vsel %vm1278_vm4, %v11099_v42, %v11101_v11  ;;  %11839 = vmatprep.mubr.bf16.mxu0 %v22700_v30  ;;  %v20613_v62 = vsel %vm1146_vm6, %v11014_v48, %v11016_v4 }
 0xd5c   : > { %11301 = vmatprep.subr.bf16.mxu1 %v20608_v56 }
 0xd5d   : > { %10859 = vrot.lane.b32.xlu0 %v23253_v51, %s15528_s13  ;;  %11810 = vmatpush1.bf16.msra.mxu0 %v20563_v20 }
 0xd5e   : > { %10861 = vrot.lane.b32.xlu1 %v23254_v33, %s15528_s13  ;;  %11302 = vmatpush1.bf16.msra.mxu1 %v11140_v6  ;;  %v11188_v42 = vpop.permute.xlu0 %11187  ;;  %v11103_v60 = vpop.permute.xlu1 %11102 }
 0xd5f   : > { %11811 = vmatprep.subr.bf16.mxu0 %v20613_v62  ;;  %v20626_v48 = vsel %vm1388_vm12, %v11186_v19, %v11188_v42  ;;  %v20630_v12 = vsel %vm1278_vm4, %v11101_v11, %v11103_v60 }
 0xd60   : > { %11303 = vmatprep.subr.bf16.mxu1 %v20626_v48 }
 0xd61   : > { %11025 = vrot.lane.b32.xlu0 %v20591_v24, %s15529_s14  ;;  %11812 = vmatpush1.bf16.msra.mxu0 %v20588_v34 }
 0xd62   : > { %11027 = vrot.lane.b32.xlu1 %v20585_v46, %s15529_s14  ;;  %11304 = vmatpush1.bf16.msra.mxu1 %v11227_v9  ;;  %v10933_v22 = vpop.permute.xlu0 %10932  ;;  %v11190_v1 = vpop.permute.xlu1 %11189 }
 0xd63   : > { %11813 = vmatprep.subr.bf16.mxu0 %v20630_v12  ;;  %11338 = vmatprep.subr.bf16.mxu1 %v20408_v27  ;;  %v20640_v47 = vsel %vm1388_vm12, %v11188_v42, %v11190_v1  ;;  %v20650_v19 = vsel %vm1034_vm1, %v10931_v44, %v10933_v22 }
 0xd65   : > { %11112 = vrot.lane.b32.xlu0 %v20591_v24, %s15532_s18  ;;  %11814 = vmatpush1.bf16.msra.mxu0 %v20608_v56 }
 0xd66   : > { %11114 = vrot.lane.b32.xlu1 %v20585_v46, %s15532_s18  ;;  %14725 = vmatmul.mubr.msk.bf16.vlgmr.msra.gmra.mrb[100].mxu1 %vm11291_vm15, %v20520_v5  ;;  %v10852_v6 = vpop.permute.xlu0 %10851 }
 0xd67   : > { %11339 = vmatpush1.bf16.msra.mxu1 %v20402_v59  ;;  %11815 = vmatprep.subr.bf16.mxu0 %v20640_v47  ;;  %v20667_v11 = vsel %vm765_vm0, %v10850_v52, %v10852_v6 }
 0xd68   : > { %11340 = vmatprep.subr.bf16.mxu1 %v20650_v19  ;;  %11370 = vmatprep.mubr.bf16.mxu1 %v22700_v30  ;;  %23255 = vst [vmem:[#allocation16_spill] sm:$0xff] %v20667_v11 }
 0xd69   : > { %11199 = vrot.lane.b32.xlu0 %v20591_v24, %s15531_s17  ;;  %11816 = vmatpush1.bf16.msra.mxu0 %v20626_v48 }
 0xd6a   : > { %11201 = vrot.lane.b32.xlu1 %v20585_v46, %s15531_s17  ;;  %11850 = vmatprep.subr.bf16.mxu0 %v20431_v54  ;;  %v11018_v9 = vpop.permute.xlu0 %11017 }
 0xd6b   : > { %11341 = vmatpush1.bf16.msra.mxu1 %v20604_v8  ;;  %v20664_v44 = vsel %vm1146_vm6, %v11016_v4, %v11018_v9 }
 0xd6c   : > { %11342 = vmatprep.subr.bf16.mxu1 %v20664_v44  ;;  %14740 = vmatmul.mubr.msk.bf16.vlgmr.msra.gmra.mrb[84].mxu0 %vm11291_vm15, %v20578_v0 }
 0xd6d   : > { %10944 = vrot.lane.b32.xlu0 %v20667_v11, %s15530_s15  ;;  %11851 = vmatpush1.bf16.msra.mxu0 %v20408_v27 }
 0xd6e   : > { %v11105_v51 = vpop.permute.xlu0 %11104  ;;  %11882 = vmatprep.mubr.bf16.mxu0 %v22700_v30 }
 0xd6f   : > { %11343 = vmatpush1.bf16.msra.mxu1 %v20613_v62  ;;  %v20678_v4 = vsel %vm1278_vm4, %v11103_v60, %v11105_v51 }
 0xd70   : > { %11344 = vmatprep.subr.bf16.mxu1 %v20678_v4 }
 0xd71   : > { %11029 = vrot.lane.b32.xlu0 %v20667_v11, %s15529_s14 }
 0xd72   : > { %v11192_v52 = vpop.permute.xlu0 %11191 }
 0xd73   : > { %11345 = vmatpush1.bf16.msra.mxu1 %v20630_v12  ;;  %v20685_v33 = vsel %vm1388_vm12, %v11190_v1, %v11192_v52 }
 0xd74   : > { %11346 = vmatprep.subr.bf16.mxu1 %v20685_v33 }
 0xd75   : > { %11116 = vrot.lane.b32.xlu0 %v20667_v11, %s15532_s18 }
 0xd77   : > { %11347 = vmatpush1.bf16.msra.mxu1 %v20640_v47 }
 0xd78   : > { %11381 = vmatprep.subr.bf16.mxu1 %v20452_v28 }
 0xd79   : > { %11203 = vrot.lane.b32.xlu0 %v20667_v11, %s15531_s17 }
 0xd7a   : > { %14726 = vmatmul.mubr.msk.bf16.vlgmr.msra.gmra.mrb[104].mxu1 %vm11291_vm15, %v20520_v5 }
 0xd7b   : > { %11382 = vmatpush1.bf16.msra.mxu1 %v20431_v54  ;;  %11413 = vmatprep.mubr.bf16.mxu1 %v22700_v30 }
 0xd9e   : > { %v10935_v60 = vpop.permute.xlu1 %10934 }
 0xd9f   : > { %v20699_v42 = vsel %vm1034_vm1, %v10933_v22, %v10935_v60 }
 0xda0   : > { %11852 = vmatprep.subr.bf16.mxu0 %v20699_v42 }
 0xda1   : > { %11853 = vmatpush1.bf16.msra.mxu0 %v20650_v19 }
 0xda2   : > { %v10854_v1 = vpop.permute.xlu1 %10853 }
 0xda3   : > { %v20704_v45 = vsel %vm765_vm0, %v10852_v6, %v10854_v1 }
 0xda4   : > { %23256 = vst [vmem:[#allocation3_spill] sm:$0xff] %v20704_v45  ;;  %10946 = vrot.lane.b32.xlu1 %v20704_v45, %s15530_s15 }
 0xda6   : > { %v11020_v21 = vpop.permute.xlu1 %11019 }
 0xda7   : > { %v20709_v18 = vsel %vm1146_vm6, %v11018_v9, %v11020_v21 }
 0xda8   : > { %11031 = vrot.lane.b32.xlu1 %v20704_v45, %s15529_s14  ;;  %11854 = vmatprep.subr.bf16.mxu0 %v20709_v18 }
 0xda9   : > { %11855 = vmatpush1.bf16.msra.mxu0 %v20664_v44 }
 0xdaa   : > { %v11107_v22 = vpop.permute.xlu1 %11106 }
 0xdab   : > { %v20716_v31 = vsel %vm1278_vm4, %v11105_v51, %v11107_v22 }
 0xdac   : > { %11118 = vrot.lane.b32.xlu1 %v20704_v45, %s15532_s18  ;;  %11856 = vmatprep.subr.bf16.mxu0 %v20716_v31 }
 0xdad   : > { %11857 = vmatpush1.bf16.msra.mxu0 %v20678_v4 }
 0xdae   : > { %v11194_v6 = vpop.permute.xlu1 %11193 }
 0xdaf   : > { %v20723_v9 = vsel %vm1388_vm12, %v11192_v52, %v11194_v6 }
 0xdb0   : > { %11205 = vrot.lane.b32.xlu1 %v20704_v45, %s15531_s17  ;;  %11858 = vmatprep.subr.bf16.mxu0 %v20723_v9 }
 0xdb1   : > { %11859 = vmatpush1.bf16.msra.mxu0 %v20685_v33 }
 0xdb2   : > { %11893 = vmatprep.subr.bf16.mxu0 %v20525_v15 }
 0xdb4   : > { %14741 = vmatmul.mubr.msk.bf16.vlgmr.msra.gmra.mrb[88].mxu0 %vm11291_vm15, %v20578_v0 }
 0xdb5   : > { %11894 = vmatpush1.bf16.msra.mxu0 %v20452_v28  ;;  %11925 = vmatprep.mubr.bf16.mxu0 %v22700_v30 }
 0xdb6   : > { %v10939_v51 = vpop.permute.xlu1 %10938 }
 0xdb7   : > { %v10937_v58 = vpop.permute.xlu0 %10936 }
 0xdb8   : > { %v20735_v52 = vsel %vm1034_vm1, %v10935_v60, %v10937_v58  ;;  %v20738_v29 = vsel %vm1034_vm1, %v10937_v58, %v10939_v51 }
 0xdb9   : > { %11383 = vmatprep.subr.bf16.mxu1 %v20735_v52  ;;  %11895 = vmatprep.subr.bf16.mxu0 %v20738_v29 }
 0xdba   : > { %11384 = vmatpush1.bf16.msra.mxu1 %v20699_v42  ;;  %11896 = vmatpush1.bf16.msra.mxu0 %v20735_v52  ;;  %v10858_v43 = vpop.permute.xlu1 %10857 }
 0xdbb   : > { %v10856_v63 = vpop.permute.xlu0 %10855 }
 0xdbc   : > { %v20745_v13 = vsel %vm765_vm0, %v10854_v1, %v10856_v63  ;;  %v20748_v17 = vsel %vm765_vm0, %v10856_v63, %v10858_v43 }
 0xdbd   : > { %23257 = vst [vmem:[#allocation115_spill] sm:$0xff] %v20745_v13  ;;  %23258 = vst [vmem:[#allocation104_spill] sm:$0xff] %v20748_v17  ;;  %10948 = vrot.lane.b32.xlu0 %v20745_v13, %s15530_s15  ;;  %10950 = vrot.lane.b32.xlu1 %v20748_v17, %s15530_s15 }
 0xdbe   : > { %v11024_v58 = vpop.permute.xlu1 %11023 }
 0xdbf   : > { %v11022_v60 = vpop.permute.xlu0 %11021 }
 0xdc0   : > { %v20755_v16 = vsel %vm1146_vm6, %v11020_v21, %v11022_v60  ;;  %v20758_v53 = vsel %vm1146_vm6, %v11022_v60, %v11024_v58 }
 0xdc1   : > { %11033 = vrot.lane.b32.xlu0 %v20745_v13, %s15529_s14  ;;  %11385 = vmatprep.subr.bf16.mxu1 %v20755_v16 }
 0xdc2   : > { %11035 = vrot.lane.b32.xlu1 %v20748_v17, %s15529_s14  ;;  %11897 = vmatprep.subr.bf16.mxu0 %v20758_v53  ;;  %v11111_v63 = vpop.permute.xlu1 %11110 }
 0xdc3   : > { %11386 = vmatpush1.bf16.msra.mxu1 %v20709_v18  ;;  %11898 = vmatpush1.bf16.msra.mxu0 %v20755_v16  ;;  %v11109_v21 = vpop.permute.xlu0 %11108 }
 0xdc4   : > { %v20769_v1 = vsel %vm1278_vm4, %v11107_v22, %v11109_v21  ;;  %v20772_v60 = vsel %vm1278_vm4, %v11109_v21, %v11111_v63 }
 0xdc5   : > { %11120 = vrot.lane.b32.xlu0 %v20745_v13, %s15532_s18  ;;  %11387 = vmatprep.subr.bf16.mxu1 %v20769_v1 }
 0xdc6   : > { %11122 = vrot.lane.b32.xlu1 %v20748_v17, %s15532_s18  ;;  %11899 = vmatprep.subr.bf16.mxu0 %v20772_v60  ;;  %v11198_v40 = vpop.permute.xlu1 %11197 }
 0xdc7   : > { %11388 = vmatpush1.bf16.msra.mxu1 %v20716_v31  ;;  %11900 = vmatpush1.bf16.msra.mxu0 %v20769_v1  ;;  %v11196_v22 = vpop.permute.xlu0 %11195 }
 0xdc8   : > { %v20783_v25 = vsel %vm1388_vm12, %v11194_v6, %v11196_v22  ;;  %v20786_v21 = vsel %vm1388_vm12, %v11196_v22, %v11198_v40 }
 0xdc9   : > { %11207 = vrot.lane.b32.xlu0 %v20745_v13, %s15531_s17  ;;  %11389 = vmatprep.subr.bf16.mxu1 %v20783_v25 }
 0xdca   : > { %11209 = vrot.lane.b32.xlu1 %v20748_v17, %s15531_s17  ;;  %11901 = vmatprep.subr.bf16.mxu0 %v20786_v21 }
 0xdcb   : > { %11390 = vmatpush1.bf16.msra.mxu1 %v20723_v9  ;;  %11902 = vmatpush1.bf16.msra.mxu0 %v20783_v25  ;;  %v10941_v7 = vpop.permute.xlu0 %10940 }
 0xdcc   : > { %11424 = vmatprep.subr.bf16.mxu1 %v20528_v41  ;;  %11936 = vmatprep.subr.bf16.mxu0 %v20591_v24  ;;  %v10943_v6 = vpop.permute.xlu1 %10942  ;;  %v20803_v22 = vsel %vm1034_vm1, %v10939_v51, %v10941_v7 }
 0xdcd   : > { %v20806_v23 = vsel %vm1034_vm1, %v10941_v7, %v10943_v6 }
 0xdce   : > { %14727 = vmatmul.mubr.msk.bf16.vlgmr.msra.gmra.mrb[108].mxu1 %vm11291_vm15, %v20520_v5  ;;  %14742 = vmatmul.mubr.msk.bf16.vlgmr.msra.gmra.mrb[92].mxu0 %vm11291_vm15, %v20578_v0 }
 0xdcf   : > { %11425 = vmatpush1.bf16.msra.mxu1 %v20525_v15  ;;  %11937 = vmatpush1.bf16.msra.mxu0 %v20528_v41  ;;  %v10860_v50 = vpop.permute.xlu0 %10859 }
 0xdd0   : > { %v20811_v32 = vsel %vm765_vm0, %v10858_v43, %v10860_v50  ;;  %11426 = vmatprep.subr.bf16.mxu1 %v20803_v22  ;;  %11938 = vmatprep.subr.bf16.mxu0 %v20806_v23  ;;  %v20815_v36 = vpop.permute.xlu1 %10861 }
 0xdd1   : > { %23259 = vst [vmem:[#allocation123_spill] sm:$0xff] %v20811_v32  ;;  %v20819_v51 = vsel %vm765_vm0, %v10860_v50, %v20815_v36  ;;  %10952 = vrot.lane.b32.xlu0 %v20811_v32, %s15530_s15  ;;  %11456 = vmatprep.mubr.bf16.mxu1 %v22700_v30 }
 0xdd2   : > { %23260 = vst [vmem:[#allocation113_spill] sm:$0xff] %v20819_v51  ;;  %10954 = vrot.lane.b32.xlu1 %v20819_v51, %s15530_s15  ;;  %11968 = vmatprep.mubr.bf16.mxu0 %v22700_v30 }
 0xdd3   : > { %11427 = vmatpush1.bf16.msra.mxu1 %v20738_v29  ;;  %11939 = vmatpush1.bf16.msra.mxu0 %v20803_v22  ;;  %v11026_v43 = vpop.permute.xlu0 %11025 }
 0xdd4   : > { %v20830_v7 = vsel %vm1146_vm6, %v11024_v58, %v11026_v43  ;;  %v11028_v50 = vpop.permute.xlu1 %11027 }
 0xdd5   : > { %23261 = vst [vmem:[#allocation122_spill] sm:$0xff] %v20830_v7  ;;  %v20833_v3 = vsel %vm1146_vm6, %v11026_v43, %v11028_v50  ;;  %11037 = vrot.lane.b32.xlu0 %v20811_v32, %s15529_s14  ;;  %11428 = vmatprep.subr.bf16.mxu1 %v20830_v7 }
 0xdd6   : > { %11039 = vrot.lane.b32.xlu1 %v20819_v51, %s15529_s14  ;;  %11940 = vmatprep.subr.bf16.mxu0 %v20833_v3 }
 0xdd7   : > { %11429 = vmatpush1.bf16.msra.mxu1 %v20758_v53  ;;  %11941 = vmatpush1.bf16.msra.mxu0 %v20830_v7  ;;  %v11113_v58 = vpop.permute.xlu0 %11112 }
 0xdd8   : > { %v20844_v49 = vsel %vm1278_vm4, %v11111_v63, %v11113_v58  ;;  %v11115_v43 = vpop.permute.xlu1 %11114 }
 0xdd9   : > { %23262 = vst [vmem:[#allocation106_spill] sm:$0xff] %v20844_v49  ;;  %v20847_v37 = vsel %vm1278_vm4, %v11113_v58, %v11115_v43  ;;  %11124 = vrot.lane.b32.xlu0 %v20811_v32, %s15532_s18  ;;  %11430 = vmatprep.subr.bf16.mxu1 %v20844_v49 }
 0xdda   : > { %23263 = vst [vmem:[#allocation117_spill] sm:$0xff] %v20847_v37  ;;  %11126 = vrot.lane.b32.xlu1 %v20819_v51, %s15532_s18  ;;  %11942 = vmatprep.subr.bf16.mxu0 %v20847_v37 }
 0xddb   : > { %11431 = vmatpush1.bf16.msra.mxu1 %v20772_v60  ;;  %11943 = vmatpush1.bf16.msra.mxu0 %v20844_v49  ;;  %v11200_v63 = vpop.permute.xlu0 %11199  ;;  %v23267_v49 = vpack.c.bf16 %v20277_v35, %v20274_v14 }
 0xddc   : > { %v20858_v39 = vsel %vm1388_vm12, %v11198_v40, %v11200_v63  ;;  %v11202_v58 = vpop.permute.xlu1 %11201  ;;  %v23294_v10 = vld [vmem:[#allocation122_spill] sm:$0xff] }
 0xddd   : > { %23264 = vst [vmem:[#allocation111_spill] sm:$0xff] %v20858_v39  ;;  %v20861_v55 = vsel %vm1388_vm12, %v11200_v63, %v11202_v58  ;;  %11211 = vrot.lane.b32.xlu0 %v20811_v32, %s15531_s17  ;;  %11432 = vmatprep.subr.bf16.mxu1 %v20858_v39  ;;  %v23266_v63 = vpack.c.bf16 %v20256_v38, %v20253_v2 }
 0xdde   : > { %23265 = vst [vmem:[#allocation8_spill] sm:$0xff] %v20861_v55  ;;  %11213 = vrot.lane.b32.xlu1 %v20819_v51, %s15531_s17  ;;  %11944 = vmatprep.subr.bf16.mxu0 %v20861_v55 }
 0xddf   : > { %11433 = vmatpush1.bf16.msra.mxu1 %v20786_v21  ;;  %11945 = vmatpush1.bf16.msra.mxu0 %v20858_v39  ;;  %v10945_v40 = vpop.permute.xlu0 %10944 }
 0xde0   : > { %11467 = vmatprep.subr.bf16.mxu1 %v20585_v46  ;;  %11979 = vmatprep.subr.bf16.mxu0 %v20667_v11  ;;  %v20884_v39 = vsel %vm1034_vm1, %v10943_v6, %v10945_v40 }
 0xde1   : > { %10863 = vrot.lane.b32.xlu0 %v23266_v63, %s15528_s13  ;;  %23268 = vst [vmem:[#allocation12_spill] sm:$0xff] %v20884_v39  ;;  %v23295_v26 = vld [vmem:[#allocation117_spill] sm:$0xff] }
 0xde2   : > { %10865 = vrot.lane.b32.xlu1 %v23267_v49, %s15528_s13  ;;  %14728 = vmatmul.mubr.msk.bf16.vlgmr.msra.gmra.mrb[112].mxu1 %vm11291_vm15, %v20520_v5 }
 0xde3   : > { %11468 = vmatpush1.bf16.msra.mxu1 %v20591_v24  ;;  %14743 = vmatmul.mubr.msk.bf16.vlgmr.msra.gmra.mrb[96].mxu0 %vm11291_vm15, %v20578_v0  ;;  %v11030_v7 = vpop.permute.xlu0 %11029 }
 0xde4   : > { %11980 = vmatpush1.bf16.msra.mxu0 %v20585_v46  ;;  %11469 = vmatprep.subr.bf16.mxu1 %v20884_v39  ;;  %v20894_v2 = vsel %vm1146_vm6, %v11028_v50, %v11030_v7 }
 0xde5   : > { %11499 = vmatprep.mubr.bf16.mxu1 %v22700_v30  ;;  %12011 = vmatprep.mubr.bf16.mxu0 %v22700_v30  ;;  %23269 = vst [vmem:[#allocation15_spill] sm:$0xff] %v20894_v2 }
 0xde7   : > { %11470 = vmatpush1.bf16.msra.mxu1 %v20806_v23  ;;  %v11117_v38 = vpop.permute.xlu0 %11116 }
 0xde8   : > { %11471 = vmatprep.subr.bf16.mxu1 %v20894_v2  ;;  %v20899_v14 = vsel %vm1278_vm4, %v11115_v43, %v11117_v38 }
 0xde9   : > { %23270 = vst [vmem:[#allocation6_spill] sm:$0xff] %v20899_v14 }
 0xdeb   : > { %11472 = vmatpush1.bf16.msra.mxu1 %v20833_v3  ;;  %v11204_v35 = vpop.permute.xlu0 %11203 }
 0xdec   : > { %11473 = vmatprep.subr.bf16.mxu1 %v20899_v14  ;;  %v20904_v49 = vsel %vm1388_vm12, %v11202_v58, %v11204_v35 }
 0xded   : > { %23271 = vst [vmem:[#allocation25_spill] sm:$0xff] %v20904_v49 }
 0xdef   : > { %11474 = vmatpush1.bf16.msra.mxu1 %v20847_v37 }
 0xdf0   : > { %11475 = vmatprep.subr.bf16.mxu1 %v20904_v49 }
 0xdf3   : > { %11476 = vmatpush1.bf16.msra.mxu1 %v20861_v55 }
 0xdf4   : > { %11510 = vmatprep.subr.bf16.mxu1 %v20704_v45 }
 0xdf6   : > { %14729 = vmatmul.mubr.msk.bf16.vlgmr.msra.gmra.mrb[116].mxu1 %vm11291_vm15, %v20520_v5 }
 0xdf7   : > { %11511 = vmatpush1.bf16.msra.mxu1 %v20667_v11  ;;  %11542 = vmatprep.mubr.bf16.mxu1 %v22700_v30 }
 0xe16   : > { %v10947_v6 = vpop.permute.xlu1 %10946  ;;  %v11751_v50 = vpop.f32.mrb[76].mxu0 }
 0xe17   : > { %v20915_v43 = vsel %vm1034_vm1, %v10945_v40, %v10947_v6  ;;  %v11752_v58 = vpop.f32.mrb[77].mxu0 }
 0xe18   : > { %23272 = vst [vmem:[#allocation69_spill] sm:$0xff] %v20915_v43  ;;  %11981 = vmatprep.subr.bf16.mxu0 %v20915_v43  ;;  %v11753_v63 = vpop.f32.mrb[78].mxu0 }
 0xe19   : > { %11982 = vmatpush1.bf16.msra.mxu0 %v20884_v39  ;;  %v11754_v46 = vpop.f32.mrb[79].mxu0 }
 0xe1a   : > { %v11032_v55 = vpop.permute.xlu1 %11031 }
 0xe1b   : > { %v20920_v37 = vsel %vm1146_vm6, %v11030_v7, %v11032_v55 }
 0xe1c   : > { %23273 = vst [vmem:[#allocation26_spill] sm:$0xff] %v20920_v37  ;;  %11983 = vmatprep.subr.bf16.mxu0 %v20920_v37 }
 0xe1d   : > { %11984 = vmatpush1.bf16.msra.mxu0 %v20894_v2 }
 0xe1e   : > { %v11119_v11 = vpop.permute.xlu1 %11118 }
 0xe1f   : > { %v20925_v50 = vsel %vm1278_vm4, %v11117_v38, %v11119_v11 }
 0xe20   : > { %23274 = vst [vmem:[#allocation74_spill] sm:$0xff] %v20925_v50  ;;  %11985 = vmatprep.subr.bf16.mxu0 %v20925_v50 }
 0xe21   : > { %11986 = vmatpush1.bf16.msra.mxu0 %v20899_v14 }
 0xe22   : > { %v11206_v40 = vpop.permute.xlu1 %11205 }
 0xe23   : > { %v20930_v58 = vsel %vm1388_vm12, %v11204_v35, %v11206_v40 }
 0xe24   : > { %23275 = vst [vmem:[#allocation23_spill] sm:$0xff] %v20930_v58  ;;  %11987 = vmatprep.subr.bf16.mxu0 %v20930_v58 }
 0xe25   : > { %11988 = vmatpush1.bf16.msra.mxu0 %v20904_v49 }
 0xe26   : > { %12022 = vmatprep.subr.bf16.mxu0 %v20745_v13 }
 0xe28   : > { %14744 = vmatmul.mubr.msk.bf16.vlgmr.msra.gmra.mrb[100].mxu0 %vm11291_vm15, %v20578_v0 }
 0xe29   : > { %12023 = vmatpush1.bf16.msra.mxu0 %v20704_v45  ;;  %12054 = vmatprep.mubr.bf16.mxu0 %v22700_v30 }
 0xe2f   : > { %v10949_v46 = vpop.permute.xlu0 %10948  ;;  %v10951_v7 = vpop.permute.xlu1 %10950 }
 0xe30   : > { %v20940_v38 = vsel %vm1034_vm1, %v10947_v6, %v10949_v46  ;;  %v20943_v35 = vsel %vm1034_vm1, %v10949_v46, %v10951_v7 }
 0xe31   : > { %23276 = vst [vmem:[#allocation67_spill] sm:$0xff] %v20940_v38  ;;  %23277 = vst [vmem:[#allocation24_spill] sm:$0xff] %v20943_v35  ;;  %11512 = vmatprep.subr.bf16.mxu1 %v20940_v38  ;;  %12024 = vmatprep.subr.bf16.mxu0 %v20943_v35 }
 0xe32   : > { %11513 = vmatpush1.bf16.msra.mxu1 %v20915_v43  ;;  %12025 = vmatpush1.bf16.msra.mxu0 %v20940_v38 }
 0xe33   : > { %v11034_v63 = vpop.permute.xlu0 %11033 }
 0xe34   : > { %v20950_v45 = vsel %vm1146_vm6, %v11032_v55, %v11034_v63  ;;  %v11036_v49 = vpop.permute.xlu1 %11035 }
 0xe35   : > { %23278 = vst [vmem:[#allocation73_spill] sm:$0xff] %v20950_v45  ;;  %v20953_v14 = vsel %vm1146_vm6, %v11034_v63, %v11036_v49  ;;  %11514 = vmatprep.subr.bf16.mxu1 %v20950_v45 }
 0xe36   : > { %23279 = vst [vmem:[#allocation124_spill] sm:$0xff] %v20953_v14  ;;  %12026 = vmatprep.subr.bf16.mxu0 %v20953_v14  ;;  %11515 = vmatpush1.bf16.msra.mxu1 %v20920_v37 }
 0xe37   : > { %12027 = vmatpush1.bf16.msra.mxu0 %v20950_v45  ;;  %v11121_v6 = vpop.permute.xlu0 %11120 }
 0xe38   : > { %v20960_v46 = vsel %vm1278_vm4, %v11119_v11, %v11121_v6  ;;  %v11123_v38 = vpop.permute.xlu1 %11122 }
 0xe39   : > { %23280 = vst [vmem:[#allocation119_spill] sm:$0xff] %v20960_v46  ;;  %v20963_v55 = vsel %vm1278_vm4, %v11121_v6, %v11123_v38  ;;  %11516 = vmatprep.subr.bf16.mxu1 %v20960_v46 }
 0xe3a   : > { %23281 = vst [vmem:[#allocation125_spill] sm:$0xff] %v20963_v55  ;;  %12028 = vmatprep.subr.bf16.mxu0 %v20963_v55  ;;  %11517 = vmatpush1.bf16.msra.mxu1 %v20925_v50 }
 0xe3b   : > { %12029 = vmatpush1.bf16.msra.mxu0 %v20960_v46  ;;  %v11208_v63 = vpop.permute.xlu0 %11207 }
 0xe3c   : > { %v20970_v2 = vsel %vm1388_vm12, %v11206_v40, %v11208_v63  ;;  %v11210_v45 = vpop.permute.xlu1 %11209 }
 0xe3d   : > { %23282 = vst [vmem:[#allocation127_spill] sm:$0xff] %v20970_v2  ;;  %v20973_v11 = vsel %vm1388_vm12, %v11208_v63, %v11210_v45  ;;  %11518 = vmatprep.subr.bf16.mxu1 %v20970_v2 }
 0xe3e   : > { %23283 = vst [vmem:[#allocation17_spill] sm:$0xff] %v20973_v11  ;;  %12030 = vmatprep.subr.bf16.mxu0 %v20973_v11  ;;  %11519 = vmatpush1.bf16.msra.mxu1 %v20930_v58 }
 0xe3f   : > { %12031 = vmatpush1.bf16.msra.mxu0 %v20970_v2  ;;  %11553 = vmatprep.subr.bf16.mxu1 %v20748_v17 }
 0xe40   : > { %12065 = vmatprep.subr.bf16.mxu0 %v20811_v32 }
 0xe41   : > { %14730 = vmatmul.mubr.msk.bf16.vlgmr.msra.gmra.mrb[120].mxu1 %vm11291_vm15, %v20520_v5 }
 0xe42   : > { %11554 = vmatpush1.bf16.msra.mxu1 %v20745_v13  ;;  %14745 = vmatmul.mubr.msk.bf16.vlgmr.msra.gmra.mrb[104].mxu0 %vm11291_vm15, %v20578_v0 }
 0xe43   : > { %12066 = vmatpush1.bf16.msra.mxu0 %v20748_v17  ;;  %v10953_v40 = vpop.permute.xlu0 %10952  ;;  %11585 = vmatprep.mubr.bf16.mxu1 %v22700_v30 }
 0xe44   : > { %v20989_v6 = vsel %vm1034_vm1, %v10951_v7, %v10953_v40  ;;  %v20991_v63 = vpop.permute.xlu1 %10954  ;;  %12097 = vmatprep.mubr.bf16.mxu0 %v22700_v30 }
 0xe45   : > { %23284 = vst [vmem:[#allocation18_spill] sm:$0xff] %v20989_v6  ;;  %v20996_v2 = vsel %vm1034_vm1, %v10953_v40, %v20991_v63  ;;  %11555 = vmatprep.subr.bf16.mxu1 %v20989_v6 }
 0xe46   : > { %23285 = vst [vmem:[#allocation27_spill] sm:$0xff] %v20996_v2  ;;  %12067 = vmatprep.subr.bf16.mxu0 %v20996_v2  ;;  %11556 = vmatpush1.bf16.msra.mxu1 %v20943_v35 }
 0xe47   : > { %12068 = vmatpush1.bf16.msra.mxu0 %v20989_v6  ;;  %v11038_v17 = vpop.permute.xlu0 %11037 }
 0xe48   : > { %v21003_v7 = vsel %vm1146_vm6, %v11036_v49, %v11038_v17  ;;  %v21005_v46 = vpop.permute.xlu1 %11039 }
 0xe49   : > { %23286 = vst [vmem:[#allocation28_spill] sm:$0xff] %v21003_v7  ;;  %v21009_v13 = vsel %vm1146_vm6, %v11038_v17, %v21005_v46  ;;  %11557 = vmatprep.subr.bf16.mxu1 %v21003_v7 }
 0xe4a   : > { %23287 = vst [vmem:[#allocation30_spill] sm:$0xff] %v21009_v13  ;;  %12069 = vmatprep.subr.bf16.mxu0 %v21009_v13  ;;  %11558 = vmatpush1.bf16.msra.mxu1 %v20953_v14 }
 0xe4b   : > { %12070 = vmatpush1.bf16.msra.mxu0 %v21003_v7  ;;  %v11125_v40 = vpop.permute.xlu0 %11124 }
 0xe4c   : > { %v21016_v6 = vsel %vm1278_vm4, %v11123_v38, %v11125_v40  ;;  %v21018_v49 = vpop.permute.xlu1 %11126 }
 0xe4d   : > { %23288 = vst [vmem:[#allocation29_spill] sm:$0xff] %v21016_v6  ;;  %v21022_v2 = vsel %vm1278_vm4, %v11125_v40, %v21018_v49  ;;  %11559 = vmatprep.subr.bf16.mxu1 %v21016_v6 }
 0xe4e   : > { %23289 = vst [vmem:[#allocation129_spill] sm:$0xff] %v21022_v2  ;;  %12071 = vmatprep.subr.bf16.mxu0 %v21022_v2  ;;  %11560 = vmatpush1.bf16.msra.mxu1 %v20963_v55 }
 0xe4f   : > { %12072 = vmatpush1.bf16.msra.mxu0 %v21016_v6  ;;  %v11212_v17 = vpop.permute.xlu0 %11211 }
 0xe50   : > { %v21029_v7 = vsel %vm1388_vm12, %v11210_v45, %v11212_v17  ;;  %v21031_v38 = vpop.permute.xlu1 %11213 }
 0xe51   : > { %v21035_v13 = vsel %vm1388_vm12, %v11212_v17, %v21031_v38  ;;  %11561 = vmatprep.subr.bf16.mxu1 %v21029_v7 }
 0xe52   : > { %23290 = vst [vmem:[#allocation70_spill] sm:$0xff] %v21035_v13  ;;  %12073 = vmatprep.subr.bf16.mxu0 %v21035_v13  ;;  %11562 = vmatpush1.bf16.msra.mxu1 %v20973_v11 }
 0xe53   : > { %12074 = vmatpush1.bf16.msra.mxu0 %v21029_v7  ;;  %v10864_v40 = vpop.permute.xlu0 %10863  ;;  %11596 = vmatprep.subr.bf16.mxu1 %v20819_v51 }
 0xe54   : > { %v21044_v45 = vsel %vm765_vm0, %v20815_v36, %v10864_v40  ;;  %12250 = vmatprep.subr.bf16.mxu0 %v20402_v59  ;;  %v21047_v6 = vpop.permute.xlu1 %10865  ;;  %v23296_v36 = vld [vmem:[#allocation106_spill] sm:$0xff] }
 0xe55   : > { %23291 = vst [vmem:[#allocation75_spill] sm:$0xff] %v21044_v45  ;;  %v21051_v17 = vsel %vm765_vm0, %v10864_v40, %v21047_v6  ;;  %10956 = vrot.lane.b32.xlu0 %v21044_v45, %s15530_s15  ;;  %14731 = vmatmul.mubr.msk.bf16.vlgmr.msra.gmra.mrb[124].mxu1 %vm11291_vm15, %v20520_v5  ;;  %v23302_v40 = vld [vmem:[#allocation6_spill] sm:$0xff] }
 0xe56   : > { %23292 = vst [vmem:[#allocation76_spill] sm:$0xff] %v21051_v17  ;;  %10958 = vrot.lane.b32.xlu1 %v21051_v17, %s15530_s15  ;;  %11597 = vmatpush1.bf16.msra.mxu1 %v20811_v32 }
 0xe57   : > { %14746 = vmatmul.mubr.msk.bf16.vlgmr.msra.gmra.mrb[108].mxu0 %vm11291_vm15, %v20578_v0  ;;  %11628 = vmatprep.mubr.bf16.mxu1 %v22700_v30  ;;  %v23298_v0 = vld [vmem:[#allocation111_spill] sm:$0xff] }
 0xe58   : > { %14752 = vmatpush1.bf16.msk.msra.mxu0 %vm20349_vm14, %v20353_v61  ;;  %12282 = vmatprep.mubr.bf16.mxu0 %v22700_v30  ;;  %v21093_v61 = vld [vmem:[%s22169_s5 + $0x10] sm:$0x3f]  }
 0xe59   : > { %12252 = vmatprep.subr.bf16.mxu0 %v20604_v8  ;;  %11041 = vrot.lane.b32.xlu0 %v21044_v45, %s15529_s14 }
 0xe5a   : > { %11043 = vrot.lane.b32.xlu1 %v21051_v17, %s15529_s14 }
 0xe5c   : > { %12253 = vmatpush1.bf16.msra.mxu0 %v20563_v20  ;;  %v23297_v20 = vld [vmem:[#allocation8_spill] sm:$0xff] }
 0xe5d   : > { %12254 = vmatprep.subr.bf16.mxu0 %v20613_v62  ;;  %11128 = vrot.lane.b32.xlu0 %v21044_v45, %s15532_s18 }
 0xe5e   : > { %11130 = vrot.lane.b32.xlu1 %v21051_v17, %s15532_s18 }
 0xe60   : > { %12255 = vmatpush1.bf16.msra.mxu0 %v20588_v34  ;;  %v23299_v34 = vld [vmem:[#allocation16_spill] sm:$0xff] }
 0xe61   : > { %12256 = vmatprep.subr.bf16.mxu0 %v20630_v12  ;;  %11215 = vrot.lane.b32.xlu0 %v21044_v45, %s15531_s17 }
 0xe62   : > { %11217 = vrot.lane.b32.xlu1 %v21051_v17, %s15531_s17 }
 0xe64   : > { %12257 = vmatpush1.bf16.msra.mxu0 %v20608_v56  ;;  %v23300_v56 = vld [vmem:[#allocation22_spill] sm:$0xff] }
 0xe65   : > { %12258 = vmatprep.subr.bf16.mxu0 %v20640_v47  ;;  %10867 = vrot.lane.b32.xlu0 %v23293_v57, %s15528_s13  ;;  %v23303_v57 = vld [vmem:[#allocation25_spill] sm:$0xff] }
 0xe68   : > { %12259 = vmatpush1.bf16.msra.mxu0 %v20626_v48  ;;  %v23301_v48 = vld [vmem:[#allocation15_spill] sm:$0xff] }
 0xe69   : > { %12293 = vmatprep.subr.bf16.mxu0 %v20431_v54 }
 0xe6b   : > { %14753 = vmatmul.mubr.msk.bf16.vlgmr.msra.gmra.mrb[80].mxu0 %vm11291_vm15, %v21093_v61 }
 0xe6c   : > { %12294 = vmatpush1.bf16.msra.mxu0 %v20408_v27  ;;  %12325 = vmatprep.mubr.bf16.mxu0 %v22700_v30 }
 0xe6d   : > { %12295 = vmatprep.subr.bf16.mxu0 %v20699_v42 }
 0xe70   : > { %12296 = vmatpush1.bf16.msra.mxu0 %v20650_v19 }
 0xe71   : > { %12297 = vmatprep.subr.bf16.mxu0 %v20709_v18 }
 0xe74   : > { %12298 = vmatpush1.bf16.msra.mxu0 %v20664_v44 }
 0xe75   : > { %12299 = vmatprep.subr.bf16.mxu0 %v20716_v31 }
 0xe78   : > { %12300 = vmatpush1.bf16.msra.mxu0 %v20678_v4 }
 0xe79   : > { %12301 = vmatprep.subr.bf16.mxu0 %v20723_v9 }
 0xe7c   : > { %12302 = vmatpush1.bf16.msra.mxu0 %v20685_v33 }
 0xe7d   : > { %12336 = vmatprep.subr.bf16.mxu0 %v20525_v15 }
 0xe7f   : > { %14754 = vmatmul.mubr.msk.bf16.vlgmr.msra.gmra.mrb[84].mxu0 %vm11291_vm15, %v21093_v61 }
 0xe80   : > { %12337 = vmatpush1.bf16.msra.mxu0 %v20452_v28  ;;  %12368 = vmatprep.mubr.bf16.mxu0 %v22700_v30 }
 0xe81   : > { %12338 = vmatprep.subr.bf16.mxu0 %v20738_v29 }
 0xe84   : > { %12339 = vmatpush1.bf16.msra.mxu0 %v20735_v52 }
 0xe85   : > { %12340 = vmatprep.subr.bf16.mxu0 %v20758_v53 }
 0xe88   : > { %12341 = vmatpush1.bf16.msra.mxu0 %v20755_v16 }
 0xe89   : > { %12342 = vmatprep.subr.bf16.mxu0 %v20772_v60 }
 0xe8c   : > { %12343 = vmatpush1.bf16.msra.mxu0 %v20769_v1 }
 0xe8d   : > { %12344 = vmatprep.subr.bf16.mxu0 %v20786_v21 }
 0xe90   : > { %12345 = vmatpush1.bf16.msra.mxu0 %v20783_v25 }
 0xe91   : > { %12379 = vmatprep.subr.bf16.mxu0 %v20591_v24 }
 0xe93   : > { %14755 = vmatmul.mubr.msk.bf16.vlgmr.msra.gmra.mrb[88].mxu0 %vm11291_vm15, %v21093_v61 }
 0xe94   : > { %12380 = vmatpush1.bf16.msra.mxu0 %v20528_v41  ;;  %12411 = vmatprep.mubr.bf16.mxu0 %v22700_v30 }
 0xe95   : > { %12381 = vmatprep.subr.bf16.mxu0 %v20806_v23 }
 0xe98   : > { %12382 = vmatpush1.bf16.msra.mxu0 %v20803_v22 }
 0xe99   : > { %12383 = vmatprep.subr.bf16.mxu0 %v20833_v3 }
 0xe9c   : > { %12384 = vmatpush1.bf16.msra.mxu0 %v23294_v10 }
 0xe9d   : > { %12385 = vmatprep.subr.bf16.mxu0 %v23295_v26 }
 0xea0   : > { %12386 = vmatpush1.bf16.msra.mxu0 %v23296_v36 }
 0xea1   : > { %12387 = vmatprep.subr.bf16.mxu0 %v23297_v20  ;;  %v23308_v20 = vld [vmem:[#allocation119_spill] sm:$0xff] }
 0xea4   : > { %12388 = vmatpush1.bf16.msra.mxu0 %v23298_v0 }
 0xea5   : > { %12422 = vmatprep.subr.bf16.mxu0 %v23299_v34  ;;  %v23304_v34 = vld [vmem:[#allocation115_spill] sm:$0xff] }
 0xea7   : > { %14756 = vmatmul.mubr.msk.bf16.vlgmr.msra.gmra.mrb[92].mxu0 %vm11291_vm15, %v21093_v61 }
 0xea8   : > { %12423 = vmatpush1.bf16.msra.mxu0 %v23300_v56  ;;  %12454 = vmatprep.mubr.bf16.mxu0 %v22700_v30 }
 0xea9   : > { %12424 = vmatprep.subr.bf16.mxu0 %v20915_v43  ;;  %v23305_v43 = vld [vmem:[#allocation3_spill] sm:$0xff] }
 0xeac   : > { %12425 = vmatpush1.bf16.msra.mxu0 %v20884_v39 }
 0xead   : > { %12426 = vmatprep.subr.bf16.mxu0 %v20920_v37  ;;  %v23306_v37 = vld [vmem:[#allocation67_spill] sm:$0xff] }
 0xeb0   : > { %12427 = vmatpush1.bf16.msra.mxu0 %v23301_v48 }
 0xeb1   : > { %12428 = vmatprep.subr.bf16.mxu0 %v20925_v50  ;;  %v23307_v50 = vld [vmem:[#allocation73_spill] sm:$0xff] }
 0xeb4   : > { %12429 = vmatpush1.bf16.msra.mxu0 %v23302_v40 }
 0xeb5   : > { %12430 = vmatprep.subr.bf16.mxu0 %v20930_v58 }
 0xeb8   : > { %12431 = vmatpush1.bf16.msra.mxu0 %v23303_v57 }
 0xeb9   : > { %12465 = vmatprep.subr.bf16.mxu0 %v23304_v34 }
 0xebb   : > { %14757 = vmatmul.mubr.msk.bf16.vlgmr.msra.gmra.mrb[96].mxu0 %vm11291_vm15, %v21093_v61 }
 0xebc   : > { %12466 = vmatpush1.bf16.msra.mxu0 %v23305_v43  ;;  %12497 = vmatprep.mubr.bf16.mxu0 %v22700_v30  ;;  %v23311_v43 = vld [vmem:[#allocation127_spill] sm:$0xff] }
 0xebd   : > { %12467 = vmatprep.subr.bf16.mxu0 %v20943_v35  ;;  %v23310_v35 = vld [vmem:[#allocation27_spill] sm:$0xff] }
 0xec0   : > { %12468 = vmatpush1.bf16.msra.mxu0 %v23306_v37 }
 0xec1   : > { %12469 = vmatprep.subr.bf16.mxu0 %v20953_v14 }
 0xec4   : > { %12470 = vmatpush1.bf16.msra.mxu0 %v23307_v50 }
 0xec5   : > { %12471 = vmatprep.subr.bf16.mxu0 %v20963_v55  ;;  %v23313_v55 = vld [vmem:[#allocation30_spill] sm:$0xff] }
 0xec7   : > { %v10957_v58 = vpop.permute.xlu0 %10956 }
 0xec8   : > { %12472 = vmatpush1.bf16.msra.mxu0 %v23308_v20  ;;  %v21161_v34 = vsel %vm1034_vm1, %v20991_v63, %v10957_v58 }
 0xec9   : > { %23309 = vst [vmem:[#allocation19_spill] sm:$0xff] %v21161_v34  ;;  %12473 = vmatprep.subr.bf16.mxu0 %v20973_v11  ;;  %11598 = vmatprep.subr.bf16.mxu1 %v21161_v34  ;;  %v23314_v11 = vld [vmem:[#allocation104_spill] sm:$0xff] }
 0xeca   : > { %11599 = vmatpush1.bf16.msra.mxu1 %v23310_v35 }
 0xecb   : > { %v11042_v37 = vpop.permute.xlu0 %11041 }
 0xecc   : > { %12474 = vmatpush1.bf16.msra.mxu0 %v23311_v43  ;;  %v21169_v14 = vsel %vm1146_vm6, %v21005_v46, %v11042_v37 }
 0xecd   : > { %23312 = vst [vmem:[#allocation20_spill] sm:$0xff] %v21169_v14  ;;  %12508 = vmatprep.subr.bf16.mxu0 %v20811_v32  ;;  %11600 = vmatprep.subr.bf16.mxu1 %v21169_v14  ;;  %v23316_v32 = vld [vmem:[#allocation18_spill] sm:$0xff] }
 0xece   : > { %11601 = vmatpush1.bf16.msra.mxu1 %v23313_v55 }
 0xecf   : > { %14758 = vmatmul.mubr.msk.bf16.vlgmr.msra.gmra.mrb[100].mxu0 %vm11291_vm15, %v21093_v61  ;;  %v11129_v63 = vpop.permute.xlu0 %11128 }
 0xed0   : > { %12509 = vmatpush1.bf16.msra.mxu0 %v23314_v11  ;;  %v21179_v20 = vsel %vm1278_vm4, %v21018_v49, %v11129_v63  ;;  %12540 = vmatprep.mubr.bf16.mxu0 %v22700_v30 }
 0xed1   : > { %23315 = vst [vmem:[#allocation34_spill] sm:$0xff] %v21179_v20  ;;  %12510 = vmatprep.subr.bf16.mxu0 %v23310_v35  ;;  %11602 = vmatprep.subr.bf16.mxu1 %v21179_v20  ;;  %v23318_v35 = vld [vmem:[#allocation28_spill] sm:$0xff] }
 0xed2   : > { %11603 = vmatpush1.bf16.msra.mxu1 %v21022_v2 }
 0xed3   : > { %v11216_v46 = vpop.permute.xlu0 %11215 }
 0xed4   : > { %12511 = vmatpush1.bf16.msra.mxu0 %v23316_v32  ;;  %v21188_v43 = vsel %vm1388_vm12, %v21031_v38, %v11216_v46  ;;  %v21206_v38 = vpop.permute.xlu1 %10958 }
 0xed5   : > { %23317 = vst [vmem:[#allocation31_spill] sm:$0xff] %v21188_v43  ;;  %12512 = vmatprep.subr.bf16.mxu0 %v23313_v55  ;;  %11604 = vmatprep.subr.bf16.mxu1 %v21188_v43 }
 0xed6   : > { %11605 = vmatpush1.bf16.msra.mxu1 %v21035_v13 }
 0xed7   : > { %v10868_v49 = vpop.permute.xlu0 %10867  ;;  %11639 = vmatprep.subr.bf16.mxu1 %v21051_v17  ;;  %v23319_v17 = vld [vmem:[#allocation29_spill] sm:$0xff] }
 0xed8   : > { %12513 = vmatpush1.bf16.msra.mxu0 %v23318_v35  ;;  %v21197_v11 = vsel %vm765_vm0, %v21047_v6, %v10868_v49  ;;  %v23320_v6 = vld [vmem:[#allocation107_spill] sm:$0xff] }
 0xed9   : > { %12514 = vmatprep.subr.bf16.mxu0 %v21022_v2  ;;  %11045 = vrot.lane.b32.xlu0 %v21197_v11, %s15529_s14  ;;  %v21218_v2 = vsel %vm765_vm0, %v10868_v49, %v23320_v6 }
 0xeda   : > { %10960 = vrot.lane.b32.xlu1 %v21197_v11, %s15530_s15  ;;  %14732 = vmatmul.mubr.msk.bf16.vlgmr.msra.gmra.mrb[128].mxu1 %vm11291_vm15, %v20520_v5  ;;  %v21221_v5 = vpop.permute.xlu1 %11043 }
 0xedb   : > { %11640 = vmatpush1.bf16.msra.mxu1 %v21044_v45  ;;  %11671 = vmatprep.mubr.bf16.mxu1 %v22700_v30  ;;  %v21245_v6 = vsel %vm1146_vm6, %v11042_v37, %v21221_v5 }
 0xedc   : > { %12515 = vmatpush1.bf16.msra.mxu0 %v23319_v17  ;;  %23321 = vst [vmem:[#allocation35_spill] sm:$0xff] %v21245_v6 }
 0xedd   : > { %12516 = vmatprep.subr.bf16.mxu0 %v21035_v13  ;;  %11219 = vrot.lane.b32.xlu0 %v21197_v11, %s15531_s17  ;;  %v21232_v13 = vsel %vm1034_vm1, %v10957_v58, %v21206_v38  ;;  %v23322_v58 = vld [vmem:[#allocation98_spill] sm:$0xff] }
 0xede   : > { %11132 = vrot.lane.b32.xlu1 %v21197_v11, %s15532_s18  ;;  %v21241_v49 = vpop.permute.xlu1 %11130  ;;  %v21250_v55 = vsel %vm765_vm0, %v23322_v58, 0  ;;  %v10788_v58 = vld [vmem:[%s22170_s6 + $0x8] sm:$0xf] }
 0xedf   : > { %23323 = vst [vmem:[#allocation32_spill] sm:$0xff] %v21250_v55 }
 0xee0   : > { %12517 = vmatpush1.bf16.msra.mxu0 %v21029_v7 }
 0xee1   : > { %12551 = vmatprep.subr.bf16.mxu0 %v21044_v45  ;;  %11047 = vrot.lane.b32.xlu0 %v21218_v2, %s15529_s14  ;;  %v21259_v45 = vsel %vm1278_vm4, %v11129_v63, %v21241_v49  ;;  %v10787_v63 = vld [vmem:[%s22170_s6] sm:$0xff] }
 0xee2   : > { %10962 = vrot.lane.b32.xlu1 %v21218_v2, %s15530_s15  ;;  %23324 = vst [vmem:[#allocation77_spill] sm:$0xff] %v21259_v45  ;;  %v21262_v37 = vpop.permute.xlu1 %11217 }
 0xee3   : > { %14759 = vmatmul.mubr.msk.bf16.vlgmr.msra.gmra.mrb[104].mxu0 %vm11291_vm15, %v21093_v61 }
 0xee4   : > { %12552 = vmatpush1.bf16.msra.mxu0 %v20819_v51  ;;  %12583 = vmatprep.mubr.bf16.mxu0 %v22700_v30 }
 0xee5   : > { %12553 = vmatprep.subr.bf16.mxu0 %v21232_v13  ;;  %11221 = vrot.lane.b32.xlu0 %v21218_v2, %s15531_s17 }
 0xee6   : > { %11134 = vrot.lane.b32.xlu1 %v21218_v2, %s15532_s18 }
 0xee8   : > { %12554 = vmatpush1.bf16.msra.mxu0 %v21161_v34 }
 0xee9   : > { %12555 = vmatprep.subr.bf16.mxu0 %v21245_v6  ;;  %12230 = vrot.lane.b32.xlu0 %v21250_v55, %s15529_s14  ;;  %s15535_s14 = smov 121  }
 0xeea   : > { %12226 = vrot.lane.b32.xlu1 %v21250_v55, %s15530_s15  ;;  %s289_s15 = sand.u32 1, %s15498_s24   ;;  %s15363_s24 = smul.u32 (%p15622_p5), 24, %s15510_s27 }
 0xeeb   : > { %s15360_s21 = smul.u32 96, %s289_s15 }
 0xeec   : > { %12556 = vmatpush1.bf16.msra.mxu0 %v21169_v14  ;;  %v21277_v14 = vsel %vm1388_vm12, %v11216_v46, %v21262_v37  ;;  %v23329_v46 = vld [vmem:[#allocation69_spill] sm:$0xff]  ;;  %s14357_s12 = sadd.s32 (%p15622_p5), %s15506_s26, %s15363_s24 }
 0xeed   : > { %12557 = vmatprep.subr.bf16.mxu0 %v21259_v45  ;;  %12238 = vrot.lane.b32.xlu0 %v21250_v55, %s15531_s17  ;;  %s22071_s17 = scalar_lea.vmem [#allocation2], %s15360_s21 }
 0xeee   : > { %12234 = vrot.lane.b32.xlu1 %v21250_v55, %s15532_s18 }
 0xef0   : > { %12558 = vmatpush1.bf16.msra.mxu0 %v21179_v20 }
 0xef1   : > { %12559 = vmatprep.subr.bf16.mxu0 %v21277_v14  ;;  %13760 = vperm.xlu0 %15432, %v10788_v58  }
 0xef2   : > { %13755 = vperm.xlu1 %15433, %v10787_v63  }
 0xef4   : > { %12560 = vmatpush1.bf16.msra.mxu0 %v21188_v43 }
 0xef5   : > { %12759 = vmatprep.subr.bf16.mxu0 %v20408_v27 }
 0xef7   : > { %14760 = vmatmul.mubr.msk.bf16.vlgmr.msra.gmra.mrb[108].mxu0 %vm11291_vm15, %v21093_v61 }
 0xef8   : > { %12760 = vmatpush1.bf16.msra.mxu0 %v20402_v59  ;;  %12791 = vmatprep.mubr.bf16.mxu0 %v22700_v30  ;;  %v21297_v59 = vld [vmem:[%s22169_s5 + $0x18] sm:$0x3f]  }
 0xef9   : > { %12761 = vmatprep.subr.bf16.mxu0 %v20650_v19 }
 0xefc   : > { %12762 = vmatpush1.bf16.msra.mxu0 %v20604_v8  ;;  %v23325_v8 = vld [vmem:[#allocation8_spill] sm:$0xff] }
 0xefd   : > { %12763 = vmatprep.subr.bf16.mxu0 %v20664_v44 }
 0xf00   : > { %12764 = vmatpush1.bf16.msra.mxu0 %v20613_v62  ;;  %v23326_v62 = vld [vmem:[#allocation3_spill] sm:$0xff] }
 0xf01   : > { %12765 = vmatprep.subr.bf16.mxu0 %v20678_v4 }
 0xf04   : > { %12766 = vmatpush1.bf16.msra.mxu0 %v20630_v12  ;;  %v23327_v12 = vld [vmem:[#allocation16_spill] sm:$0xff] }
 0xf05   : > { %12767 = vmatprep.subr.bf16.mxu0 %v20685_v33 }
 0xf08   : > { %12768 = vmatpush1.bf16.msra.mxu0 %v20640_v47  ;;  %v23328_v47 = vld [vmem:[#allocation67_spill] sm:$0xff] }
 0xf09   : > { %12802 = vmatprep.subr.bf16.mxu0 %v20452_v28 }
 0xf0b   : > { %14765 = vmatmul.mubr.msk.bf16.vlgmr.msra.gmra.mrb[80].mxu0 %vm11291_vm15, %v21297_v59 }
 0xf0c   : > { %12803 = vmatpush1.bf16.msra.mxu0 %v20431_v54  ;;  %12834 = vmatprep.mubr.bf16.mxu0 %v22700_v30 }
 0xf0d   : > { %12804 = vmatprep.subr.bf16.mxu0 %v20735_v52 }
 0xf10   : > { %12805 = vmatpush1.bf16.msra.mxu0 %v20699_v42 }
 0xf11   : > { %12806 = vmatprep.subr.bf16.mxu0 %v20755_v16 }
 0xf14   : > { %12807 = vmatpush1.bf16.msra.mxu0 %v20709_v18 }
 0xf15   : > { %12808 = vmatprep.subr.bf16.mxu0 %v20769_v1 }
 0xf18   : > { %12809 = vmatpush1.bf16.msra.mxu0 %v20716_v31 }
 0xf19   : > { %12810 = vmatprep.subr.bf16.mxu0 %v20783_v25 }
 0xf1c   : > { %12811 = vmatpush1.bf16.msra.mxu0 %v20723_v9 }
 0xf1d   : > { %12845 = vmatprep.subr.bf16.mxu0 %v20528_v41 }
 0xf1f   : > { %14766 = vmatmul.mubr.msk.bf16.vlgmr.msra.gmra.mrb[84].mxu0 %vm11291_vm15, %v21297_v59 }
 0xf20   : > { %12846 = vmatpush1.bf16.msra.mxu0 %v20525_v15  ;;  %12877 = vmatprep.mubr.bf16.mxu0 %v22700_v30 }
 0xf21   : > { %12847 = vmatprep.subr.bf16.mxu0 %v20803_v22 }
 0xf24   : > { %12848 = vmatpush1.bf16.msra.mxu0 %v20738_v29 }
 0xf25   : > { %12849 = vmatprep.subr.bf16.mxu0 %v23294_v10 }
 0xf28   : > { %12850 = vmatpush1.bf16.msra.mxu0 %v20758_v53 }
 0xf29   : > { %12851 = vmatprep.subr.bf16.mxu0 %v23296_v36 }
 0xf2c   : > { %12852 = vmatpush1.bf16.msra.mxu0 %v20772_v60 }
 0xf2d   : > { %12853 = vmatprep.subr.bf16.mxu0 %v23298_v0 }
 0xf30   : > { %12854 = vmatpush1.bf16.msra.mxu0 %v20786_v21 }
 0xf31   : > { %12888 = vmatprep.subr.bf16.mxu0 %v23300_v56 }
 0xf33   : > { %14767 = vmatmul.mubr.msk.bf16.vlgmr.msra.gmra.mrb[88].mxu0 %vm11291_vm15, %v21297_v59 }
 0xf34   : > { %12889 = vmatpush1.bf16.msra.mxu0 %v20591_v24  ;;  %12920 = vmatprep.mubr.bf16.mxu0 %v22700_v30 }
 0xf35   : > { %12890 = vmatprep.subr.bf16.mxu0 %v20884_v39  ;;  %v23336_v39 = vld [vmem:[#allocation115_spill] sm:$0xff] }
 0xf38   : > { %12891 = vmatpush1.bf16.msra.mxu0 %v20806_v23 }
 0xf39   : > { %12892 = vmatprep.subr.bf16.mxu0 %v23301_v48  ;;  %v23332_v48 = vld [vmem:[#allocation74_spill] sm:$0xff] }
 0xf3c   : > { %12893 = vmatpush1.bf16.msra.mxu0 %v20833_v3 }
 0xf3d   : > { %12894 = vmatprep.subr.bf16.mxu0 %v23302_v40  ;;  %v23331_v40 = vld [vmem:[#allocation119_spill] sm:$0xff] }
 0xf40   : > { %12895 = vmatpush1.bf16.msra.mxu0 %v23295_v26 }
 0xf41   : > { %12896 = vmatprep.subr.bf16.mxu0 %v23303_v57  ;;  %v23330_v57 = vld [vmem:[#allocation26_spill] sm:$0xff] }
 0xf44   : > { %12897 = vmatpush1.bf16.msra.mxu0 %v23325_v8 }
 0xf45   : > { %12931 = vmatprep.subr.bf16.mxu0 %v23326_v62 }
 0xf47   : > { %14768 = vmatmul.mubr.msk.bf16.vlgmr.msra.gmra.mrb[92].mxu0 %vm11291_vm15, %v21297_v59 }
 0xf48   : > { %12932 = vmatpush1.bf16.msra.mxu0 %v23327_v12  ;;  %12963 = vmatprep.mubr.bf16.mxu0 %v22700_v30  ;;  %v23340_v12 = vld [vmem:[#allocation124_spill] sm:$0xff] }
 0xf49   : > { %12933 = vmatprep.subr.bf16.mxu0 %v23328_v47 }
 0xf4b   : > { %v11046_v58 = vpop.permute.xlu0 %11045 }
 0xf4c   : > { %12934 = vmatpush1.bf16.msra.mxu0 %v23329_v46  ;;  %v10961_v63 = vpop.permute.xlu1 %10960  ;;  %v21354_v62 = vsel %vm1146_vm6, %v21221_v5, %v11046_v58  ;;  %v23333_v5 = vld [vmem:[#allocation127_spill] sm:$0xff]  ;;  %v23339_v46 = vld [vmem:[#allocation101_spill] sm:$0xff] }
 0xf4d   : > { %12935 = vmatprep.subr.bf16.mxu0 %v23307_v50  ;;  %v21349_v55 = vsel %vm1034_vm1, %v21206_v38, %v10961_v63 }
 0xf4e   : > { %11641 = vmatprep.subr.bf16.mxu1 %v21349_v55 }
 0xf4f   : > { %11642 = vmatpush1.bf16.msra.mxu1 %v21232_v13  ;;  %v11220_v38 = vpop.permute.xlu0 %11219 }
 0xf50   : > { %12936 = vmatpush1.bf16.msra.mxu0 %v23330_v57  ;;  %v11133_v47 = vpop.permute.xlu1 %11132  ;;  %11643 = vmatprep.subr.bf16.mxu1 %v21354_v62  ;;  %v21370_v57 = vsel %vm1388_vm12, %v21262_v37, %v11220_v38  ;;  %v15460_v37 = vld [vmem:[%s22169_s5 + $0x8] sm:$0x3f]  }
 0xf51   : > { %12937 = vmatprep.subr.bf16.mxu0 %v23331_v40  ;;  %v21362_v50 = vsel %vm1278_vm4, %v21241_v49, %v11133_v47  ;;  %v23334_v40 = vld [vmem:[#allocation23_spill] sm:$0xff]  ;;  %v23335_v49 = vld [vmem:[#allocation104_spill] sm:$0xff] }
 0xf53   : > { %11644 = vmatpush1.bf16.msra.mxu1 %v21245_v6 }
 0xf54   : > { %12938 = vmatpush1.bf16.msra.mxu0 %v23332_v48  ;;  %11645 = vmatprep.subr.bf16.mxu1 %v21362_v50  ;;  %v10963_v48 = vpop.permute.xlu1 %10962 }
 0xf55   : > { %12939 = vmatprep.subr.bf16.mxu0 %v23333_v5 }
 0xf57   : > { %11646 = vmatpush1.bf16.msra.mxu1 %v21259_v45 }
 0xf58   : > { %12940 = vmatpush1.bf16.msra.mxu0 %v23334_v40  ;;  %11647 = vmatprep.subr.bf16.mxu1 %v21370_v57  ;;  %v23338_v40 = vld [vmem:[#allocation24_spill] sm:$0xff] }
 0xf59   : > { %12974 = vmatprep.subr.bf16.mxu0 %v23335_v49  ;;  %v23337_v49 = vld [vmem:[#allocation105_spill] sm:$0xff] }
 0xf5a   : > { %v21389_v5 = vsel %vm1034_vm1, %v10963_v48, %v23337_v49  ;;  %v11135_v49 = vpop.permute.xlu1 %11134 }
 0xf5b   : > { %11648 = vmatpush1.bf16.msra.mxu1 %v21277_v14  ;;  %14769 = vmatmul.mubr.msk.bf16.vlgmr.msra.gmra.mrb[96].mxu0 %vm11291_vm15, %v21297_v59 }
 0xf5c   : > { %12975 = vmatpush1.bf16.msra.mxu0 %v23336_v39  ;;  %11678 = vmatprep.subr.bf16.mxu1 %v21218_v2  ;;  %v11048_v39 = vpop.permute.xlu0 %11047 }
 0xf5d   : > { %12976 = vmatprep.subr.bf16.mxu0 %v23316_v32  ;;  %13006 = vmatprep.mubr.bf16.mxu0 %v22700_v30  ;;  %v21397_v32 = vsel %vm1034_vm1, %v10961_v63, %v10963_v48  ;;  %v21401_v56 = vsel %vm1146_vm6, %v11048_v39, %v23339_v46  ;;  %v23342_v63 = vld [vmem:[#allocation125_spill] sm:$0xff] }
 0xf5e   : > { %14733 = vmatmul.mubr.msk.bf16.vlgmr.msra.gmra.mrb[132].mxu1 %vm11291_vm15, %v15460_v37 }
 0xf5f   : > { %11679 = vmatpush1.bf16.msra.mxu1 %v21197_v11  ;;  %11710 = vmatprep.mubr.bf16.mxu1 %v22700_v30 }
 0xf60   : > { %12977 = vmatpush1.bf16.msra.mxu0 %v23338_v40  ;;  %11680 = vmatprep.subr.bf16.mxu1 %v21389_v5  ;;  %v21408_v40 = vsel %vm1146_vm6, %v11046_v58, %v11048_v39  ;;  %v11222_v46 = vpop.permute.xlu0 %11221 }
 0xf61   : > { %12978 = vmatprep.subr.bf16.mxu0 %v23318_v35  ;;  %v23341_v35 = vld [vmem:[#allocation110_spill] sm:$0xff]  ;;  %v21430_v58 = vsel %vm1388_vm12, %v11220_v38, %v11222_v46  ;;  %v23347_v38 = vld [vmem:[#allocation27_spill] sm:$0xff] }
 0xf62   : > { %v21412_v48 = vsel %vm1278_vm4, %v11135_v49, %v23341_v35  ;;  %v23344_v35 = vld [vmem:[#allocation17_spill] sm:$0xff] }
 0xf63   : > { %11681 = vmatpush1.bf16.msra.mxu1 %v21397_v32 }
 0xf64   : > { %12979 = vmatpush1.bf16.msra.mxu0 %v23340_v12  ;;  %11682 = vmatprep.subr.bf16.mxu1 %v21401_v56  ;;  %v21419_v12 = vsel %vm1278_vm4, %v11133_v47, %v11135_v49  ;;  %v23345_v47 = vld [vmem:[#allocation123_spill] sm:$0xff]  ;;  %v23348_v49 = vld [vmem:[#allocation20_spill] sm:$0xff] }
 0xf65   : > { %12980 = vmatprep.subr.bf16.mxu0 %v23319_v17  ;;  %v23343_v17 = vld [vmem:[#allocation116_spill] sm:$0xff] }
 0xf66   : > { %v21423_v39 = vsel %vm1388_vm12, %v11222_v46, %v23343_v17  ;;  %v23346_v17 = vld [vmem:[#allocation75_spill] sm:$0xff]  ;;  %v23349_v46 = vld [vmem:[#allocation30_spill] sm:$0xff] }
 0xf67   : > { %11683 = vmatpush1.bf16.msra.mxu1 %v21408_v40 }
 0xf68   : > { %12981 = vmatpush1.bf16.msra.mxu0 %v23342_v63  ;;  %11684 = vmatprep.subr.bf16.mxu1 %v21412_v48 }
 0xf69   : > { %12982 = vmatprep.subr.bf16.mxu0 %v21029_v7 }
 0xf6b   : > { %11685 = vmatpush1.bf16.msra.mxu1 %v21419_v12 }
 0xf6c   : > { %12983 = vmatpush1.bf16.msra.mxu0 %v23344_v35  ;;  %11686 = vmatprep.subr.bf16.mxu1 %v21423_v39 }
 0xf6d   : > { %13017 = vmatprep.subr.bf16.mxu0 %v20819_v51 }
 0xf6f   : > { %11687 = vmatpush1.bf16.msra.mxu1 %v21430_v58  ;;  %14770 = vmatmul.mubr.msk.bf16.vlgmr.msra.gmra.mrb[100].mxu0 %vm11291_vm15, %v21297_v59 }
 0xf70   : > { %13018 = vmatpush1.bf16.msra.mxu0 %v23345_v47  ;;  %12108 = vmatprep.subr.bf16.mxu1 %v23346_v17 }
 0xf71   : > { %13019 = vmatprep.subr.bf16.mxu0 %v21161_v34  ;;  %13049 = vmatprep.mubr.bf16.mxu0 %v22700_v30 }
 0xf72   : > { %14734 = vmatmul.mubr.msk.bf16.vlgmr.msra.gmra.mrb[136].mxu1 %vm11291_vm15, %v15460_v37  ;;  %v23350_v37 = vld [vmem:[#allocation129_spill] sm:$0xff] }
 0xf73   : > { %12109 = vmatpush1.bf16.msra.mxu1 %v20819_v51  ;;  %12140 = vmatprep.mubr.bf16.mxu1 %v22700_v30  ;;  %v23351_v51 = vld [vmem:[#allocation70_spill] sm:$0xff] }
 0xf74   : > { %13020 = vmatpush1.bf16.msra.mxu0 %v23347_v38  ;;  %12110 = vmatprep.subr.bf16.mxu1 %v21232_v13 }
 0xf75   : > { %13021 = vmatprep.subr.bf16.mxu0 %v23348_v49 }
 0xf77   : > { %12111 = vmatpush1.bf16.msra.mxu1 %v21161_v34  ;;  %v23352_v34 = vld [vmem:[#allocation76_spill] sm:$0xff] }
 0xf78   : > { %13022 = vmatpush1.bf16.msra.mxu0 %v23349_v46  ;;  %12112 = vmatprep.subr.bf16.mxu1 %v21245_v6 }
 0xf79   : > { %13023 = vmatprep.subr.bf16.mxu0 %v21179_v20 }
 0xf7b   : > { %12113 = vmatpush1.bf16.msra.mxu1 %v23348_v49 }
 0xf7c   : > { %13024 = vmatpush1.bf16.msra.mxu0 %v23350_v37  ;;  %12114 = vmatprep.subr.bf16.mxu1 %v21259_v45 }
 0xf7d   : > { %13025 = vmatprep.subr.bf16.mxu0 %v21188_v43 }
 0xf7f   : > { %12115 = vmatpush1.bf16.msra.mxu1 %v21179_v20  ;;  %v15461_v20 = vld [vmem:[%s22169_s5] sm:$0x3f]  }
 0xf80   : > { %13026 = vmatpush1.bf16.msra.mxu0 %v23351_v51  ;;  %12116 = vmatprep.subr.bf16.mxu1 %v21277_v14 }
 0xf81   : > { %13060 = vmatprep.subr.bf16.mxu0 %v23352_v34 }
 0xf83   : > { %12117 = vmatpush1.bf16.msra.mxu1 %v21188_v43  ;;  %14771 = vmatmul.mubr.msk.bf16.vlgmr.msra.gmra.mrb[104].mxu0 %vm11291_vm15, %v21297_v59  ;;  %v21485_v43 = vpop.f32.mrb[100].mxu1 }
 0xf84   : > { %13061 = vmatpush1.bf16.msra.mxu0 %v23346_v17  ;;  %12147 = vmatprep.subr.bf16.mxu1 %v21197_v11  ;;  %v21487_v49 = vpop.f32.mrb[101].mxu1 }
 0xf85   : > { %13062 = vmatprep.subr.bf16.mxu0 %v21349_v55  ;;  %13092 = vmatprep.mubr.bf16.mxu0 %v22700_v30  ;;  %23353 = vst [vmem:[#allocation79_spill] sm:$0xff] %v21487_v49  ;;  %v23355_v49 = vld [vmem:[#allocation108_spill] sm:$0xff] }
 0xf86   : > { %14747 = vmatmul.mubr.msk.bf16.vlgmr.msra.gmra.mrb[140].mxu1 %vm11291_vm15, %v15461_v20 }
 0xf87   : > { %12148 = vmatpush1.bf16.msra.mxu1 %v23352_v34  ;;  %12179 = vmatprep.mubr.bf16.mxu1 %v22700_v30 }
 0xf88   : > { %13063 = vmatpush1.bf16.msra.mxu0 %v21232_v13  ;;  %12149 = vmatprep.subr.bf16.mxu1 %v21397_v32 }
 0xf89   : > { %13064 = vmatprep.subr.bf16.mxu0 %v21354_v62 }
 0xf8b   : > { %12150 = vmatpush1.bf16.msra.mxu1 %v21349_v55 }
 0xf8c   : > { %13065 = vmatpush1.bf16.msra.mxu0 %v21245_v6  ;;  %12151 = vmatprep.subr.bf16.mxu1 %v21408_v40  ;;  %v21494_v6 = vpop.f32.mrb[102].mxu1 }
 0xf8d   : > { %13066 = vmatprep.subr.bf16.mxu0 %v21362_v50 }
 0xf8f   : > { %12152 = vmatpush1.bf16.msra.mxu1 %v21354_v62 }
 0xf90   : > { %13067 = vmatpush1.bf16.msra.mxu0 %v21259_v45  ;;  %12153 = vmatprep.subr.bf16.mxu1 %v21419_v12  ;;  %v23354_v45 = vld [vmem:[#allocation112_spill] sm:$0xff] }
 0xf91   : > { %13068 = vmatprep.subr.bf16.mxu0 %v21370_v57 }
 0xf93   : > { %12154 = vmatpush1.bf16.msra.mxu1 %v21362_v50 }
 0xf94   : > { %13069 = vmatpush1.bf16.msra.mxu0 %v21277_v14  ;;  %12155 = vmatprep.subr.bf16.mxu1 %v21430_v58 }
 0xf95   : > { %13260 = vmatprep.subr.bf16.mxu0 %v20431_v54  ;;  %v21498_v54 = vpop.f32.mrb[103].mxu1 }
 0xf97   : > { %12156 = vmatpush1.bf16.msra.mxu1 %v21370_v57  ;;  %14772 = vmatmul.mubr.msk.bf16.vlgmr.msra.gmra.mrb[108].mxu0 %vm11291_vm15, %v21297_v59 }
 0xf98   : > { %13261 = vmatpush1.bf16.msra.mxu0 %v20408_v27  ;;  %12186 = vmatprep.subr.bf16.mxu1 %v23354_v45  ;;  %v23356_v27 = vld [vmem:[#allocation99_spill] sm:$0xff] }
 0xf99   : > { %13262 = vmatprep.subr.bf16.mxu0 %v20699_v42  ;;  %13292 = vmatprep.mubr.bf16.mxu0 %v22700_v30  ;;  %v23357_v42 = vld [vmem:[#allocation128_spill] sm:$0xff] }
 0xf9a   : > { %14748 = vmatmul.mubr.msk.bf16.vlgmr.msra.gmra.mrb[144].mxu1 %vm11291_vm15, %v15461_v20 }
 0xf9b   : > { %12187 = vmatpush1.bf16.msra.mxu1 %v21218_v2  ;;  %12218 = vmatprep.mubr.bf16.mxu1 %v22700_v30 }
 0xf9c   : > { %13263 = vmatpush1.bf16.msra.mxu0 %v20650_v19  ;;  %12188 = vmatprep.subr.bf16.mxu1 %v23355_v49  ;;  %v23358_v19 = vld [vmem:[#allocation7_spill] sm:$0xff] }
 0xf9d   : > { %13264 = vmatprep.subr.bf16.mxu0 %v20709_v18  ;;  %v21518_v18 = vld [vmem:[%s22169_s5 + $0x20] sm:$0x3f]  }
 0xf9f   : > { %12189 = vmatpush1.bf16.msra.mxu1 %v21389_v5 }
 0xfa0   : > { %13265 = vmatpush1.bf16.msra.mxu0 %v20664_v44  ;;  %12190 = vmatprep.subr.bf16.mxu1 %v23356_v27 }
 0xfa1   : > { %13266 = vmatprep.subr.bf16.mxu0 %v20716_v31  ;;  %v21523_v31 = vpop.f32.mrb[104].mxu1 }
 0xfa2   : > { %v21525_v44 = vpop.f32.mrb[105].mxu1 }
 0xfa3   : > { %12191 = vmatpush1.bf16.msra.mxu1 %v21401_v56 }
 0xfa4   : > { %13267 = vmatpush1.bf16.msra.mxu0 %v20678_v4  ;;  %12192 = vmatprep.subr.bf16.mxu1 %v23357_v42  ;;  %v21532_v4 = vpop.f32.mrb[106].mxu1 }
 0xfa5   : > { %13268 = vmatprep.subr.bf16.mxu0 %v20723_v9  ;;  %v23367_v9 = vld [vmem:[#allocation114_spill] sm:$0xff] }
 0xfa7   : > { %12193 = vmatpush1.bf16.msra.mxu1 %v21412_v48 }
 0xfa8   : > { %13269 = vmatpush1.bf16.msra.mxu0 %v20685_v33  ;;  %12194 = vmatprep.subr.bf16.mxu1 %v23358_v19  ;;  %v23366_v33 = vld [vmem:[#allocation22_spill] sm:$0xff] }
 0xfa9   : > { %13303 = vmatprep.subr.bf16.mxu0 %v20525_v15  ;;  %v21536_v15 = vpop.f32.mrb[107].mxu1 }
 0xfab   : > { %14778 = vmatmul.mubr.msk.bf16.vlgmr.msra.gmra.mrb[80].mxu0 %vm11291_vm15, %v21518_v18  ;;  %12195 = vmatpush1.bf16.msra.mxu1 %v21423_v39 }
 0xfac   : > { %13304 = vmatpush1.bf16.msra.mxu0 %v20452_v28  ;;  %12594 = vmatprep.subr.bf16.mxu1 %v21197_v11 }
 0xfad   : > { %13305 = vmatprep.subr.bf16.mxu0 %v20738_v29  ;;  %13335 = vmatprep.mubr.bf16.mxu0 %v22700_v30 }
 0xfae   : > { %14749 = vmatmul.mubr.msk.bf16.vlgmr.msra.gmra.mrb[148].mxu1 %vm11291_vm15, %v15461_v20  ;;  %v23374_v20 = vld [vmem:[#allocation131_spill] sm:$0xff] }
 0xfaf   : > { %12595 = vmatpush1.bf16.msra.mxu1 %v23352_v34  ;;  %12626 = vmatprep.mubr.bf16.mxu1 %v22700_v30 }
 0xfb0   : > { %13306 = vmatpush1.bf16.msra.mxu0 %v20735_v52  ;;  %12596 = vmatprep.subr.bf16.mxu1 %v21397_v32 }
 0xfb1   : > { %13307 = vmatprep.subr.bf16.mxu0 %v20758_v53  ;;  %v21555_v53 = vpop.f32.mrb[108].mxu1 }
 0xfb3   : > { %12597 = vmatpush1.bf16.msra.mxu1 %v21349_v55 }
 0xfb4   : > { %13308 = vmatpush1.bf16.msra.mxu0 %v20755_v16  ;;  %12598 = vmatprep.subr.bf16.mxu1 %v21408_v40  ;;  %v21558_v16 = vpop.f32.mrb[109].mxu1 }
 0xfb5   : > { %13309 = vmatprep.subr.bf16.mxu0 %v20772_v60  ;;  %23359 = vst [vmem:[#allocation78_spill] sm:$0xff] %v21558_v16  ;;  %v21563_v28 = vpop.f32.mrb[110].mxu1  ;;  %v23370_v60 = vld [vmem:[#allocation109_spill] sm:$0xff]  ;;  %v23391_v16 = vld [vmem:[#allocation126_spill] sm:$0xff] }
 0xfb6   : > { %23360 = vst [vmem:[#allocation71_spill] sm:$0xff] %v21563_v28  ;;  %v21567_v29 = vpop.f32.mrb[111].mxu1 }
 0xfb7   : > { %12599 = vmatpush1.bf16.msra.mxu1 %v21354_v62  ;;  %23361 = vst [vmem:[#allocation10_spill] sm:$0xff] %v21567_v29  ;;  %v23386_v29 = vld [vmem:[#allocation132_spill] sm:$0xff] }
 0xfb8   : > { %13310 = vmatpush1.bf16.msra.mxu0 %v20769_v1  ;;  %12600 = vmatprep.subr.bf16.mxu1 %v21419_v12  ;;  %v23369_v1 = vld [vmem:[#allocation69_spill] sm:$0xff] }
 0xfb9   : > { %13311 = vmatprep.subr.bf16.mxu0 %v20786_v21  ;;  %v23371_v21 = vld [vmem:[#allocation100_spill] sm:$0xff] }
 0xfbb   : > { %12601 = vmatpush1.bf16.msra.mxu1 %v21362_v50 }
 0xfbc   : > { %13312 = vmatpush1.bf16.msra.mxu0 %v20783_v25  ;;  %12602 = vmatprep.subr.bf16.mxu1 %v21430_v58 }
 0xfbd   : > { %13346 = vmatprep.subr.bf16.mxu0 %v20591_v24  ;;  %v21599_v24 = vpop.permute.xlu1 %12226 }
 0xfbf   : > { %14779 = vmatmul.mubr.msk.bf16.vlgmr.msra.gmra.mrb[84].mxu0 %vm11291_vm15, %v21518_v18  ;;  %12603 = vmatpush1.bf16.msra.mxu1 %v21370_v57 }
 0xfc0   : > { %13347 = vmatpush1.bf16.msra.mxu0 %v20528_v41  ;;  %12633 = vmatprep.subr.bf16.mxu1 %v23354_v45 }
 0xfc1   : > { %13348 = vmatprep.subr.bf16.mxu0 %v20806_v23  ;;  %13378 = vmatprep.mubr.bf16.mxu0 %v22700_v30  ;;  %v23363_v23 = vld [vmem:[#allocation16_spill] sm:$0xff] }
 0xfc2   : > { %14761 = vmatmul.mubr.msk.bf16.vlgmr.msra.gmra.mrb[152].mxu1 %vm11291_vm15, %v21093_v61 }
 0xfc3   : > { %12634 = vmatpush1.bf16.msra.mxu1 %v21218_v2  ;;  %12665 = vmatprep.mubr.bf16.mxu1 %v22700_v30 }
 0xfc4   : > { %13349 = vmatpush1.bf16.msra.mxu0 %v20803_v22  ;;  %12635 = vmatprep.subr.bf16.mxu1 %v23355_v49  ;;  %v21613_v22 = vsel %vm1034_vm1, %v23371_v21, %v21599_v24  ;;  %v23378_v21 = vld [vmem:[#allocation130_spill] sm:$0xff] }
 0xfc5   : > { %13350 = vmatprep.subr.bf16.mxu0 %v20833_v3  ;;  %v21589_v3 = vpop.f32.mrb[112].mxu1 }
 0xfc6   : > { %23362 = vst [vmem:[#allocation49_spill] sm:$0xff] %v21589_v3  ;;  %v21592_v25 = vpop.f32.mrb[113].mxu1 }
 0xfc7   : > { %12636 = vmatpush1.bf16.msra.mxu1 %v21389_v5  ;;  %23364 = vst [vmem:[#allocation43_spill] sm:$0xff] %v21592_v25  ;;  %v21597_v41 = vpop.f32.mrb[114].mxu1  ;;  %v23383_v25 = vld [vmem:[#allocation23_spill] sm:$0xff] }
 0xfc8   : > { %13351 = vmatpush1.bf16.msra.mxu0 %v23294_v10  ;;  %12637 = vmatprep.subr.bf16.mxu1 %v23356_v27  ;;  %23365 = vst [vmem:[#allocation41_spill] sm:$0xff] %v21597_v41  ;;  %v21603_v52 = vpop.f32.mrb[115].mxu1  ;;  %v21616_v10 = vpop.permute.xlu0 %12230 }
 0xfc9   : > { %13352 = vmatprep.subr.bf16.mxu0 %v23295_v26  ;;  %23368 = vst [vmem:[#allocation55_spill] sm:$0xff] %v21603_v52  ;;  %v23372_v26 = vld [vmem:[#allocation12_spill] sm:$0xff]  ;;  %v21638_v52 = vpop.f32.mrb[116].mxu1 }
 0xfca   : > { %23380 = vst [vmem:[#allocation52_spill] sm:$0xff] %v21638_v52 }
 0xfcb   : > { %12638 = vmatpush1.bf16.msra.mxu1 %v21401_v56 }
 0xfcc   : > { %13353 = vmatpush1.bf16.msra.mxu0 %v23296_v36  ;;  %12639 = vmatprep.subr.bf16.mxu1 %v23357_v42  ;;  %v23373_v36 = vld [vmem:[#allocation26_spill] sm:$0xff]  ;;  %v21640_v41 = vpop.permute.xlu0 %12238 }
 0xfcd   : > { %13354 = vmatprep.subr.bf16.mxu0 %v23325_v8 }
 0xfcf   : > { %12640 = vmatpush1.bf16.msra.mxu1 %v21412_v48 }
 0xfd0   : > { %13355 = vmatpush1.bf16.msra.mxu0 %v23298_v0  ;;  %12641 = vmatprep.subr.bf16.mxu1 %v23358_v19  ;;  %v23375_v0 = vld [vmem:[#allocation121_spill] sm:$0xff] }
 0xfd1   : > { %13389 = vmatprep.subr.bf16.mxu0 %v23363_v23  ;;  %v21625_v8 = vsel %vm1146_vm6, %v23375_v0, %v21616_v10  ;;  %v21627_v23 = vpop.permute.xlu1 %12234  ;;  %v23381_v0 = vld [vmem:[#allocation6_spill] sm:$0xff] }
 0xfd3   : > { %14780 = vmatmul.mubr.msk.bf16.vlgmr.msra.gmra.mrb[88].mxu0 %vm11291_vm15, %v21518_v18  ;;  %12642 = vmatpush1.bf16.msra.mxu1 %v21423_v39 }
 0xfd4   : > { %13390 = vmatpush1.bf16.msra.mxu0 %v23366_v33  ;;  %12672 = vmatprep.subr.bf16.mxu1 %v23367_v9  ;;  %v23376_v33 = vld [vmem:[#allocation15_spill] sm:$0xff] }
 0xfd5   : > { %13391 = vmatprep.subr.bf16.mxu0 %v23369_v1  ;;  %13421 = vmatprep.mubr.bf16.mxu0 %v22700_v30  ;;  %v23377_v1 = vld [vmem:[#allocation74_spill] sm:$0xff] }
 0xfd6   : > { %14762 = vmatmul.mubr.msk.bf16.vlgmr.msra.gmra.mrb[156].mxu1 %vm11291_vm15, %v21093_v61 }
 0xfd7   : > { %12673 = vmatpush1.bf16.msra.mxu1 %v23370_v60  ;;  %12704 = vmatprep.mubr.bf16.mxu1 %v22700_v30 }
 0xfd8   : > { %13392 = vmatpush1.bf16.msra.mxu0 %v23372_v26  ;;  %12674 = vmatprep.subr.bf16.mxu1 %v21613_v22  ;;  %v23379_v26 = vld [vmem:[#allocation120_spill] sm:$0xff] }
 0xfd9   : > { %13393 = vmatprep.subr.bf16.mxu0 %v23373_v36  ;;  %v21636_v36 = vsel %vm1278_vm4, %v23379_v26, %v21627_v23  ;;  %v23387_v26 = vld [vmem:[#allocation118_spill] sm:$0xff] }
 0xfda   : > { %v21655_v52 = vsel %vm1388_vm12, %v23387_v26, %v21640_v41  ;;  %v23392_v26 = vld [vmem:[#allocation3_spill] sm:$0xff] }
 0xfdb   : > { %12675 = vmatpush1.bf16.msra.mxu1 %v23374_v20 }
 0xfdc   : > { %13394 = vmatpush1.bf16.msra.mxu0 %v23376_v33  ;;  %12676 = vmatprep.subr.bf16.mxu1 %v21625_v8  ;;  %v21644_v33 = vpop.f32.mrb[117].mxu1 }
 0xfdd   : > { %13395 = vmatprep.subr.bf16.mxu0 %v23377_v1  ;;  %23382 = vst [vmem:[#allocation80_spill] sm:$0xff] %v21644_v33  ;;  %v21647_v1 = vpop.f32.mrb[118].mxu1 }
 0xfde   : > { %23384 = vst [vmem:[#allocation82_spill] sm:$0xff] %v21647_v1  ;;  %v21649_v3 = vpop.f32.mrb[119].mxu1 }
 0xfdf   : > { %12677 = vmatpush1.bf16.msra.mxu1 %v23378_v21  ;;  %23385 = vst [vmem:[#allocation72_spill] sm:$0xff] %v21649_v3  ;;  %v21657_v28 = vpop.f32.mrb[120].mxu1 }
 0xfe0   : > { %13396 = vmatpush1.bf16.msra.mxu0 %v23381_v0  ;;  %12678 = vmatprep.subr.bf16.mxu1 %v21636_v36  ;;  %v23388_v0 = vld [vmem:[#allocation25_spill] sm:$0xff]  ;;  %v21661_v33 = vpop.f32.mrb[121].mxu1 }
 0xfe1   : > { %13397 = vmatprep.subr.bf16.mxu0 %v23383_v25  ;;  %v23389_v25 = vld [vmem:[#allocation115_spill] sm:$0xff]  ;;  %v21664_v1 = vpop.f32.mrb[122].mxu1 }
 0xfe2   : > { %v21666_v3 = vpop.f32.mrb[123].mxu1 }
 0xfe3   : > { %12679 = vmatpush1.bf16.msra.mxu1 %v23386_v29  ;;  %23390 = vst [vmem:[#allocation81_spill] sm:$0xff] %v21666_v3  ;;  %v23395_v3 = vld [vmem:[#allocation124_spill] sm:$0xff] }
 0xfe4   : > { %13398 = vmatpush1.bf16.msra.mxu0 %v23388_v0  ;;  %12680 = vmatprep.subr.bf16.mxu1 %v21655_v52  ;;  %v23393_v0 = vld [vmem:[#allocation24_spill] sm:$0xff] }
 0xfe5   : > { %13432 = vmatprep.subr.bf16.mxu0 %v23389_v25  ;;  %v23394_v25 = vld [vmem:[#allocation67_spill] sm:$0xff] }
 0xfe7   : > { %14781 = vmatmul.mubr.msk.bf16.vlgmr.msra.gmra.mrb[92].mxu0 %vm11291_vm15, %v21518_v18  ;;  %12681 = vmatpush1.bf16.msra.mxu1 %v23391_v16 }
 0xfe8   : > { %13433 = vmatpush1.bf16.msra.mxu0 %v23392_v26  ;;  %13103 = vmatprep.subr.bf16.mxu1 %v21218_v2  ;;  %v23396_v26 = vld [vmem:[#allocation73_spill] sm:$0xff] }
 0xfe9   : > { %13434 = vmatprep.subr.bf16.mxu0 %v23393_v0  ;;  %13464 = vmatprep.mubr.bf16.mxu0 %v22700_v30  ;;  %v23398_v0 = vld [vmem:[#allocation127_spill] sm:$0xff] }
 0xfea   : > { %14763 = vmatmul.mubr.msk.bf16.vlgmr.msra.gmra.mrb[160].mxu1 %vm11291_vm15, %v21093_v61  ;;  %v23397_v61 = vld [vmem:[#allocation119_spill] sm:$0xff] }
 0xfeb   : > { %13104 = vmatpush1.bf16.msra.mxu1 %v21197_v11  ;;  %13135 = vmatprep.mubr.bf16.mxu1 %v22700_v30 }
 0xfec   : > { %13435 = vmatpush1.bf16.msra.mxu0 %v23394_v25  ;;  %13105 = vmatprep.subr.bf16.mxu1 %v21389_v5 }
 0xfed   : > { %13436 = vmatprep.subr.bf16.mxu0 %v23395_v3 }
 0xfef   : > { %13106 = vmatpush1.bf16.msra.mxu1 %v21397_v32 }
 0xff0   : > { %13437 = vmatpush1.bf16.msra.mxu0 %v23396_v26  ;;  %13107 = vmatprep.subr.bf16.mxu1 %v21401_v56 }
 0xff1   : > { %13438 = vmatprep.subr.bf16.mxu0 %v23342_v63  ;;  %v23399_v63 = vld [vmem:[#allocation104_spill] sm:$0xff] }
 0xff3   : > { %13108 = vmatpush1.bf16.msra.mxu1 %v21408_v40 }
 0xff4   : > { %13439 = vmatpush1.bf16.msra.mxu0 %v23397_v61  ;;  %13109 = vmatprep.subr.bf16.mxu1 %v21412_v48  ;;  %v23402_v61 = vld [vmem:[#allocation29_spill] sm:$0xff] }
 0xff5   : > { %13440 = vmatprep.subr.bf16.mxu0 %v23344_v35  ;;  %v23400_v35 = vld [vmem:[#allocation18_spill] sm:$0xff] }
 0xff7   : > { %13110 = vmatpush1.bf16.msra.mxu1 %v21419_v12 }
 0xff8   : > { %13441 = vmatpush1.bf16.msra.mxu0 %v23398_v0  ;;  %13111 = vmatprep.subr.bf16.mxu1 %v21423_v39  ;;  %v23407_v0 = vld [vmem:[#allocation35_spill] sm:$0xff] }
 0xff9   : > { %13475 = vmatprep.subr.bf16.mxu0 %v23345_v47  ;;  %v23401_v47 = vld [vmem:[#allocation28_spill] sm:$0xff] }
 0xffb   : > { %14782 = vmatmul.mubr.msk.bf16.vlgmr.msra.gmra.mrb[96].mxu0 %vm11291_vm15, %v21518_v18  ;;  %13112 = vmatpush1.bf16.msra.mxu1 %v21430_v58 }
 0xffc   : > { %13476 = vmatpush1.bf16.msra.mxu0 %v23399_v63  ;;  %13142 = vmatprep.subr.bf16.mxu1 %v23370_v60 }
 0xffd   : > { %13477 = vmatprep.subr.bf16.mxu0 %v23347_v38  ;;  %13507 = vmatprep.mubr.bf16.mxu0 %v22700_v30  ;;  %v21711_v38 = vpop.f32.mrb[124].mxu1 }
 0xffe   : > { %14773 = vmatmul.mubr.msk.bf16.vlgmr.msra.gmra.mrb[164].mxu1 %vm11291_vm15, %v21297_v59  ;;  %v21714_v3 = vpop.f32.mrb[125].mxu1 }
 0xfff   : > { %13143 = vmatpush1.bf16.msra.mxu1 %v23354_v45  ;;  %13174 = vmatprep.mubr.bf16.mxu1 %v22700_v30  ;;  %v21716_v25 = vpop.f32.mrb[126].mxu1 }
0x1000   : > { %13478 = vmatpush1.bf16.msra.mxu0 %v23400_v35  ;;  %13144 = vmatprep.subr.bf16.mxu1 %v23374_v20  ;;  %v21719_v26 = vpop.f32.mrb[127].mxu1  ;;  %v23409_v35 = vld [vmem:[#allocation20_spill] sm:$0xff] }
0x1001   : > { %13479 = vmatprep.subr.bf16.mxu0 %v23349_v46  ;;  %v23403_v46 = vld [vmem:[#allocation113_spill] sm:$0xff] }
0x1003   : > { %13145 = vmatpush1.bf16.msra.mxu1 %v23355_v49 }
0x1004   : > { %13480 = vmatpush1.bf16.msra.mxu0 %v23401_v47  ;;  %13146 = vmatprep.subr.bf16.mxu1 %v23378_v21  ;;  %v23411_v47 = vld [vmem:[#allocation14_spill] sm:$0xff] }
0x1005   : > { %13481 = vmatprep.subr.bf16.mxu0 %v23350_v37  ;;  %v23404_v37 = vld [vmem:[#allocation98_spill] sm:$0xff] }
0x1007   : > { %13147 = vmatpush1.bf16.msra.mxu1 %v23356_v27 }
0x1008   : > { %13482 = vmatpush1.bf16.msra.mxu0 %v23402_v61  ;;  %13148 = vmatprep.subr.bf16.mxu1 %v23386_v29  ;;  %v21761_v61 = vsel %vm1278_vm4, %v21627_v23, %v23411_v47  ;;  %v21775_v23 = vpop.f32.mrb[128].mxu1 }
0x1009   : > { %13483 = vmatprep.subr.bf16.mxu0 %v23351_v51  ;;  %v23405_v51 = vld [vmem:[#allocation83_spill] sm:$0xff] }
0x100b   : > { %13149 = vmatpush1.bf16.msra.mxu1 %v23357_v42 }
0x100c   : > { %13484 = vmatpush1.bf16.msra.mxu0 %v21029_v7  ;;  %13150 = vmatprep.subr.bf16.mxu1 %v23391_v16  ;;  %v21742_v7 = vsel %vm1034_vm1, %v21599_v24, %v23405_v51  ;;  %v23410_v24 = vld [vmem:[#allocation77_spill] sm:$0xff]  ;;  %vm14325_vm1 = vcmask 129024  }
0x100d   : > { %13518 = vmatprep.subr.bf16.mxu0 %v23346_v17  ;;  %v23406_v17 = vld [vmem:[#allocation19_spill] sm:$0xff] }
0x100f   : > { %14783 = vmatmul.mubr.msk.bf16.vlgmr.msra.gmra.mrb[100].mxu0 %vm11291_vm15, %v21518_v18  ;;  %13151 = vmatpush1.bf16.msra.mxu1 %v23358_v19 }
0x1010   : > { %13519 = vmatpush1.bf16.msra.mxu0 %v23403_v46  ;;  %14775 = vmatprep.subr.msk.bf16.mxu1 %vm765_vm0, %v23404_v37  ;;  %v23412_v46 = vld [vmem:[#allocation34_spill] sm:$0xff]  ;;  %vm14323_vm0 = vcmask 130055  }
0x1011   : > { %13520 = vmatprep.subr.bf16.mxu0 %v21232_v13  ;;  %13550 = vmatprep.mubr.bf16.mxu0 %v22700_v30  ;;  %v23408_v13 = vld [vmem:[#allocation85_spill] sm:$0xff] }
0x1012   : > { %14774 = vmatmul.mubr.msk.bf16.vlgmr.msra.gmra.mrb[168].mxu1 %vm11291_vm15, %v21297_v59  ;;  %v21752_v63 = vsel %vm1146_vm6, %v21616_v10, %v23408_v13  ;;  %v23413_v10 = vld [vmem:[#allocation21_spill] sm:$0xff] }
0x1013   : > { %13182 = vmatpush1.bf16.msra.mxu1 %v23367_v9  ;;  %13213 = vmatprep.mubr.bf16.mxu1 %v22700_v30  ;;  %v21770_v37 = vsel %vm1388_vm12, %v21640_v41, %v23413_v10 }
0x1014   : > { %13521 = vmatpush1.bf16.msra.mxu0 %v23406_v17  ;;  %13183 = vmatprep.subr.bf16.mxu1 %v21742_v7  ;;  %v23414_v17 = vld [vmem:[#allocation31_spill] sm:$0xff] }
0x1015   : > { %13522 = vmatprep.subr.bf16.mxu0 %v23407_v0  ;;  %v21777_v0 = vpop.f32.mrb[129].mxu1 }
0x1017   : > { %13184 = vmatpush1.bf16.msra.mxu1 %v21613_v22 }
0x1018   : > { %13523 = vmatpush1.bf16.msra.mxu0 %v23409_v35  ;;  %13185 = vmatprep.subr.bf16.mxu1 %v21752_v63 }
0x1019   : > { %13524 = vmatprep.subr.bf16.mxu0 %v23410_v24  ;;  %v21850_v24 = vpop.permute.xlu0 %13760 }
0x101b   : > { %13186 = vmatpush1.bf16.msra.mxu1 %v21625_v8 }
0x101c   : > { %13525 = vmatpush1.bf16.msra.mxu0 %v23412_v46  ;;  %13187 = vmatprep.subr.bf16.mxu1 %v21761_v61 }
0x101d   : > { %13526 = vmatprep.subr.bf16.mxu0 %v21277_v14  ;;  %v21782_v14 = vpop.f32.mrb[130].mxu1 }
0x101e   : > { %v21786_v41 = vpop.f32.mrb[131].mxu1 }
0x101f   : > { %13188 = vmatpush1.bf16.msra.mxu1 %v21636_v36 }
0x1020   : > { %13527 = vmatpush1.bf16.msra.mxu0 %v23414_v17  ;;  %13189 = vmatprep.subr.bf16.mxu1 %v21770_v37 }
0x1021   : > { %13561 = vmatprep.subr.bf16.mxu0 %v21197_v11 }
0x1023   : > { %14784 = vmatmul.mubr.msk.bf16.vlgmr.msra.gmra.mrb[104].mxu0 %vm11291_vm15, %v21518_v18  ;;  %13190 = vmatpush1.bf16.msra.mxu1 %v21655_v52 }
0x1024   : > { %13562 = vmatpush1.bf16.msra.mxu0 %v23352_v34  ;;  %13604 = vmatprep.subr.bf16.mxu1 %v23354_v45 }
0x1025   : > { %13563 = vmatprep.subr.bf16.mxu0 %v21397_v32  ;;  %13593 = vmatprep.mubr.bf16.mxu0 %v22700_v30 }
0x1026   : > { %14776 = vmatmul.mubr.msk.bf16.vlgmr.msra.gmra.mrb[172].mxu1 %vm11291_vm15, %v21297_v59 }
0x1027   : > { %13605 = vmatpush1.bf16.msra.mxu1 %v21218_v2  ;;  %13636 = vmatprep.mubr.bf16.mxu1 %v22700_v30 }
0x1028   : > { %13564 = vmatpush1.bf16.msra.mxu0 %v21349_v55  ;;  %13606 = vmatprep.subr.bf16.mxu1 %v23355_v49 }
0x1029   : > { %13565 = vmatprep.subr.bf16.mxu0 %v21408_v40  ;;  %v23415_v40 = vld [vmem:[#allocation32_spill] sm:$0xff] }
0x102b   : > { %13607 = vmatpush1.bf16.msra.mxu1 %v21389_v5 }
0x102c   : > { %13566 = vmatpush1.bf16.msra.mxu0 %v21354_v62  ;;  %13608 = vmatprep.subr.bf16.mxu1 %v23356_v27 }
0x102d   : > { %13567 = vmatprep.subr.bf16.mxu0 %v21419_v12 }
0x102f   : > { %13609 = vmatpush1.bf16.msra.mxu1 %v21401_v56 }
0x1030   : > { %13568 = vmatpush1.bf16.msra.mxu0 %v21362_v50  ;;  %13610 = vmatprep.subr.bf16.mxu1 %v23357_v42  ;;  %v23416_v42 = vld [vmem:[#allocation79_spill] sm:$0xff] }
0x1031   : > { %13569 = vmatprep.subr.bf16.mxu0 %v21430_v58  ;;  %v11673_v32 = vpop.f32.mrb[132].mxu1 }
0x1032   : > { %v11674_v2 = vpop.f32.mrb[133].mxu1 }
0x1033   : > { %13611 = vmatpush1.bf16.msra.mxu1 %v21412_v48  ;;  %v11675_v55 = vpop.f32.mrb[134].mxu1 }
0x1034   : > { %13570 = vmatpush1.bf16.msra.mxu0 %v21370_v57  ;;  %13612 = vmatprep.subr.bf16.mxu1 %v23358_v19  ;;  %v11676_v11 = vpop.f32.mrb[135].mxu1 }
0x1037   : > { %14785 = vmatmul.mubr.msk.bf16.vlgmr.msra.gmra.mrb[108].mxu0 %vm11291_vm15, %v21518_v18  ;;  %13613 = vmatpush1.bf16.msra.mxu1 %v21423_v39 }
0x1038   : > { %13643 = vmatprep.subr.bf16.mxu1 %v23367_v9 }
0x103a   : > { %14786 = vmatmul.mubr.msk.bf16.vlgmr.msra.gmra.mrb[176].mxu1 %vm11291_vm15, %v21518_v18 }
0x103b   : > { %13644 = vmatpush1.bf16.msra.mxu1 %v23370_v60  ;;  %13675 = vmatprep.mubr.bf16.mxu1 %v22700_v30 }
0x103c   : > { %13645 = vmatprep.subr.bf16.mxu1 %v21613_v22 }
0x103f   : > { %13646 = vmatpush1.bf16.msra.mxu1 %v23374_v20 }
0x1040   : > { %13647 = vmatprep.subr.bf16.mxu1 %v21625_v8 }
0x1043   : > { %13648 = vmatpush1.bf16.msra.mxu1 %v23378_v21 }
0x1044   : > { %13649 = vmatprep.subr.bf16.mxu1 %v21636_v36 }
0x1045   : > { %v11712_v50 = vpop.f32.mrb[136].mxu1 }
0x1046   : > { %v11713_v45 = vpop.f32.mrb[137].mxu1 }
0x1047   : > { %13650 = vmatpush1.bf16.msra.mxu1 %v23386_v29  ;;  %v11714_v34 = vpop.f32.mrb[138].mxu1  ;;  %v23417_v45 = vld [vmem:[#allocation4_spill] sm:$0xff] }
0x1048   : > { %13651 = vmatprep.subr.bf16.mxu1 %v21655_v52  ;;  %v11715_v56 = vpop.f32.mrb[139].mxu1 }
0x104b   : > { %13652 = vmatpush1.bf16.msra.mxu1 %v23391_v16 }
0x104c   : > { %13682 = vmatprep.subr.bf16.mxu1 %v22700_v30 }
0x104e   : > { %14787 = vmatmul.mubr.msk.bf16.vlgmr.msra.gmra.mrb[180].mxu1 %vm11291_vm15, %v21518_v18 }
0x104f   : > { %13683 = vmatpush1.bf16.msra.mxu1 %v23415_v40  ;;  %13714 = vmatprep.mubr.bf16.mxu1 %v22700_v30 }
0x1050   : > { %13684 = vmatprep.subr.bf16.mxu1 %v23405_v51  ;;  %v21844_v51 = vpop.permute.xlu1 %13755 }
0x1053   : > { %13685 = vmatpush1.bf16.msra.mxu1 %v21742_v7 }
0x1054   : > { %13686 = vmatprep.subr.bf16.mxu1 %v23408_v13 }
0x1057   : > { %13687 = vmatpush1.bf16.msra.mxu1 %v21752_v63 }
0x1058   : > { %13688 = vmatprep.subr.bf16.mxu1 %v23411_v47 }
0x1059   : > { %v12142_v57 = vpop.f32.mrb[140].mxu1 }
0x105a   : > { %v12143_v59 = vpop.f32.mrb[141].mxu1 }
0x105b   : > { %13689 = vmatpush1.bf16.msra.mxu1 %v21761_v61  ;;  %v12144_v62 = vpop.f32.mrb[142].mxu1 }
0x105c   : > { %13690 = vmatprep.subr.bf16.mxu1 %v23413_v10  ;;  %v12145_v12 = vpop.f32.mrb[143].mxu1 }
0x105f   : > { %13691 = vmatpush1.bf16.msra.mxu1 %v21770_v37 }
0x1062   : > { %14788 = vmatmul.mubr.msk.bf16.vlgmr.msra.gmra.mrb[184].mxu1 %vm11291_vm15, %v21518_v18 }
0x106d   : > { %v12181_v30 = vpop.f32.mrb[144].mxu1 }
0x106e   : > { %v12182_v5 = vpop.f32.mrb[145].mxu1 }
0x106f   : > { %v12183_v48 = vpop.f32.mrb[146].mxu1 }
0x1070   : > { %v12184_v39 = vpop.f32.mrb[147].mxu1 }
0x107e   : > { %v13294_v58 = vpop.f32.mrb[80].mxu0 }
0x107f   : > { %v14792_v49 = vadd.f32 %v13294_v58, %v21485_v43  ;;  %v13296_v27 = vpop.f32.mrb[81].mxu0 }
0x1080   : > { %v14793_v19 = vadd.f32 %v13296_v27, %v23416_v42  ;;  %v13298_v16 = vpop.f32.mrb[82].mxu0 }
0x1081   : > { %v14794_v29 = vadd.f32 %v13298_v16, %v21494_v6  ;;  %v13300_v9 = vpop.f32.mrb[83].mxu0  ;;  %v12220_v52 = vpop.f32.mrb[148].mxu1  ;;  %v13763_v13 = vadd.f32 %v14792_v49, %v21844_v51  ;;  %v23418_v16 = vld [vmem:[#allocation78_spill] sm:$0xff] }
0x1082   : > { %v14795_v60 = vadd.f32 %v13300_v9, %v21498_v54  ;;  %v12221_v22 = vpop.f32.mrb[149].mxu1  ;;  %v13764_v47 = vadd.f32 %v14793_v19, %v21844_v51  ;;  %v23419_v52 = vld [vmem:[#allocation71_spill] sm:$0xff] }
0x1083   : > { %v12222_v20 = vpop.f32.mrb[150].mxu1 }
0x1084   : > { %v12223_v18 = vpop.f32.mrb[151].mxu1 }
0x1085   : > { %v23420_v18 = vld [vmem:[#allocation10_spill] sm:$0xff] }
0x1092   : > { %v13337_v8 = vpop.f32.mrb[84].mxu0 }
0x1093   : > { %v14796_v21 = vadd.f32 %v13337_v8, %v21523_v31  ;;  %v13339_v36 = vpop.f32.mrb[85].mxu0 }
0x1094   : > { %v14797_v43 = vadd.f32 %v13339_v36, %v21525_v44  ;;  %v13341_v7 = vpop.f32.mrb[86].mxu0  ;;  %v13779_v44 = vadd.f32 %v14794_v29, %v21850_v24 }
0x1095   : > { %v13765_v6 = vadd.f32 %v14796_v21, %v21844_v51  ;;  %v14798_v63 = vadd.f32 %v13341_v7, %v21532_v4  ;;  %v13343_v35 = vpop.f32.mrb[87].mxu0  ;;  %v12628_v54 = vpop.f32.mrb[152].mxu1  ;;  %v13780_v4 = vadd.f32 %v14795_v60, %v21850_v24 }
0x1096   : > { %v13766_v31 = vadd.f32 %v14797_v43, %v21844_v51  ;;  %v14799_v61 = vadd.f32 %v13343_v35, %v21536_v15  ;;  %v12629_v46 = vpop.f32.mrb[153].mxu1  ;;  %v23422_v35 = vld [vmem:[#allocation43_spill] sm:$0xff] }
0x1097   : > { %v13795_v10 = vcombine.low %v13763_v13, %v13765_v6  ;;  %v13796_v37 = vcombine.high %v13763_v13, %v13765_v6  ;;  %v13781_v17 = vadd.f32 %v14798_v63, %v21850_v24  ;;  %v12630_v32 = vpop.f32.mrb[154].mxu1  ;;  %v23421_v13 = vld [vmem:[#allocation49_spill] sm:$0xff] }
0x1098   : > { %v13811_v2 = vcombine.low %v13764_v47, %v13766_v31  ;;  %v13812_v55 = vcombine.high %v13764_v47, %v13766_v31  ;;  %v13782_v11 = vadd.f32 %v14799_v61, %v21850_v24  ;;  %v12631_v50 = vpop.f32.mrb[155].mxu1  ;;  %v23423_v61 = vld [vmem:[#allocation41_spill] sm:$0xff]  ;;  %v23424_v32 = vld [vmem:[#allocation55_spill] sm:$0xff] }
0x1099   : > { %v21860_v34 = vrot.slane %v13795_v10, %v23417_v45  ;;  %v21863_v15 = vrot.slane %v13796_v37, %v23417_v45  ;;  %v14067_v56 = vcombine.low %v13779_v44, %v13781_v17 }
0x109a   : > { %v13819_v40 = vrot.slane %v13811_v2, %v23417_v45  ;;  %v21867_v57 = vrot.slane %v13812_v55, %v23417_v45  ;;  %v14075_v59 = vcombine.low %v13780_v4, %v13782_v11 }
0x109b   : > { %v21870_v62 = vrot.slane %v14067_v56, %v23417_v45 }
0x109c   : > { %v13859_v12 = vcombine.low %v21860_v34, %v13819_v40  ;;  %v13860_v30 = vcombine.high %v21860_v34, %v13819_v40  ;;  %v13875_v5 = vcombine.low %v21863_v15, %v21867_v57  ;;  %v13876_v48 = vcombine.high %v21863_v15, %v21867_v57 }
0x109d   : > { %v21879_v39 = vrot.slane %v14075_v59, %v23417_v45 }
0x109f   : > { %v14099_v58 = vcombine.low %v21870_v62, %v21879_v39  ;;  %v14100_v49 = vcombine.high %v21870_v62, %v21879_v39 }
0x10a6   : > { %v13380_v27 = vpop.f32.mrb[88].mxu0 }
0x10a7   : > { %v14800_v42 = vadd.f32 %v13380_v27, %v21555_v53  ;;  %v13382_v19 = vpop.f32.mrb[89].mxu0 }
0x10a8   : > { %v14801_v29 = vadd.f32 %v13382_v19, %v23418_v16  ;;  %v13384_v9 = vpop.f32.mrb[90].mxu0 }
0x10a9   : > { %v14802_v60 = vadd.f32 %v13384_v9, %v23419_v52  ;;  %v13386_v22 = vpop.f32.mrb[91].mxu0  ;;  %v12667_v20 = vpop.f32.mrb[156].mxu1  ;;  %v13767_v47 = vadd.f32 %v14800_v42, %v21844_v51 }
0x10aa   : > { %v14803_v8 = vadd.f32 %v13386_v22, %v23420_v18  ;;  %v12668_v21 = vpop.f32.mrb[157].mxu1  ;;  %v13768_v37 = vadd.f32 %v14801_v29, %v21844_v51 }
0x10ab   : > { %v12669_v36 = vpop.f32.mrb[158].mxu1  ;;  %v13783_v55 = vadd.f32 %v14802_v60, %v21850_v24  ;;  %v23425_v21 = vld [vmem:[#allocation5_spill] sm:$0xff] }
0x10ac   : > { %v12670_v43 = vpop.f32.mrb[159].mxu1  ;;  %v13784_v56 = vadd.f32 %v14803_v8, %v21850_v24  ;;  %v13867_v36 = vrot.slane %v13859_v12, %v23425_v21 }
0x10ad   : > { %v13874_v43 = vrot.slane %v13860_v30, %v23425_v21 }
0x10ba   : > { %v13423_v7 = vpop.f32.mrb[92].mxu0 }
0x10bb   : > { %v14804_v6 = vadd.f32 %v13423_v7, %v23421_v13  ;;  %v13425_v63 = vpop.f32.mrb[93].mxu0  ;;  %v13883_v13 = vrot.slane %v13875_v5, %v23425_v21 }
0x10bc   : > { %v14805_v54 = vadd.f32 %v13425_v63, %v23422_v35  ;;  %v13427_v53 = vpop.f32.mrb[94].mxu0 }
0x10bd   : > { %v13769_v31 = vadd.f32 %v14804_v6, %v21844_v51  ;;  %v14806_v46 = vadd.f32 %v13427_v53, %v23423_v61  ;;  %v13429_v44 = vpop.f32.mrb[95].mxu0  ;;  %v12706_v10 = vpop.f32.mrb[160].mxu1 }
0x10be   : > { %v13770_v17 = vadd.f32 %v14805_v54, %v21844_v51  ;;  %v14807_v4 = vadd.f32 %v13429_v44, %v23424_v32  ;;  %v12707_v2 = vpop.f32.mrb[161].mxu1  ;;  %v21914_v54 = vrot.slane %v13876_v48, %v23425_v21  ;;  %v21927_v48 = vrot.slane %v14099_v58, %v23425_v21  ;;  %v15462_v32 = vld [vmem:[%s15649_s11] sm:$0xff] }
0x10bf   : > { %v13827_v11 = vcombine.low %v13767_v47, %v13769_v31  ;;  %v13828_v50 = vcombine.high %v13767_v47, %v13769_v31  ;;  %v13785_v34 = vadd.f32 %v14806_v46, %v21850_v24  ;;  %v12708_v15 = vpop.f32.mrb[162].mxu1 }
0x10c0   : > { %v13843_v40 = vcombine.low %v13768_v37, %v13770_v17  ;;  %v13844_v57 = vcombine.high %v13768_v37, %v13770_v17  ;;  %v13786_v59 = vadd.f32 %v14807_v4, %v21850_v24  ;;  %v12709_v27 = vpop.f32.mrb[163].mxu1  ;;  %v21933_v17 = vrot.slane %v14100_v49, %v23425_v21 }
0x10c1   : > { %v13835_v42 = vrot.slane %v13827_v11, %v23417_v45  ;;  %v13842_v19 = vrot.slane %v13828_v50, %v23417_v45  ;;  %v14083_v16 = vcombine.low %v13783_v55, %v13785_v34  ;;  %v23426_v34 = vld [vmem:[#allocation52_spill] sm:$0xff]  ;;  %v23428_v27 = vld [vmem:[#allocation82_spill] sm:$0xff] }
0x10c2   : > { %v13851_v29 = vrot.slane %v13843_v40, %v23417_v45  ;;  %v13858_v9 = vrot.slane %v13844_v57, %v23417_v45  ;;  %v14091_v52 = vcombine.low %v13784_v56, %v13786_v59  ;;  %v23427_v40 = vld [vmem:[#allocation80_spill] sm:$0xff] }
0x10c3   : > { %v14090_v60 = vrot.slane %v14083_v16, %v23417_v45 }
0x10c4   : > { %v13891_v22 = vcombine.low %v13835_v42, %v13851_v29  ;;  %v13892_v20 = vcombine.high %v13835_v42, %v13851_v29  ;;  %v13907_v18 = vcombine.low %v13842_v19, %v13858_v9  ;;  %v13908_v8 = vcombine.high %v13842_v19, %v13858_v9  ;;  %v23429_v29 = vld [vmem:[#allocation72_spill] sm:$0xff] }
0x10c5   : > { %v14098_v7 = vrot.slane %v14091_v52, %v23417_v45 }
0x10c6   : > { %v13899_v6 = vrot.slane %v13891_v22, %v23425_v21  ;;  %v13906_v63 = vrot.slane %v13892_v20, %v23425_v21  ;;  %v13915_v35 = vrot.slane %v13907_v18, %v23425_v21  ;;  %v13922_v53 = vrot.slane %v13908_v8, %v23425_v21  ;;  %v15463_v8 = vld [vmem:[%s15649_s11 + $0x18] sm:$0xff] }
0x10c7   : > { %v14115_v47 = vcombine.low %v14090_v60, %v14098_v7  ;;  %v14116_v12 = vcombine.high %v14090_v60, %v14098_v7 }
0x10c8   : > { %v13923_v31 = vcombine.low %v13867_v36, %v13899_v6  ;;  %v13924_v30 = vcombine.high %v13867_v36, %v13899_v6  ;;  %v13925_v61 = vcombine.low %v13874_v43, %v13906_v63  ;;  %v13926_v46 = vcombine.high %v13874_v43, %v13906_v63 }
0x10c9   : > { %v21918_v5 = vrot.slane %v14115_v47, %v23425_v21  ;;  %v21921_v44 = vrot.slane %v14116_v12, %v23425_v21  ;;  %v13927_v10 = vcombine.low %v13883_v13, %v13915_v35  ;;  %v13928_v37 = vcombine.high %v13883_v13, %v13915_v35 }
0x10ca   : > { %v14203_v4 = vadd.f32 %v15462_v32, %v13923_v31  ;;  %v13929_v2 = vcombine.low %v21914_v54, %v13922_v53  ;;  %v13930_v55 = vcombine.high %v21914_v54, %v13922_v53  ;;  %v14205_v50 = vadd.f32 %v15462_v32, %v13924_v30 }
0x10cb   : > { %v14131_v11 = vcombine.low %v21927_v48, %v21918_v5  ;;  %v14132_v58 = vcombine.high %v21927_v48, %v21918_v5  ;;  %v14133_v62 = vcombine.low %v21933_v17, %v21921_v44  ;;  %v14134_v39 = vcombine.high %v21933_v17, %v21921_v44 }
0x10cc   : > { %14251 = vrot.lane.b32.xlu1 %v14203_v4, %s15535_s14  ;;  %v14207_v52 = vadd.f32 %v15462_v32, %v13925_v61  ;;  %v14209_v18 = vadd.f32 %v15462_v32, %v13926_v46  ;;  %v14211_v36 = vadd.f32 %v15463_v8, %v13927_v10  ;;  %v14213_v43 = vadd.f32 %v15463_v8, %v13928_v37  ;;  %v23430_v10 = vld [vmem:[#allocation81_spill] sm:$0xff] }
0x10cd   : > { %v14215_v13 = vadd.f32 %v15463_v8, %v13929_v2  ;;  %v14217_v37 = vadd.f32 %v15463_v8, %v13930_v55 }
0x10ce   : > { %v13466_v49 = vpop.f32.mrb[96].mxu0 }
0x10cf   : > { %v14808_v15 = vadd.f32 %v13466_v49, %v23426_v34  ;;  %v13468_v56 = vpop.f32.mrb[97].mxu0 }
0x10d0   : > { %v14809_v57 = vadd.f32 %v13468_v56, %v23427_v40  ;;  %v13470_v59 = vpop.f32.mrb[98].mxu0  ;;  %14255 = vrot.lane.b32.xlu1 %v14205_v50, %s15535_s14 }
0x10d1   : > { %v14810_v42 = vadd.f32 %v13470_v59, %v23428_v27  ;;  %v13472_v19 = vpop.f32.mrb[99].mxu0  ;;  %v13137_v16 = vpop.f32.mrb[164].mxu1  ;;  %v13771_v53 = vadd.f32 %v14808_v15, %v21844_v51 }
0x10d2   : > { %v14811_v9 = vadd.f32 %v13472_v19, %v23429_v29  ;;  %v13138_v60 = vpop.f32.mrb[165].mxu1  ;;  %v13772_v61 = vadd.f32 %v14809_v57, %v21844_v51  ;;  %v15464_v16 = vld [vmem:[%s15649_s11 + $0x30] sm:$0xff] }
0x10d3   : > { %v13139_v22 = vpop.f32.mrb[166].mxu1  ;;  %v14219_v29 = vadd.f32 %v15464_v16, %v14131_v11  ;;  %v14221_v11 = vadd.f32 %v15464_v16, %v14132_v58  ;;  %v14225_v5 = vadd.f32 %v15464_v16, %v14134_v39 }
0x10d4   : > { %14259 = vrot.lane.b32.xlu1 %v14207_v52, %s15535_s14  ;;  %v13140_v20 = vpop.f32.mrb[167].mxu1 }
0x10d8   : > { %14263 = vrot.lane.b32.xlu1 %v14209_v18, %s15535_s14 }
0x10dc   : > { %14267 = vrot.lane.b32.xlu1 %v14211_v36, %s15535_s14 }
0x10e0   : > { %14271 = vrot.lane.b32.xlu1 %v14213_v43, %s15535_s14  ;;  %v14223_v43 = vadd.f32 %v15464_v16, %v14133_v62 }
0x10e2   : > { %v13509_v7 = vpop.f32.mrb[100].mxu0 }
0x10e3   : > { %v14812_v6 = vadd.f32 %v13509_v7, %v21657_v28  ;;  %v13511_v63 = vpop.f32.mrb[101].mxu0 }
0x10e4   : > { %v14813_v35 = vadd.f32 %v13511_v63, %v21661_v33  ;;  %v13513_v54 = vpop.f32.mrb[102].mxu0  ;;  %14275 = vrot.lane.b32.xlu1 %v14215_v13, %s15535_s14  ;;  %v13787_v33 = vadd.f32 %v14810_v42, %v21850_v24 }
0x10e5   : > { %v13773_v47 = vadd.f32 %v14812_v6, %v21844_v51  ;;  %v14814_v12 = vadd.f32 %v13513_v54, %v21664_v1  ;;  %v13515_v31 = vpop.f32.mrb[103].mxu0  ;;  %v13176_v30 = vpop.f32.mrb[168].mxu1  ;;  %v13788_v1 = vadd.f32 %v14811_v9, %v21850_v24 }
0x10e6   : > { %v13774_v46 = vadd.f32 %v14813_v35, %v21844_v51  ;;  %v14815_v28 = vadd.f32 %v13515_v31, %v23430_v10  ;;  %v13177_v32 = vpop.f32.mrb[169].mxu1 }
0x10e7   : > { %v13931_v4 = vcombine.low %v13771_v53, %v13773_v47  ;;  %v13932_v2 = vcombine.high %v13771_v53, %v13773_v47  ;;  %v13789_v49 = vadd.f32 %v14814_v12, %v21850_v24  ;;  %v13178_v50 = vpop.f32.mrb[170].mxu1 }
0x10e8   : > { %v13947_v34 = vcombine.low %v13772_v61, %v13774_v46  ;;  %v13948_v15 = vcombine.high %v13772_v61, %v13774_v46  ;;  %v13790_v56 = vadd.f32 %v14815_v28, %v21850_v24  ;;  %14279 = vrot.lane.b32.xlu1 %v14217_v37, %s15535_s14  ;;  %v13179_v40 = vpop.f32.mrb[171].mxu1 }
0x10e9   : > { %v21972_v55 = vrot.slane %v13931_v4, %v23417_v45  ;;  %v21975_v57 = vrot.slane %v13932_v2, %v23417_v45  ;;  %v14135_v59 = vcombine.low %v13787_v33, %v13789_v49 }
0x10ea   : > { %v21978_v27 = vrot.slane %v13947_v34, %v23417_v45  ;;  %v21981_v42 = vrot.slane %v13948_v15, %v23417_v45  ;;  %v14143_v19 = vcombine.low %v13788_v1, %v13790_v56 }
0x10eb   : > { %v21985_v9 = vrot.slane %v14135_v59, %v23417_v45 }
0x10ec   : > { %v13995_v52 = vcombine.low %v21972_v55, %v21978_v27  ;;  %v13996_v60 = vcombine.high %v21972_v55, %v21978_v27  ;;  %v14011_v22 = vcombine.low %v21975_v57, %v21981_v42  ;;  %v14012_v20 = vcombine.high %v21975_v57, %v21981_v42  ;;  %14283 = vrot.lane.b32.xlu1 %v14219_v29, %s15535_s14 }
0x10ed   : > { %v21997_v18 = vrot.slane %v14143_v19, %v23417_v45 }
0x10ee   : > { %v14003_v29 = vrot.slane %v13995_v52, %v23425_v21 }
0x10ef   : > { %v14167_v8 = vcombine.low %v21985_v9, %v21997_v18  ;;  %v14168_v36 = vcombine.high %v21985_v9, %v21997_v18 }
0x10f0   : > { %14287 = vrot.lane.b32.xlu1 %v14221_v11, %s15535_s14 }
0x10f1   : > { %v14175_v57 = vrot.slane %v14167_v8, %v23425_v21  ;;  %v14182_v42 = vrot.slane %v14168_v36, %v23425_v21  ;;  %v15466_v36 = vld [vmem:[%s15649_s11 + $0x20] sm:$0xff] }
0x10f4   : > { %14291 = vrot.lane.b32.xlu1 %v14223_v43, %s15535_s14  ;;  %v14019_v43 = vrot.slane %v14011_v22, %v23425_v21 }
0x10f6   : > { %v13552_v7 = vpop.f32.mrb[104].mxu0 }
0x10f7   : > { %v14816_v48 = vadd.f32 %v13552_v7, %v21711_v38  ;;  %v13554_v58 = vpop.f32.mrb[105].mxu0 }
0x10f8   : > { %v14817_v13 = vadd.f32 %v13554_v58, %v21714_v3  ;;  %v13556_v6 = vpop.f32.mrb[106].mxu0  ;;  %14295 = vrot.lane.b32.xlu1 %v14225_v5, %s15535_s14  ;;  %v14026_v58 = vrot.slane %v14012_v20, %v23425_v21  ;;  %v15465_v20 = vld [vmem:[%s15649_s11 + $0x8] sm:$0xff] }
0x10f9   : > { %v14818_v63 = vadd.f32 %v13556_v6, %v21716_v25  ;;  %v13558_v35 = vpop.f32.mrb[107].mxu0  ;;  %v13215_v54 = vpop.f32.mrb[172].mxu1  ;;  %v13775_v3 = vadd.f32 %v14816_v48, %v21844_v51 }
0x10fa   : > { %v14819_v62 = vadd.f32 %v13558_v35, %v21719_v26  ;;  %v13216_v53 = vpop.f32.mrb[173].mxu1  ;;  %v13776_v26 = vadd.f32 %v14817_v13, %v21844_v51 }
0x10fb   : > { %v13217_v47 = vpop.f32.mrb[174].mxu1 }
0x10fc   : > { %v13218_v12 = vpop.f32.mrb[175].mxu1  ;;  %v13792_v2 = vadd.f32 %v14819_v62, %v21850_v24 }
0x110a   : > { %v13595_v31 = vpop.f32.mrb[108].mxu0 }
0x110b   : > { %v14820_v44 = vadd.f32 %v13595_v31, %v21775_v23  ;;  %v13597_v17 = vpop.f32.mrb[109].mxu0  ;;  %v13791_v23 = vadd.f32 %v14818_v63, %v21850_v24 }
0x110c   : > { %v14821_v38 = vadd.f32 %v13597_v17, %v21777_v0  ;;  %v13599_v39 = vpop.f32.mrb[110].mxu0 }
0x110d   : > { %v13777_v30 = vadd.f32 %v14820_v44, %v21844_v51  ;;  %v14822_v25 = vadd.f32 %v13599_v39, %v21782_v14  ;;  %v13601_v61 = vpop.f32.mrb[111].mxu0  ;;  %v13638_v46 = vpop.f32.mrb[176].mxu1 }
0x110e   : > { %v13778_v10 = vadd.f32 %v14821_v38, %v21844_v51  ;;  %v14823_v28 = vadd.f32 %v13601_v61, %v21786_v41  ;;  %v13639_v37 = vpop.f32.mrb[177].mxu1 }
0x110f   : > { %v13963_v32 = vcombine.low %v13775_v3, %v13777_v30  ;;  %v13964_v0 = vcombine.high %v13775_v3, %v13777_v30  ;;  %v13793_v33 = vadd.f32 %v14822_v25, %v21850_v24  ;;  %v13640_v4 = vpop.f32.mrb[178].mxu1 }
0x1110   : > { %v13979_v49 = vcombine.low %v13776_v26, %v13778_v10  ;;  %v13980_v14 = vcombine.high %v13776_v26, %v13778_v10  ;;  %v13794_v50 = vadd.f32 %v14823_v28, %v21850_v24  ;;  %v13641_v1 = vpop.f32.mrb[179].mxu1  ;;  %v14010_v24 = vrot.slane %v13996_v60, %v23425_v21 }
0x1111   : > { %v13971_v34 = vrot.slane %v13963_v32, %v23417_v45  ;;  %v13978_v51 = vrot.slane %v13964_v0, %v23417_v45  ;;  %v14151_v41 = vcombine.low %v13791_v23, %v13793_v33  ;;  %v15467_v0 = vld [vmem:[%s15649_s11 + $0x38] sm:$0xff]  ;;  %s14789_s11 = sshll.u32 (%p15622_p5), %s14357_s12, 3 }
0x1112   : > { %v13987_v15 = vrot.slane %v13979_v49, %v23417_v45  ;;  %v13994_v56 = vrot.slane %v13980_v14, %v23417_v45  ;;  %v14159_v40 = vcombine.low %v13792_v2, %v13794_v50  ;;  %s14359_s10 = scalar_lea.vmem (%p15622_p5), %s22171_s7, %s14789_s11 }
0x1113   : > { %v14158_v55 = vrot.slane %v14151_v41, %v23417_v45 }
0x1114   : > { %v14027_v59 = vcombine.low %v13971_v34, %v13987_v15  ;;  %v14028_v27 = vcombine.high %v13971_v34, %v13987_v15  ;;  %v14043_v19 = vcombine.low %v13978_v51, %v13994_v56  ;;  %v14044_v16 = vcombine.high %v13978_v51, %v13994_v56 }
0x1115   : > { %v14166_v11 = vrot.slane %v14159_v40, %v23417_v45 }
0x1116   : > { %v14035_v7 = vrot.slane %v14027_v59, %v23425_v21  ;;  %v14042_v5 = vrot.slane %v14028_v27, %v23425_v21  ;;  %v14051_v48 = vrot.slane %v14043_v19, %v23425_v21  ;;  %v14058_v52 = vrot.slane %v14044_v16, %v23425_v21 }
0x1117   : > { %v14183_v13 = vcombine.low %v14158_v55, %v14166_v11  ;;  %v14184_v60 = vcombine.high %v14158_v55, %v14166_v11 }
0x1118   : > { %v14059_v6 = vcombine.low %v14003_v29, %v14035_v7  ;;  %v14060_v45 = vcombine.high %v14003_v29, %v14035_v7  ;;  %v14061_v63 = vcombine.low %v14010_v24, %v14042_v5  ;;  %v14062_v22 = vcombine.high %v14010_v24, %v14042_v5 }
0x1119   : > { %v14191_v35 = vrot.slane %v14183_v13, %v23425_v21  ;;  %v14198_v54 = vrot.slane %v14184_v60, %v23425_v21  ;;  %v14063_v62 = vcombine.low %v14019_v43, %v14051_v48  ;;  %v14064_v53 = vcombine.high %v14019_v43, %v14051_v48 }
0x111a   : > { %v14204_v47 = vadd.f32 %v15465_v20, %v14059_v6  ;;  %v14065_v12 = vcombine.low %v14026_v58, %v14058_v52  ;;  %v14066_v31 = vcombine.high %v14026_v58, %v14058_v52  ;;  %v14206_v3 = vadd.f32 %v15465_v20, %v14060_v45 }
0x111b   : > { %v14199_v44 = vcombine.low %v14175_v57, %v14191_v35  ;;  %v14200_v17 = vcombine.high %v14175_v57, %v14191_v35  ;;  %v14201_v38 = vcombine.low %v14182_v42, %v14198_v54  ;;  %v14202_v39 = vcombine.high %v14182_v42, %v14198_v54 }
0x111c   : > { %14253 = vrot.lane.b32.xlu0 %v14204_v47, %s15535_s14  ;;  %v14208_v30 = vadd.f32 %v15465_v20, %v14061_v63  ;;  %v14210_v18 = vadd.f32 %v15465_v20, %v14062_v22  ;;  %v14212_v61 = vadd.f32 %v15466_v36, %v14063_v62  ;;  %v14214_v46 = vadd.f32 %v15466_v36, %v14064_v53 }
0x111d   : > { %v14216_v26 = vadd.f32 %v15466_v36, %v14065_v12  ;;  %v14218_v28 = vadd.f32 %v15466_v36, %v14066_v31  ;;  %v14220_v33 = vadd.f32 %v15467_v0, %v14199_v44  ;;  %v14222_v2 = vadd.f32 %v15467_v0, %v14200_v17 }
0x111e   : > { %v14224_v14 = vadd.f32 %v15467_v0, %v14201_v38  ;;  %v14226_v1 = vadd.f32 %v15467_v0, %v14202_v39 }
0x1120   : > { %14257 = vrot.lane.b32.xlu0 %v14206_v3, %s15535_s14 }
0x1121   : > { %v13677_v8 = vpop.f32.mrb[180].mxu1 }
0x1122   : > { %v13678_v25 = vpop.f32.mrb[181].mxu1 }
0x1123   : > { %v13679_v9 = vpop.f32.mrb[182].mxu1 }
0x1124   : > { %14261 = vrot.lane.b32.xlu0 %v14208_v30, %s15535_s14  ;;  %v13680_v21 = vpop.f32.mrb[183].mxu1 }
0x1128   : > { %14265 = vrot.lane.b32.xlu0 %v14210_v18, %s15535_s14 }
0x112c   : > { %14269 = vrot.lane.b32.xlu0 %v14212_v61, %s15535_s14 }
0x1130   : > { %14273 = vrot.lane.b32.xlu0 %v14214_v46, %s15535_s14 }
0x1134   : > { %14277 = vrot.lane.b32.xlu0 %v14216_v26, %s15535_s14 }
0x1135   : > { %v13716_v10 = vpop.f32.mrb[184].mxu1 }
0x1136   : > { %v13717_v37 = vpop.f32.mrb[185].mxu1 }
0x1137   : > { %v13718_v23 = vpop.f32.mrb[186].mxu1 }
0x1138   : > { %14281 = vrot.lane.b32.xlu0 %v14218_v28, %s15535_s14  ;;  %v13719_v32 = vpop.f32.mrb[187].mxu1 }
0x113c   : > { %14285 = vrot.lane.b32.xlu0 %v14220_v33, %s15535_s14 }
0x113e   : > { %v14252_v4 = vpop.permute.xlu1 %14251 }
0x113f   : > { %14324 = vst.msk [vmem:[%s22071_s17 - $0x7] sm:$0x80] %vm14323_vm0, %v14252_v4 }
0x1140   : > { %14289 = vrot.lane.b32.xlu0 %v14222_v2, %s15535_s14 }
0x1142   : > { %v14256_v49 = vpop.permute.xlu1 %14255 }
0x1143   : > { %14327 = vst.msk [vmem:[%s22071_s17 + $0x1] sm:$0x80] %vm14323_vm0, %v14256_v49 }
0x1144   : > { %14293 = vrot.lane.b32.xlu0 %v14224_v14, %s15535_s14 }
0x1146   : > { %v14260_v50 = vpop.permute.xlu1 %14259 }
0x1147   : > { %14329 = vst.msk [vmem:[%s22071_s17 + $0x9] sm:$0x80] %vm14323_vm0, %v14260_v50 }
0x1148   : > { %14297 = vrot.lane.b32.xlu0 %v14226_v1, %s15535_s14 }
0x114a   : > { %v14264_v34 = vpop.permute.xlu1 %14263 }
0x114b   : > { %14331 = vst.msk [vmem:[%s22071_s17 + $0x11] sm:$0x80] %vm14323_vm0, %v14264_v34 }
0x114e   : > { %v14268_v51 = vpop.permute.xlu1 %14267 }
0x114f   : > { %14333 = vst.msk [vmem:[%s22071_s17 + $0x19] sm:$0x80] %vm14323_vm0, %v14268_v51 }
0x1152   : > { %v14272_v41 = vpop.permute.xlu1 %14271 }
0x1153   : > { %14335 = vst.msk [vmem:[%s22071_s17 + $0x21] sm:$0x80] %vm14323_vm0, %v14272_v41 }
0x1156   : > { %v14276_v15 = vpop.permute.xlu1 %14275 }
0x1157   : > { %14337 = vst.msk [vmem:[%s22071_s17 + $0x29] sm:$0x80] %vm14323_vm0, %v14276_v15 }
0x115a   : > { %v14280_v56 = vpop.permute.xlu1 %14279 }
0x115b   : > { %14339 = vst.msk [vmem:[%s22071_s17 + $0x31] sm:$0x80] %vm14323_vm0, %v14280_v56 }
0x115e   : > { %v14284_v40 = vpop.permute.xlu1 %14283 }
0x115f   : > { %14341 = vst.msk [vmem:[%s22071_s17 + $0x39] sm:$0x80] %vm14323_vm0, %v14284_v40 }
0x1162   : > { %v14288_v55 = vpop.permute.xlu1 %14287 }
0x1163   : > { %14343 = vst.msk [vmem:[%s22071_s17 + $0x41] sm:$0x80] %vm14323_vm0, %v14288_v55 }
0x1166   : > { %v14292_v59 = vpop.permute.xlu1 %14291 }
0x1167   : > { %14345 = vst.msk [vmem:[%s22071_s17 + $0x49] sm:$0x80] %vm14323_vm0, %v14292_v59 }
0x116a   : > { %v14296_v27 = vpop.permute.xlu1 %14295 }
0x116b   : > { %14347 = vst.msk [vmem:[%s22071_s17 + $0x51] sm:$0x80] %vm14323_vm0, %v14296_v27 }
0x118e   : > { %v14254_v19 = vpop.permute.xlu0 %14253 }
0x118f   : > { %14326 = vst.msk [vmem:[%s22071_s17 + $0x1] sm:$0x7f] %vm14325_vm1, %v14254_v19 }
0x1192   : > { %v14258_v16 = vpop.permute.xlu0 %14257 }
0x1193   : > { %14328 = vst.msk [vmem:[%s22071_s17 + $0x9] sm:$0x7f] %vm14325_vm1, %v14258_v16 }
0x1196   : > { %v14262_v29 = vpop.permute.xlu0 %14261  ;;  %v14409_v60 = vld [vmem:[%s22071_s17] sm:$0xff] (%p15622_p5) }
0x1197   : > { %14330 = vst.msk [vmem:[%s22071_s17 + $0x11] sm:$0x7f] %vm14325_vm1, %v14262_v29  ;;  %14410 = vst [vmem:[%s14359_s10] sm:$0xff] (%p15622_p5), %v14409_v60 }
0x119a   : > { %v14266_v24 = vpop.permute.xlu0 %14265  ;;  %v14411_v6 = vld [vmem:[%s22071_s17 + $0x8] sm:$0xff] (%p15622_p5) }
0x119b   : > { %14332 = vst.msk [vmem:[%s22071_s17 + $0x19] sm:$0x7f] %vm14325_vm1, %v14266_v24  ;;  %14412 = vst [vmem:[%s14359_s10 + $0x10] sm:$0xff] (%p15622_p5), %v14411_v6 }
0x119e   : > { %v14270_v11 = vpop.permute.xlu0 %14269  ;;  %v14413_v45 = vld [vmem:[%s22071_s17 + $0x10] sm:$0xff] (%p15622_p5) }
0x119f   : > { %14334 = vst.msk [vmem:[%s22071_s17 + $0x21] sm:$0x7f] %vm14325_vm1, %v14270_v11  ;;  %14414 = vst [vmem:[%s14359_s10 + $0x20] sm:$0xff] (%p15622_p5), %v14413_v45 }
0x11a2   : > { %v14274_v43 = vpop.permute.xlu0 %14273  ;;  %v14415_v63 = vld [vmem:[%s22071_s17 + $0x18] sm:$0xff] (%p15622_p5) }
0x11a3   : > { %14336 = vst.msk [vmem:[%s22071_s17 + $0x29] sm:$0x7f] %vm14325_vm1, %v14274_v43  ;;  %14416 = vst [vmem:[%s14359_s10 + $0x30] sm:$0xff] (%p15622_p5), %v14415_v63 }
0x11a6   : > { %v14278_v7 = vpop.permute.xlu0 %14277  ;;  %v14417_v22 = vld [vmem:[%s22071_s17 + $0x20] sm:$0xff] (%p15622_p5) }
0x11a7   : > { %14338 = vst.msk [vmem:[%s22071_s17 + $0x31] sm:$0x7f] %vm14325_vm1, %v14278_v7  ;;  %14418 = vst [vmem:[%s14359_s10 + $0x40] sm:$0xff] (%p15622_p5), %v14417_v22 }
0x11aa   : > { %v14282_v5 = vpop.permute.xlu0 %14281  ;;  %v14419_v35 = vld [vmem:[%s22071_s17 + $0x28] sm:$0xff] (%p15622_p5) }
0x11ab   : > { %14340 = vst.msk [vmem:[%s22071_s17 + $0x39] sm:$0x7f] %vm14325_vm1, %v14282_v5  ;;  %14420 = vst [vmem:[%s14359_s10 + $0x50] sm:$0xff] (%p15622_p5), %v14419_v35 }
0x11ae   : > { %v14286_v48 = vpop.permute.xlu0 %14285  ;;  %v14421_v54 = vld [vmem:[%s22071_s17 + $0x30] sm:$0xff] (%p15622_p5) }
0x11af   : > { %14342 = vst.msk [vmem:[%s22071_s17 + $0x41] sm:$0x7f] %vm14325_vm1, %v14286_v48  ;;  %14422 = vst [vmem:[%s14359_s10 + $0x60] sm:$0xff] (%p15622_p5), %v14421_v54 }
0x11b2   : > { %v14290_v58 = vpop.permute.xlu0 %14289  ;;  %v14423_v62 = vld [vmem:[%s22071_s17 + $0x38] sm:$0xff] (%p15622_p5) }
0x11b3   : > { %14344 = vst.msk [vmem:[%s22071_s17 + $0x49] sm:$0x7f] %vm14325_vm1, %v14290_v58  ;;  %14424 = vst [vmem:[%s14359_s10 + $0x70] sm:$0xff] (%p15622_p5), %v14423_v62 }
0x11b5   : > { %14355 = sbr.rel (!%p15622_p5) target bundleno = 4548 (0x11c4), region = 52 }
0x11b6   : > { %v14294_v52 = vpop.permute.xlu0 %14293  ;;  %v14425_v53 = vld [vmem:[%s22071_s17 + $0x40] sm:$0xff] (%p15622_p5) }
0x11b7   : > { %14346 = vst.msk [vmem:[%s22071_s17 + $0x51] sm:$0x7f] %vm14325_vm1, %v14294_v52  ;;  %14426 = vst [vmem:[%s14359_s10 + $0x80] sm:$0xff] (%p15622_p5), %v14425_v53 }
0x11ba   : > { %v14298_v13 = vpop.permute.xlu0 %14297  ;;  %v14427_v57 = vld [vmem:[%s22071_s17 + $0x48] sm:$0xff] (%p15622_p5) }
0x11bb   : > { %14348 = vst.msk [vmem:[%s22071_s17 + $0x59] sm:$0x7f] %vm14325_vm1, %v14298_v13  ;;  %14428 = vst [vmem:[%s14359_s10 + $0x90] sm:$0xff] (%p15622_p5), %v14427_v57 }
0x11be   : > { %v14429_v42 = vld [vmem:[%s22071_s17 + $0x50] sm:$0xff] }
0x11bf   : > { %14430 = vst [vmem:[%s14359_s10 + $0xa0] sm:$0xff] %v14429_v42 }
0x11c2   : > { %v14431_v20 = vld [vmem:[%s22071_s17 + $0x58] sm:$0xff] }
0x11c3   : > { %14432 = vst [vmem:[%s14359_s10 + $0xb0] sm:$0xff] %v14431_v20 }
0x11c4 PF: > { %s17_s30 = sadd.s32 1, %s15522_s30   ;;  %s23431_s24 = smov %s15502_s25 }
0x11c5   : > { %p14_p11 = scmp.ge.s32.totalorder %s17_s30, 6   ;;  %s23432_s25 = smov %s15633_s16 }
0x11c6   : > { %s23433_s26 = smov %s15514_s28  ;;  %s23434_s27 = smov %s15518_s29 }
0x11c7   : > { %s23435_s28 = smov %s23438_s8  ;;  %s23436_s29 = smov %s23442_s9 }
0x11c8   :  { %16 = sbr.rel (!%p14_p11) target bundleno = 4 (0x4), region = 120 }

</bundles_post_ra>
